<compile_context>
chip_gen: v7x
topology: tpu7x:2x2x1
jax: 0.10.0
libtpu: 0.0.40
codegen_flags: <defaults>
</compile_context>

<pallas_src>
import functools

import jax
import jax.numpy as jnp
from jax.experimental import pallas as pl
from jax.experimental.pallas import tpu as pltpu

LANE = 128  # TPU lane width; channel / feature axes are zero-padded to this.
_VMEM = pl.BlockSpec(memory_space=pltpu.MemorySpace.VMEM)


def _round_up(v, m):
    return (v + m - 1) // m * m


def _pad2(a, rows, cols):
    return jnp.pad(a, ((0, rows - a.shape[0]), (0, cols - a.shape[1])))


def _pad_bias(b):
    return jnp.pad(b, (0, LANE - b.shape[0])).reshape(1, LANE)


# ---------------------------------------------------------------------------
# Kernel A: conv1 (im2col matmul) + bias + 2x2 max-pool + ReLU
# ---------------------------------------------------------------------------
def _conv1_pool_relu_kernel(p_ref, w_ref, b_ref, o_ref):
    # p_ref: (4, TQ, Kp)   chunk c holds the im2col patches whose conv outputs
    #                      land in pooling slot c = dy*2+dx.
    # w_ref: (Kp, LANE)    conv1 weight, (ky,kx,c)-major rows, OC zero-padded.
    # b_ref: (1, LANE)     conv1 bias, zero-padded.
    # o_ref: (TQ, LANE)    pooled + ReLU activation, lane-dense.
    w = w_ref[...]
    m = None
    for chunk in range(4):
        y = jnp.dot(p_ref[chunk], w, preferred_element_type=jnp.float32)
        m = y if m is None else jnp.maximum(m, y)
    # Bias is identical across the 4 pooled candidates, so adding it after the
    # max (and before the ReLU) matches conv -> pool -> relu exactly.
    o_ref[...] = jnp.maximum(m + b_ref[...], 0.0).astype(o_ref.dtype)


# ---------------------------------------------------------------------------
# Kernel B: conv2 + bias + 2x2 max-pool + fc1 + ReLU + fc2 + log_softmax
# ---------------------------------------------------------------------------
def _conv2_fc_kernel(x_ref, w2_ref, b2_ref, w3_ref, b3_ref, w4_ref, b4_ref,
                     o_ref, *, n, width, kh, kw, ph, pw, n_cls):
    # x_ref : (H1*W1*N, LANE)     conv1-pooled act, row = (y*width + x)*n + b
    # w2_ref: (KH*KW, LANE, LANE) conv2 weight per tap, in/out chans padded
    # w3_ref: (PH*PW, LANE, LANE) fc1 weight per pooled spatial position
    # w4_ref: (LANE, LANE)        fc2 weight (transposed, padded)
    b2 = b2_ref[...]
    h_acc = None
    for py in range(ph):                       # conv2-pooled output positions
        for px in range(pw):
            pooled = None
            for dy in range(2):                # 2x2 max-pool window
                for dx in range(2):
                    acc = None
                    for ky in range(kh):       # in-kernel im2col: static
                        for kx in range(kw):   # row slices of resident act
                            r = ((2 * py + dy + ky) * width
                                 + (2 * px + dx + kx)) * n
                            part = jnp.dot(x_ref[r:r + n, :],
                                           w2_ref[ky * kw + kx],
                                           preferred_element_type=jnp.float32)
                            acc = part if acc is None else acc + part
                    pooled = acc if pooled is None else jnp.maximum(pooled, acc)
            pooled = pooled + b2               # Dropout2d == identity (eval)
            # fc1 contribution of this spatial position; the channel-major
            # flatten is absorbed into the per-position weight slice, so no
            # transpose / reshape of the activation is needed.
            part = jnp.dot(pooled, w3_ref[py * pw + px],
                           preferred_element_type=jnp.float32)
            h_acc = part if h_acc is None else h_acc + part
    h = jnp.maximum(h_acc + b3_ref[...], 0.0)  # fc1 + ReLU; F.dropout == id
    logits = jnp.dot(h, w4_ref[...], preferred_element_type=jnp.float32)
    logits = logits + b4_ref[...]
    # Masked, numerically stable log_softmax over the n_cls real lanes only.
    col = jax.lax.broadcasted_iota(jnp.int32, logits.shape, 1)
    masked = jnp.where(col < n_cls, logits, jnp.float32(-1e30))
    mx = jnp.max(masked, axis=-1, keepdims=True)
    lse = mx + jnp.log(jnp.sum(jnp.exp(masked - mx), axis=-1, keepdims=True))
    o_ref[...] = (masked - lse).astype(o_ref.dtype)


# ---------------------------------------------------------------------------
# Wrapper: layout prep + two pallas_calls
# ---------------------------------------------------------------------------
def ho_conv_classifier_forward(x, params):
    """Forward pass of HOConvClassifier (eval mode) with Pallas TPU kernels."""
    n, c, h, w = x.shape
    oc1, _, kh, kw = params["conv1_w"].shape
    oc2 = params["conv2_w"].shape[0]
    hid, flat = params["fc1_w"].shape
    n_cls = params["fc2_w"].shape[0]

    oh1, ow1 = h - kh + 1, w - kw + 1          # conv1 output spatial
    ph1, pw1 = oh1 // 2, ow1 // 2              # after MaxPool2d(2)
    oh2, ow2 = ph1 - kh + 1, pw1 - kw + 1      # conv2 output spatial
    ph2, pw2 = oh2 // 2, ow2 // 2              # after MaxPool2d(2)
    assert flat == oc2 * ph2 * pw2, "fc1 does not match the conv stack"
    assert max(oc1, oc2, hid, n_cls) <= LANE

    f1 = kh * kw * c                           # conv1 im2col feature size
    k1p = _round_up(f1, LANE)

    # conv1 patch matrix: rows (dy, dx, py, px, n), features (ky, kx, c),
    # lane-padded.  This is the only XLA-side layout glue left.
    x_nhwc = jnp.transpose(x, (0, 2, 3, 1))
    taps = [x_nhwc[:, ky:ky + oh1, kx:kx + ow1, :]
            for ky in range(kh) for kx in range(kw)]
    pat = jnp.stack(taps, axis=3).reshape(n, oh1, ow1, f1)
    pat = pat[:, :2 * ph1, :2 * pw1, :]
    pat = pat.reshape(n, ph1, 2, pw1, 2, f1).transpose(2, 4, 1, 3, 0, 5)
    pat = pat.reshape(4, ph1 * pw1 * n, f1)
    patches1 = jnp.pad(pat, ((0, 0), (0, 0), (0, k1p - f1)))

    # Weights / biases zero-padded to lane-dense layouts (done once per call).
    w1p = _pad2(params["conv1_w"].transpose(2, 3, 1, 0).reshape(f1, oc1),
                k1p, LANE)
    b1p = _pad_bias(params["conv1_b"])
    w2p = jnp.pad(
        params["conv2_w"].transpose(2, 3, 1, 0).reshape(kh * kw, oc1, oc2),
        ((0, 0), (0, LANE - oc1), (0, LANE - oc2)))
    b2p = _pad_bias(params["conv2_b"])
    w3p = jnp.pad(
        params["fc1_w"].reshape(hid, oc2, ph2 * pw2).transpose(2, 1, 0),
        ((0, 0), (0, LANE - oc2), (0, LANE - hid)))
    b3p = _pad_bias(params["fc1_b"])
    w4p = _pad2(params["fc2_w"].T, LANE, LANE)
    b4p = _pad_bias(params["fc2_b"])

    # Kernel A: conv1 + pool + ReLU, gridded over pooled rows (scales to big
    # batches while keeping VMEM bounded; weights use constant index_maps).
    q1 = ph1 * pw1 * n
    tq = q1 if q1 <= 512 else 512
    pooled1 = pl.pallas_call(
        _conv1_pool_relu_kernel,
        out_shape=jax.ShapeDtypeStruct((q1, LANE), jnp.float32),
        grid_spec=pltpu.PrefetchScalarGridSpec(
            num_scalar_prefetch=0,
            grid=(pl.cdiv(q1, tq),),
            in_specs=[
                pl.BlockSpec((4, tq, k1p), lambda i: (0, i, 0)),
                pl.BlockSpec((k1p, LANE), lambda i: (0, 0)),  # resident weight
                pl.BlockSpec((1, LANE), lambda i: (0, 0)),    # resident bias
            ],
            out_specs=pl.BlockSpec((tq, LANE), lambda i: (i, 0)),
        ),
        compiler_params=pltpu.CompilerParams(
            dimension_semantics=("parallel",)),
    )(patches1, w1p, b1p)

    # Kernel B: conv2 + pool + fc1 + ReLU + fc2 + log_softmax, fully fused.
    out_pad = pl.pallas_call(
        functools.partial(_conv2_fc_kernel, n=n, width=pw1, kh=kh, kw=kw,
                          ph=ph2, pw=pw2, n_cls=n_cls),
        out_shape=jax.ShapeDtypeStruct((n, LANE), jnp.float32),
        in_specs=[_VMEM] * 7,
        out_specs=_VMEM,
    )(pooled1, w2p, b2p, w3p, b3p, w4p, b4p)

    return out_pad[:, :n_cls]


# ---------------------------------------------------------------------------
# Independent plain-JAX reference (for the correctness self-check)
# ---------------------------------------------------------------------------
def _reference_forward(x, params):
    def conv(v, wgt, bias):
        y = jax.lax.conv_general_dilated(
            v, wgt, window_strides=(1, 1), padding="VALID",
            dimension_numbers=("NCHW", "OIHW", "NCHW"))
        return y + bias.reshape(1, -1, 1, 1)

    def pool2(v):
        return jax.lax.reduce_window(v, -jnp.inf, jax.lax.max,
                                     (1, 1, 2, 2), (1, 1, 2, 2), "VALID")

    y = jnp.maximum(pool2(conv(x, params["conv1_w"], params["conv1_b"])), 0.0)
    y = pool2(conv(y, params["conv2_w"], params["conv2_b"]))
    y = y.reshape(y.shape[0], -1)
    y = jnp.maximum(y @ params["fc1_w"].T + params["fc1_b"], 0.0)
    y = y @ params["fc2_w"].T + params["fc2_b"]
    return jax.nn.log_softmax(y, axis=-1)


# ---------------------------------------------------------------------------
# Main
# ---------------------------------------------------------------------------
if __name__ == "__main__":
    key = jax.random.PRNGKey(0)
    ks = jax.random.split(key, 9)

    # Small shapes consistent with the module (default is (1, 28, 28) MNIST).
    N, C, H, W = 2, 4, 16, 16
    x = jax.random.normal(ks[0], (N, C, H, W), dtype=jnp.float32)

    def uinit(k, shape, fan_in):
        bound = 1.0 / float(fan_in) ** 0.5
        return jax.random.uniform(k, shape, jnp.float32, -bound, bound)

    # conv1: out_channel=10, kernel (C, 5, 5)
    conv1_w = uinit(ks[1], (10, C, 5, 5), C * 25)
    conv1_b = uinit(ks[2], (10,), C * 25)
    c1, h1, w1 = 10, (H - 4) // 2, (W - 4) // 2            # (10, 6, 6)

    # conv2: out_channel=20, kernel (c1, 5, 5)
    conv2_w = uinit(ks[3], (20, c1, 5, 5), c1 * 25)
    conv2_b = uinit(ks[4], (20,), c1 * 25)
    c2, h2, w2 = 20, (h1 - 4) // 2, (w1 - 4) // 2          # (20, 1, 1)

    conv_output_size = c2 * h2 * w2                        # 20
    hidden = conv_output_size // 4                         # 5

    fc1_w = uinit(ks[5], (hidden, conv_output_size), conv_output_size)
    fc1_b = uinit(ks[6], (hidden,), conv_output_size)
    fc2_w = uinit(ks[7], (10, hidden), hidden)
    fc2_b = uinit(ks[8], (10,), hidden)

    params = dict(conv1_w=conv1_w, conv1_b=conv1_b,
                  conv2_w=conv2_w, conv2_b=conv2_b,
                  fc1_w=fc1_w, fc1_b=fc1_b,
                  fc2_w=fc2_w, fc2_b=fc2_b)

    out = jax.jit(ho_conv_classifier_forward)(x, params)
    out = jax.block_until_ready(out)

    assert out.shape == (N, 10), out.shape
    # rows are valid log-probabilities
    assert jnp.allclose(jnp.sum(jnp.exp(out), axis=1), 1.0, atol=1e-4)
    # matches an independent plain-JAX formulation of the same module
    ref = _reference_forward(x, params)
    assert jnp.allclose(out, ref, atol=2e-2, rtol=1e-3), \
        float(jnp.max(jnp.abs(out - ref)))
    print("KERNEL_OK")
</pallas_src>

<mosaic_0001>
module attributes {stable_mosaic.version = 11 : i64} {
  func.func @_conv1_pool_relu_kernel(%arg0: i32, %arg1: memref<4x72x128xf32, #tpu.memory_space<vmem>>, %arg2: memref<128x128xf32, #tpu.memory_space<vmem>>, %arg3: memref<1x128xf32, #tpu.memory_space<vmem>>, %arg4: memref<72x128xf32, #tpu.memory_space<vmem>>) attributes {dimension_semantics = [#tpu.dimension_semantics<parallel>], iteration_bounds = array<i64: 1>, scalar_prefetch = 0 : i64, scratch_operands = 0 : i64, tpu.core_type = #tpu.core_type<tc>, window_params = [{transform_indices = @transform_0, window_bounds = array<i64: 4, 72, 128>}, {pipeline_mode = #tpu.pipeline_mode<synchronous>, transform_indices = @transform_1, window_bounds = array<i64: 128, 128>}, {pipeline_mode = #tpu.pipeline_mode<synchronous>, transform_indices = @transform_2, window_bounds = array<i64: 1, 128>}, {transform_indices = @transform_3, window_bounds = array<i64: 72, 128>}]} {
    %c0 = arith.constant 0 : index
    %c0_0 = arith.constant 0 : index
    %0 = vector.load %arg2[%c0, %c0_0] : memref<128x128xf32, #tpu.memory_space<vmem>>, vector<128x128xf32>
    %c0_1 = arith.constant 0 : index
    %c0_2 = arith.constant 0 : index
    %c0_3 = arith.constant 0 : index
    %1 = vector.load %arg1[%c0_1, %c0_2, %c0_3] : memref<4x72x128xf32, #tpu.memory_space<vmem>>, vector<1x72x128xf32>
    %2 = vector.shape_cast %1 : vector<1x72x128xf32> to vector<72x128xf32>
    %cst = arith.constant dense<0.000000e+00> : vector<72x128xf32>
    %3 = tpu.matmul %2, %0, %cst {dimension_numbers = #tpu.dot_dimension_numbers<[1], [0], [0], [1], [0, 0, 1, 1], [], []>} : vector<72x128xf32>, vector<128x128xf32>, vector<72x128xf32> -> vector<72x128xf32>
    %c1 = arith.constant 1 : index
    %c0_4 = arith.constant 0 : index
    %c0_5 = arith.constant 0 : index
    %4 = vector.load %arg1[%c1, %c0_4, %c0_5] : memref<4x72x128xf32, #tpu.memory_space<vmem>>, vector<1x72x128xf32>
    %5 = vector.shape_cast %4 : vector<1x72x128xf32> to vector<72x128xf32>
    %cst_6 = arith.constant dense<0.000000e+00> : vector<72x128xf32>
    %6 = tpu.matmul %5, %0, %cst_6 {dimension_numbers = #tpu.dot_dimension_numbers<[1], [0], [0], [1], [0, 0, 1, 1], [], []>} : vector<72x128xf32>, vector<128x128xf32>, vector<72x128xf32> -> vector<72x128xf32>
    %7 = arith.maximumf %3, %6 : vector<72x128xf32>
    %c2 = arith.constant 2 : index
    %c0_7 = arith.constant 0 : index
    %c0_8 = arith.constant 0 : index
    %8 = vector.load %arg1[%c2, %c0_7, %c0_8] : memref<4x72x128xf32, #tpu.memory_space<vmem>>, vector<1x72x128xf32>
    %9 = vector.shape_cast %8 : vector<1x72x128xf32> to vector<72x128xf32>
    %cst_9 = arith.constant dense<0.000000e+00> : vector<72x128xf32>
    %10 = tpu.matmul %9, %0, %cst_9 {dimension_numbers = #tpu.dot_dimension_numbers<[1], [0], [0], [1], [0, 0, 1, 1], [], []>} : vector<72x128xf32>, vector<128x128xf32>, vector<72x128xf32> -> vector<72x128xf32>
    %11 = arith.maximumf %7, %10 : vector<72x128xf32>
    %c3 = arith.constant 3 : index
    %c0_10 = arith.constant 0 : index
    %c0_11 = arith.constant 0 : index
    %12 = vector.load %arg1[%c3, %c0_10, %c0_11] : memref<4x72x128xf32, #tpu.memory_space<vmem>>, vector<1x72x128xf32>
    %13 = vector.shape_cast %12 : vector<1x72x128xf32> to vector<72x128xf32>
    %cst_12 = arith.constant dense<0.000000e+00> : vector<72x128xf32>
    %14 = tpu.matmul %13, %0, %cst_12 {dimension_numbers = #tpu.dot_dimension_numbers<[1], [0], [0], [1], [0, 0, 1, 1], [], []>} : vector<72x128xf32>, vector<128x128xf32>, vector<72x128xf32> -> vector<72x128xf32>
    %15 = arith.maximumf %11, %14 : vector<72x128xf32>
    %c0_13 = arith.constant 0 : index
    %c0_14 = arith.constant 0 : index
    %16 = vector.load %arg3[%c0_13, %c0_14] : memref<1x128xf32, #tpu.memory_space<vmem>>, vector<1x128xf32>
    %17 = vector.broadcast %16 : vector<1x128xf32> to vector<72x128xf32>
    %18 = arith.addf %15, %17 : vector<72x128xf32>
    %cst_15 = arith.constant 0.000000e+00 : f32
    %19 = vector.broadcast %cst_15 : f32 to vector<72x128xf32>
    %20 = arith.maximumf %18, %19 : vector<72x128xf32>
    %c0_16 = arith.constant 0 : index
    %c0_17 = arith.constant 0 : index
    %21 = vector.load %arg4[%c0_16, %c0_17] : memref<72x128xf32, #tpu.memory_space<vmem>>, vector<72x128xf32>
    tpu.vector_store %arg4[%c0_16, %c0_17], %20 {strides = array<i32>} : memref<72x128xf32, #tpu.memory_space<vmem>>, vector<72x128xf32>,
    return
  }
  func.func @transform_0(%arg0: i32) -> (i32, i32, i32) {
    %c0_i32 = arith.constant 0 : i32
    %c0_i32_0 = arith.constant 0 : i32
    %c0_i32_1 = arith.constant 0 : i32
    return %c0_i32, %arg0, %c0_i32_0 : i32, i32, i32
  }
  func.func @transform_1(%arg0: i32) -> (i32, i32) {
    %c0_i32 = arith.constant 0 : i32
    %c0_i32_0 = arith.constant 0 : i32
    %c0_i32_1 = arith.constant 0 : i32
    return %c0_i32, %c0_i32_0 : i32, i32
  }
  func.func @transform_2(%arg0: i32) -> (i32, i32) {
    %c0_i32 = arith.constant 0 : i32
    %c0_i32_0 = arith.constant 0 : i32
    %c0_i32_1 = arith.constant 0 : i32
    return %c0_i32, %c0_i32_0 : i32, i32
  }
  func.func @transform_3(%arg0: i32) -> (i32, i32) {
    %c0_i32 = arith.constant 0 : i32
    %c0_i32_0 = arith.constant 0 : i32
    return %arg0, %c0_i32 : i32, i32
  }
}

module attributes {stable_mosaic.version = 11 : i64} {
  func.func @_conv2_fc_kernel(%arg0: memref<72x128xf32, #tpu.memory_space<vmem>>, %arg1: memref<25x128x128xf32, #tpu.memory_space<vmem>>, %arg2: memref<1x128xf32, #tpu.memory_space<vmem>>, %arg3: memref<1x128x128xf32, #tpu.memory_space<vmem>>, %arg4: memref<1x128xf32, #tpu.memory_space<vmem>>, %arg5: memref<128x128xf32, #tpu.memory_space<vmem>>, %arg6: memref<1x128xf32, #tpu.memory_space<vmem>>, %arg7: memref<2x128xf32, #tpu.memory_space<vmem>>) attributes {dimension_semantics = [], scalar_prefetch = 0 : i64, scratch_operands = 0 : i64, tpu.core_type = #tpu.core_type<tc>} {
    %c0 = arith.constant 0 : index
    %c0_0 = arith.constant 0 : index
    %0 = vector.load %arg2[%c0, %c0_0] : memref<1x128xf32, #tpu.memory_space<vmem>>, vector<1x128xf32>
    %c0_1 = arith.constant 0 : index
    %c0_2 = arith.constant 0 : index
    %1 = vector.load %arg0[%c0_1, %c0_2] : memref<72x128xf32, #tpu.memory_space<vmem>>, vector<2x128xf32>
    %c0_3 = arith.constant 0 : index
    %c0_4 = arith.constant 0 : index
    %c0_5 = arith.constant 0 : index
    %2 = vector.load %arg1[%c0_3, %c0_4, %c0_5] : memref<25x128x128xf32, #tpu.memory_space<vmem>>, vector<1x128x128xf32>
    %3 = vector.shape_cast %2 : vector<1x128x128xf32> to vector<128x128xf32>
    %cst = arith.constant dense<0.000000e+00> : vector<2x128xf32>
    %4 = tpu.matmul %1, %3, %cst {dimension_numbers = #tpu.dot_dimension_numbers<[1], [0], [0], [1], [0, 0, 1, 1], [], []>} : vector<2x128xf32>, vector<128x128xf32>, vector<2x128xf32> -> vector<2x128xf32>
    %c2 = arith.constant 2 : index
    %c0_6 = arith.constant 0 : index
    %5 = vector.load %arg0[%c2, %c0_6] : memref<72x128xf32, #tpu.memory_space<vmem>>, vector<2x128xf32>
    %c1 = arith.constant 1 : index
    %c0_7 = arith.constant 0 : index
    %c0_8 = arith.constant 0 : index
    %6 = vector.load %arg1[%c1, %c0_7, %c0_8] : memref<25x128x128xf32, #tpu.memory_space<vmem>>, vector<1x128x128xf32>
    %7 = vector.shape_cast %6 : vector<1x128x128xf32> to vector<128x128xf32>
    %cst_9 = arith.constant dense<0.000000e+00> : vector<2x128xf32>
    %8 = tpu.matmul %5, %7, %cst_9 {dimension_numbers = #tpu.dot_dimension_numbers<[1], [0], [0], [1], [0, 0, 1, 1], [], []>} : vector<2x128xf32>, vector<128x128xf32>, vector<2x128xf32> -> vector<2x128xf32>
    %9 = arith.addf %4, %8 : vector<2x128xf32>
    %c4 = arith.constant 4 : index
    %c0_10 = arith.constant 0 : index
    %10 = vector.load %arg0[%c4, %c0_10] : memref<72x128xf32, #tpu.memory_space<vmem>>, vector<2x128xf32>
    %c2_11 = arith.constant 2 : index
    %c0_12 = arith.constant 0 : index
    %c0_13 = arith.constant 0 : index
    %11 = vector.load %arg1[%c2_11, %c0_12, %c0_13] : memref<25x128x128xf32, #tpu.memory_space<vmem>>, vector<1x128x128xf32>
    %12 = vector.shape_cast %11 : vector<1x128x128xf32> to vector<128x128xf32>
    %cst_14 = arith.constant dense<0.000000e+00> : vector<2x128xf32>
    %13 = tpu.matmul %10, %12, %cst_14 {dimension_numbers = #tpu.dot_dimension_numbers<[1], [0], [0], [1], [0, 0, 1, 1], [], []>} : vector<2x128xf32>, vector<128x128xf32>, vector<2x128xf32> -> vector<2x128xf32>
    %14 = arith.addf %9, %13 : vector<2x128xf32>
    %c6 = arith.constant 6 : index
    %c0_15 = arith.constant 0 : index
    %15 = vector.load %arg0[%c6, %c0_15] : memref<72x128xf32, #tpu.memory_space<vmem>>, vector<2x128xf32>
    %c3 = arith.constant 3 : index
    %c0_16 = arith.constant 0 : index
    %c0_17 = arith.constant 0 : index
    %16 = vector.load %arg1[%c3, %c0_16, %c0_17] : memref<25x128x128xf32, #tpu.memory_space<vmem>>, vector<1x128x128xf32>
    %17 = vector.shape_cast %16 : vector<1x128x128xf32> to vector<128x128xf32>
    %cst_18 = arith.constant dense<0.000000e+00> : vector<2x128xf32>
    %18 = tpu.matmul %15, %17, %cst_18 {dimension_numbers = #tpu.dot_dimension_numbers<[1], [0], [0], [1], [0, 0, 1, 1], [], []>} : vector<2x128xf32>, vector<128x128xf32>, vector<2x128xf32> -> vector<2x128xf32>
    %19 = arith.addf %14, %18 : vector<2x128xf32>
    %c8 = arith.constant 8 : index
    %c0_19 = arith.constant 0 : index
    %20 = vector.load %arg0[%c8, %c0_19] : memref<72x128xf32, #tpu.memory_space<vmem>>, vector<2x128xf32>
    %c4_20 = arith.constant 4 : index
    %c0_21 = arith.constant 0 : index
    %c0_22 = arith.constant 0 : index
    %21 = vector.load %arg1[%c4_20, %c0_21, %c0_22] : memref<25x128x128xf32, #tpu.memory_space<vmem>>, vector<1x128x128xf32>
    %22 = vector.shape_cast %21 : vector<1x128x128xf32> to vector<128x128xf32>
    %cst_23 = arith.constant dense<0.000000e+00> : vector<2x128xf32>
    %23 = tpu.matmul %20, %22, %cst_23 {dimension_numbers = #tpu.dot_dimension_numbers<[1], [0], [0], [1], [0, 0, 1, 1], [], []>} : vector<2x128xf32>, vector<128x128xf32>, vector<2x128xf32> -> vector<2x128xf32>
    %24 = arith.addf %19, %23 : vector<2x128xf32>
    %c12 = arith.constant 12 : index
    %c0_24 = arith.constant 0 : index
    %25 = vector.load %arg0[%c12, %c0_24] : memref<72x128xf32, #tpu.memory_space<vmem>>, vector<2x128xf32>
    %c5 = arith.constant 5 : index
    %c0_25 = arith.constant 0 : index
    %c0_26 = arith.constant 0 : index
    %26 = vector.load %arg1[%c5, %c0_25, %c0_26] : memref<25x128x128xf32, #tpu.memory_space<vmem>>, vector<1x128x128xf32>
    %27 = vector.shape_cast %26 : vector<1x128x128xf32> to vector<128x128xf32>
    %cst_27 = arith.constant dense<0.000000e+00> : vector<2x128xf32>
    %28 = tpu.matmul %25, %27, %cst_27 {dimension_numbers = #tpu.dot_dimension_numbers<[1], [0], [0], [1], [0, 0, 1, 1], [], []>} : vector<2x128xf32>, vector<128x128xf32>, vector<2x128xf32> -> vector<2x128xf32>
    %29 = arith.addf %24, %28 : vector<2x128xf32>
    %c14 = arith.constant 14 : index
    %c0_28 = arith.constant 0 : index
    %30 = vector.load %arg0[%c14, %c0_28] : memref<72x128xf32, #tpu.memory_space<vmem>>, vector<2x128xf32>
    %c6_29 = arith.constant 6 : index
    %c0_30 = arith.constant 0 : index
    %c0_31 = arith.constant 0 : index
    %31 = vector.load %arg1[%c6_29, %c0_30, %c0_31] : memref<25x128x128xf32, #tpu.memory_space<vmem>>, vector<1x128x128xf32>
    %32 = vector.shape_cast %31 : vector<1x128x128xf32> to vector<128x128xf32>
    %cst_32 = arith.constant dense<0.000000e+00> : vector<2x128xf32>
    %33 = tpu.matmul %30, %32, %cst_32 {dimension_numbers = #tpu.dot_dimension_numbers<[1], [0], [0], [1], [0, 0, 1, 1], [], []>} : vector<2x128xf32>, vector<128x128xf32>, vector<2x128xf32> -> vector<2x128xf32>
    %34 = arith.addf %29, %33 : vector<2x128xf32>
    %c16 = arith.constant 16 : index
    %c0_33 = arith.constant 0 : index
    %35 = vector.load %arg0[%c16, %c0_33] : memref<72x128xf32, #tpu.memory_space<vmem>>, vector<2x128xf32>
    %c7 = arith.constant 7 : index
    %c0_34 = arith.constant 0 : index
    %c0_35 = arith.constant 0 : index
    %36 = vector.load %arg1[%c7, %c0_34, %c0_35] : memref<25x128x128xf32, #tpu.memory_space<vmem>>, vector<1x128x128xf32>
    %37 = vector.shape_cast %36 : vector<1x128x128xf32> to vector<128x128xf32>
    %cst_36 = arith.constant dense<0.000000e+00> : vector<2x128xf32>
    %38 = tpu.matmul %35, %37, %cst_36 {dimension_numbers = #tpu.dot_dimension_numbers<[1], [0], [0], [1], [0, 0, 1, 1], [], []>} : vector<2x128xf32>, vector<128x128xf32>, vector<2x128xf32> -> vector<2x128xf32>
    %39 = arith.addf %34, %38 : vector<2x128xf32>
    %c18 = arith.constant 18 : index
    %c0_37 = arith.constant 0 : index
    %40 = vector.load %arg0[%c18, %c0_37] : memref<72x128xf32, #tpu.memory_space<vmem>>, vector<2x128xf32>
    %c8_38 = arith.constant 8 : index
    %c0_39 = arith.constant 0 : index
    %c0_40 = arith.constant 0 : index
    %41 = vector.load %arg1[%c8_38, %c0_39, %c0_40] : memref<25x128x128xf32, #tpu.memory_space<vmem>>, vector<1x128x128xf32>
    %42 = vector.shape_cast %41 : vector<1x128x128xf32> to vector<128x128xf32>
    %cst_41 = arith.constant dense<0.000000e+00> : vector<2x128xf32>
    %43 = tpu.matmul %40, %42, %cst_41 {dimension_numbers = #tpu.dot_dimension_numbers<[1], [0], [0], [1], [0, 0, 1, 1], [], []>} : vector<2x128xf32>, vector<128x128xf32>, vector<2x128xf32> -> vector<2x128xf32>
    %44 = arith.addf %39, %43 : vector<2x128xf32>
    %c20 = arith.constant 20 : index
    %c0_42 = arith.constant 0 : index
    %45 = vector.load %arg0[%c20, %c0_42] : memref<72x128xf32, #tpu.memory_space<vmem>>, vector<2x128xf32>
    %c9 = arith.constant 9 : index
    %c0_43 = arith.constant 0 : index
    %c0_44 = arith.constant 0 : index
    %46 = vector.load %arg1[%c9, %c0_43, %c0_44] : memref<25x128x128xf32, #tpu.memory_space<vmem>>, vector<1x128x128xf32>
    %47 = vector.shape_cast %46 : vector<1x128x128xf32> to vector<128x128xf32>
    %cst_45 = arith.constant dense<0.000000e+00> : vector<2x128xf32>
    %48 = tpu.matmul %45, %47, %cst_45 {dimension_numbers = #tpu.dot_dimension_numbers<[1], [0], [0], [1], [0, 0, 1, 1], [], []>} : vector<2x128xf32>, vector<128x128xf32>, vector<2x128xf32> -> vector<2x128xf32>
    %49 = arith.addf %44, %48 : vector<2x128xf32>
    %c24 = arith.constant 24 : index
    %c0_46 = arith.constant 0 : index
    %50 = vector.load %arg0[%c24, %c0_46] : memref<72x128xf32, #tpu.memory_space<vmem>>, vector<2x128xf32>
    %c10 = arith.constant 10 : index
    %c0_47 = arith.constant 0 : index
    %c0_48 = arith.constant 0 : index
    %51 = vector.load %arg1[%c10, %c0_47, %c0_48] : memref<25x128x128xf32, #tpu.memory_space<vmem>>, vector<1x128x128xf32>
    %52 = vector.shape_cast %51 : vector<1x128x128xf32> to vector<128x128xf32>
    %cst_49 = arith.constant dense<0.000000e+00> : vector<2x128xf32>
    %53 = tpu.matmul %50, %52, %cst_49 {dimension_numbers = #tpu.dot_dimension_numbers<[1], [0], [0], [1], [0, 0, 1, 1], [], []>} : vector<2x128xf32>, vector<128x128xf32>, vector<2x128xf32> -> vector<2x128xf32>
    %54 = arith.addf %49, %53 : vector<2x128xf32>
    %c26 = arith.constant 26 : index
    %c0_50 = arith.constant 0 : index
    %55 = vector.load %arg0[%c26, %c0_50] : memref<72x128xf32, #tpu.memory_space<vmem>>, vector<2x128xf32>
    %c11 = arith.constant 11 : index
    %c0_51 = arith.constant 0 : index
    %c0_52 = arith.constant 0 : index
    %56 = vector.load %arg1[%c11, %c0_51, %c0_52] : memref<25x128x128xf32, #tpu.memory_space<vmem>>, vector<1x128x128xf32>
    %57 = vector.shape_cast %56 : vector<1x128x128xf32> to vector<128x128xf32>
    %cst_53 = arith.constant dense<0.000000e+00> : vector<2x128xf32>
    %58 = tpu.matmul %55, %57, %cst_53 {dimension_numbers = #tpu.dot_dimension_numbers<[1], [0], [0], [1], [0, 0, 1, 1], [], []>} : vector<2x128xf32>, vector<128x128xf32>, vector<2x128xf32> -> vector<2x128xf32>
    %59 = arith.addf %54, %58 : vector<2x128xf32>
    %c28 = arith.constant 28 : index
    %c0_54 = arith.constant 0 : index
    %60 = vector.load %arg0[%c28, %c0_54] : memref<72x128xf32, #tpu.memory_space<vmem>>, vector<2x128xf32>
    %c12_55 = arith.constant 12 : index
    %c0_56 = arith.constant 0 : index
    %c0_57 = arith.constant 0 : index
    %61 = vector.load %arg1[%c12_55, %c0_56, %c0_57] : memref<25x128x128xf32, #tpu.memory_space<vmem>>, vector<1x128x128xf32>
    %62 = vector.shape_cast %61 : vector<1x128x128xf32> to vector<128x128xf32>
    %cst_58 = arith.constant dense<0.000000e+00> : vector<2x128xf32>
    %63 = tpu.matmul %60, %62, %cst_58 {dimension_numbers = #tpu.dot_dimension_numbers<[1], [0], [0], [1], [0, 0, 1, 1], [], []>} : vector<2x128xf32>, vector<128x128xf32>, vector<2x128xf32> -> vector<2x128xf32>
    %64 = arith.addf %59, %63 : vector<2x128xf32>
    %c30 = arith.constant 30 : index
    %c0_59 = arith.constant 0 : index
    %65 = vector.load %arg0[%c30, %c0_59] : memref<72x128xf32, #tpu.memory_space<vmem>>, vector<2x128xf32>
    %c13 = arith.constant 13 : index
    %c0_60 = arith.constant 0 : index
    %c0_61 = arith.constant 0 : index
    %66 = vector.load %arg1[%c13, %c0_60, %c0_61] : memref<25x128x128xf32, #tpu.memory_space<vmem>>, vector<1x128x128xf32>
    %67 = vector.shape_cast %66 : vector<1x128x128xf32> to vector<128x128xf32>
    %cst_62 = arith.constant dense<0.000000e+00> : vector<2x128xf32>
    %68 = tpu.matmul %65, %67, %cst_62 {dimension_numbers = #tpu.dot_dimension_numbers<[1], [0], [0], [1], [0, 0, 1, 1], [], []>} : vector<2x128xf32>, vector<128x128xf32>, vector<2x128xf32> -> vector<2x128xf32>
    %69 = arith.addf %64, %68 : vector<2x128xf32>
    %c32 = arith.constant 32 : index
    %c0_63 = arith.constant 0 : index
    %70 = vector.load %arg0[%c32, %c0_63] : memref<72x128xf32, #tpu.memory_space<vmem>>, vector<2x128xf32>
    %c14_64 = arith.constant 14 : index
    %c0_65 = arith.constant 0 : index
    %c0_66 = arith.constant 0 : index
    %71 = vector.load %arg1[%c14_64, %c0_65, %c0_66] : memref<25x128x128xf32, #tpu.memory_space<vmem>>, vector<1x128x128xf32>
    %72 = vector.shape_cast %71 : vector<1x128x128xf32> to vector<128x128xf32>
    %cst_67 = arith.constant dense<0.000000e+00> : vector<2x128xf32>
    %73 = tpu.matmul %70, %72, %cst_67 {dimension_numbers = #tpu.dot_dimension_numbers<[1], [0], [0], [1], [0, 0, 1, 1], [], []>} : vector<2x128xf32>, vector<128x128xf32>, vector<2x128xf32> -> vector<2x128xf32>
    %74 = arith.addf %69, %73 : vector<2x128xf32>
    %c36 = arith.constant 36 : index
    %c0_68 = arith.constant 0 : index
    %75 = vector.load %arg0[%c36, %c0_68] : memref<72x128xf32, #tpu.memory_space<vmem>>, vector<2x128xf32>
    %c15 = arith.constant 15 : index
    %c0_69 = arith.constant 0 : index
    %c0_70 = arith.constant 0 : index
    %76 = vector.load %arg1[%c15, %c0_69, %c0_70] : memref<25x128x128xf32, #tpu.memory_space<vmem>>, vector<1x128x128xf32>
    %77 = vector.shape_cast %76 : vector<1x128x128xf32> to vector<128x128xf32>
    %cst_71 = arith.constant dense<0.000000e+00> : vector<2x128xf32>
    %78 = tpu.matmul %75, %77, %cst_71 {dimension_numbers = #tpu.dot_dimension_numbers<[1], [0], [0], [1], [0, 0, 1, 1], [], []>} : vector<2x128xf32>, vector<128x128xf32>, vector<2x128xf32> -> vector<2x128xf32>
    %79 = arith.addf %74, %78 : vector<2x128xf32>
    %c38 = arith.constant 38 : index
    %c0_72 = arith.constant 0 : index
    %80 = vector.load %arg0[%c38, %c0_72] : memref<72x128xf32, #tpu.memory_space<vmem>>, vector<2x128xf32>
    %c16_73 = arith.constant 16 : index
    %c0_74 = arith.constant 0 : index
    %c0_75 = arith.constant 0 : index
    %81 = vector.load %arg1[%c16_73, %c0_74, %c0_75] : memref<25x128x128xf32, #tpu.memory_space<vmem>>, vector<1x128x128xf32>
    %82 = vector.shape_cast %81 : vector<1x128x128xf32> to vector<128x128xf32>
    %cst_76 = arith.constant dense<0.000000e+00> : vector<2x128xf32>
    %83 = tpu.matmul %80, %82, %cst_76 {dimension_numbers = #tpu.dot_dimension_numbers<[1], [0], [0], [1], [0, 0, 1, 1], [], []>} : vector<2x128xf32>, vector<128x128xf32>, vector<2x128xf32> -> vector<2x128xf32>
    %84 = arith.addf %79, %83 : vector<2x128xf32>
    %c40 = arith.constant 40 : index
    %c0_77 = arith.constant 0 : index
    %85 = vector.load %arg0[%c40, %c0_77] : memref<72x128xf32, #tpu.memory_space<vmem>>, vector<2x128xf32>
    %c17 = arith.constant 17 : index
    %c0_78 = arith.constant 0 : index
    %c0_79 = arith.constant 0 : index
    %86 = vector.load %arg1[%c17, %c0_78, %c0_79] : memref<25x128x128xf32, #tpu.memory_space<vmem>>, vector<1x128x128xf32>
    %87 = vector.shape_cast %86 : vector<1x128x128xf32> to vector<128x128xf32>
    %cst_80 = arith.constant dense<0.000000e+00> : vector<2x128xf32>
    %88 = tpu.matmul %85, %87, %cst_80 {dimension_numbers = #tpu.dot_dimension_numbers<[1], [0], [0], [1], [0, 0, 1, 1], [], []>} : vector<2x128xf32>, vector<128x128xf32>, vector<2x128xf32> -> vector<2x128xf32>
    %89 = arith.addf %84, %88 : vector<2x128xf32>
    %c42 = arith.constant 42 : index
    %c0_81 = arith.constant 0 : index
    %90 = vector.load %arg0[%c42, %c0_81] : memref<72x128xf32, #tpu.memory_space<vmem>>, vector<2x128xf32>
    %c18_82 = arith.constant 18 : index
    %c0_83 = arith.constant 0 : index
    %c0_84 = arith.constant 0 : index
    %91 = vector.load %arg1[%c18_82, %c0_83, %c0_84] : memref<25x128x128xf32, #tpu.memory_space<vmem>>, vector<1x128x128xf32>
    %92 = vector.shape_cast %91 : vector<1x128x128xf32> to vector<128x128xf32>
    %cst_85 = arith.constant dense<0.000000e+00> : vector<2x128xf32>
    %93 = tpu.matmul %90, %92, %cst_85 {dimension_numbers = #tpu.dot_dimension_numbers<[1], [0], [0], [1], [0, 0, 1, 1], [], []>} : vector<2x128xf32>, vector<128x128xf32>, vector<2x128xf32> -> vector<2x128xf32>
    %94 = arith.addf %89, %93 : vector<2x128xf32>
    %c44 = arith.constant 44 : index
    %c0_86 = arith.constant 0 : index
    %95 = vector.load %arg0[%c44, %c0_86] : memref<72x128xf32, #tpu.memory_space<vmem>>, vector<2x128xf32>
    %c19 = arith.constant 19 : index
    %c0_87 = arith.constant 0 : index
    %c0_88 = arith.constant 0 : index
    %96 = vector.load %arg1[%c19, %c0_87, %c0_88] : memref<25x128x128xf32, #tpu.memory_space<vmem>>, vector<1x128x128xf32>
    %97 = vector.shape_cast %96 : vector<1x128x128xf32> to vector<128x128xf32>
    %cst_89 = arith.constant dense<0.000000e+00> : vector<2x128xf32>
    %98 = tpu.matmul %95, %97, %cst_89 {dimension_numbers = #tpu.dot_dimension_numbers<[1], [0], [0], [1], [0, 0, 1, 1], [], []>} : vector<2x128xf32>, vector<128x128xf32>, vector<2x128xf32> -> vector<2x128xf32>
    %99 = arith.addf %94, %98 : vector<2x128xf32>
    %c48 = arith.constant 48 : index
    %c0_90 = arith.constant 0 : index
    %100 = vector.load %arg0[%c48, %c0_90] : memref<72x128xf32, #tpu.memory_space<vmem>>, vector<2x128xf32>
    %c20_91 = arith.constant 20 : index
    %c0_92 = arith.constant 0 : index
    %c0_93 = arith.constant 0 : index
    %101 = vector.load %arg1[%c20_91, %c0_92, %c0_93] : memref<25x128x128xf32, #tpu.memory_space<vmem>>, vector<1x128x128xf32>
    %102 = vector.shape_cast %101 : vector<1x128x128xf32> to vector<128x128xf32>
    %cst_94 = arith.constant dense<0.000000e+00> : vector<2x128xf32>
    %103 = tpu.matmul %100, %102, %cst_94 {dimension_numbers = #tpu.dot_dimension_numbers<[1], [0], [0], [1], [0, 0, 1, 1], [], []>} : vector<2x128xf32>, vector<128x128xf32>, vector<2x128xf32> -> vector<2x128xf32>
    %104 = arith.addf %99, %103 : vector<2x128xf32>
    %c50 = arith.constant 50 : index
    %c0_95 = arith.constant 0 : index
    %105 = vector.load %arg0[%c50, %c0_95] : memref<72x128xf32, #tpu.memory_space<vmem>>, vector<2x128xf32>
    %c21 = arith.constant 21 : index
    %c0_96 = arith.constant 0 : index
    %c0_97 = arith.constant 0 : index
    %106 = vector.load %arg1[%c21, %c0_96, %c0_97] : memref<25x128x128xf32, #tpu.memory_space<vmem>>, vector<1x128x128xf32>
    %107 = vector.shape_cast %106 : vector<1x128x128xf32> to vector<128x128xf32>
    %cst_98 = arith.constant dense<0.000000e+00> : vector<2x128xf32>
    %108 = tpu.matmul %105, %107, %cst_98 {dimension_numbers = #tpu.dot_dimension_numbers<[1], [0], [0], [1], [0, 0, 1, 1], [], []>} : vector<2x128xf32>, vector<128x128xf32>, vector<2x128xf32> -> vector<2x128xf32>
    %109 = arith.addf %104, %108 : vector<2x128xf32>
    %c52 = arith.constant 52 : index
    %c0_99 = arith.constant 0 : index
    %110 = vector.load %arg0[%c52, %c0_99] : memref<72x128xf32, #tpu.memory_space<vmem>>, vector<2x128xf32>
    %c22 = arith.constant 22 : index
    %c0_100 = arith.constant 0 : index
    %c0_101 = arith.constant 0 : index
    %111 = vector.load %arg1[%c22, %c0_100, %c0_101] : memref<25x128x128xf32, #tpu.memory_space<vmem>>, vector<1x128x128xf32>
    %112 = vector.shape_cast %111 : vector<1x128x128xf32> to vector<128x128xf32>
    %cst_102 = arith.constant dense<0.000000e+00> : vector<2x128xf32>
    %113 = tpu.matmul %110, %112, %cst_102 {dimension_numbers = #tpu.dot_dimension_numbers<[1], [0], [0], [1], [0, 0, 1, 1], [], []>} : vector<2x128xf32>, vector<128x128xf32>, vector<2x128xf32> -> vector<2x128xf32>
    %114 = arith.addf %109, %113 : vector<2x128xf32>
    %c54 = arith.constant 54 : index
    %c0_103 = arith.constant 0 : index
    %115 = vector.load %arg0[%c54, %c0_103] : memref<72x128xf32, #tpu.memory_space<vmem>>, vector<2x128xf32>
    %c23 = arith.constant 23 : index
    %c0_104 = arith.constant 0 : index
    %c0_105 = arith.constant 0 : index
    %116 = vector.load %arg1[%c23, %c0_104, %c0_105] : memref<25x128x128xf32, #tpu.memory_space<vmem>>, vector<1x128x128xf32>
    %117 = vector.shape_cast %116 : vector<1x128x128xf32> to vector<128x128xf32>
    %cst_106 = arith.constant dense<0.000000e+00> : vector<2x128xf32>
    %118 = tpu.matmul %115, %117, %cst_106 {dimension_numbers = #tpu.dot_dimension_numbers<[1], [0], [0], [1], [0, 0, 1, 1], [], []>} : vector<2x128xf32>, vector<128x128xf32>, vector<2x128xf32> -> vector<2x128xf32>
    %119 = arith.addf %114, %118 : vector<2x128xf32>
    %c56 = arith.constant 56 : index
    %c0_107 = arith.constant 0 : index
    %120 = vector.load %arg0[%c56, %c0_107] : memref<72x128xf32, #tpu.memory_space<vmem>>, vector<2x128xf32>
    %c24_108 = arith.constant 24 : index
    %c0_109 = arith.constant 0 : index
    %c0_110 = arith.constant 0 : index
    %121 = vector.load %arg1[%c24_108, %c0_109, %c0_110] : memref<25x128x128xf32, #tpu.memory_space<vmem>>, vector<1x128x128xf32>
    %122 = vector.shape_cast %121 : vector<1x128x128xf32> to vector<128x128xf32>
    %cst_111 = arith.constant dense<0.000000e+00> : vector<2x128xf32>
    %123 = tpu.matmul %120, %122, %cst_111 {dimension_numbers = #tpu.dot_dimension_numbers<[1], [0], [0], [1], [0, 0, 1, 1], [], []>} : vector<2x128xf32>, vector<128x128xf32>, vector<2x128xf32> -> vector<2x128xf32>
    %124 = arith.addf %119, %123 : vector<2x128xf32>
    %c2_112 = arith.constant 2 : index
    %c0_113 = arith.constant 0 : index
    %125 = vector.load %arg0[%c2_112, %c0_113] : memref<72x128xf32, #tpu.memory_space<vmem>>, vector<2x128xf32>
    %c0_114 = arith.constant 0 : index
    %c0_115 = arith.constant 0 : index
    %c0_116 = arith.constant 0 : index
    %126 = vector.load %arg1[%c0_114, %c0_115, %c0_116] : memref<25x128x128xf32, #tpu.memory_space<vmem>>, vector<1x128x128xf32>
    %127 = vector.shape_cast %126 : vector<1x128x128xf32> to vector<128x128xf32>
    %cst_117 = arith.constant dense<0.000000e+00> : vector<2x128xf32>
    %128 = tpu.matmul %125, %127, %cst_117 {dimension_numbers = #tpu.dot_dimension_numbers<[1], [0], [0], [1], [0, 0, 1, 1], [], []>} : vector<2x128xf32>, vector<128x128xf32>, vector<2x128xf32> -> vector<2x128xf32>
    %c4_118 = arith.constant 4 : index
    %c0_119 = arith.constant 0 : index
    %129 = vector.load %arg0[%c4_118, %c0_119] : memref<72x128xf32, #tpu.memory_space<vmem>>, vector<2x128xf32>
    %c1_120 = arith.constant 1 : index
    %c0_121 = arith.constant 0 : index
    %c0_122 = arith.constant 0 : index
    %130 = vector.load %arg1[%c1_120, %c0_121, %c0_122] : memref<25x128x128xf32, #tpu.memory_space<vmem>>, vector<1x128x128xf32>
    %131 = vector.shape_cast %130 : vector<1x128x128xf32> to vector<128x128xf32>
    %cst_123 = arith.constant dense<0.000000e+00> : vector<2x128xf32>
    %132 = tpu.matmul %129, %131, %cst_123 {dimension_numbers = #tpu.dot_dimension_numbers<[1], [0], [0], [1], [0, 0, 1, 1], [], []>} : vector<2x128xf32>, vector<128x128xf32>, vector<2x128xf32> -> vector<2x128xf32>
    %133 = arith.addf %128, %132 : vector<2x128xf32>
    %c6_124 = arith.constant 6 : index
    %c0_125 = arith.constant 0 : index
    %134 = vector.load %arg0[%c6_124, %c0_125] : memref<72x128xf32, #tpu.memory_space<vmem>>, vector<2x128xf32>
    %c2_126 = arith.constant 2 : index
    %c0_127 = arith.constant 0 : index
    %c0_128 = arith.constant 0 : index
    %135 = vector.load %arg1[%c2_126, %c0_127, %c0_128] : memref<25x128x128xf32, #tpu.memory_space<vmem>>, vector<1x128x128xf32>
    %136 = vector.shape_cast %135 : vector<1x128x128xf32> to vector<128x128xf32>
    %cst_129 = arith.constant dense<0.000000e+00> : vector<2x128xf32>
    %137 = tpu.matmul %134, %136, %cst_129 {dimension_numbers = #tpu.dot_dimension_numbers<[1], [0], [0], [1], [0, 0, 1, 1], [], []>} : vector<2x128xf32>, vector<128x128xf32>, vector<2x128xf32> -> vector<2x128xf32>
    %138 = arith.addf %133, %137 : vector<2x128xf32>
    %c8_130 = arith.constant 8 : index
    %c0_131 = arith.constant 0 : index
    %139 = vector.load %arg0[%c8_130, %c0_131] : memref<72x128xf32, #tpu.memory_space<vmem>>, vector<2x128xf32>
    %c3_132 = arith.constant 3 : index
    %c0_133 = arith.constant 0 : index
    %c0_134 = arith.constant 0 : index
    %140 = vector.load %arg1[%c3_132, %c0_133, %c0_134] : memref<25x128x128xf32, #tpu.memory_space<vmem>>, vector<1x128x128xf32>
    %141 = vector.shape_cast %140 : vector<1x128x128xf32> to vector<128x128xf32>
    %cst_135 = arith.constant dense<0.000000e+00> : vector<2x128xf32>
    %142 = tpu.matmul %139, %141, %cst_135 {dimension_numbers = #tpu.dot_dimension_numbers<[1], [0], [0], [1], [0, 0, 1, 1], [], []>} : vector<2x128xf32>, vector<128x128xf32>, vector<2x128xf32> -> vector<2x128xf32>
    %143 = arith.addf %138, %142 : vector<2x128xf32>
    %c10_136 = arith.constant 10 : index
    %c0_137 = arith.constant 0 : index
    %144 = vector.load %arg0[%c10_136, %c0_137] : memref<72x128xf32, #tpu.memory_space<vmem>>, vector<2x128xf32>
    %c4_138 = arith.constant 4 : index
    %c0_139 = arith.constant 0 : index
    %c0_140 = arith.constant 0 : index
    %145 = vector.load %arg1[%c4_138, %c0_139, %c0_140] : memref<25x128x128xf32, #tpu.memory_space<vmem>>, vector<1x128x128xf32>
    %146 = vector.shape_cast %145 : vector<1x128x128xf32> to vector<128x128xf32>
    %cst_141 = arith.constant dense<0.000000e+00> : vector<2x128xf32>
    %147 = tpu.matmul %144, %146, %cst_141 {dimension_numbers = #tpu.dot_dimension_numbers<[1], [0], [0], [1], [0, 0, 1, 1], [], []>} : vector<2x128xf32>, vector<128x128xf32>, vector<2x128xf32> -> vector<2x128xf32>
    %148 = arith.addf %143, %147 : vector<2x128xf32>
    %c14_142 = arith.constant 14 : index
    %c0_143 = arith.constant 0 : index
    %149 = vector.load %arg0[%c14_142, %c0_143] : memref<72x128xf32, #tpu.memory_space<vmem>>, vector<2x128xf32>
    %c5_144 = arith.constant 5 : index
    %c0_145 = arith.constant 0 : index
    %c0_146 = arith.constant 0 : index
    %150 = vector.load %arg1[%c5_144, %c0_145, %c0_146] : memref<25x128x128xf32, #tpu.memory_space<vmem>>, vector<1x128x128xf32>
    %151 = vector.shape_cast %150 : vector<1x128x128xf32> to vector<128x128xf32>
    %cst_147 = arith.constant dense<0.000000e+00> : vector<2x128xf32>
    %152 = tpu.matmul %149, %151, %cst_147 {dimension_numbers = #tpu.dot_dimension_numbers<[1], [0], [0], [1], [0, 0, 1, 1], [], []>} : vector<2x128xf32>, vector<128x128xf32>, vector<2x128xf32> -> vector<2x128xf32>
    %153 = arith.addf %148, %152 : vector<2x128xf32>
    %c16_148 = arith.constant 16 : index
    %c0_149 = arith.constant 0 : index
    %154 = vector.load %arg0[%c16_148, %c0_149] : memref<72x128xf32, #tpu.memory_space<vmem>>, vector<2x128xf32>
    %c6_150 = arith.constant 6 : index
    %c0_151 = arith.constant 0 : index
    %c0_152 = arith.constant 0 : index
    %155 = vector.load %arg1[%c6_150, %c0_151, %c0_152] : memref<25x128x128xf32, #tpu.memory_space<vmem>>, vector<1x128x128xf32>
    %156 = vector.shape_cast %155 : vector<1x128x128xf32> to vector<128x128xf32>
    %cst_153 = arith.constant dense<0.000000e+00> : vector<2x128xf32>
    %157 = tpu.matmul %154, %156, %cst_153 {dimension_numbers = #tpu.dot_dimension_numbers<[1], [0], [0], [1], [0, 0, 1, 1], [], []>} : vector<2x128xf32>, vector<128x128xf32>, vector<2x128xf32> -> vector<2x128xf32>
    %158 = arith.addf %153, %157 : vector<2x128xf32>
    %c18_154 = arith.constant 18 : index
    %c0_155 = arith.constant 0 : index
    %159 = vector.load %arg0[%c18_154, %c0_155] : memref<72x128xf32, #tpu.memory_space<vmem>>, vector<2x128xf32>
    %c7_156 = arith.constant 7 : index
    %c0_157 = arith.constant 0 : index
    %c0_158 = arith.constant 0 : index
    %160 = vector.load %arg1[%c7_156, %c0_157, %c0_158] : memref<25x128x128xf32, #tpu.memory_space<vmem>>, vector<1x128x128xf32>
    %161 = vector.shape_cast %160 : vector<1x128x128xf32> to vector<128x128xf32>
    %cst_159 = arith.constant dense<0.000000e+00> : vector<2x128xf32>
    %162 = tpu.matmul %159, %161, %cst_159 {dimension_numbers = #tpu.dot_dimension_numbers<[1], [0], [0], [1], [0, 0, 1, 1], [], []>} : vector<2x128xf32>, vector<128x128xf32>, vector<2x128xf32> -> vector<2x128xf32>
    %163 = arith.addf %158, %162 : vector<2x128xf32>
    %c20_160 = arith.constant 20 : index
    %c0_161 = arith.constant 0 : index
    %164 = vector.load %arg0[%c20_160, %c0_161] : memref<72x128xf32, #tpu.memory_space<vmem>>, vector<2x128xf32>
    %c8_162 = arith.constant 8 : index
    %c0_163 = arith.constant 0 : index
    %c0_164 = arith.constant 0 : index
    %165 = vector.load %arg1[%c8_162, %c0_163, %c0_164] : memref<25x128x128xf32, #tpu.memory_space<vmem>>, vector<1x128x128xf32>
    %166 = vector.shape_cast %165 : vector<1x128x128xf32> to vector<128x128xf32>
    %cst_165 = arith.constant dense<0.000000e+00> : vector<2x128xf32>
    %167 = tpu.matmul %164, %166, %cst_165 {dimension_numbers = #tpu.dot_dimension_numbers<[1], [0], [0], [1], [0, 0, 1, 1], [], []>} : vector<2x128xf32>, vector<128x128xf32>, vector<2x128xf32> -> vector<2x128xf32>
    %168 = arith.addf %163, %167 : vector<2x128xf32>
    %c22_166 = arith.constant 22 : index
    %c0_167 = arith.constant 0 : index
    %169 = vector.load %arg0[%c22_166, %c0_167] : memref<72x128xf32, #tpu.memory_space<vmem>>, vector<2x128xf32>
    %c9_168 = arith.constant 9 : index
    %c0_169 = arith.constant 0 : index
    %c0_170 = arith.constant 0 : index
    %170 = vector.load %arg1[%c9_168, %c0_169, %c0_170] : memref<25x128x128xf32, #tpu.memory_space<vmem>>, vector<1x128x128xf32>
    %171 = vector.shape_cast %170 : vector<1x128x128xf32> to vector<128x128xf32>
    %cst_171 = arith.constant dense<0.000000e+00> : vector<2x128xf32>
    %172 = tpu.matmul %169, %171, %cst_171 {dimension_numbers = #tpu.dot_dimension_numbers<[1], [0], [0], [1], [0, 0, 1, 1], [], []>} : vector<2x128xf32>, vector<128x128xf32>, vector<2x128xf32> -> vector<2x128xf32>
    %173 = arith.addf %168, %172 : vector<2x128xf32>
    %c26_172 = arith.constant 26 : index
    %c0_173 = arith.constant 0 : index
    %174 = vector.load %arg0[%c26_172, %c0_173] : memref<72x128xf32, #tpu.memory_space<vmem>>, vector<2x128xf32>
    %c10_174 = arith.constant 10 : index
    %c0_175 = arith.constant 0 : index
    %c0_176 = arith.constant 0 : index
    %175 = vector.load %arg1[%c10_174, %c0_175, %c0_176] : memref<25x128x128xf32, #tpu.memory_space<vmem>>, vector<1x128x128xf32>
    %176 = vector.shape_cast %175 : vector<1x128x128xf32> to vector<128x128xf32>
    %cst_177 = arith.constant dense<0.000000e+00> : vector<2x128xf32>
    %177 = tpu.matmul %174, %176, %cst_177 {dimension_numbers = #tpu.dot_dimension_numbers<[1], [0], [0], [1], [0, 0, 1, 1], [], []>} : vector<2x128xf32>, vector<128x128xf32>, vector<2x128xf32> -> vector<2x128xf32>
    %178 = arith.addf %173, %177 : vector<2x128xf32>
    %c28_178 = arith.constant 28 : index
    %c0_179 = arith.constant 0 : index
    %179 = vector.load %arg0[%c28_178, %c0_179] : memref<72x128xf32, #tpu.memory_space<vmem>>, vector<2x128xf32>
    %c11_180 = arith.constant 11 : index
    %c0_181 = arith.constant 0 : index
    %c0_182 = arith.constant 0 : index
    %180 = vector.load %arg1[%c11_180, %c0_181, %c0_182] : memref<25x128x128xf32, #tpu.memory_space<vmem>>, vector<1x128x128xf32>
    %181 = vector.shape_cast %180 : vector<1x128x128xf32> to vector<128x128xf32>
    %cst_183 = arith.constant dense<0.000000e+00> : vector<2x128xf32>
    %182 = tpu.matmul %179, %181, %cst_183 {dimension_numbers = #tpu.dot_dimension_numbers<[1], [0], [0], [1], [0, 0, 1, 1], [], []>} : vector<2x128xf32>, vector<128x128xf32>, vector<2x128xf32> -> vector<2x128xf32>
    %183 = arith.addf %178, %182 : vector<2x128xf32>
    %c30_184 = arith.constant 30 : index
    %c0_185 = arith.constant 0 : index
    %184 = vector.load %arg0[%c30_184, %c0_185] : memref<72x128xf32, #tpu.memory_space<vmem>>, vector<2x128xf32>
    %c12_186 = arith.constant 12 : index
    %c0_187 = arith.constant 0 : index
    %c0_188 = arith.constant 0 : index
    %185 = vector.load %arg1[%c12_186, %c0_187, %c0_188] : memref<25x128x128xf32, #tpu.memory_space<vmem>>, vector<1x128x128xf32>
    %186 = vector.shape_cast %185 : vector<1x128x128xf32> to vector<128x128xf32>
    %cst_189 = arith.constant dense<0.000000e+00> : vector<2x128xf32>
    %187 = tpu.matmul %184, %186, %cst_189 {dimension_numbers = #tpu.dot_dimension_numbers<[1], [0], [0], [1], [0, 0, 1, 1], [], []>} : vector<2x128xf32>, vector<128x128xf32>, vector<2x128xf32> -> vector<2x128xf32>
    %188 = arith.addf %183, %187 : vector<2x128xf32>
    %c32_190 = arith.constant 32 : index
    %c0_191 = arith.constant 0 : index
    %189 = vector.load %arg0[%c32_190, %c0_191] : memref<72x128xf32, #tpu.memory_space<vmem>>, vector<2x128xf32>
    %c13_192 = arith.constant 13 : index
    %c0_193 = arith.constant 0 : index
    %c0_194 = arith.constant 0 : index
    %190 = vector.load %arg1[%c13_192, %c0_193, %c0_194] : memref<25x128x128xf32, #tpu.memory_space<vmem>>, vector<1x128x128xf32>
    %191 = vector.shape_cast %190 : vector<1x128x128xf32> to vector<128x128xf32>
    %cst_195 = arith.constant dense<0.000000e+00> : vector<2x128xf32>
    %192 = tpu.matmul %189, %191, %cst_195 {dimension_numbers = #tpu.dot_dimension_numbers<[1], [0], [0], [1], [0, 0, 1, 1], [], []>} : vector<2x128xf32>, vector<128x128xf32>, vector<2x128xf32> -> vector<2x128xf32>
    %193 = arith.addf %188, %192 : vector<2x128xf32>
    %c34 = arith.constant 34 : index
    %c0_196 = arith.constant 0 : index
    %194 = vector.load %arg0[%c34, %c0_196] : memref<72x128xf32, #tpu.memory_space<vmem>>, vector<2x128xf32>
    %c14_197 = arith.constant 14 : index
    %c0_198 = arith.constant 0 : index
    %c0_199 = arith.constant 0 : index
    %195 = vector.load %arg1[%c14_197, %c0_198, %c0_199] : memref<25x128x128xf32, #tpu.memory_space<vmem>>, vector<1x128x128xf32>
    %196 = vector.shape_cast %195 : vector<1x128x128xf32> to vector<128x128xf32>
    %cst_200 = arith.constant dense<0.000000e+00> : vector<2x128xf32>
    %197 = tpu.matmul %194, %196, %cst_200 {dimension_numbers = #tpu.dot_dimension_numbers<[1], [0], [0], [1], [0, 0, 1, 1], [], []>} : vector<2x128xf32>, vector<128x128xf32>, vector<2x128xf32> -> vector<2x128xf32>
    %198 = arith.addf %193, %197 : vector<2x128xf32>
    %c38_201 = arith.constant 38 : index
    %c0_202 = arith.constant 0 : index
    %199 = vector.load %arg0[%c38_201, %c0_202] : memref<72x128xf32, #tpu.memory_space<vmem>>, vector<2x128xf32>
    %c15_203 = arith.constant 15 : index
    %c0_204 = arith.constant 0 : index
    %c0_205 = arith.constant 0 : index
    %200 = vector.load %arg1[%c15_203, %c0_204, %c0_205] : memref<25x128x128xf32, #tpu.memory_space<vmem>>, vector<1x128x128xf32>
    %201 = vector.shape_cast %200 : vector<1x128x128xf32> to vector<128x128xf32>
    %cst_206 = arith.constant dense<0.000000e+00> : vector<2x128xf32>
    %202 = tpu.matmul %199, %201, %cst_206 {dimension_numbers = #tpu.dot_dimension_numbers<[1], [0], [0], [1], [0, 0, 1, 1], [], []>} : vector<2x128xf32>, vector<128x128xf32>, vector<2x128xf32> -> vector<2x128xf32>
    %203 = arith.addf %198, %202 : vector<2x128xf32>
    %c40_207 = arith.constant 40 : index
    %c0_208 = arith.constant 0 : index
    %204 = vector.load %arg0[%c40_207, %c0_208] : memref<72x128xf32, #tpu.memory_space<vmem>>, vector<2x128xf32>
    %c16_209 = arith.constant 16 : index
    %c0_210 = arith.constant 0 : index
    %c0_211 = arith.constant 0 : index
    %205 = vector.load %arg1[%c16_209, %c0_210, %c0_211] : memref<25x128x128xf32, #tpu.memory_space<vmem>>, vector<1x128x128xf32>
    %206 = vector.shape_cast %205 : vector<1x128x128xf32> to vector<128x128xf32>
    %cst_212 = arith.constant dense<0.000000e+00> : vector<2x128xf32>
    %207 = tpu.matmul %204, %206, %cst_212 {dimension_numbers = #tpu.dot_dimension_numbers<[1], [0], [0], [1], [0, 0, 1, 1], [], []>} : vector<2x128xf32>, vector<128x128xf32>, vector<2x128xf32> -> vector<2x128xf32>
    %208 = arith.addf %203, %207 : vector<2x128xf32>
    %c42_213 = arith.constant 42 : index
    %c0_214 = arith.constant 0 : index
    %209 = vector.load %arg0[%c42_213, %c0_214] : memref<72x128xf32, #tpu.memory_space<vmem>>, vector<2x128xf32>
    %c17_215 = arith.constant 17 : index
    %c0_216 = arith.constant 0 : index
    %c0_217 = arith.constant 0 : index
    %210 = vector.load %arg1[%c17_215, %c0_216, %c0_217] : memref<25x128x128xf32, #tpu.memory_space<vmem>>, vector<1x128x128xf32>
    %211 = vector.shape_cast %210 : vector<1x128x128xf32> to vector<128x128xf32>
    %cst_218 = arith.constant dense<0.000000e+00> : vector<2x128xf32>
    %212 = tpu.matmul %209, %211, %cst_218 {dimension_numbers = #tpu.dot_dimension_numbers<[1], [0], [0], [1], [0, 0, 1, 1], [], []>} : vector<2x128xf32>, vector<128x128xf32>, vector<2x128xf32> -> vector<2x128xf32>
    %213 = arith.addf %208, %212 : vector<2x128xf32>
    %c44_219 = arith.constant 44 : index
    %c0_220 = arith.constant 0 : index
    %214 = vector.load %arg0[%c44_219, %c0_220] : memref<72x128xf32, #tpu.memory_space<vmem>>, vector<2x128xf32>
    %c18_221 = arith.constant 18 : index
    %c0_222 = arith.constant 0 : index
    %c0_223 = arith.constant 0 : index
    %215 = vector.load %arg1[%c18_221, %c0_222, %c0_223] : memref<25x128x128xf32, #tpu.memory_space<vmem>>, vector<1x128x128xf32>
    %216 = vector.shape_cast %215 : vector<1x128x128xf32> to vector<128x128xf32>
    %cst_224 = arith.constant dense<0.000000e+00> : vector<2x128xf32>
    %217 = tpu.matmul %214, %216, %cst_224 {dimension_numbers = #tpu.dot_dimension_numbers<[1], [0], [0], [1], [0, 0, 1, 1], [], []>} : vector<2x128xf32>, vector<128x128xf32>, vector<2x128xf32> -> vector<2x128xf32>
    %218 = arith.addf %213, %217 : vector<2x128xf32>
    %c46 = arith.constant 46 : index
    %c0_225 = arith.constant 0 : index
    %219 = vector.load %arg0[%c46, %c0_225] : memref<72x128xf32, #tpu.memory_space<vmem>>, vector<2x128xf32>
    %c19_226 = arith.constant 19 : index
    %c0_227 = arith.constant 0 : index
    %c0_228 = arith.constant 0 : index
    %220 = vector.load %arg1[%c19_226, %c0_227, %c0_228] : memref<25x128x128xf32, #tpu.memory_space<vmem>>, vector<1x128x128xf32>
    %221 = vector.shape_cast %220 : vector<1x128x128xf32> to vector<128x128xf32>
    %cst_229 = arith.constant dense<0.000000e+00> : vector<2x128xf32>
    %222 = tpu.matmul %219, %221, %cst_229 {dimension_numbers = #tpu.dot_dimension_numbers<[1], [0], [0], [1], [0, 0, 1, 1], [], []>} : vector<2x128xf32>, vector<128x128xf32>, vector<2x128xf32> -> vector<2x128xf32>
    %223 = arith.addf %218, %222 : vector<2x128xf32>
    %c50_230 = arith.constant 50 : index
    %c0_231 = arith.constant 0 : index
    %224 = vector.load %arg0[%c50_230, %c0_231] : memref<72x128xf32, #tpu.memory_space<vmem>>, vector<2x128xf32>
    %c20_232 = arith.constant 20 : index
    %c0_233 = arith.constant 0 : index
    %c0_234 = arith.constant 0 : index
    %225 = vector.load %arg1[%c20_232, %c0_233, %c0_234] : memref<25x128x128xf32, #tpu.memory_space<vmem>>, vector<1x128x128xf32>
    %226 = vector.shape_cast %225 : vector<1x128x128xf32> to vector<128x128xf32>
    %cst_235 = arith.constant dense<0.000000e+00> : vector<2x128xf32>
    %227 = tpu.matmul %224, %226, %cst_235 {dimension_numbers = #tpu.dot_dimension_numbers<[1], [0], [0], [1], [0, 0, 1, 1], [], []>} : vector<2x128xf32>, vector<128x128xf32>, vector<2x128xf32> -> vector<2x128xf32>
    %228 = arith.addf %223, %227 : vector<2x128xf32>
    %c52_236 = arith.constant 52 : index
    %c0_237 = arith.constant 0 : index
    %229 = vector.load %arg0[%c52_236, %c0_237] : memref<72x128xf32, #tpu.memory_space<vmem>>, vector<2x128xf32>
    %c21_238 = arith.constant 21 : index
    %c0_239 = arith.constant 0 : index
    %c0_240 = arith.constant 0 : index
    %230 = vector.load %arg1[%c21_238, %c0_239, %c0_240] : memref<25x128x128xf32, #tpu.memory_space<vmem>>, vector<1x128x128xf32>
    %231 = vector.shape_cast %230 : vector<1x128x128xf32> to vector<128x128xf32>
    %cst_241 = arith.constant dense<0.000000e+00> : vector<2x128xf32>
    %232 = tpu.matmul %229, %231, %cst_241 {dimension_numbers = #tpu.dot_dimension_numbers<[1], [0], [0], [1], [0, 0, 1, 1], [], []>} : vector<2x128xf32>, vector<128x128xf32>, vector<2x128xf32> -> vector<2x128xf32>
    %233 = arith.addf %228, %232 : vector<2x128xf32>
    %c54_242 = arith.constant 54 : index
    %c0_243 = arith.constant 0 : index
    %234 = vector.load %arg0[%c54_242, %c0_243] : memref<72x128xf32, #tpu.memory_space<vmem>>, vector<2x128xf32>
    %c22_244 = arith.constant 22 : index
    %c0_245 = arith.constant 0 : index
    %c0_246 = arith.constant 0 : index
    %235 = vector.load %arg1[%c22_244, %c0_245, %c0_246] : memref<25x128x128xf32, #tpu.memory_space<vmem>>, vector<1x128x128xf32>
    %236 = vector.shape_cast %235 : vector<1x128x128xf32> to vector<128x128xf32>
    %cst_247 = arith.constant dense<0.000000e+00> : vector<2x128xf32>
    %237 = tpu.matmul %234, %236, %cst_247 {dimension_numbers = #tpu.dot_dimension_numbers<[1], [0], [0], [1], [0, 0, 1, 1], [], []>} : vector<2x128xf32>, vector<128x128xf32>, vector<2x128xf32> -> vector<2x128xf32>
    %238 = arith.addf %233, %237 : vector<2x128xf32>
    %c56_248 = arith.constant 56 : index
    %c0_249 = arith.constant 0 : index
    %239 = vector.load %arg0[%c56_248, %c0_249] : memref<72x128xf32, #tpu.memory_space<vmem>>, vector<2x128xf32>
    %c23_250 = arith.constant 23 : index
    %c0_251 = arith.constant 0 : index
    %c0_252 = arith.constant 0 : index
    %240 = vector.load %arg1[%c23_250, %c0_251, %c0_252] : memref<25x128x128xf32, #tpu.memory_space<vmem>>, vector<1x128x128xf32>
    %241 = vector.shape_cast %240 : vector<1x128x128xf32> to vector<128x128xf32>
    %cst_253 = arith.constant dense<0.000000e+00> : vector<2x128xf32>
    %242 = tpu.matmul %239, %241, %cst_253 {dimension_numbers = #tpu.dot_dimension_numbers<[1], [0], [0], [1], [0, 0, 1, 1], [], []>} : vector<2x128xf32>, vector<128x128xf32>, vector<2x128xf32> -> vector<2x128xf32>
    %243 = arith.addf %238, %242 : vector<2x128xf32>
    %c58 = arith.constant 58 : index
    %c0_254 = arith.constant 0 : index
    %244 = vector.load %arg0[%c58, %c0_254] : memref<72x128xf32, #tpu.memory_space<vmem>>, vector<2x128xf32>
    %c24_255 = arith.constant 24 : index
    %c0_256 = arith.constant 0 : index
    %c0_257 = arith.constant 0 : index
    %245 = vector.load %arg1[%c24_255, %c0_256, %c0_257] : memref<25x128x128xf32, #tpu.memory_space<vmem>>, vector<1x128x128xf32>
    %246 = vector.shape_cast %245 : vector<1x128x128xf32> to vector<128x128xf32>
    %cst_258 = arith.constant dense<0.000000e+00> : vector<2x128xf32>
    %247 = tpu.matmul %244, %246, %cst_258 {dimension_numbers = #tpu.dot_dimension_numbers<[1], [0], [0], [1], [0, 0, 1, 1], [], []>} : vector<2x128xf32>, vector<128x128xf32>, vector<2x128xf32> -> vector<2x128xf32>
    %248 = arith.addf %243, %247 : vector<2x128xf32>
    %249 = arith.maximumf %124, %248 : vector<2x128xf32>
    %c12_259 = arith.constant 12 : index
    %c0_260 = arith.constant 0 : index
    %250 = vector.load %arg0[%c12_259, %c0_260] : memref<72x128xf32, #tpu.memory_space<vmem>>, vector<2x128xf32>
    %c0_261 = arith.constant 0 : index
    %c0_262 = arith.constant 0 : index
    %c0_263 = arith.constant 0 : index
    %251 = vector.load %arg1[%c0_261, %c0_262, %c0_263] : memref<25x128x128xf32, #tpu.memory_space<vmem>>, vector<1x128x128xf32>
    %252 = vector.shape_cast %251 : vector<1x128x128xf32> to vector<128x128xf32>
    %cst_264 = arith.constant dense<0.000000e+00> : vector<2x128xf32>
    %253 = tpu.matmul %250, %252, %cst_264 {dimension_numbers = #tpu.dot_dimension_numbers<[1], [0], [0], [1], [0, 0, 1, 1], [], []>} : vector<2x128xf32>, vector<128x128xf32>, vector<2x128xf32> -> vector<2x128xf32>
    %c14_265 = arith.constant 14 : index
    %c0_266 = arith.constant 0 : index
    %254 = vector.load %arg0[%c14_265, %c0_266] : memref<72x128xf32, #tpu.memory_space<vmem>>, vector<2x128xf32>
    %c1_267 = arith.constant 1 : index
    %c0_268 = arith.constant 0 : index
    %c0_269 = arith.constant 0 : index
    %255 = vector.load %arg1[%c1_267, %c0_268, %c0_269] : memref<25x128x128xf32, #tpu.memory_space<vmem>>, vector<1x128x128xf32>
    %256 = vector.shape_cast %255 : vector<1x128x128xf32> to vector<128x128xf32>
    %cst_270 = arith.constant dense<0.000000e+00> : vector<2x128xf32>
    %257 = tpu.matmul %254, %256, %cst_270 {dimension_numbers = #tpu.dot_dimension_numbers<[1], [0], [0], [1], [0, 0, 1, 1], [], []>} : vector<2x128xf32>, vector<128x128xf32>, vector<2x128xf32> -> vector<2x128xf32>
    %258 = arith.addf %253, %257 : vector<2x128xf32>
    %c16_271 = arith.constant 16 : index
    %c0_272 = arith.constant 0 : index
    %259 = vector.load %arg0[%c16_271, %c0_272] : memref<72x128xf32, #tpu.memory_space<vmem>>, vector<2x128xf32>
    %c2_273 = arith.constant 2 : index
    %c0_274 = arith.constant 0 : index
    %c0_275 = arith.constant 0 : index
    %260 = vector.load %arg1[%c2_273, %c0_274, %c0_275] : memref<25x128x128xf32, #tpu.memory_space<vmem>>, vector<1x128x128xf32>
    %261 = vector.shape_cast %260 : vector<1x128x128xf32> to vector<128x128xf32>
    %cst_276 = arith.constant dense<0.000000e+00> : vector<2x128xf32>
    %262 = tpu.matmul %259, %261, %cst_276 {dimension_numbers = #tpu.dot_dimension_numbers<[1], [0], [0], [1], [0, 0, 1, 1], [], []>} : vector<2x128xf32>, vector<128x128xf32>, vector<2x128xf32> -> vector<2x128xf32>
    %263 = arith.addf %258, %262 : vector<2x128xf32>
    %c18_277 = arith.constant 18 : index
    %c0_278 = arith.constant 0 : index
    %264 = vector.load %arg0[%c18_277, %c0_278] : memref<72x128xf32, #tpu.memory_space<vmem>>, vector<2x128xf32>
    %c3_279 = arith.constant 3 : index
    %c0_280 = arith.constant 0 : index
    %c0_281 = arith.constant 0 : index
    %265 = vector.load %arg1[%c3_279, %c0_280, %c0_281] : memref<25x128x128xf32, #tpu.memory_space<vmem>>, vector<1x128x128xf32>
    %266 = vector.shape_cast %265 : vector<1x128x128xf32> to vector<128x128xf32>
    %cst_282 = arith.constant dense<0.000000e+00> : vector<2x128xf32>
    %267 = tpu.matmul %264, %266, %cst_282 {dimension_numbers = #tpu.dot_dimension_numbers<[1], [0], [0], [1], [0, 0, 1, 1], [], []>} : vector<2x128xf32>, vector<128x128xf32>, vector<2x128xf32> -> vector<2x128xf32>
    %268 = arith.addf %263, %267 : vector<2x128xf32>
    %c20_283 = arith.constant 20 : index
    %c0_284 = arith.constant 0 : index
    %269 = vector.load %arg0[%c20_283, %c0_284] : memref<72x128xf32, #tpu.memory_space<vmem>>, vector<2x128xf32>
    %c4_285 = arith.constant 4 : index
    %c0_286 = arith.constant 0 : index
    %c0_287 = arith.constant 0 : index
    %270 = vector.load %arg1[%c4_285, %c0_286, %c0_287] : memref<25x128x128xf32, #tpu.memory_space<vmem>>, vector<1x128x128xf32>
    %271 = vector.shape_cast %270 : vector<1x128x128xf32> to vector<128x128xf32>
    %cst_288 = arith.constant dense<0.000000e+00> : vector<2x128xf32>
    %272 = tpu.matmul %269, %271, %cst_288 {dimension_numbers = #tpu.dot_dimension_numbers<[1], [0], [0], [1], [0, 0, 1, 1], [], []>} : vector<2x128xf32>, vector<128x128xf32>, vector<2x128xf32> -> vector<2x128xf32>
    %273 = arith.addf %268, %272 : vector<2x128xf32>
    %c24_289 = arith.constant 24 : index
    %c0_290 = arith.constant 0 : index
    %274 = vector.load %arg0[%c24_289, %c0_290] : memref<72x128xf32, #tpu.memory_space<vmem>>, vector<2x128xf32>
    %c5_291 = arith.constant 5 : index
    %c0_292 = arith.constant 0 : index
    %c0_293 = arith.constant 0 : index
    %275 = vector.load %arg1[%c5_291, %c0_292, %c0_293] : memref<25x128x128xf32, #tpu.memory_space<vmem>>, vector<1x128x128xf32>
    %276 = vector.shape_cast %275 : vector<1x128x128xf32> to vector<128x128xf32>
    %cst_294 = arith.constant dense<0.000000e+00> : vector<2x128xf32>
    %277 = tpu.matmul %274, %276, %cst_294 {dimension_numbers = #tpu.dot_dimension_numbers<[1], [0], [0], [1], [0, 0, 1, 1], [], []>} : vector<2x128xf32>, vector<128x128xf32>, vector<2x128xf32> -> vector<2x128xf32>
    %278 = arith.addf %273, %277 : vector<2x128xf32>
    %c26_295 = arith.constant 26 : index
    %c0_296 = arith.constant 0 : index
    %279 = vector.load %arg0[%c26_295, %c0_296] : memref<72x128xf32, #tpu.memory_space<vmem>>, vector<2x128xf32>
    %c6_297 = arith.constant 6 : index
    %c0_298 = arith.constant 0 : index
    %c0_299 = arith.constant 0 : index
    %280 = vector.load %arg1[%c6_297, %c0_298, %c0_299] : memref<25x128x128xf32, #tpu.memory_space<vmem>>, vector<1x128x128xf32>
    %281 = vector.shape_cast %280 : vector<1x128x128xf32> to vector<128x128xf32>
    %cst_300 = arith.constant dense<0.000000e+00> : vector<2x128xf32>
    %282 = tpu.matmul %279, %281, %cst_300 {dimension_numbers = #tpu.dot_dimension_numbers<[1], [0], [0], [1], [0, 0, 1, 1], [], []>} : vector<2x128xf32>, vector<128x128xf32>, vector<2x128xf32> -> vector<2x128xf32>
    %283 = arith.addf %278, %282 : vector<2x128xf32>
    %c28_301 = arith.constant 28 : index
    %c0_302 = arith.constant 0 : index
    %284 = vector.load %arg0[%c28_301, %c0_302] : memref<72x128xf32, #tpu.memory_space<vmem>>, vector<2x128xf32>
    %c7_303 = arith.constant 7 : index
    %c0_304 = arith.constant 0 : index
    %c0_305 = arith.constant 0 : index
    %285 = vector.load %arg1[%c7_303, %c0_304, %c0_305] : memref<25x128x128xf32, #tpu.memory_space<vmem>>, vector<1x128x128xf32>
    %286 = vector.shape_cast %285 : vector<1x128x128xf32> to vector<128x128xf32>
    %cst_306 = arith.constant dense<0.000000e+00> : vector<2x128xf32>
    %287 = tpu.matmul %284, %286, %cst_306 {dimension_numbers = #tpu.dot_dimension_numbers<[1], [0], [0], [1], [0, 0, 1, 1], [], []>} : vector<2x128xf32>, vector<128x128xf32>, vector<2x128xf32> -> vector<2x128xf32>
    %288 = arith.addf %283, %287 : vector<2x128xf32>
    %c30_307 = arith.constant 30 : index
    %c0_308 = arith.constant 0 : index
    %289 = vector.load %arg0[%c30_307, %c0_308] : memref<72x128xf32, #tpu.memory_space<vmem>>, vector<2x128xf32>
    %c8_309 = arith.constant 8 : index
    %c0_310 = arith.constant 0 : index
    %c0_311 = arith.constant 0 : index
    %290 = vector.load %arg1[%c8_309, %c0_310, %c0_311] : memref<25x128x128xf32, #tpu.memory_space<vmem>>, vector<1x128x128xf32>
    %291 = vector.shape_cast %290 : vector<1x128x128xf32> to vector<128x128xf32>
    %cst_312 = arith.constant dense<0.000000e+00> : vector<2x128xf32>
    %292 = tpu.matmul %289, %291, %cst_312 {dimension_numbers = #tpu.dot_dimension_numbers<[1], [0], [0], [1], [0, 0, 1, 1], [], []>} : vector<2x128xf32>, vector<128x128xf32>, vector<2x128xf32> -> vector<2x128xf32>
    %293 = arith.addf %288, %292 : vector<2x128xf32>
    %c32_313 = arith.constant 32 : index
    %c0_314 = arith.constant 0 : index
    %294 = vector.load %arg0[%c32_313, %c0_314] : memref<72x128xf32, #tpu.memory_space<vmem>>, vector<2x128xf32>
    %c9_315 = arith.constant 9 : index
    %c0_316 = arith.constant 0 : index
    %c0_317 = arith.constant 0 : index
    %295 = vector.load %arg1[%c9_315, %c0_316, %c0_317] : memref<25x128x128xf32, #tpu.memory_space<vmem>>, vector<1x128x128xf32>
    %296 = vector.shape_cast %295 : vector<1x128x128xf32> to vector<128x128xf32>
    %cst_318 = arith.constant dense<0.000000e+00> : vector<2x128xf32>
    %297 = tpu.matmul %294, %296, %cst_318 {dimension_numbers = #tpu.dot_dimension_numbers<[1], [0], [0], [1], [0, 0, 1, 1], [], []>} : vector<2x128xf32>, vector<128x128xf32>, vector<2x128xf32> -> vector<2x128xf32>
    %298 = arith.addf %293, %297 : vector<2x128xf32>
    %c36_319 = arith.constant 36 : index
    %c0_320 = arith.constant 0 : index
    %299 = vector.load %arg0[%c36_319, %c0_320] : memref<72x128xf32, #tpu.memory_space<vmem>>, vector<2x128xf32>
    %c10_321 = arith.constant 10 : index
    %c0_322 = arith.constant 0 : index
    %c0_323 = arith.constant 0 : index
    %300 = vector.load %arg1[%c10_321, %c0_322, %c0_323] : memref<25x128x128xf32, #tpu.memory_space<vmem>>, vector<1x128x128xf32>
    %301 = vector.shape_cast %300 : vector<1x128x128xf32> to vector<128x128xf32>
    %cst_324 = arith.constant dense<0.000000e+00> : vector<2x128xf32>
    %302 = tpu.matmul %299, %301, %cst_324 {dimension_numbers = #tpu.dot_dimension_numbers<[1], [0], [0], [1], [0, 0, 1, 1], [], []>} : vector<2x128xf32>, vector<128x128xf32>, vector<2x128xf32> -> vector<2x128xf32>
    %303 = arith.addf %298, %302 : vector<2x128xf32>
    %c38_325 = arith.constant 38 : index
    %c0_326 = arith.constant 0 : index
    %304 = vector.load %arg0[%c38_325, %c0_326] : memref<72x128xf32, #tpu.memory_space<vmem>>, vector<2x128xf32>
    %c11_327 = arith.constant 11 : index
    %c0_328 = arith.constant 0 : index
    %c0_329 = arith.constant 0 : index
    %305 = vector.load %arg1[%c11_327, %c0_328, %c0_329] : memref<25x128x128xf32, #tpu.memory_space<vmem>>, vector<1x128x128xf32>
    %306 = vector.shape_cast %305 : vector<1x128x128xf32> to vector<128x128xf32>
    %cst_330 = arith.constant dense<0.000000e+00> : vector<2x128xf32>
    %307 = tpu.matmul %304, %306, %cst_330 {dimension_numbers = #tpu.dot_dimension_numbers<[1], [0], [0], [1], [0, 0, 1, 1], [], []>} : vector<2x128xf32>, vector<128x128xf32>, vector<2x128xf32> -> vector<2x128xf32>
    %308 = arith.addf %303, %307 : vector<2x128xf32>
    %c40_331 = arith.constant 40 : index
    %c0_332 = arith.constant 0 : index
    %309 = vector.load %arg0[%c40_331, %c0_332] : memref<72x128xf32, #tpu.memory_space<vmem>>, vector<2x128xf32>
    %c12_333 = arith.constant 12 : index
    %c0_334 = arith.constant 0 : index
    %c0_335 = arith.constant 0 : index
    %310 = vector.load %arg1[%c12_333, %c0_334, %c0_335] : memref<25x128x128xf32, #tpu.memory_space<vmem>>, vector<1x128x128xf32>
    %311 = vector.shape_cast %310 : vector<1x128x128xf32> to vector<128x128xf32>
    %cst_336 = arith.constant dense<0.000000e+00> : vector<2x128xf32>
    %312 = tpu.matmul %309, %311, %cst_336 {dimension_numbers = #tpu.dot_dimension_numbers<[1], [0], [0], [1], [0, 0, 1, 1], [], []>} : vector<2x128xf32>, vector<128x128xf32>, vector<2x128xf32> -> vector<2x128xf32>
    %313 = arith.addf %308, %312 : vector<2x128xf32>
    %c42_337 = arith.constant 42 : index
    %c0_338 = arith.constant 0 : index
    %314 = vector.load %arg0[%c42_337, %c0_338] : memref<72x128xf32, #tpu.memory_space<vmem>>, vector<2x128xf32>
    %c13_339 = arith.constant 13 : index
    %c0_340 = arith.constant 0 : index
    %c0_341 = arith.constant 0 : index
    %315 = vector.load %arg1[%c13_339, %c0_340, %c0_341] : memref<25x128x128xf32, #tpu.memory_space<vmem>>, vector<1x128x128xf32>
    %316 = vector.shape_cast %315 : vector<1x128x128xf32> to vector<128x128xf32>
    %cst_342 = arith.constant dense<0.000000e+00> : vector<2x128xf32>
    %317 = tpu.matmul %314, %316, %cst_342 {dimension_numbers = #tpu.dot_dimension_numbers<[1], [0], [0], [1], [0, 0, 1, 1], [], []>} : vector<2x128xf32>, vector<128x128xf32>, vector<2x128xf32> -> vector<2x128xf32>
    %318 = arith.addf %313, %317 : vector<2x128xf32>
    %c44_343 = arith.constant 44 : index
    %c0_344 = arith.constant 0 : index
    %319 = vector.load %arg0[%c44_343, %c0_344] : memref<72x128xf32, #tpu.memory_space<vmem>>, vector<2x128xf32>
    %c14_345 = arith.constant 14 : index
    %c0_346 = arith.constant 0 : index
    %c0_347 = arith.constant 0 : index
    %320 = vector.load %arg1[%c14_345, %c0_346, %c0_347] : memref<25x128x128xf32, #tpu.memory_space<vmem>>, vector<1x128x128xf32>
    %321 = vector.shape_cast %320 : vector<1x128x128xf32> to vector<128x128xf32>
    %cst_348 = arith.constant dense<0.000000e+00> : vector<2x128xf32>
    %322 = tpu.matmul %319, %321, %cst_348 {dimension_numbers = #tpu.dot_dimension_numbers<[1], [0], [0], [1], [0, 0, 1, 1], [], []>} : vector<2x128xf32>, vector<128x128xf32>, vector<2x128xf32> -> vector<2x128xf32>
    %323 = arith.addf %318, %322 : vector<2x128xf32>
    %c48_349 = arith.constant 48 : index
    %c0_350 = arith.constant 0 : index
    %324 = vector.load %arg0[%c48_349, %c0_350] : memref<72x128xf32, #tpu.memory_space<vmem>>, vector<2x128xf32>
    %c15_351 = arith.constant 15 : index
    %c0_352 = arith.constant 0 : index
    %c0_353 = arith.constant 0 : index
    %325 = vector.load %arg1[%c15_351, %c0_352, %c0_353] : memref<25x128x128xf32, #tpu.memory_space<vmem>>, vector<1x128x128xf32>
    %326 = vector.shape_cast %325 : vector<1x128x128xf32> to vector<128x128xf32>
    %cst_354 = arith.constant dense<0.000000e+00> : vector<2x128xf32>
    %327 = tpu.matmul %324, %326, %cst_354 {dimension_numbers = #tpu.dot_dimension_numbers<[1], [0], [0], [1], [0, 0, 1, 1], [], []>} : vector<2x128xf32>, vector<128x128xf32>, vector<2x128xf32> -> vector<2x128xf32>
    %328 = arith.addf %323, %327 : vector<2x128xf32>
    %c50_355 = arith.constant 50 : index
    %c0_356 = arith.constant 0 : index
    %329 = vector.load %arg0[%c50_355, %c0_356] : memref<72x128xf32, #tpu.memory_space<vmem>>, vector<2x128xf32>
    %c16_357 = arith.constant 16 : index
    %c0_358 = arith.constant 0 : index
    %c0_359 = arith.constant 0 : index
    %330 = vector.load %arg1[%c16_357, %c0_358, %c0_359] : memref<25x128x128xf32, #tpu.memory_space<vmem>>, vector<1x128x128xf32>
    %331 = vector.shape_cast %330 : vector<1x128x128xf32> to vector<128x128xf32>
    %cst_360 = arith.constant dense<0.000000e+00> : vector<2x128xf32>
    %332 = tpu.matmul %329, %331, %cst_360 {dimension_numbers = #tpu.dot_dimension_numbers<[1], [0], [0], [1], [0, 0, 1, 1], [], []>} : vector<2x128xf32>, vector<128x128xf32>, vector<2x128xf32> -> vector<2x128xf32>
    %333 = arith.addf %328, %332 : vector<2x128xf32>
    %c52_361 = arith.constant 52 : index
    %c0_362 = arith.constant 0 : index
    %334 = vector.load %arg0[%c52_361, %c0_362] : memref<72x128xf32, #tpu.memory_space<vmem>>, vector<2x128xf32>
    %c17_363 = arith.constant 17 : index
    %c0_364 = arith.constant 0 : index
    %c0_365 = arith.constant 0 : index
    %335 = vector.load %arg1[%c17_363, %c0_364, %c0_365] : memref<25x128x128xf32, #tpu.memory_space<vmem>>, vector<1x128x128xf32>
    %336 = vector.shape_cast %335 : vector<1x128x128xf32> to vector<128x128xf32>
    %cst_366 = arith.constant dense<0.000000e+00> : vector<2x128xf32>
    %337 = tpu.matmul %334, %336, %cst_366 {dimension_numbers = #tpu.dot_dimension_numbers<[1], [0], [0], [1], [0, 0, 1, 1], [], []>} : vector<2x128xf32>, vector<128x128xf32>, vector<2x128xf32> -> vector<2x128xf32>
    %338 = arith.addf %333, %337 : vector<2x128xf32>
    %c54_367 = arith.constant 54 : index
    %c0_368 = arith.constant 0 : index
    %339 = vector.load %arg0[%c54_367, %c0_368] : memref<72x128xf32, #tpu.memory_space<vmem>>, vector<2x128xf32>
    %c18_369 = arith.constant 18 : index
    %c0_370 = arith.constant 0 : index
    %c0_371 = arith.constant 0 : index
    %340 = vector.load %arg1[%c18_369, %c0_370, %c0_371] : memref<25x128x128xf32, #tpu.memory_space<vmem>>, vector<1x128x128xf32>
    %341 = vector.shape_cast %340 : vector<1x128x128xf32> to vector<128x128xf32>
    %cst_372 = arith.constant dense<0.000000e+00> : vector<2x128xf32>
    %342 = tpu.matmul %339, %341, %cst_372 {dimension_numbers = #tpu.dot_dimension_numbers<[1], [0], [0], [1], [0, 0, 1, 1], [], []>} : vector<2x128xf32>, vector<128x128xf32>, vector<2x128xf32> -> vector<2x128xf32>
    %343 = arith.addf %338, %342 : vector<2x128xf32>
    %c56_373 = arith.constant 56 : index
    %c0_374 = arith.constant 0 : index
    %344 = vector.load %arg0[%c56_373, %c0_374] : memref<72x128xf32, #tpu.memory_space<vmem>>, vector<2x128xf32>
    %c19_375 = arith.constant 19 : index
    %c0_376 = arith.constant 0 : index
    %c0_377 = arith.constant 0 : index
    %345 = vector.load %arg1[%c19_375, %c0_376, %c0_377] : memref<25x128x128xf32, #tpu.memory_space<vmem>>, vector<1x128x128xf32>
    %346 = vector.shape_cast %345 : vector<1x128x128xf32> to vector<128x128xf32>
    %cst_378 = arith.constant dense<0.000000e+00> : vector<2x128xf32>
    %347 = tpu.matmul %344, %346, %cst_378 {dimension_numbers = #tpu.dot_dimension_numbers<[1], [0], [0], [1], [0, 0, 1, 1], [], []>} : vector<2x128xf32>, vector<128x128xf32>, vector<2x128xf32> -> vector<2x128xf32>
    %348 = arith.addf %343, %347 : vector<2x128xf32>
    %c60 = arith.constant 60 : index
    %c0_379 = arith.constant 0 : index
    %349 = vector.load %arg0[%c60, %c0_379] : memref<72x128xf32, #tpu.memory_space<vmem>>, vector<2x128xf32>
    %c20_380 = arith.constant 20 : index
    %c0_381 = arith.constant 0 : index
    %c0_382 = arith.constant 0 : index
    %350 = vector.load %arg1[%c20_380, %c0_381, %c0_382] : memref<25x128x128xf32, #tpu.memory_space<vmem>>, vector<1x128x128xf32>
    %351 = vector.shape_cast %350 : vector<1x128x128xf32> to vector<128x128xf32>
    %cst_383 = arith.constant dense<0.000000e+00> : vector<2x128xf32>
    %352 = tpu.matmul %349, %351, %cst_383 {dimension_numbers = #tpu.dot_dimension_numbers<[1], [0], [0], [1], [0, 0, 1, 1], [], []>} : vector<2x128xf32>, vector<128x128xf32>, vector<2x128xf32> -> vector<2x128xf32>
    %353 = arith.addf %348, %352 : vector<2x128xf32>
    %c62 = arith.constant 62 : index
    %c0_384 = arith.constant 0 : index
    %354 = vector.load %arg0[%c62, %c0_384] : memref<72x128xf32, #tpu.memory_space<vmem>>, vector<2x128xf32>
    %c21_385 = arith.constant 21 : index
    %c0_386 = arith.constant 0 : index
    %c0_387 = arith.constant 0 : index
    %355 = vector.load %arg1[%c21_385, %c0_386, %c0_387] : memref<25x128x128xf32, #tpu.memory_space<vmem>>, vector<1x128x128xf32>
    %356 = vector.shape_cast %355 : vector<1x128x128xf32> to vector<128x128xf32>
    %cst_388 = arith.constant dense<0.000000e+00> : vector<2x128xf32>
    %357 = tpu.matmul %354, %356, %cst_388 {dimension_numbers = #tpu.dot_dimension_numbers<[1], [0], [0], [1], [0, 0, 1, 1], [], []>} : vector<2x128xf32>, vector<128x128xf32>, vector<2x128xf32> -> vector<2x128xf32>
    %358 = arith.addf %353, %357 : vector<2x128xf32>
    %c64 = arith.constant 64 : index
    %c0_389 = arith.constant 0 : index
    %359 = vector.load %arg0[%c64, %c0_389] : memref<72x128xf32, #tpu.memory_space<vmem>>, vector<2x128xf32>
    %c22_390 = arith.constant 22 : index
    %c0_391 = arith.constant 0 : index
    %c0_392 = arith.constant 0 : index
    %360 = vector.load %arg1[%c22_390, %c0_391, %c0_392] : memref<25x128x128xf32, #tpu.memory_space<vmem>>, vector<1x128x128xf32>
    %361 = vector.shape_cast %360 : vector<1x128x128xf32> to vector<128x128xf32>
    %cst_393 = arith.constant dense<0.000000e+00> : vector<2x128xf32>
    %362 = tpu.matmul %359, %361, %cst_393 {dimension_numbers = #tpu.dot_dimension_numbers<[1], [0], [0], [1], [0, 0, 1, 1], [], []>} : vector<2x128xf32>, vector<128x128xf32>, vector<2x128xf32> -> vector<2x128xf32>
    %363 = arith.addf %358, %362 : vector<2x128xf32>
    %c66 = arith.constant 66 : index
    %c0_394 = arith.constant 0 : index
    %364 = vector.load %arg0[%c66, %c0_394] : memref<72x128xf32, #tpu.memory_space<vmem>>, vector<2x128xf32>
    %c23_395 = arith.constant 23 : index
    %c0_396 = arith.constant 0 : index
    %c0_397 = arith.constant 0 : index
    %365 = vector.load %arg1[%c23_395, %c0_396, %c0_397] : memref<25x128x128xf32, #tpu.memory_space<vmem>>, vector<1x128x128xf32>
    %366 = vector.shape_cast %365 : vector<1x128x128xf32> to vector<128x128xf32>
    %cst_398 = arith.constant dense<0.000000e+00> : vector<2x128xf32>
    %367 = tpu.matmul %364, %366, %cst_398 {dimension_numbers = #tpu.dot_dimension_numbers<[1], [0], [0], [1], [0, 0, 1, 1], [], []>} : vector<2x128xf32>, vector<128x128xf32>, vector<2x128xf32> -> vector<2x128xf32>
    %368 = arith.addf %363, %367 : vector<2x128xf32>
    %c68 = arith.constant 68 : index
    %c0_399 = arith.constant 0 : index
    %369 = vector.load %arg0[%c68, %c0_399] : memref<72x128xf32, #tpu.memory_space<vmem>>, vector<2x128xf32>
    %c24_400 = arith.constant 24 : index
    %c0_401 = arith.constant 0 : index
    %c0_402 = arith.constant 0 : index
    %370 = vector.load %arg1[%c24_400, %c0_401, %c0_402] : memref<25x128x128xf32, #tpu.memory_space<vmem>>, vector<1x128x128xf32>
    %371 = vector.shape_cast %370 : vector<1x128x128xf32> to vector<128x128xf32>
    %cst_403 = arith.constant dense<0.000000e+00> : vector<2x128xf32>
    %372 = tpu.matmul %369, %371, %cst_403 {dimension_numbers = #tpu.dot_dimension_numbers<[1], [0], [0], [1], [0, 0, 1, 1], [], []>} : vector<2x128xf32>, vector<128x128xf32>, vector<2x128xf32> -> vector<2x128xf32>
    %373 = arith.addf %368, %372 : vector<2x128xf32>
    %374 = arith.maximumf %249, %373 : vector<2x128xf32>
    %c14_404 = arith.constant 14 : index
    %c0_405 = arith.constant 0 : index
    %375 = vector.load %arg0[%c14_404, %c0_405] : memref<72x128xf32, #tpu.memory_space<vmem>>, vector<2x128xf32>
    %c0_406 = arith.constant 0 : index
    %c0_407 = arith.constant 0 : index
    %c0_408 = arith.constant 0 : index
    %376 = vector.load %arg1[%c0_406, %c0_407, %c0_408] : memref<25x128x128xf32, #tpu.memory_space<vmem>>, vector<1x128x128xf32>
    %377 = vector.shape_cast %376 : vector<1x128x128xf32> to vector<128x128xf32>
    %cst_409 = arith.constant dense<0.000000e+00> : vector<2x128xf32>
    %378 = tpu.matmul %375, %377, %cst_409 {dimension_numbers = #tpu.dot_dimension_numbers<[1], [0], [0], [1], [0, 0, 1, 1], [], []>} : vector<2x128xf32>, vector<128x128xf32>, vector<2x128xf32> -> vector<2x128xf32>
    %c16_410 = arith.constant 16 : index
    %c0_411 = arith.constant 0 : index
    %379 = vector.load %arg0[%c16_410, %c0_411] : memref<72x128xf32, #tpu.memory_space<vmem>>, vector<2x128xf32>
    %c1_412 = arith.constant 1 : index
    %c0_413 = arith.constant 0 : index
    %c0_414 = arith.constant 0 : index
    %380 = vector.load %arg1[%c1_412, %c0_413, %c0_414] : memref<25x128x128xf32, #tpu.memory_space<vmem>>, vector<1x128x128xf32>
    %381 = vector.shape_cast %380 : vector<1x128x128xf32> to vector<128x128xf32>
    %cst_415 = arith.constant dense<0.000000e+00> : vector<2x128xf32>
    %382 = tpu.matmul %379, %381, %cst_415 {dimension_numbers = #tpu.dot_dimension_numbers<[1], [0], [0], [1], [0, 0, 1, 1], [], []>} : vector<2x128xf32>, vector<128x128xf32>, vector<2x128xf32> -> vector<2x128xf32>
    %383 = arith.addf %378, %382 : vector<2x128xf32>
    %c18_416 = arith.constant 18 : index
    %c0_417 = arith.constant 0 : index
    %384 = vector.load %arg0[%c18_416, %c0_417] : memref<72x128xf32, #tpu.memory_space<vmem>>, vector<2x128xf32>
    %c2_418 = arith.constant 2 : index
    %c0_419 = arith.constant 0 : index
    %c0_420 = arith.constant 0 : index
    %385 = vector.load %arg1[%c2_418, %c0_419, %c0_420] : memref<25x128x128xf32, #tpu.memory_space<vmem>>, vector<1x128x128xf32>
    %386 = vector.shape_cast %385 : vector<1x128x128xf32> to vector<128x128xf32>
    %cst_421 = arith.constant dense<0.000000e+00> : vector<2x128xf32>
    %387 = tpu.matmul %384, %386, %cst_421 {dimension_numbers = #tpu.dot_dimension_numbers<[1], [0], [0], [1], [0, 0, 1, 1], [], []>} : vector<2x128xf32>, vector<128x128xf32>, vector<2x128xf32> -> vector<2x128xf32>
    %388 = arith.addf %383, %387 : vector<2x128xf32>
    %c20_422 = arith.constant 20 : index
    %c0_423 = arith.constant 0 : index
    %389 = vector.load %arg0[%c20_422, %c0_423] : memref<72x128xf32, #tpu.memory_space<vmem>>, vector<2x128xf32>
    %c3_424 = arith.constant 3 : index
    %c0_425 = arith.constant 0 : index
    %c0_426 = arith.constant 0 : index
    %390 = vector.load %arg1[%c3_424, %c0_425, %c0_426] : memref<25x128x128xf32, #tpu.memory_space<vmem>>, vector<1x128x128xf32>
    %391 = vector.shape_cast %390 : vector<1x128x128xf32> to vector<128x128xf32>
    %cst_427 = arith.constant dense<0.000000e+00> : vector<2x128xf32>
    %392 = tpu.matmul %389, %391, %cst_427 {dimension_numbers = #tpu.dot_dimension_numbers<[1], [0], [0], [1], [0, 0, 1, 1], [], []>} : vector<2x128xf32>, vector<128x128xf32>, vector<2x128xf32> -> vector<2x128xf32>
    %393 = arith.addf %388, %392 : vector<2x128xf32>
    %c22_428 = arith.constant 22 : index
    %c0_429 = arith.constant 0 : index
    %394 = vector.load %arg0[%c22_428, %c0_429] : memref<72x128xf32, #tpu.memory_space<vmem>>, vector<2x128xf32>
    %c4_430 = arith.constant 4 : index
    %c0_431 = arith.constant 0 : index
    %c0_432 = arith.constant 0 : index
    %395 = vector.load %arg1[%c4_430, %c0_431, %c0_432] : memref<25x128x128xf32, #tpu.memory_space<vmem>>, vector<1x128x128xf32>
    %396 = vector.shape_cast %395 : vector<1x128x128xf32> to vector<128x128xf32>
    %cst_433 = arith.constant dense<0.000000e+00> : vector<2x128xf32>
    %397 = tpu.matmul %394, %396, %cst_433 {dimension_numbers = #tpu.dot_dimension_numbers<[1], [0], [0], [1], [0, 0, 1, 1], [], []>} : vector<2x128xf32>, vector<128x128xf32>, vector<2x128xf32> -> vector<2x128xf32>
    %398 = arith.addf %393, %397 : vector<2x128xf32>
    %c26_434 = arith.constant 26 : index
    %c0_435 = arith.constant 0 : index
    %399 = vector.load %arg0[%c26_434, %c0_435] : memref<72x128xf32, #tpu.memory_space<vmem>>, vector<2x128xf32>
    %c5_436 = arith.constant 5 : index
    %c0_437 = arith.constant 0 : index
    %c0_438 = arith.constant 0 : index
    %400 = vector.load %arg1[%c5_436, %c0_437, %c0_438] : memref<25x128x128xf32, #tpu.memory_space<vmem>>, vector<1x128x128xf32>
    %401 = vector.shape_cast %400 : vector<1x128x128xf32> to vector<128x128xf32>
    %cst_439 = arith.constant dense<0.000000e+00> : vector<2x128xf32>
    %402 = tpu.matmul %399, %401, %cst_439 {dimension_numbers = #tpu.dot_dimension_numbers<[1], [0], [0], [1], [0, 0, 1, 1], [], []>} : vector<2x128xf32>, vector<128x128xf32>, vector<2x128xf32> -> vector<2x128xf32>
    %403 = arith.addf %398, %402 : vector<2x128xf32>
    %c28_440 = arith.constant 28 : index
    %c0_441 = arith.constant 0 : index
    %404 = vector.load %arg0[%c28_440, %c0_441] : memref<72x128xf32, #tpu.memory_space<vmem>>, vector<2x128xf32>
    %c6_442 = arith.constant 6 : index
    %c0_443 = arith.constant 0 : index
    %c0_444 = arith.constant 0 : index
    %405 = vector.load %arg1[%c6_442, %c0_443, %c0_444] : memref<25x128x128xf32, #tpu.memory_space<vmem>>, vector<1x128x128xf32>
    %406 = vector.shape_cast %405 : vector<1x128x128xf32> to vector<128x128xf32>
    %cst_445 = arith.constant dense<0.000000e+00> : vector<2x128xf32>
    %407 = tpu.matmul %404, %406, %cst_445 {dimension_numbers = #tpu.dot_dimension_numbers<[1], [0], [0], [1], [0, 0, 1, 1], [], []>} : vector<2x128xf32>, vector<128x128xf32>, vector<2x128xf32> -> vector<2x128xf32>
    %408 = arith.addf %403, %407 : vector<2x128xf32>
    %c30_446 = arith.constant 30 : index
    %c0_447 = arith.constant 0 : index
    %409 = vector.load %arg0[%c30_446, %c0_447] : memref<72x128xf32, #tpu.memory_space<vmem>>, vector<2x128xf32>
    %c7_448 = arith.constant 7 : index
    %c0_449 = arith.constant 0 : index
    %c0_450 = arith.constant 0 : index
    %410 = vector.load %arg1[%c7_448, %c0_449, %c0_450] : memref<25x128x128xf32, #tpu.memory_space<vmem>>, vector<1x128x128xf32>
    %411 = vector.shape_cast %410 : vector<1x128x128xf32> to vector<128x128xf32>
    %cst_451 = arith.constant dense<0.000000e+00> : vector<2x128xf32>
    %412 = tpu.matmul %409, %411, %cst_451 {dimension_numbers = #tpu.dot_dimension_numbers<[1], [0], [0], [1], [0, 0, 1, 1], [], []>} : vector<2x128xf32>, vector<128x128xf32>, vector<2x128xf32> -> vector<2x128xf32>
    %413 = arith.addf %408, %412 : vector<2x128xf32>
    %c32_452 = arith.constant 32 : index
    %c0_453 = arith.constant 0 : index
    %414 = vector.load %arg0[%c32_452, %c0_453] : memref<72x128xf32, #tpu.memory_space<vmem>>, vector<2x128xf32>
    %c8_454 = arith.constant 8 : index
    %c0_455 = arith.constant 0 : index
    %c0_456 = arith.constant 0 : index
    %415 = vector.load %arg1[%c8_454, %c0_455, %c0_456] : memref<25x128x128xf32, #tpu.memory_space<vmem>>, vector<1x128x128xf32>
    %416 = vector.shape_cast %415 : vector<1x128x128xf32> to vector<128x128xf32>
    %cst_457 = arith.constant dense<0.000000e+00> : vector<2x128xf32>
    %417 = tpu.matmul %414, %416, %cst_457 {dimension_numbers = #tpu.dot_dimension_numbers<[1], [0], [0], [1], [0, 0, 1, 1], [], []>} : vector<2x128xf32>, vector<128x128xf32>, vector<2x128xf32> -> vector<2x128xf32>
    %418 = arith.addf %413, %417 : vector<2x128xf32>
    %c34_458 = arith.constant 34 : index
    %c0_459 = arith.constant 0 : index
    %419 = vector.load %arg0[%c34_458, %c0_459] : memref<72x128xf32, #tpu.memory_space<vmem>>, vector<2x128xf32>
    %c9_460 = arith.constant 9 : index
    %c0_461 = arith.constant 0 : index
    %c0_462 = arith.constant 0 : index
    %420 = vector.load %arg1[%c9_460, %c0_461, %c0_462] : memref<25x128x128xf32, #tpu.memory_space<vmem>>, vector<1x128x128xf32>
    %421 = vector.shape_cast %420 : vector<1x128x128xf32> to vector<128x128xf32>
    %cst_463 = arith.constant dense<0.000000e+00> : vector<2x128xf32>
    %422 = tpu.matmul %419, %421, %cst_463 {dimension_numbers = #tpu.dot_dimension_numbers<[1], [0], [0], [1], [0, 0, 1, 1], [], []>} : vector<2x128xf32>, vector<128x128xf32>, vector<2x128xf32> -> vector<2x128xf32>
    %423 = arith.addf %418, %422 : vector<2x128xf32>
    %c38_464 = arith.constant 38 : index
    %c0_465 = arith.constant 0 : index
    %424 = vector.load %arg0[%c38_464, %c0_465] : memref<72x128xf32, #tpu.memory_space<vmem>>, vector<2x128xf32>
    %c10_466 = arith.constant 10 : index
    %c0_467 = arith.constant 0 : index
    %c0_468 = arith.constant 0 : index
    %425 = vector.load %arg1[%c10_466, %c0_467, %c0_468] : memref<25x128x128xf32, #tpu.memory_space<vmem>>, vector<1x128x128xf32>
    %426 = vector.shape_cast %425 : vector<1x128x128xf32> to vector<128x128xf32>
    %cst_469 = arith.constant dense<0.000000e+00> : vector<2x128xf32>
    %427 = tpu.matmul %424, %426, %cst_469 {dimension_numbers = #tpu.dot_dimension_numbers<[1], [0], [0], [1], [0, 0, 1, 1], [], []>} : vector<2x128xf32>, vector<128x128xf32>, vector<2x128xf32> -> vector<2x128xf32>
    %428 = arith.addf %423, %427 : vector<2x128xf32>
    %c40_470 = arith.constant 40 : index
    %c0_471 = arith.constant 0 : index
    %429 = vector.load %arg0[%c40_470, %c0_471] : memref<72x128xf32, #tpu.memory_space<vmem>>, vector<2x128xf32>
    %c11_472 = arith.constant 11 : index
    %c0_473 = arith.constant 0 : index
    %c0_474 = arith.constant 0 : index
    %430 = vector.load %arg1[%c11_472, %c0_473, %c0_474] : memref<25x128x128xf32, #tpu.memory_space<vmem>>, vector<1x128x128xf32>
    %431 = vector.shape_cast %430 : vector<1x128x128xf32> to vector<128x128xf32>
    %cst_475 = arith.constant dense<0.000000e+00> : vector<2x128xf32>
    %432 = tpu.matmul %429, %431, %cst_475 {dimension_numbers = #tpu.dot_dimension_numbers<[1], [0], [0], [1], [0, 0, 1, 1], [], []>} : vector<2x128xf32>, vector<128x128xf32>, vector<2x128xf32> -> vector<2x128xf32>
    %433 = arith.addf %428, %432 : vector<2x128xf32>
    %c42_476 = arith.constant 42 : index
    %c0_477 = arith.constant 0 : index
    %434 = vector.load %arg0[%c42_476, %c0_477] : memref<72x128xf32, #tpu.memory_space<vmem>>, vector<2x128xf32>
    %c12_478 = arith.constant 12 : index
    %c0_479 = arith.constant 0 : index
    %c0_480 = arith.constant 0 : index
    %435 = vector.load %arg1[%c12_478, %c0_479, %c0_480] : memref<25x128x128xf32, #tpu.memory_space<vmem>>, vector<1x128x128xf32>
    %436 = vector.shape_cast %435 : vector<1x128x128xf32> to vector<128x128xf32>
    %cst_481 = arith.constant dense<0.000000e+00> : vector<2x128xf32>
    %437 = tpu.matmul %434, %436, %cst_481 {dimension_numbers = #tpu.dot_dimension_numbers<[1], [0], [0], [1], [0, 0, 1, 1], [], []>} : vector<2x128xf32>, vector<128x128xf32>, vector<2x128xf32> -> vector<2x128xf32>
    %438 = arith.addf %433, %437 : vector<2x128xf32>
    %c44_482 = arith.constant 44 : index
    %c0_483 = arith.constant 0 : index
    %439 = vector.load %arg0[%c44_482, %c0_483] : memref<72x128xf32, #tpu.memory_space<vmem>>, vector<2x128xf32>
    %c13_484 = arith.constant 13 : index
    %c0_485 = arith.constant 0 : index
    %c0_486 = arith.constant 0 : index
    %440 = vector.load %arg1[%c13_484, %c0_485, %c0_486] : memref<25x128x128xf32, #tpu.memory_space<vmem>>, vector<1x128x128xf32>
    %441 = vector.shape_cast %440 : vector<1x128x128xf32> to vector<128x128xf32>
    %cst_487 = arith.constant dense<0.000000e+00> : vector<2x128xf32>
    %442 = tpu.matmul %439, %441, %cst_487 {dimension_numbers = #tpu.dot_dimension_numbers<[1], [0], [0], [1], [0, 0, 1, 1], [], []>} : vector<2x128xf32>, vector<128x128xf32>, vector<2x128xf32> -> vector<2x128xf32>
    %443 = arith.addf %438, %442 : vector<2x128xf32>
    %c46_488 = arith.constant 46 : index
    %c0_489 = arith.constant 0 : index
    %444 = vector.load %arg0[%c46_488, %c0_489] : memref<72x128xf32, #tpu.memory_space<vmem>>, vector<2x128xf32>
    %c14_490 = arith.constant 14 : index
    %c0_491 = arith.constant 0 : index
    %c0_492 = arith.constant 0 : index
    %445 = vector.load %arg1[%c14_490, %c0_491, %c0_492] : memref<25x128x128xf32, #tpu.memory_space<vmem>>, vector<1x128x128xf32>
    %446 = vector.shape_cast %445 : vector<1x128x128xf32> to vector<128x128xf32>
    %cst_493 = arith.constant dense<0.000000e+00> : vector<2x128xf32>
    %447 = tpu.matmul %444, %446, %cst_493 {dimension_numbers = #tpu.dot_dimension_numbers<[1], [0], [0], [1], [0, 0, 1, 1], [], []>} : vector<2x128xf32>, vector<128x128xf32>, vector<2x128xf32> -> vector<2x128xf32>
    %448 = arith.addf %443, %447 : vector<2x128xf32>
    %c50_494 = arith.constant 50 : index
    %c0_495 = arith.constant 0 : index
    %449 = vector.load %arg0[%c50_494, %c0_495] : memref<72x128xf32, #tpu.memory_space<vmem>>, vector<2x128xf32>
    %c15_496 = arith.constant 15 : index
    %c0_497 = arith.constant 0 : index
    %c0_498 = arith.constant 0 : index
    %450 = vector.load %arg1[%c15_496, %c0_497, %c0_498] : memref<25x128x128xf32, #tpu.memory_space<vmem>>, vector<1x128x128xf32>
    %451 = vector.shape_cast %450 : vector<1x128x128xf32> to vector<128x128xf32>
    %cst_499 = arith.constant dense<0.000000e+00> : vector<2x128xf32>
    %452 = tpu.matmul %449, %451, %cst_499 {dimension_numbers = #tpu.dot_dimension_numbers<[1], [0], [0], [1], [0, 0, 1, 1], [], []>} : vector<2x128xf32>, vector<128x128xf32>, vector<2x128xf32> -> vector<2x128xf32>
    %453 = arith.addf %448, %452 : vector<2x128xf32>
    %c52_500 = arith.constant 52 : index
    %c0_501 = arith.constant 0 : index
    %454 = vector.load %arg0[%c52_500, %c0_501] : memref<72x128xf32, #tpu.memory_space<vmem>>, vector<2x128xf32>
    %c16_502 = arith.constant 16 : index
    %c0_503 = arith.constant 0 : index
    %c0_504 = arith.constant 0 : index
    %455 = vector.load %arg1[%c16_502, %c0_503, %c0_504] : memref<25x128x128xf32, #tpu.memory_space<vmem>>, vector<1x128x128xf32>
    %456 = vector.shape_cast %455 : vector<1x128x128xf32> to vector<128x128xf32>
    %cst_505 = arith.constant dense<0.000000e+00> : vector<2x128xf32>
    %457 = tpu.matmul %454, %456, %cst_505 {dimension_numbers = #tpu.dot_dimension_numbers<[1], [0], [0], [1], [0, 0, 1, 1], [], []>} : vector<2x128xf32>, vector<128x128xf32>, vector<2x128xf32> -> vector<2x128xf32>
    %458 = arith.addf %453, %457 : vector<2x128xf32>
    %c54_506 = arith.constant 54 : index
    %c0_507 = arith.constant 0 : index
    %459 = vector.load %arg0[%c54_506, %c0_507] : memref<72x128xf32, #tpu.memory_space<vmem>>, vector<2x128xf32>
    %c17_508 = arith.constant 17 : index
    %c0_509 = arith.constant 0 : index
    %c0_510 = arith.constant 0 : index
    %460 = vector.load %arg1[%c17_508, %c0_509, %c0_510] : memref<25x128x128xf32, #tpu.memory_space<vmem>>, vector<1x128x128xf32>
    %461 = vector.shape_cast %460 : vector<1x128x128xf32> to vector<128x128xf32>
    %cst_511 = arith.constant dense<0.000000e+00> : vector<2x128xf32>
    %462 = tpu.matmul %459, %461, %cst_511 {dimension_numbers = #tpu.dot_dimension_numbers<[1], [0], [0], [1], [0, 0, 1, 1], [], []>} : vector<2x128xf32>, vector<128x128xf32>, vector<2x128xf32> -> vector<2x128xf32>
    %463 = arith.addf %458, %462 : vector<2x128xf32>
    %c56_512 = arith.constant 56 : index
    %c0_513 = arith.constant 0 : index
    %464 = vector.load %arg0[%c56_512, %c0_513] : memref<72x128xf32, #tpu.memory_space<vmem>>, vector<2x128xf32>
    %c18_514 = arith.constant 18 : index
    %c0_515 = arith.constant 0 : index
    %c0_516 = arith.constant 0 : index
    %465 = vector.load %arg1[%c18_514, %c0_515, %c0_516] : memref<25x128x128xf32, #tpu.memory_space<vmem>>, vector<1x128x128xf32>
    %466 = vector.shape_cast %465 : vector<1x128x128xf32> to vector<128x128xf32>
    %cst_517 = arith.constant dense<0.000000e+00> : vector<2x128xf32>
    %467 = tpu.matmul %464, %466, %cst_517 {dimension_numbers = #tpu.dot_dimension_numbers<[1], [0], [0], [1], [0, 0, 1, 1], [], []>} : vector<2x128xf32>, vector<128x128xf32>, vector<2x128xf32> -> vector<2x128xf32>
    %468 = arith.addf %463, %467 : vector<2x128xf32>
    %c58_518 = arith.constant 58 : index
    %c0_519 = arith.constant 0 : index
    %469 = vector.load %arg0[%c58_518, %c0_519] : memref<72x128xf32, #tpu.memory_space<vmem>>, vector<2x128xf32>
    %c19_520 = arith.constant 19 : index
    %c0_521 = arith.constant 0 : index
    %c0_522 = arith.constant 0 : index
    %470 = vector.load %arg1[%c19_520, %c0_521, %c0_522] : memref<25x128x128xf32, #tpu.memory_space<vmem>>, vector<1x128x128xf32>
    %471 = vector.shape_cast %470 : vector<1x128x128xf32> to vector<128x128xf32>
    %cst_523 = arith.constant dense<0.000000e+00> : vector<2x128xf32>
    %472 = tpu.matmul %469, %471, %cst_523 {dimension_numbers = #tpu.dot_dimension_numbers<[1], [0], [0], [1], [0, 0, 1, 1], [], []>} : vector<2x128xf32>, vector<128x128xf32>, vector<2x128xf32> -> vector<2x128xf32>
    %473 = arith.addf %468, %472 : vector<2x128xf32>
    %c62_524 = arith.constant 62 : index
    %c0_525 = arith.constant 0 : index
    %474 = vector.load %arg0[%c62_524, %c0_525] : memref<72x128xf32, #tpu.memory_space<vmem>>, vector<2x128xf32>
    %c20_526 = arith.constant 20 : index
    %c0_527 = arith.constant 0 : index
    %c0_528 = arith.constant 0 : index
    %475 = vector.load %arg1[%c20_526, %c0_527, %c0_528] : memref<25x128x128xf32, #tpu.memory_space<vmem>>, vector<1x128x128xf32>
    %476 = vector.shape_cast %475 : vector<1x128x128xf32> to vector<128x128xf32>
    %cst_529 = arith.constant dense<0.000000e+00> : vector<2x128xf32>
    %477 = tpu.matmul %474, %476, %cst_529 {dimension_numbers = #tpu.dot_dimension_numbers<[1], [0], [0], [1], [0, 0, 1, 1], [], []>} : vector<2x128xf32>, vector<128x128xf32>, vector<2x128xf32> -> vector<2x128xf32>
    %478 = arith.addf %473, %477 : vector<2x128xf32>
    %c64_530 = arith.constant 64 : index
    %c0_531 = arith.constant 0 : index
    %479 = vector.load %arg0[%c64_530, %c0_531] : memref<72x128xf32, #tpu.memory_space<vmem>>, vector<2x128xf32>
    %c21_532 = arith.constant 21 : index
    %c0_533 = arith.constant 0 : index
    %c0_534 = arith.constant 0 : index
    %480 = vector.load %arg1[%c21_532, %c0_533, %c0_534] : memref<25x128x128xf32, #tpu.memory_space<vmem>>, vector<1x128x128xf32>
    %481 = vector.shape_cast %480 : vector<1x128x128xf32> to vector<128x128xf32>
    %cst_535 = arith.constant dense<0.000000e+00> : vector<2x128xf32>
    %482 = tpu.matmul %479, %481, %cst_535 {dimension_numbers = #tpu.dot_dimension_numbers<[1], [0], [0], [1], [0, 0, 1, 1], [], []>} : vector<2x128xf32>, vector<128x128xf32>, vector<2x128xf32> -> vector<2x128xf32>
    %483 = arith.addf %478, %482 : vector<2x128xf32>
    %c66_536 = arith.constant 66 : index
    %c0_537 = arith.constant 0 : index
    %484 = vector.load %arg0[%c66_536, %c0_537] : memref<72x128xf32, #tpu.memory_space<vmem>>, vector<2x128xf32>
    %c22_538 = arith.constant 22 : index
    %c0_539 = arith.constant 0 : index
    %c0_540 = arith.constant 0 : index
    %485 = vector.load %arg1[%c22_538, %c0_539, %c0_540] : memref<25x128x128xf32, #tpu.memory_space<vmem>>, vector<1x128x128xf32>
    %486 = vector.shape_cast %485 : vector<1x128x128xf32> to vector<128x128xf32>
    %cst_541 = arith.constant dense<0.000000e+00> : vector<2x128xf32>
    %487 = tpu.matmul %484, %486, %cst_541 {dimension_numbers = #tpu.dot_dimension_numbers<[1], [0], [0], [1], [0, 0, 1, 1], [], []>} : vector<2x128xf32>, vector<128x128xf32>, vector<2x128xf32> -> vector<2x128xf32>
    %488 = arith.addf %483, %487 : vector<2x128xf32>
    %c68_542 = arith.constant 68 : index
    %c0_543 = arith.constant 0 : index
    %489 = vector.load %arg0[%c68_542, %c0_543] : memref<72x128xf32, #tpu.memory_space<vmem>>, vector<2x128xf32>
    %c23_544 = arith.constant 23 : index
    %c0_545 = arith.constant 0 : index
    %c0_546 = arith.constant 0 : index
    %490 = vector.load %arg1[%c23_544, %c0_545, %c0_546] : memref<25x128x128xf32, #tpu.memory_space<vmem>>, vector<1x128x128xf32>
    %491 = vector.shape_cast %490 : vector<1x128x128xf32> to vector<128x128xf32>
    %cst_547 = arith.constant dense<0.000000e+00> : vector<2x128xf32>
    %492 = tpu.matmul %489, %491, %cst_547 {dimension_numbers = #tpu.dot_dimension_numbers<[1], [0], [0], [1], [0, 0, 1, 1], [], []>} : vector<2x128xf32>, vector<128x128xf32>, vector<2x128xf32> -> vector<2x128xf32>
    %493 = arith.addf %488, %492 : vector<2x128xf32>
    %c70 = arith.constant 70 : index
    %c0_548 = arith.constant 0 : index
    %494 = vector.load %arg0[%c70, %c0_548] : memref<72x128xf32, #tpu.memory_space<vmem>>, vector<2x128xf32>
    %c24_549 = arith.constant 24 : index
    %c0_550 = arith.constant 0 : index
    %c0_551 = arith.constant 0 : index
    %495 = vector.load %arg1[%c24_549, %c0_550, %c0_551] : memref<25x128x128xf32, #tpu.memory_space<vmem>>, vector<1x128x128xf32>
    %496 = vector.shape_cast %495 : vector<1x128x128xf32> to vector<128x128xf32>
    %cst_552 = arith.constant dense<0.000000e+00> : vector<2x128xf32>
    %497 = tpu.matmul %494, %496, %cst_552 {dimension_numbers = #tpu.dot_dimension_numbers<[1], [0], [0], [1], [0, 0, 1, 1], [], []>} : vector<2x128xf32>, vector<128x128xf32>, vector<2x128xf32> -> vector<2x128xf32>
    %498 = arith.addf %493, %497 : vector<2x128xf32>
    %499 = arith.maximumf %374, %498 : vector<2x128xf32>
    %500 = vector.broadcast %0 : vector<1x128xf32> to vector<2x128xf32>
    %501 = arith.addf %499, %500 : vector<2x128xf32>
    %c0_553 = arith.constant 0 : index
    %c0_554 = arith.constant 0 : index
    %c0_555 = arith.constant 0 : index
    %502 = vector.load %arg3[%c0_553, %c0_554, %c0_555] : memref<1x128x128xf32, #tpu.memory_space<vmem>>, vector<1x128x128xf32>
    %503 = vector.shape_cast %502 : vector<1x128x128xf32> to vector<128x128xf32>
    %cst_556 = arith.constant dense<0.000000e+00> : vector<2x128xf32>
    %504 = tpu.matmul %501, %503, %cst_556 {dimension_numbers = #tpu.dot_dimension_numbers<[1], [0], [0], [1], [0, 0, 1, 1], [], []>} : vector<2x128xf32>, vector<128x128xf32>, vector<2x128xf32> -> vector<2x128xf32>
    %c0_557 = arith.constant 0 : index
    %c0_558 = arith.constant 0 : index
    %505 = vector.load %arg4[%c0_557, %c0_558] : memref<1x128xf32, #tpu.memory_space<vmem>>, vector<1x128xf32>
    %506 = vector.broadcast %505 : vector<1x128xf32> to vector<2x128xf32>
    %507 = arith.addf %504, %506 : vector<2x128xf32>
    %cst_559 = arith.constant 0.000000e+00 : f32
    %508 = vector.broadcast %cst_559 : f32 to vector<2x128xf32>
    %509 = arith.maximumf %507, %508 : vector<2x128xf32>
    %c0_560 = arith.constant 0 : index
    %c0_561 = arith.constant 0 : index
    %510 = vector.load %arg5[%c0_560, %c0_561] : memref<128x128xf32, #tpu.memory_space<vmem>>, vector<128x128xf32>
    %cst_562 = arith.constant dense<0.000000e+00> : vector<2x128xf32>
    %511 = tpu.matmul %509, %510, %cst_562 {dimension_numbers = #tpu.dot_dimension_numbers<[1], [0], [0], [1], [0, 0, 1, 1], [], []>} : vector<2x128xf32>, vector<128x128xf32>, vector<2x128xf32> -> vector<2x128xf32>
    %c0_563 = arith.constant 0 : index
    %c0_564 = arith.constant 0 : index
    %512 = vector.load %arg6[%c0_563, %c0_564] : memref<1x128xf32, #tpu.memory_space<vmem>>, vector<1x128xf32>
    %513 = vector.broadcast %512 : vector<1x128xf32> to vector<2x128xf32>
    %514 = arith.addf %511, %513 : vector<2x128xf32>
    %515 = tpu.iota {dimensions = array<i32: 1>} : vector<2x128xi32>
    %c10_i32 = arith.constant 10 : i32
    %516 = vector.broadcast %c10_i32 : i32 to vector<2x128xi32>
    %517 = arith.cmpi slt, %515, %516 : vector<2x128xi32>
    %cst_565 = arith.constant -1.000000e+30 : f32
    %518 = vector.broadcast %cst_565 : f32 to vector<2x128xf32>
    %519 = arith.select %517, %514, %518 : vector<2x128xi1>, vector<2x128xf32>
    %cst_566 = arith.constant dense<0xFF800000> : vector<2xf32>
    %520 = vector.multi_reduction <maximumf>, %519, %cst_566 [1] : vector<2x128xf32> to vector<2xf32>
    %521 = vector.shape_cast %520 : vector<2xf32> to vector<2x1xf32>
    %522 = vector.broadcast %521 : vector<2x1xf32> to vector<2x128xf32>
    %523 = arith.subf %519, %522 : vector<2x128xf32>
    %524 = math.exp %523 : vector<2x128xf32>
    %cst_567 = arith.constant dense<0.000000e+00> : vector<2xf32>
    %525 = vector.multi_reduction <add>, %524, %cst_567 [1] : vector<2x128xf32> to vector<2xf32>
    %526 = vector.shape_cast %525 : vector<2xf32> to vector<2x1xf32>
    %527 = math.log %526 : vector<2x1xf32>
    %528 = arith.addf %521, %527 : vector<2x1xf32>
    %529 = vector.broadcast %528 : vector<2x1xf32> to vector<2x128xf32>
    %530 = arith.subf %519, %529 : vector<2x128xf32>
    %c0_568 = arith.constant 0 : index
    %c0_569 = arith.constant 0 : index
    %531 = vector.load %arg7[%c0_568, %c0_569] : memref<2x128xf32, #tpu.memory_space<vmem>>, vector<2x128xf32>
    tpu.vector_store %arg7[%c0_568, %c0_569], %530 {strides = array<i32>} : memref<2x128xf32, #tpu.memory_space<vmem>>, vector<2x128xf32>,
    return
  }
}

</mosaic_0001>

<bundles_post_ra>
// kernel: ho_conv_classifier_forward.2
= control target key start
LH: loop header
LB: loop body
LE: loop exit
PB: predicated region body
PF: predicated region fallthrough
CT: control target
= control target key end

     0   :  { %v1037_v0 = vmov 0.0|0.0   ;;  %vm1038_vm0 = vmmov 0   ;;  %v1039_v6 = vmov 0.0   ;;  %s1451_s1 = inlined_call_operand.vmem [shape: f32[128,128], index: 1, kind: input, shape index: {}]   ;;  %s1452_s0 = inlined_call_operand.vmem [shape: f32[4,72,128], index: 0, kind: input, shape index: {}]   ;;  %s1453_s2 = inlined_call_operand.vmem [shape: f32[1,128], index: 2, kind: input, shape index: {}]   ;;  %s1454_s3 = inlined_call_operand.vmem [shape: f32[72,128], index: 3, kind: output, shape index: {}]  }
   0x1   :  { %938 = vmatprep.subr.bf16.mxu0 %v1037_v0  ;;  %v14_v1 = vld [vmem:[%s1451_s1] sm:$0xff]  ;;  %v15_v2 = vld [vmem:[%s1451_s1 + $0x8] sm:$0xff]  ;;  %962 = vmatprep.subr.bf16.mxu1 %v1037_v0  ;;  %v16_v3 = vld [vmem:[%s1451_s1 + $0x10] sm:$0xff] }
   0x2   :  { %v1071_v4 = vpack.c.bf16 %v15_v2, %v14_v1  ;;  %v17_v5 = vld [vmem:[%s1451_s1 + $0x18] sm:$0xff]  ;;  %734 = vmatprep.mubr.msk.f32.mxu0 %vm1038_vm0, %v1039_v6  ;;  %793 = vmatprep.mubr.msk.f32.mxu1 %vm1038_vm0, %v1039_v6  ;;  %v18_v8 = vld [vmem:[%s1451_s1 + $0x20] sm:$0xff]  ;;  %v19_v9 = vld [vmem:[%s1451_s1 + $0x28] sm:$0xff] }
   0x3   :  { %v1082_v7 = vpack.c.bf16 %v17_v5, %v16_v3  ;;  %v1094_v10 = vpack.c.bf16 %v19_v9, %v18_v8  ;;  %v20_v11 = vld [vmem:[%s1451_s1 + $0x30] sm:$0xff]  ;;  %v21_v12 = vld [vmem:[%s1451_s1 + $0x38] sm:$0xff]  ;;  %v22_v14 = vld [vmem:[%s1451_s1 + $0x40] sm:$0xff] }
   0x4   :  { %940 = vmatpush3.bf16.msra.mxu0 %v1071_v4  ;;  %964 = vmatpush3.bf16.msra.mxu1 %v1071_v4  ;;  %v1106_v13 = vpack.c.bf16 %v21_v12, %v20_v11  ;;  %v23_v15 = vld [vmem:[%s1451_s1 + $0x48] sm:$0xff]  ;;  %v24_v17 = vld [vmem:[%s1451_s1 + $0x50] sm:$0xff]  ;;  %v25_v18 = vld [vmem:[%s1451_s1 + $0x58] sm:$0xff] }
   0x5   :  { %941 = vmatprep.subr.bf16.mxu0 %v1037_v0  ;;  %965 = vmatprep.subr.bf16.mxu1 %v1037_v0  ;;  %v1118_v16 = vpack.c.bf16 %v23_v15, %v22_v14  ;;  %v1130_v19 = vpack.c.bf16 %v25_v18, %v24_v17  ;;  %v26_v20 = vld [vmem:[%s1451_s1 + $0x60] sm:$0xff]  ;;  %v27_v21 = vld [vmem:[%s1451_s1 + $0x68] sm:$0xff]  ;;  %v28_v23 = vld [vmem:[%s1451_s1 + $0x70] sm:$0xff] }
   0x6   :  { %v1142_v22 = vpack.c.bf16 %v27_v21, %v26_v20  ;;  %v29_v24 = vld [vmem:[%s1451_s1 + $0x78] sm:$0xff]  ;;  %v30_v26 = vld [vmem:[%s1452_s0] sm:$0xff]  ;;  %v574_v27 = vld [vmem:[%s1452_s0 + $0x48] sm:$0xff] }
   0x7   :  { %v1154_v25 = vpack.c.bf16 %v29_v24, %v28_v23  ;;  %v31_v28 = vld [vmem:[%s1452_s0 + $0x8] sm:$0xff]  ;;  %v575_v29 = vld [vmem:[%s1452_s0 + $0x50] sm:$0xff]  ;;  %v576_v31 = vld [vmem:[%s1452_s0 + $0x58] sm:$0xff] }
   0x8   :  { %943 = vmatpush3.bf16.msra.mxu0 %v1082_v7  ;;  %967 = vmatpush3.bf16.msra.mxu1 %v1082_v7  ;;  %v32_v30 = vld [vmem:[%s1452_s0 + $0x10] sm:$0xff]  ;;  %v33_v32 = vld [vmem:[%s1452_s0 + $0x18] sm:$0xff]  ;;  %v577_v33 = vld [vmem:[%s1452_s0 + $0x60] sm:$0xff] }
   0x9   :  { %944 = vmatprep.subr.bf16.mxu0 %v1037_v0  ;;  %968 = vmatprep.subr.bf16.mxu1 %v1037_v0  ;;  %v34_v34 = vld [vmem:[%s1452_s0 + $0x20] sm:$0xff]  ;;  %v578_v35 = vld [vmem:[%s1452_s0 + $0x68] sm:$0xff]  ;;  %v579_v37 = vld [vmem:[%s1452_s0 + $0x70] sm:$0xff] }
   0xa   :  { %v35_v36 = vld [vmem:[%s1452_s0 + $0x28] sm:$0xff]  ;;  %v36_v38 = vld [vmem:[%s1452_s0 + $0x30] sm:$0xff]  ;;  %v580_v39 = vld [vmem:[%s1452_s0 + $0x78] sm:$0xff] }
   0xb   :  { %v37_v40 = vld [vmem:[%s1452_s0 + $0x38] sm:$0xff]  ;;  %v581_v41 = vld [vmem:[%s1452_s0 + $0x80] sm:$0xff]  ;;  %v582_v43 = vld [vmem:[%s1452_s0 + $0x88] sm:$0xff] }
   0xc   :  { %946 = vmatpush3.bf16.msra.mxu0 %v1094_v10  ;;  %970 = vmatpush3.bf16.msra.mxu1 %v1094_v10  ;;  %v38_v42 = vld [vmem:[%s1452_s0 + $0x40] sm:$0xff]  ;;  %v583_v44 = vld [vmem:[%s1452_s0 + $0x90] sm:$0xff]  ;;  %v592_v45 = vld [vmem:[%s1452_s0 + $0xd8] sm:$0xff] }
   0xd   :  { %947 = vmatprep.subr.bf16.mxu0 %v1037_v0  ;;  %971 = vmatprep.subr.bf16.mxu1 %v1037_v0  ;;  %v584_v46 = vld [vmem:[%s1452_s0 + $0x98] sm:$0xff]  ;;  %v593_v47 = vld [vmem:[%s1452_s0 + $0xe0] sm:$0xff]  ;;  %v594_v49 = vld [vmem:[%s1452_s0 + $0xe8] sm:$0xff] }
   0xe   :  { %v585_v48 = vld [vmem:[%s1452_s0 + $0xa0] sm:$0xff]  ;;  %v586_v50 = vld [vmem:[%s1452_s0 + $0xa8] sm:$0xff]  ;;  %v595_v51 = vld [vmem:[%s1452_s0 + $0xf0] sm:$0xff] }
   0xf   :  { %v587_v52 = vld [vmem:[%s1452_s0 + $0xb0] sm:$0xff]  ;;  %v596_v53 = vld [vmem:[%s1452_s0 + $0xf8] sm:$0xff]  ;;  %v597_v55 = vld [vmem:[%s1452_s0 + $0x100] sm:$0xff] }
  0x10   :  { %949 = vmatpush3.bf16.msra.mxu0 %v1106_v13  ;;  %973 = vmatpush3.bf16.msra.mxu1 %v1106_v13  ;;  %v588_v54 = vld [vmem:[%s1452_s0 + $0xb8] sm:$0xff]  ;;  %v589_v56 = vld [vmem:[%s1452_s0 + $0xc0] sm:$0xff]  ;;  %v598_v57 = vld [vmem:[%s1452_s0 + $0x108] sm:$0xff] }
  0x11   :  { %950 = vmatprep.subr.bf16.mxu0 %v1037_v0  ;;  %974 = vmatprep.subr.bf16.mxu1 %v1037_v0  ;;  %v590_v58 = vld [vmem:[%s1452_s0 + $0xc8] sm:$0xff]  ;;  %v599_v59 = vld [vmem:[%s1452_s0 + $0x110] sm:$0xff]  ;;  %v600_v61 = vld [vmem:[%s1452_s0 + $0x118] sm:$0xff] }
  0x12   :  { %v591_v60 = vld [vmem:[%s1452_s0 + $0xd0] sm:$0xff] }
  0x14   :  { %952 = vmatpush3.bf16.msra.mxu0 %v1118_v16  ;;  %976 = vmatpush3.bf16.msra.mxu1 %v1118_v16 }
  0x15   :  { %953 = vmatprep.subr.bf16.mxu0 %v1037_v0  ;;  %977 = vmatprep.subr.bf16.mxu1 %v1037_v0 }
  0x18   :  { %955 = vmatpush3.bf16.msra.mxu0 %v1130_v19  ;;  %979 = vmatpush3.bf16.msra.mxu1 %v1130_v19 }
  0x19   :  { %956 = vmatprep.subr.bf16.mxu0 %v1037_v0  ;;  %980 = vmatprep.subr.bf16.mxu1 %v1037_v0 }
  0x1c   :  { %958 = vmatpush3.bf16.msra.mxu0 %v1142_v22  ;;  %982 = vmatpush3.bf16.msra.mxu1 %v1142_v22 }
  0x1d   :  { %959 = vmatprep.subr.bf16.mxu0 %v1037_v0  ;;  %983 = vmatprep.subr.bf16.mxu1 %v1037_v0 }
  0x20   :  { %961 = vmatpush3.bf16.msra.mxu0 %v1154_v25  ;;  %985 = vmatpush3.bf16.msra.mxu1 %v1154_v25 }
  0x21   :  { %986 = vmatprep.subr.bf16.mxu0 %v1037_v0  ;;  %1010 = vmatprep.subr.bf16.mxu1 %v1037_v0 }
  0x23   :  { %735 = vmatmul.mubr.f32.vlgmr.msra.gmra.mrb[0].mxu0 %v30_v26  ;;  %794 = vmatmul.mubr.f32.vlgmr.msra.gmra.mrb[0].mxu1 %v574_v27 }
  0x24   :  { %988 = vmatpush3.bf16.msra.mxu0 %v1071_v4  ;;  %737 = vmatprep.mubr.msk.f32.mxu0 %vm1038_vm0, %v1039_v6 }
  0x25   :  { %1012 = vmatpush3.bf16.msra.mxu1 %v1071_v4  ;;  %796 = vmatprep.mubr.msk.f32.mxu1 %vm1038_vm0, %v1039_v6 }
  0x26   :  { %989 = vmatprep.subr.bf16.mxu0 %v1037_v0  ;;  %1013 = vmatprep.subr.bf16.mxu1 %v1037_v0 }
  0x27   :  { %738 = vmatmul.mubr.f32.gmra.mrb[2].mxu0 %v31_v28  ;;  %797 = vmatmul.mubr.f32.gmra.mrb[2].mxu1 %v575_v29 }
  0x28   :  { %991 = vmatpush3.bf16.msra.mxu0 %v1082_v7  ;;  %740 = vmatprep.mubr.msk.f32.mxu0 %vm1038_vm0, %v1039_v6 }
  0x29   :  { %799 = vmatprep.mubr.msk.f32.mxu1 %vm1038_vm0, %v1039_v6  ;;  %1015 = vmatpush3.bf16.msra.mxu1 %v1082_v7 }
  0x2a   :  { %992 = vmatprep.subr.bf16.mxu0 %v1037_v0  ;;  %1016 = vmatprep.subr.bf16.mxu1 %v1037_v0 }
  0x2b   :  { %741 = vmatmul.mubr.f32.gmra.mrb[4].mxu0 %v32_v30  ;;  %800 = vmatmul.mubr.f32.gmra.mrb[4].mxu1 %v576_v31 }
  0x2c   :  { %994 = vmatpush3.bf16.msra.mxu0 %v1094_v10  ;;  %743 = vmatprep.mubr.msk.f32.mxu0 %vm1038_vm0, %v1039_v6 }
  0x2d   :  { %802 = vmatprep.mubr.msk.f32.mxu1 %vm1038_vm0, %v1039_v6  ;;  %1018 = vmatpush3.bf16.msra.mxu1 %v1094_v10 }
  0x2e   :  { %995 = vmatprep.subr.bf16.mxu0 %v1037_v0  ;;  %1019 = vmatprep.subr.bf16.mxu1 %v1037_v0 }
  0x2f   :  { %744 = vmatmul.mubr.f32.gmra.mrb[6].mxu0 %v33_v32  ;;  %803 = vmatmul.mubr.f32.gmra.mrb[6].mxu1 %v577_v33 }
  0x30   :  { %746 = vmatprep.mubr.msk.f32.mxu0 %vm1038_vm0, %v1039_v6  ;;  %997 = vmatpush3.bf16.msra.mxu0 %v1106_v13 }
  0x31   :  { %805 = vmatprep.mubr.msk.f32.mxu1 %vm1038_vm0, %v1039_v6  ;;  %1021 = vmatpush3.bf16.msra.mxu1 %v1106_v13 }
  0x32   :  { %998 = vmatprep.subr.bf16.mxu0 %v1037_v0  ;;  %1022 = vmatprep.subr.bf16.mxu1 %v1037_v0 }
  0x33   :  { %747 = vmatmul.mubr.f32.gmra.mrb[8].mxu0 %v34_v34  ;;  %806 = vmatmul.mubr.f32.gmra.mrb[8].mxu1 %v578_v35 }
  0x34   :  { %749 = vmatprep.mubr.msk.f32.mxu0 %vm1038_vm0, %v1039_v6  ;;  %1000 = vmatpush3.bf16.msra.mxu0 %v1118_v16 }
  0x35   :  { %808 = vmatprep.mubr.msk.f32.mxu1 %vm1038_vm0, %v1039_v6  ;;  %1024 = vmatpush3.bf16.msra.mxu1 %v1118_v16 }
  0x36   :  { %1001 = vmatprep.subr.bf16.mxu0 %v1037_v0  ;;  %1025 = vmatprep.subr.bf16.mxu1 %v1037_v0 }
  0x37   :  { %750 = vmatmul.mubr.f32.gmra.mrb[10].mxu0 %v35_v36  ;;  %809 = vmatmul.mubr.f32.gmra.mrb[10].mxu1 %v579_v37 }
  0x38   :  { %752 = vmatprep.mubr.msk.f32.mxu0 %vm1038_vm0, %v1039_v6  ;;  %811 = vmatprep.mubr.msk.f32.mxu1 %vm1038_vm0, %v1039_v6 }
  0x39   :  { %1003 = vmatpush3.bf16.msra.mxu0 %v1130_v19  ;;  %1027 = vmatpush3.bf16.msra.mxu1 %v1130_v19 }
  0x3a   :  { %1004 = vmatprep.subr.bf16.mxu0 %v1037_v0  ;;  %1028 = vmatprep.subr.bf16.mxu1 %v1037_v0 }
  0x3b   :  { %753 = vmatmul.mubr.f32.gmra.mrb[12].mxu0 %v36_v38  ;;  %812 = vmatmul.mubr.f32.gmra.mrb[12].mxu1 %v580_v39 }
  0x3c   :  { %755 = vmatprep.mubr.msk.f32.mxu0 %vm1038_vm0, %v1039_v6  ;;  %814 = vmatprep.mubr.msk.f32.mxu1 %vm1038_vm0, %v1039_v6 }
  0x3d   :  { %1006 = vmatpush3.bf16.msra.mxu0 %v1142_v22  ;;  %1030 = vmatpush3.bf16.msra.mxu1 %v1142_v22 }
  0x3e   :  { %1007 = vmatprep.subr.bf16.mxu0 %v1037_v0  ;;  %1031 = vmatprep.subr.bf16.mxu1 %v1037_v0 }
  0x3f   :  { %756 = vmatmul.mubr.f32.gmra.mrb[14].mxu0 %v37_v40  ;;  %815 = vmatmul.mubr.f32.gmra.mrb[14].mxu1 %v581_v41 }
  0x40   :  { %758 = vmatprep.mubr.msk.f32.mxu0 %vm1038_vm0, %v1039_v6  ;;  %817 = vmatprep.mubr.msk.f32.mxu1 %vm1038_vm0, %v1039_v6 }
  0x41   :  { %1009 = vmatpush3.bf16.msra.mxu0 %v1154_v25  ;;  %1033 = vmatpush3.bf16.msra.mxu1 %v1154_v25 }
  0x43   :  { %759 = vmatmul.mubr.f32.gmra.mrb[16].mxu0 %v38_v42  ;;  %818 = vmatmul.mubr.f32.gmra.mrb[16].mxu1 %v582_v43 }
  0x44   :  { %852 = vmatprep.mubr.msk.f32.mxu0 %vm1038_vm0, %v1039_v6  ;;  %911 = vmatprep.mubr.msk.f32.mxu1 %vm1038_vm0, %v1039_v6 }
  0x47   :  { %853 = vmatmul.mubr.f32.vlgmr.msra.gmra.mrb[18].mxu0 %v583_v44  ;;  %912 = vmatmul.mubr.f32.vlgmr.msra.gmra.mrb[18].mxu1 %v592_v45 }
  0x48   :  { %855 = vmatprep.mubr.msk.f32.mxu0 %vm1038_vm0, %v1039_v6  ;;  %914 = vmatprep.mubr.msk.f32.mxu1 %vm1038_vm0, %v1039_v6 }
  0x4b   :  { %856 = vmatmul.mubr.f32.gmra.mrb[20].mxu0 %v584_v46  ;;  %915 = vmatmul.mubr.f32.gmra.mrb[20].mxu1 %v593_v47 }
  0x4c   :  { %858 = vmatprep.mubr.msk.f32.mxu0 %vm1038_vm0, %v1039_v6  ;;  %917 = vmatprep.mubr.msk.f32.mxu1 %vm1038_vm0, %v1039_v6 }
  0x4f   :  { %859 = vmatmul.mubr.f32.gmra.mrb[22].mxu0 %v585_v48  ;;  %918 = vmatmul.mubr.f32.gmra.mrb[22].mxu1 %v594_v49  ;;  %v1401_v48 = vld [vmem:[%s1453_s2] ss:$0 sm:$0xff] }
  0x50   :  { %861 = vmatprep.mubr.msk.f32.mxu0 %vm1038_vm0, %v1039_v6  ;;  %920 = vmatprep.mubr.msk.f32.mxu1 %vm1038_vm0, %v1039_v6 }
  0x53   :  { %862 = vmatmul.mubr.f32.gmra.mrb[24].mxu0 %v586_v50  ;;  %921 = vmatmul.mubr.f32.gmra.mrb[24].mxu1 %v595_v51 }
  0x54   :  { %864 = vmatprep.mubr.msk.f32.mxu0 %vm1038_vm0, %v1039_v6  ;;  %923 = vmatprep.mubr.msk.f32.mxu1 %vm1038_vm0, %v1039_v6 }
  0x57   :  { %865 = vmatmul.mubr.f32.gmra.mrb[26].mxu0 %v587_v52  ;;  %924 = vmatmul.mubr.f32.gmra.mrb[26].mxu1 %v596_v53 }
  0x58   :  { %867 = vmatprep.mubr.msk.f32.mxu0 %vm1038_vm0, %v1039_v6  ;;  %926 = vmatprep.mubr.msk.f32.mxu1 %vm1038_vm0, %v1039_v6 }
  0x5b   :  { %868 = vmatmul.mubr.f32.gmra.mrb[28].mxu0 %v588_v54  ;;  %927 = vmatmul.mubr.f32.gmra.mrb[28].mxu1 %v597_v55 }
  0x5c   :  { %870 = vmatprep.mubr.msk.f32.mxu0 %vm1038_vm0, %v1039_v6  ;;  %929 = vmatprep.mubr.msk.f32.mxu1 %vm1038_vm0, %v1039_v6 }
  0x5f   :  { %871 = vmatmul.mubr.f32.gmra.mrb[30].mxu0 %v589_v56  ;;  %930 = vmatmul.mubr.f32.gmra.mrb[30].mxu1 %v598_v57 }
  0x60   :  { %873 = vmatprep.mubr.msk.f32.mxu0 %vm1038_vm0, %v1039_v6  ;;  %932 = vmatprep.mubr.msk.f32.mxu1 %vm1038_vm0, %v1039_v6 }
  0x63   :  { %874 = vmatmul.mubr.f32.gmra.mrb[32].mxu0 %v590_v58  ;;  %933 = vmatmul.mubr.f32.gmra.mrb[32].mxu1 %v599_v59 }
  0x64   :  { %876 = vmatprep.mubr.msk.f32.mxu0 %vm1038_vm0, %v1039_v6  ;;  %935 = vmatprep.mubr.msk.f32.mxu1 %vm1038_vm0, %v1039_v6 }
  0x67   :  { %877 = vmatmul.mubr.f32.gmra.mrb[34].mxu0 %v591_v60  ;;  %936 = vmatmul.mubr.f32.gmra.mrb[34].mxu1 %v600_v61 }
  0xf6   :  { %v105_v62 = vpop.f32.mrb[0].mxu0  ;;  %v225_v63 = vpop.f32.mrb[0].mxu1 }
  0xf7   :  { %v736_v0 = vpop.f32.mrb[1].mxu0  ;;  %v269_v1 = vmax.f32 %v105_v62, %v225_v63  ;;  %v795_v2 = vpop.f32.mrb[1].mxu1 }
  0xfa   :  { %v110_v3 = vpop.f32.mrb[2].mxu0  ;;  %v230_v4 = vpop.f32.mrb[2].mxu1 }
  0xfb   :  { %v739_v5 = vpop.f32.mrb[3].mxu0  ;;  %v270_v7 = vmax.f32 %v110_v3, %v230_v4  ;;  %v798_v8 = vpop.f32.mrb[3].mxu1 }
  0xfe   :  { %v115_v9 = vpop.f32.mrb[4].mxu0  ;;  %v235_v10 = vpop.f32.mrb[4].mxu1 }
  0xff   :  { %v742_v11 = vpop.f32.mrb[5].mxu0  ;;  %v271_v6 = vmax.f32 %v115_v9, %v235_v10  ;;  %v801_v12 = vpop.f32.mrb[5].mxu1 }
 0x102   :  { %v120_v13 = vpop.f32.mrb[6].mxu0  ;;  %v240_v14 = vpop.f32.mrb[6].mxu1 }
 0x103   :  { %v745_v15 = vpop.f32.mrb[7].mxu0  ;;  %v272_v16 = vmax.f32 %v120_v13, %v240_v14  ;;  %v804_v17 = vpop.f32.mrb[7].mxu1 }
 0x106   :  { %v1368_v18 = vpop.f32.mrb[8].mxu0  ;;  %v1370_v19 = vpop.f32.mrb[8].mxu1 }
 0x107   :  { %v748_v20 = vpop.f32.mrb[9].mxu0  ;;  %v273_v21 = vmax.f32 %v1368_v18, %v1370_v19  ;;  %v807_v22 = vpop.f32.mrb[9].mxu1 }
 0x10a   :  { %v1374_v23 = vpop.f32.mrb[10].mxu0  ;;  %v1376_v24 = vpop.f32.mrb[10].mxu1 }
 0x10b   :  { %v751_v25 = vpop.f32.mrb[11].mxu0  ;;  %v274_v26 = vmax.f32 %v1374_v23, %v1376_v24  ;;  %v810_v27 = vpop.f32.mrb[11].mxu1 }
 0x10e   :  { %v1380_v28 = vpop.f32.mrb[12].mxu0  ;;  %v1382_v29 = vpop.f32.mrb[12].mxu1 }
 0x10f   :  { %v754_v30 = vpop.f32.mrb[13].mxu0  ;;  %v275_v31 = vmax.f32 %v1380_v28, %v1382_v29  ;;  %v813_v32 = vpop.f32.mrb[13].mxu1 }
 0x112   :  { %v1386_v33 = vpop.f32.mrb[14].mxu0  ;;  %v1388_v34 = vpop.f32.mrb[14].mxu1 }
 0x113   :  { %v757_v35 = vpop.f32.mrb[15].mxu0  ;;  %v276_v36 = vmax.f32 %v1386_v33, %v1388_v34  ;;  %v816_v37 = vpop.f32.mrb[15].mxu1 }
 0x116   :  { %v1392_v38 = vpop.f32.mrb[16].mxu0  ;;  %v1394_v39 = vpop.f32.mrb[16].mxu1 }
 0x117   :  { %v760_v40 = vpop.f32.mrb[17].mxu0  ;;  %v277_v41 = vmax.f32 %v1392_v38, %v1394_v39  ;;  %v819_v42 = vpop.f32.mrb[17].mxu1 }
 0x11a   :  { %v354_v43 = vpop.f32.mrb[18].mxu0  ;;  %v483_v44 = vpop.f32.mrb[18].mxu1 }
 0x11b   :  { %v398_v45 = vmax.f32 %v269_v1, %v354_v43  ;;  %v854_v46 = vpop.f32.mrb[19].mxu0  ;;  %v913_v47 = vpop.f32.mrb[19].mxu1 }
 0x11d   :  { %v527_v49 = vmax.f32 %v398_v45, %v483_v44 }
 0x11e   :  { %v359_v50 = vpop.f32.mrb[20].mxu0  ;;  %v488_v51 = vpop.f32.mrb[20].mxu1 }
 0x11f   :  { %v543_v52 = vadd.f32 %v1401_v48, %v527_v49  ;;  %v399_v53 = vmax.f32 %v270_v7, %v359_v50  ;;  %v857_v54 = vpop.f32.mrb[21].mxu0  ;;  %v916_v55 = vpop.f32.mrb[21].mxu1 }
 0x121   :  { %v552_v56 = vmax.f32 %v543_v52, 0.0  ;;  %v528_v57 = vmax.f32 %v399_v53, %v488_v51 }
 0x122   :  { %v364_v58 = vpop.f32.mrb[22].mxu0  ;;  %v493_v59 = vpop.f32.mrb[22].mxu1 }
 0x123   :  { %561 = vst [vmem:[%s1454_s3] sm:$0xff] %v552_v56  ;;  %v544_v60 = vadd.f32 %v1401_v48, %v528_v57  ;;  %v400_v61 = vmax.f32 %v271_v6, %v364_v58  ;;  %v860_v62 = vpop.f32.mrb[23].mxu0  ;;  %v919_v63 = vpop.f32.mrb[23].mxu1 }
 0x125   :  { %v553_v0 = vmax.f32 %v544_v60, 0.0  ;;  %v529_v1 = vmax.f32 %v400_v61, %v493_v59 }
 0x126   :  { %v369_v2 = vpop.f32.mrb[24].mxu0  ;;  %v498_v3 = vpop.f32.mrb[24].mxu1 }
 0x127   :  { %562 = vst [vmem:[%s1454_s3 + $0x8] sm:$0xff] %v553_v0  ;;  %v545_v4 = vadd.f32 %v1401_v48, %v529_v1  ;;  %v401_v5 = vmax.f32 %v272_v16, %v369_v2  ;;  %v863_v7 = vpop.f32.mrb[25].mxu0  ;;  %v922_v8 = vpop.f32.mrb[25].mxu1 }
 0x129   :  { %v554_v9 = vmax.f32 %v545_v4, 0.0  ;;  %v530_v10 = vmax.f32 %v401_v5, %v498_v3 }
 0x12a   :  { %v374_v11 = vpop.f32.mrb[26].mxu0  ;;  %v503_v12 = vpop.f32.mrb[26].mxu1 }
 0x12b   :  { %563 = vst [vmem:[%s1454_s3 + $0x10] sm:$0xff] %v554_v9  ;;  %v546_v6 = vadd.f32 %v1401_v48, %v530_v10  ;;  %v402_v13 = vmax.f32 %v273_v21, %v374_v11  ;;  %v866_v14 = vpop.f32.mrb[27].mxu0  ;;  %v925_v15 = vpop.f32.mrb[27].mxu1 }
 0x12d   :  { %v555_v17 = vmax.f32 %v546_v6, 0.0  ;;  %v531_v18 = vmax.f32 %v402_v13, %v503_v12 }
 0x12e   :  { %v379_v19 = vpop.f32.mrb[28].mxu0  ;;  %v508_v20 = vpop.f32.mrb[28].mxu1 }
 0x12f   :  { %564 = vst [vmem:[%s1454_s3 + $0x18] sm:$0xff] %v555_v17  ;;  %v547_v16 = vadd.f32 %v1401_v48, %v531_v18  ;;  %v403_v22 = vmax.f32 %v274_v26, %v379_v19  ;;  %v869_v25 = vpop.f32.mrb[29].mxu0  ;;  %v928_v27 = vpop.f32.mrb[29].mxu1 }
 0x131   :  { %v556_v30 = vmax.f32 %v547_v16, 0.0  ;;  %v532_v21 = vmax.f32 %v403_v22, %v508_v20 }
 0x132   :  { %v384_v32 = vpop.f32.mrb[30].mxu0  ;;  %v513_v35 = vpop.f32.mrb[30].mxu1 }
 0x133   :  { %565 = vst [vmem:[%s1454_s3 + $0x20] sm:$0xff] %v556_v30  ;;  %v548_v37 = vadd.f32 %v1401_v48, %v532_v21  ;;  %v404_v40 = vmax.f32 %v275_v31, %v384_v32  ;;  %v872_v42 = vpop.f32.mrb[31].mxu0  ;;  %v931_v43 = vpop.f32.mrb[31].mxu1 }
 0x135   :  { %v557_v23 = vmax.f32 %v548_v37, 0.0  ;;  %v533_v24 = vmax.f32 %v404_v40, %v513_v35 }
 0x136   :  { %v389_v26 = vpop.f32.mrb[32].mxu0  ;;  %v518_v44 = vpop.f32.mrb[32].mxu1 }
 0x137   :  { %566 = vst [vmem:[%s1454_s3 + $0x28] sm:$0xff] %v557_v23  ;;  %v549_v45 = vadd.f32 %v1401_v48, %v533_v24  ;;  %v405_v46 = vmax.f32 %v276_v36, %v389_v26  ;;  %v875_v47 = vpop.f32.mrb[33].mxu0  ;;  %v934_v49 = vpop.f32.mrb[33].mxu1 }
 0x139   :  { %v558_v28 = vmax.f32 %v549_v45, 0.0  ;;  %v534_v29 = vmax.f32 %v405_v46, %v518_v44 }
 0x13a   :  { %v394_v31 = vpop.f32.mrb[34].mxu0  ;;  %v523_v50 = vpop.f32.mrb[34].mxu1 }
 0x13b   :  { %567 = vst [vmem:[%s1454_s3 + $0x30] sm:$0xff] %v558_v28  ;;  %v550_v51 = vadd.f32 %v1401_v48, %v534_v29  ;;  %v406_v52 = vmax.f32 %v277_v41, %v394_v31  ;;  %v878_v53 = vpop.f32.mrb[35].mxu0  ;;  %v937_v54 = vpop.f32.mrb[35].mxu1 }
 0x13d   :  { %v559_v33 = vmax.f32 %v550_v51, 0.0  ;;  %v535_v34 = vmax.f32 %v406_v52, %v523_v50 }
 0x13f   :  { %568 = vst [vmem:[%s1454_s3 + $0x38] sm:$0xff] %v559_v33  ;;  %v551_v36 = vadd.f32 %v1401_v48, %v535_v34 }
 0x141   :  { %v560_v55 = vmax.f32 %v551_v36, 0.0 }
 0x143   :  { %569 = vst [vmem:[%s1454_s3 + $0x40] sm:$0xff] %v560_v55 }

// kernel: ho_conv_classifier_forward.3
= control target key start
LH: loop header
LB: loop body
LE: loop exit
PB: predicated region body
PF: predicated region fallthrough
CT: control target
= control target key end

     0   :  { %v20117_v3 = vmov 0.0|0.0   ;;  %vm16198_vm0 = vmmov 0   ;;  %v20055_v6 = vmov 0.0   ;;  %s20047_s0 = inlined_call_operand.vmem [shape: f32[72,128], index: 0, kind: input, shape index: {}]   ;;  %s20048_s1 = inlined_call_operand.vmem [shape: f32[25,128,128], index: 1, kind: input, shape index: {}]   ;;  %s20049_s2 = inlined_call_operand.vmem [shape: f32[1,128], index: 2, kind: input, shape index: {}]   ;;  %s20050_s3 = inlined_call_operand.vmem [shape: f32[1,128,128], index: 3, kind: input, shape index: {}]   ;;  %s20051_s4 = inlined_call_operand.vmem [shape: f32[1,128], index: 4, kind: input, shape index: {}]   ;;  %s20052_s5 = inlined_call_operand.vmem [shape: f32[128,128], index: 5, kind: input, shape index: {}]   ;;  %s20053_s6 = inlined_call_operand.vmem [shape: f32[1,128], index: 6, kind: input, shape index: {}]   ;;  %s20054_s7 = inlined_call_operand.hbm [shape: f32[2,128], index: 7, kind: output, shape index: {}]  }
   0x1   :  { %v7810_v0 = vld [vmem:[%s20048_s1 + $0x80] sm:$0xff]  ;;  %v7811_v1 = vld [vmem:[%s20048_s1 + $0x88] sm:$0xff]  ;;  %v7812_v2 = vld [vmem:[%s20048_s1 + $0x90] sm:$0xff]  ;;  %13501 = vmatprep.subr.bf16.mxu0 %v20117_v3  ;;  %14101 = vmatprep.subr.bf16.mxu1 %v20117_v3 }
   0x2   :  { %v16252_v4 = vpack.c.bf16 %v7811_v1, %v7810_v0  ;;  %v7813_v5 = vld [vmem:[%s20048_s1 + $0x98] sm:$0xff]  ;;  %9963 = vmatprep.mubr.msk.f32.mxu0 %vm16198_vm0, %v20055_v6  ;;  %10838 = vmatprep.mubr.msk.f32.mxu1 %vm16198_vm0, %v20055_v6  ;;  %v7814_v8 = vld [vmem:[%s20048_s1 + $0xa0] sm:$0xff]  ;;  %v7815_v9 = vld [vmem:[%s20048_s1 + $0xa8] sm:$0xff] }
   0x3   :  { %v16263_v7 = vpack.c.bf16 %v7813_v5, %v7812_v2  ;;  %v16275_v10 = vpack.c.bf16 %v7815_v9, %v7814_v8  ;;  %v7816_v11 = vld [vmem:[%s20048_s1 + $0xb0] sm:$0xff]  ;;  %v7817_v12 = vld [vmem:[%s20048_s1 + $0xb8] sm:$0xff]  ;;  %v7818_v14 = vld [vmem:[%s20048_s1 + $0xc0] sm:$0xff] }
   0x4   :  { %13503 = vmatpush3.bf16.msra.mxu0 %v16252_v4  ;;  %14103 = vmatpush3.bf16.msra.mxu1 %v16252_v4  ;;  %v16287_v13 = vpack.c.bf16 %v7817_v12, %v7816_v11  ;;  %v7819_v15 = vld [vmem:[%s20048_s1 + $0xc8] sm:$0xff]  ;;  %v7820_v17 = vld [vmem:[%s20048_s1 + $0xd0] sm:$0xff]  ;;  %v7821_v18 = vld [vmem:[%s20048_s1 + $0xd8] sm:$0xff] }
   0x5   :  { %13504 = vmatprep.subr.bf16.mxu0 %v20117_v3  ;;  %14104 = vmatprep.subr.bf16.mxu1 %v20117_v3  ;;  %v16299_v16 = vpack.c.bf16 %v7819_v15, %v7818_v14  ;;  %v16311_v19 = vpack.c.bf16 %v7821_v18, %v7820_v17  ;;  %v7822_v20 = vld [vmem:[%s20048_s1 + $0xe0] sm:$0xff]  ;;  %v7823_v21 = vld [vmem:[%s20048_s1 + $0xe8] sm:$0xff]  ;;  %v7824_v23 = vld [vmem:[%s20048_s1 + $0xf0] sm:$0xff] }
   0x6   :  { %v16323_v22 = vpack.c.bf16 %v7823_v21, %v7822_v20  ;;  %v7825_v24 = vld [vmem:[%s20048_s1 + $0xf8] sm:$0xff] }
   0x7   :  { %v16335_v25 = vpack.c.bf16 %v7825_v24, %v7824_v23 }
   0x8   :  { %13506 = vmatpush3.bf16.msra.mxu0 %v16263_v7  ;;  %14106 = vmatpush3.bf16.msra.mxu1 %v16263_v7 }
   0x9   :  { %13507 = vmatprep.subr.bf16.mxu0 %v20117_v3  ;;  %14107 = vmatprep.subr.bf16.mxu1 %v20117_v3 }
   0xc   :  { %13509 = vmatpush3.bf16.msra.mxu0 %v16275_v10  ;;  %14109 = vmatpush3.bf16.msra.mxu1 %v16275_v10 }
   0xd   :  { %13510 = vmatprep.subr.bf16.mxu0 %v20117_v3  ;;  %14110 = vmatprep.subr.bf16.mxu1 %v20117_v3 }
  0x10   :  { %13512 = vmatpush3.bf16.msra.mxu0 %v16287_v13  ;;  %14112 = vmatpush3.bf16.msra.mxu1 %v16287_v13 }
  0x11   :  { %13513 = vmatprep.subr.bf16.mxu0 %v20117_v3  ;;  %14113 = vmatprep.subr.bf16.mxu1 %v20117_v3 }
  0x14   :  { %13515 = vmatpush3.bf16.msra.mxu0 %v16299_v16  ;;  %14115 = vmatpush3.bf16.msra.mxu1 %v16299_v16 }
  0x15   :  { %13516 = vmatprep.subr.bf16.mxu0 %v20117_v3  ;;  %14116 = vmatprep.subr.bf16.mxu1 %v20117_v3 }
  0x18   :  { %13518 = vmatpush3.bf16.msra.mxu0 %v16311_v19  ;;  %14118 = vmatpush3.bf16.msra.mxu1 %v16311_v19 }
  0x19   :  { %13519 = vmatprep.subr.bf16.mxu0 %v20117_v3  ;;  %14119 = vmatprep.subr.bf16.mxu1 %v20117_v3 }
  0x1c   :  { %13521 = vmatpush3.bf16.msra.mxu0 %v16323_v22  ;;  %14121 = vmatpush3.bf16.msra.mxu1 %v16323_v22 }
  0x1d   :  { %12 = vsyncpa [#allocation3], 0  ;;  %13522 = vmatprep.subr.bf16.mxu0 %v20117_v3  ;;  %14122 = vmatprep.subr.bf16.mxu1 %v20117_v3  ;;  %v29_v26 = vld [vmem:[%s20048_s1] sm:$0xff]  ;;  %v30_v27 = vld [vmem:[%s20048_s1 + $0x8] sm:$0xff]  ;;  %vm7781_vm2 = vcmask 1041408  }
  0x1e   :  { %v16350_v28 = vld [vmem:[%s20047_s0 + $0x2] sm:$0x3]  ;;  %v16352_v29 = vpack.c.bf16 %v30_v27, %v29_v26  ;;  %v16357_v30 = vld [vmem:[%s20047_s0 + $0x4] sm:$0x3]  ;;  %v31_v31 = vld [vmem:[%s20048_s1 + $0x10] sm:$0xff] }
  0x1f   :  { %v32_v32 = vld [vmem:[%s20048_s1 + $0x18] sm:$0xff]  ;;  %v33_v34 = vld [vmem:[%s20048_s1 + $0x20] sm:$0xff]  ;;  %v34_v35 = vld [vmem:[%s20048_s1 + $0x28] sm:$0xff] }
  0x20   :  { %13524 = vmatpush3.bf16.msra.mxu0 %v16335_v25  ;;  %14124 = vmatpush3.bf16.msra.mxu1 %v16335_v25  ;;  %v16371_v33 = vpack.c.bf16 %v32_v32, %v31_v31  ;;  %v16387_v36 = vpack.c.bf16 %v34_v35, %v33_v34  ;;  %v35_v37 = vld [vmem:[%s20048_s1 + $0x30] sm:$0xff]  ;;  %v36_v38 = vld [vmem:[%s20048_s1 + $0x38] sm:$0xff]  ;;  %v37_v40 = vld [vmem:[%s20048_s1 + $0x40] sm:$0xff] }
  0x21   :  { %13525 = vmatprep.subr.bf16.mxu0 %v20117_v3  ;;  %14125 = vmatprep.subr.bf16.mxu1 %v20117_v3  ;;  %v16399_v39 = vpack.c.bf16 %v36_v38, %v35_v37  ;;  %v38_v41 = vld [vmem:[%s20048_s1 + $0x48] sm:$0xff]  ;;  %v39_v43 = vld [vmem:[%s20048_s1 + $0x50] sm:$0xff]  ;;  %v40_v44 = vld [vmem:[%s20048_s1 + $0x58] sm:$0xff] }
  0x22   :  { %v16411_v42 = vpack.c.bf16 %v38_v41, %v37_v40  ;;  %v16423_v45 = vpack.c.bf16 %v40_v44, %v39_v43  ;;  %v41_v46 = vld [vmem:[%s20048_s1 + $0x60] sm:$0xff]  ;;  %v42_v47 = vld [vmem:[%s20048_s1 + $0x68] sm:$0xff]  ;;  %v43_v49 = vld [vmem:[%s20048_s1 + $0x70] sm:$0xff] }
  0x23   :  { %9964 = vmatmul.mubr.f32.vlgmr.msra.gmra.mrb[0].mxu0 %v16350_v28  ;;  %10839 = vmatmul.mubr.f32.vlgmr.msra.gmra.mrb[0].mxu1 %v16357_v30  ;;  %v16435_v48 = vpack.c.bf16 %v42_v47, %v41_v46  ;;  %v44_v50 = vld [vmem:[%s20048_s1 + $0x78] sm:$0xff]  ;;  %v7826_v52 = vld [vmem:[%s20048_s1 + $0x100] sm:$0xff]  ;;  %v7827_v53 = vld [vmem:[%s20048_s1 + $0x108] sm:$0xff] }
  0x24   :  { %13527 = vmatpush3.bf16.msra.mxu0 %v16352_v29  ;;  %14127 = vmatpush3.bf16.msra.mxu1 %v16352_v29  ;;  %v16447_v51 = vpack.c.bf16 %v44_v50, %v43_v49  ;;  %v28_v54 = vld [vmem:[%s20047_s0] sm:$0x3]  ;;  %v16462_v55 = vpack.c.bf16 %v7827_v53, %v7826_v52  ;;  %v7828_v56 = vld [vmem:[%s20048_s1 + $0x110] sm:$0xff]  ;;  %v7829_v57 = vld [vmem:[%s20048_s1 + $0x118] sm:$0xff] }
  0x25   :  { %13528 = vmatprep.subr.bf16.mxu0 %v20117_v3  ;;  %14128 = vmatprep.subr.bf16.mxu1 %v20117_v3  ;;  %v16475_v58 = vpack.c.bf16 %v7829_v57, %v7828_v56  ;;  %v7830_v59 = vld [vmem:[%s20048_s1 + $0x120] sm:$0xff]  ;;  %v7831_v60 = vld [vmem:[%s20048_s1 + $0x128] sm:$0xff]  ;;  %v7832_v62 = vld [vmem:[%s20048_s1 + $0x130] sm:$0xff] }
  0x26   :  { %9998 = vmatprep.mubr.msk.f32.mxu0 %vm16198_vm0, %v20055_v6  ;;  %10873 = vmatprep.mubr.msk.f32.mxu1 %vm16198_vm0, %v20055_v6  ;;  %v16491_v61 = vpack.c.bf16 %v7831_v60, %v7830_v59  ;;  %v7833_v63 = vld [vmem:[%s20048_s1 + $0x138] sm:$0xff]  ;;  %v7834_v1 = vld [vmem:[%s20048_s1 + $0x140] sm:$0xff]  ;;  %v7835_v2 = vld [vmem:[%s20048_s1 + $0x148] sm:$0xff] }
  0x27   :  { %v16503_v0 = vpack.c.bf16 %v7833_v63, %v7832_v62  ;;  %v16515_v5 = vpack.c.bf16 %v7835_v2, %v7834_v1  ;;  %v7836_v8 = vld [vmem:[%s20048_s1 + $0x150] sm:$0xff]  ;;  %v7837_v9 = vld [vmem:[%s20048_s1 + $0x158] sm:$0xff]  ;;  %v7838_v12 = vld [vmem:[%s20048_s1 + $0x160] sm:$0xff] }
  0x28   :  { %13530 = vmatpush3.bf16.msra.mxu0 %v16371_v33  ;;  %14130 = vmatpush3.bf16.msra.mxu1 %v16371_v33  ;;  %v16527_v11 = vpack.c.bf16 %v7837_v9, %v7836_v8  ;;  %v7839_v14 = vld [vmem:[%s20048_s1 + $0x168] sm:$0xff]  ;;  %v7840_v17 = vld [vmem:[%s20048_s1 + $0x170] sm:$0xff]  ;;  %v7841_v18 = vld [vmem:[%s20048_s1 + $0x178] sm:$0xff] }
  0x29   :  { %13531 = vmatprep.subr.bf16.mxu0 %v20117_v3  ;;  %14131 = vmatprep.subr.bf16.mxu1 %v20117_v3  ;;  %v16539_v15 = vpack.c.bf16 %v7839_v14, %v7838_v12  ;;  %v16551_v20 = vpack.c.bf16 %v7841_v18, %v7840_v17  ;;  %v7842_v21 = vld [vmem:[%s20048_s1 + $0x180] sm:$0xff]  ;;  %v7843_v23 = vld [vmem:[%s20048_s1 + $0x188] sm:$0xff]  ;;  %v7844_v27 = vld [vmem:[%s20048_s1 + $0x190] sm:$0xff] }
  0x2a   :  { %v16563_v24 = vpack.c.bf16 %v7843_v23, %v7842_v21  ;;  %v16568_v26 = vld [vmem:[%s20047_s0 + $0x6] sm:$0x3]  ;;  %v7848_v35 = vld [vmem:[%s20048_s1 + $0x1b0] sm:$0xff]  ;;  %v7849_v37 = vld [vmem:[%s20048_s1 + $0x1b8] sm:$0xff] }
  0x2b   :  { %v7846_v32 = vld [vmem:[%s20048_s1 + $0x1a0] sm:$0xff]  ;;  %v16610_v38 = vpack.c.bf16 %v7849_v37, %v7848_v35  ;;  %v7851_v41 = vld [vmem:[%s20048_s1 + $0x1c8] sm:$0xff]  ;;  %v7852_v44 = vld [vmem:[%s20048_s1 + $0x1d0] sm:$0xff] }
  0x2c   :  { %13533 = vmatpush3.bf16.msra.mxu0 %v16387_v36  ;;  %14133 = vmatpush3.bf16.msra.mxu1 %v16387_v36  ;;  %v7850_v40 = vld [vmem:[%s20048_s1 + $0x1c0] sm:$0xff]  ;;  %v7853_v46 = vld [vmem:[%s20048_s1 + $0x1d8] sm:$0xff]  ;;  %v7855_v50 = vld [vmem:[%s20048_s1 + $0x1e8] sm:$0xff] }
  0x2d   :  { %13534 = vmatprep.subr.bf16.mxu0 %v20117_v3  ;;  %14134 = vmatprep.subr.bf16.mxu1 %v20117_v3  ;;  %v16622_v43 = vpack.c.bf16 %v7851_v41, %v7850_v40  ;;  %v16634_v47 = vpack.c.bf16 %v7853_v46, %v7852_v44  ;;  %v7854_v49 = vld [vmem:[%s20048_s1 + $0x1e0] sm:$0xff]  ;;  %v7856_v53 = vld [vmem:[%s20048_s1 + $0x1f0] sm:$0xff]  ;;  %v7859_v59 = vld [vmem:[%s20048_s1 + $0x208] sm:$0xff] }
  0x2e   :  { %v16646_v52 = vpack.c.bf16 %v7855_v50, %v7854_v49  ;;  %v7858_v57 = vld [vmem:[%s20048_s1 + $0x200] sm:$0xff]  ;;  %v16675_v62 = vld [vmem:[%s20047_s0 + $0x8] sm:$0x3]  ;;  %v7860_v63 = vld [vmem:[%s20048_s1 + $0x210] sm:$0xff] }
  0x2f   :  { %v16670_v60 = vpack.c.bf16 %v7859_v59, %v7858_v57  ;;  %v7861_v1 = vld [vmem:[%s20048_s1 + $0x218] sm:$0xff]  ;;  %v7862_v8 = vld [vmem:[%s20048_s1 + $0x220] sm:$0xff]  ;;  %v7863_v9 = vld [vmem:[%s20048_s1 + $0x228] sm:$0xff] }
  0x30   :  { %13536 = vmatpush3.bf16.msra.mxu0 %v16399_v39  ;;  %14136 = vmatpush3.bf16.msra.mxu1 %v16399_v39  ;;  %v16689_v2 = vpack.c.bf16 %v7861_v1, %v7860_v63  ;;  %v16705_v12 = vpack.c.bf16 %v7863_v9, %v7862_v8  ;;  %v7864_v14 = vld [vmem:[%s20048_s1 + $0x230] sm:$0xff]  ;;  %v7865_v17 = vld [vmem:[%s20048_s1 + $0x238] sm:$0xff]  ;;  %v7866_v21 = vld [vmem:[%s20048_s1 + $0x240] sm:$0xff] }
  0x31   :  { %13537 = vmatprep.subr.bf16.mxu0 %v20117_v3  ;;  %14137 = vmatprep.subr.bf16.mxu1 %v20117_v3  ;;  %v16717_v18 = vpack.c.bf16 %v7865_v17, %v7864_v14  ;;  %v7867_v23 = vld [vmem:[%s20048_s1 + $0x248] sm:$0xff]  ;;  %v7872_v40 = vld [vmem:[%s20048_s1 + $0x270] sm:$0xff]  ;;  %v7873_v41 = vld [vmem:[%s20048_s1 + $0x278] sm:$0xff] }
  0x32   :  { %v7871_v35 = vld [vmem:[%s20048_s1 + $0x268] sm:$0xff]  ;;  %v16765_v44 = vpack.c.bf16 %v7873_v41, %v7872_v40  ;;  %v7874_v46 = vld [vmem:[%s20048_s1 + $0x280] sm:$0xff]  ;;  %v7877_v57 = vld [vmem:[%s20048_s1 + $0x298] sm:$0xff] }
  0x33   :  { %v7875_v49 = vld [vmem:[%s20048_s1 + $0x288] sm:$0xff]  ;;  %v7878_v63 = vld [vmem:[%s20048_s1 + $0x2a0] sm:$0xff]  ;;  %v7880_v8 = vld [vmem:[%s20048_s1 + $0x2b0] sm:$0xff] }
  0x34   :  { %13539 = vmatpush3.bf16.msra.mxu0 %v16411_v42  ;;  %14139 = vmatpush3.bf16.msra.mxu1 %v16411_v42  ;;  %v16777_v50 = vpack.c.bf16 %v7875_v49, %v7874_v46  ;;  %v7879_v1 = vld [vmem:[%s20048_s1 + $0x2a8] sm:$0xff]  ;;  %v7881_v9 = vld [vmem:[%s20048_s1 + $0x2b8] sm:$0xff]  ;;  %v7882_v17 = vld [vmem:[%s20048_s1 + $0x2c0] sm:$0xff] }
  0x35   :  { %13540 = vmatprep.subr.bf16.mxu0 %v20117_v3  ;;  %14140 = vmatprep.subr.bf16.mxu1 %v20117_v3  ;;  %v16821_v14 = vpack.c.bf16 %v7881_v9, %v7880_v8  ;;  %v7887_v40 = vld [vmem:[%s20048_s1 + $0x2e8] sm:$0xff]  ;;  %v7888_v46 = vld [vmem:[%s20048_s1 + $0x2f0] sm:$0xff]  ;;  %v7889_v49 = vld [vmem:[%s20048_s1 + $0x2f8] sm:$0xff] }
  0x36   :  { %v16889_v8 = vld [vmem:[%s20047_s0 + $0xe] sm:$0x3]  ;;  %v7892_v9 = vld [vmem:[%s20048_s1 + $0x310] sm:$0xff] }
  0x38   :  { %13542 = vmatpush3.bf16.msra.mxu0 %v16423_v45  ;;  %14142 = vmatpush3.bf16.msra.mxu1 %v16423_v45 }
  0x39   :  { %13543 = vmatprep.subr.bf16.mxu0 %v20117_v3  ;;  %14143 = vmatprep.subr.bf16.mxu1 %v20117_v3 }
  0x3c   :  { %13545 = vmatpush3.bf16.msra.mxu0 %v16435_v48  ;;  %14145 = vmatpush3.bf16.msra.mxu1 %v16435_v48 }
  0x3d   :  { %13546 = vmatprep.subr.bf16.mxu0 %v20117_v3  ;;  %14146 = vmatprep.subr.bf16.mxu1 %v20117_v3 }
  0x40   :  { %13548 = vmatpush3.bf16.msra.mxu0 %v16447_v51  ;;  %14148 = vmatpush3.bf16.msra.mxu1 %v16447_v51 }
  0x41   :  { %13549 = vmatprep.subr.bf16.mxu0 %v20117_v3  ;;  %14149 = vmatprep.subr.bf16.mxu1 %v20117_v3 }
  0x43   :  { %9999 = vmatmul.mubr.f32.vlgmr.msra.gmra.mrb[0].mxu0 %v28_v54  ;;  %10874 = vmatmul.mubr.f32.vlgmr.msra.gmra.mrb[0].mxu1 %v16350_v28  ;;  %v7845_v28 = vld [vmem:[%s20048_s1 + $0x198] sm:$0xff] }
  0x44   :  { %13551 = vmatpush3.bf16.msra.mxu0 %v16462_v55  ;;  %14151 = vmatpush3.bf16.msra.mxu1 %v16462_v55  ;;  %v16582_v31 = vpack.c.bf16 %v7845_v28, %v7844_v27  ;;  %v7857_v54 = vld [vmem:[%s20048_s1 + $0x1f8] sm:$0xff]  ;;  %v7868_v27 = vld [vmem:[%s20048_s1 + $0x250] sm:$0xff] }
  0x45   :  { %13552 = vmatprep.subr.bf16.mxu0 %v20117_v3  ;;  %14152 = vmatprep.subr.bf16.mxu1 %v20117_v3  ;;  %v16658_v56 = vpack.c.bf16 %v7857_v54, %v7856_v53  ;;  %v7869_v28 = vld [vmem:[%s20048_s1 + $0x258] sm:$0xff]  ;;  %v2532_v53 = vld [vmem:[%s20047_s0 + $0xa] sm:$0x3]  ;;  %v7876_v54 = vld [vmem:[%s20048_s1 + $0x290] sm:$0xff] }
  0x46   :  { %10033 = vmatprep.mubr.msk.f32.mxu0 %vm16198_vm0, %v20055_v6  ;;  %10908 = vmatprep.mubr.msk.f32.mxu1 %vm16198_vm0, %v20055_v6  ;;  %v16793_v59 = vpack.c.bf16 %v7877_v57, %v7876_v54  ;;  %v7890_v54 = vld [vmem:[%s20048_s1 + $0x300] sm:$0xff]  ;;  %v7891_v57 = vld [vmem:[%s20048_s1 + $0x308] sm:$0xff] }
  0x48   :  { %13554 = vmatpush3.bf16.msra.mxu0 %v16475_v58  ;;  %14154 = vmatpush3.bf16.msra.mxu1 %v16475_v58 }
  0x49   :  { %13555 = vmatprep.subr.bf16.mxu0 %v20117_v3  ;;  %14155 = vmatprep.subr.bf16.mxu1 %v20117_v3 }
  0x4c   :  { %13557 = vmatpush3.bf16.msra.mxu0 %v16491_v61  ;;  %14157 = vmatpush3.bf16.msra.mxu1 %v16491_v61 }
  0x4d   :  { %13558 = vmatprep.subr.bf16.mxu0 %v20117_v3  ;;  %14158 = vmatprep.subr.bf16.mxu1 %v20117_v3 }
  0x50   :  { %13560 = vmatpush3.bf16.msra.mxu0 %v16503_v0  ;;  %14160 = vmatpush3.bf16.msra.mxu1 %v16503_v0 }
  0x51   :  { %13561 = vmatprep.subr.bf16.mxu0 %v20117_v3  ;;  %14161 = vmatprep.subr.bf16.mxu1 %v20117_v3 }
  0x54   :  { %13563 = vmatpush3.bf16.msra.mxu0 %v16515_v5  ;;  %14163 = vmatpush3.bf16.msra.mxu1 %v16515_v5 }
  0x55   :  { %13564 = vmatprep.subr.bf16.mxu0 %v20117_v3  ;;  %14164 = vmatprep.subr.bf16.mxu1 %v20117_v3 }
  0x58   :  { %13566 = vmatpush3.bf16.msra.mxu0 %v16527_v11  ;;  %14166 = vmatpush3.bf16.msra.mxu1 %v16527_v11 }
  0x59   :  { %13567 = vmatprep.subr.bf16.mxu0 %v20117_v3  ;;  %14167 = vmatprep.subr.bf16.mxu1 %v20117_v3 }
  0x5c   :  { %13569 = vmatpush3.bf16.msra.mxu0 %v16539_v15  ;;  %14169 = vmatpush3.bf16.msra.mxu1 %v16539_v15 }
  0x5d   :  { %13570 = vmatprep.subr.bf16.mxu0 %v20117_v3  ;;  %14170 = vmatprep.subr.bf16.mxu1 %v20117_v3 }
  0x60   :  { %13572 = vmatpush3.bf16.msra.mxu0 %v16551_v20  ;;  %14172 = vmatpush3.bf16.msra.mxu1 %v16551_v20 }
  0x61   :  { %13573 = vmatprep.subr.bf16.mxu0 %v20117_v3  ;;  %14173 = vmatprep.subr.bf16.mxu1 %v20117_v3 }
  0x63   :  { %10034 = vmatmul.mubr.f32.vlgmr.msra.gmra.mrb[0].mxu0 %v16357_v30  ;;  %10909 = vmatmul.mubr.f32.vlgmr.msra.gmra.mrb[0].mxu1 %v16568_v26  ;;  %v7847_v30 = vld [vmem:[%s20048_s1 + $0x1a8] sm:$0xff] }
  0x64   :  { %13575 = vmatpush3.bf16.msra.mxu0 %v16563_v24  ;;  %14175 = vmatpush3.bf16.msra.mxu1 %v16563_v24  ;;  %v16598_v34 = vpack.c.bf16 %v7847_v30, %v7846_v32  ;;  %v16741_v32 = vpack.c.bf16 %v7869_v28, %v7868_v27  ;;  %v7870_v30 = vld [vmem:[%s20048_s1 + $0x260] sm:$0xff]  ;;  %v7884_v27 = vld [vmem:[%s20048_s1 + $0x2d0] sm:$0xff]  ;;  %v7885_v28 = vld [vmem:[%s20048_s1 + $0x2d8] sm:$0xff] }
  0x65   :  { %13576 = vmatprep.subr.bf16.mxu0 %v20117_v3  ;;  %14176 = vmatprep.subr.bf16.mxu1 %v20117_v3  ;;  %v16753_v37 = vpack.c.bf16 %v7871_v35, %v7870_v30  ;;  %v16845_v30 = vpack.c.bf16 %v7885_v28, %v7884_v27  ;;  %v7886_v35 = vld [vmem:[%s20048_s1 + $0x2e0] sm:$0xff]  ;;  %v7895_v28 = vld [vmem:[%s20048_s1 + $0x328] sm:$0xff] }
  0x66   :  { %10068 = vmatprep.mubr.msk.f32.mxu0 %vm16198_vm0, %v20055_v6  ;;  %10943 = vmatprep.mubr.msk.f32.mxu1 %vm16198_vm0, %v20055_v6  ;;  %v16857_v41 = vpack.c.bf16 %v7887_v40, %v7886_v35  ;;  %v7894_v27 = vld [vmem:[%s20048_s1 + $0x320] sm:$0xff]  ;;  %v7896_v40 = vld [vmem:[%s20048_s1 + $0x330] sm:$0xff] }
  0x67   :  { %v16918_v35 = vpack.c.bf16 %v7895_v28, %v7894_v27  ;;  %v7902_v28 = vld [vmem:[%s20048_s1 + $0x360] sm:$0xff] }
  0x68   :  { %13578 = vmatpush3.bf16.msra.mxu0 %v16582_v31  ;;  %14178 = vmatpush3.bf16.msra.mxu1 %v16582_v31 }
  0x69   :  { %13579 = vmatprep.subr.bf16.mxu0 %v20117_v3  ;;  %14179 = vmatprep.subr.bf16.mxu1 %v20117_v3 }
  0x6c   :  { %13581 = vmatpush3.bf16.msra.mxu0 %v16598_v34  ;;  %14181 = vmatpush3.bf16.msra.mxu1 %v16598_v34 }
  0x6d   :  { %13582 = vmatprep.subr.bf16.mxu0 %v20117_v3  ;;  %14182 = vmatprep.subr.bf16.mxu1 %v20117_v3 }
  0x70   :  { %13584 = vmatpush3.bf16.msra.mxu0 %v16610_v38  ;;  %14184 = vmatpush3.bf16.msra.mxu1 %v16610_v38 }
  0x71   :  { %13585 = vmatprep.subr.bf16.mxu0 %v20117_v3  ;;  %14185 = vmatprep.subr.bf16.mxu1 %v20117_v3 }
  0x74   :  { %13587 = vmatpush3.bf16.msra.mxu0 %v16622_v43  ;;  %14187 = vmatpush3.bf16.msra.mxu1 %v16622_v43 }
  0x75   :  { %13588 = vmatprep.subr.bf16.mxu0 %v20117_v3  ;;  %14188 = vmatprep.subr.bf16.mxu1 %v20117_v3 }
  0x78   :  { %13590 = vmatpush3.bf16.msra.mxu0 %v16634_v47  ;;  %14190 = vmatpush3.bf16.msra.mxu1 %v16634_v47 }
  0x79   :  { %13591 = vmatprep.subr.bf16.mxu0 %v20117_v3  ;;  %14191 = vmatprep.subr.bf16.mxu1 %v20117_v3 }
  0x7c   :  { %13593 = vmatpush3.bf16.msra.mxu0 %v16646_v52  ;;  %14193 = vmatpush3.bf16.msra.mxu1 %v16646_v52 }
  0x7d   :  { %13594 = vmatprep.subr.bf16.mxu0 %v20117_v3  ;;  %14194 = vmatprep.subr.bf16.mxu1 %v20117_v3 }
  0x80   :  { %13596 = vmatpush3.bf16.msra.mxu0 %v16658_v56  ;;  %14196 = vmatpush3.bf16.msra.mxu1 %v16658_v56 }
  0x81   :  { %13597 = vmatprep.subr.bf16.mxu0 %v20117_v3  ;;  %14197 = vmatprep.subr.bf16.mxu1 %v20117_v3 }
  0x83   :  { %10069 = vmatmul.mubr.f32.vlgmr.msra.gmra.mrb[0].mxu0 %v16568_v26  ;;  %10944 = vmatmul.mubr.f32.vlgmr.msra.gmra.mrb[0].mxu1 %v16675_v62  ;;  %v16729_v26 = vpack.c.bf16 %v7867_v23, %v7866_v21  ;;  %v7883_v21 = vld [vmem:[%s20048_s1 + $0x2c8] sm:$0xff] }
  0x84   :  { %13599 = vmatpush3.bf16.msra.mxu0 %v16670_v60  ;;  %14199 = vmatpush3.bf16.msra.mxu1 %v16670_v60  ;;  %v16833_v23 = vpack.c.bf16 %v7883_v21, %v7882_v17  ;;  %v7893_v17 = vld [vmem:[%s20048_s1 + $0x318] sm:$0xff] }
  0x85   :  { %13600 = vmatprep.subr.bf16.mxu0 %v20117_v3  ;;  %14200 = vmatprep.subr.bf16.mxu1 %v20117_v3  ;;  %v16902_v21 = vpack.c.bf16 %v7893_v17, %v7892_v9  ;;  %v7900_v9 = vld [vmem:[%s20048_s1 + $0x350] sm:$0xff]  ;;  %v7901_v17 = vld [vmem:[%s20048_s1 + $0x358] sm:$0xff] }
  0x86   :  { %10103 = vmatprep.mubr.msk.f32.mxu0 %vm16198_vm0, %v20055_v6  ;;  %10978 = vmatprep.mubr.msk.f32.mxu1 %vm16198_vm0, %v20055_v6  ;;  %v16954_v27 = vpack.c.bf16 %v7901_v17, %v7900_v9  ;;  %v7906_v17 = vld [vmem:[%s20048_s1 + $0x380] sm:$0xff] }
  0x88   :  { %13602 = vmatpush3.bf16.msra.mxu0 %v16689_v2  ;;  %14202 = vmatpush3.bf16.msra.mxu1 %v16689_v2 }
  0x89   :  { %13603 = vmatprep.subr.bf16.mxu0 %v20117_v3  ;;  %14203 = vmatprep.subr.bf16.mxu1 %v20117_v3 }
  0x8c   :  { %13605 = vmatpush3.bf16.msra.mxu0 %v16705_v12  ;;  %14205 = vmatpush3.bf16.msra.mxu1 %v16705_v12 }
  0x8d   :  { %13606 = vmatprep.subr.bf16.mxu0 %v20117_v3  ;;  %14206 = vmatprep.subr.bf16.mxu1 %v20117_v3 }
  0x90   :  { %13608 = vmatpush3.bf16.msra.mxu0 %v16717_v18  ;;  %14208 = vmatpush3.bf16.msra.mxu1 %v16717_v18 }
  0x91   :  { %13609 = vmatprep.subr.bf16.mxu0 %v20117_v3  ;;  %14209 = vmatprep.subr.bf16.mxu1 %v20117_v3 }
  0x94   :  { %13611 = vmatpush3.bf16.msra.mxu0 %v16729_v26  ;;  %14211 = vmatpush3.bf16.msra.mxu1 %v16729_v26 }
  0x95   :  { %13612 = vmatprep.subr.bf16.mxu0 %v20117_v3  ;;  %14212 = vmatprep.subr.bf16.mxu1 %v20117_v3 }
  0x98   :  { %13614 = vmatpush3.bf16.msra.mxu0 %v16741_v32  ;;  %14214 = vmatpush3.bf16.msra.mxu1 %v16741_v32 }
  0x99   :  { %13615 = vmatprep.subr.bf16.mxu0 %v20117_v3  ;;  %14215 = vmatprep.subr.bf16.mxu1 %v20117_v3 }
  0x9c   :  { %13617 = vmatpush3.bf16.msra.mxu0 %v16753_v37  ;;  %14217 = vmatpush3.bf16.msra.mxu1 %v16753_v37 }
  0x9d   :  { %13618 = vmatprep.subr.bf16.mxu0 %v20117_v3  ;;  %14218 = vmatprep.subr.bf16.mxu1 %v20117_v3 }
  0xa0   :  { %13620 = vmatpush3.bf16.msra.mxu0 %v16765_v44  ;;  %14220 = vmatpush3.bf16.msra.mxu1 %v16765_v44 }
  0xa1   :  { %13621 = vmatprep.subr.bf16.mxu0 %v20117_v3  ;;  %14221 = vmatprep.subr.bf16.mxu1 %v20117_v3 }
  0xa3   :  { %10104 = vmatmul.mubr.f32.vlgmr.msra.gmra.mrb[0].mxu0 %v16675_v62  ;;  %10979 = vmatmul.mubr.f32.vlgmr.msra.gmra.mrb[0].mxu1 %v2532_v53  ;;  %v16809_v62 = vpack.c.bf16 %v7879_v1, %v7878_v63  ;;  %v16869_v53 = vpack.c.bf16 %v7889_v49, %v7888_v46  ;;  %v470_v63 = vld [vmem:[%s20047_s0 + $0xc] sm:$0x3]  ;;  %v16884_v1 = vpack.c.bf16 %v7891_v57, %v7890_v54  ;;  %v7897_v46 = vld [vmem:[%s20048_s1 + $0x338] sm:$0xff]  ;;  %v7898_v54 = vld [vmem:[%s20048_s1 + $0x340] sm:$0xff] }
  0xa4   :  { %13623 = vmatpush3.bf16.msra.mxu0 %v16777_v50  ;;  %14223 = vmatpush3.bf16.msra.mxu1 %v16777_v50  ;;  %v16930_v49 = vpack.c.bf16 %v7897_v46, %v7896_v40  ;;  %v7899_v57 = vld [vmem:[%s20048_s1 + $0x348] sm:$0xff] }
  0xa5   :  { %13624 = vmatprep.subr.bf16.mxu0 %v20117_v3  ;;  %14224 = vmatprep.subr.bf16.mxu1 %v20117_v3  ;;  %v7903_v40 = vld [vmem:[%s20048_s1 + $0x368] sm:$0xff] }
  0xa6   :  { %10138 = vmatprep.mubr.msk.f32.mxu0 %vm16198_vm0, %v20055_v6  ;;  %11013 = vmatprep.mubr.msk.f32.mxu1 %vm16198_vm0, %v20055_v6  ;;  %v16966_v46 = vpack.c.bf16 %v7903_v40, %v7902_v28  ;;  %v7907_v28 = vld [vmem:[%s20048_s1 + $0x388] sm:$0xff] }
  0xa7   :  { %v16990_v40 = vpack.c.bf16 %v7907_v28, %v7906_v17  ;;  %v7910_v28 = vld [vmem:[%s20048_s1 + $0x3a0] sm:$0xff] }
  0xa8   :  { %13626 = vmatpush3.bf16.msra.mxu0 %v16793_v59  ;;  %14226 = vmatpush3.bf16.msra.mxu1 %v16793_v59  ;;  %20345 = vst [vmem:[#allocation5_spill] sm:$0xff] %v16966_v46 }
  0xa9   :  { %13627 = vmatprep.subr.bf16.mxu0 %v20117_v3  ;;  %14227 = vmatprep.subr.bf16.mxu1 %v20117_v3  ;;  %20347 = vst [vmem:[#allocation7_spill] sm:$0xff] %v16990_v40 }
  0xac   :  { %13629 = vmatpush3.bf16.msra.mxu0 %v16809_v62  ;;  %14229 = vmatpush3.bf16.msra.mxu1 %v16809_v62 }
  0xad   :  { %13630 = vmatprep.subr.bf16.mxu0 %v20117_v3  ;;  %14230 = vmatprep.subr.bf16.mxu1 %v20117_v3 }
  0xb0   :  { %13632 = vmatpush3.bf16.msra.mxu0 %v16821_v14  ;;  %14232 = vmatpush3.bf16.msra.mxu1 %v16821_v14 }
  0xb1   :  { %13633 = vmatprep.subr.bf16.mxu0 %v20117_v3  ;;  %14233 = vmatprep.subr.bf16.mxu1 %v20117_v3 }
  0xb4   :  { %13635 = vmatpush3.bf16.msra.mxu0 %v16833_v23  ;;  %14235 = vmatpush3.bf16.msra.mxu1 %v16833_v23 }
  0xb5   :  { %13636 = vmatprep.subr.bf16.mxu0 %v20117_v3  ;;  %14236 = vmatprep.subr.bf16.mxu1 %v20117_v3 }
  0xb8   :  { %13638 = vmatpush3.bf16.msra.mxu0 %v16845_v30  ;;  %14238 = vmatpush3.bf16.msra.mxu1 %v16845_v30 }
  0xb9   :  { %13639 = vmatprep.subr.bf16.mxu0 %v20117_v3  ;;  %14239 = vmatprep.subr.bf16.mxu1 %v20117_v3 }
  0xbc   :  { %13641 = vmatpush3.bf16.msra.mxu0 %v16857_v41  ;;  %14241 = vmatpush3.bf16.msra.mxu1 %v16857_v41 }
  0xbd   :  { %13642 = vmatprep.subr.bf16.mxu0 %v20117_v3  ;;  %14242 = vmatprep.subr.bf16.mxu1 %v20117_v3 }
  0xc0   :  { %13644 = vmatpush3.bf16.msra.mxu0 %v16869_v53  ;;  %14244 = vmatpush3.bf16.msra.mxu1 %v16869_v53 }
  0xc1   :  { %13645 = vmatprep.subr.bf16.mxu0 %v20117_v3  ;;  %14245 = vmatprep.subr.bf16.mxu1 %v20117_v3 }
  0xc3   :  { %10139 = vmatmul.mubr.f32.vlgmr.msra.gmra.mrb[0].mxu0 %v470_v63  ;;  %11014 = vmatmul.mubr.f32.vlgmr.msra.gmra.mrb[0].mxu1 %v16889_v8  ;;  %v16942_v63 = vpack.c.bf16 %v7899_v57, %v7898_v54  ;;  %v7904_v54 = vld [vmem:[%s20048_s1 + $0x370] sm:$0xff]  ;;  %v7905_v57 = vld [vmem:[%s20048_s1 + $0x378] sm:$0xff] }
  0xc4   :  { %13647 = vmatpush3.bf16.msra.mxu0 %v16884_v1  ;;  %14247 = vmatpush3.bf16.msra.mxu1 %v16884_v1  ;;  %v16978_v9 = vpack.c.bf16 %v7905_v57, %v7904_v54  ;;  %v16995_v54 = vld [vmem:[%s20047_s0 + $0x10] sm:$0x3] }
  0xc5   :  { %13648 = vmatprep.subr.bf16.mxu0 %v20117_v3  ;;  %14248 = vmatprep.subr.bf16.mxu1 %v20117_v3  ;;  %v7908_v57 = vld [vmem:[%s20048_s1 + $0x390] sm:$0xff] }
  0xc6   :  { %10173 = vmatprep.mubr.msk.f32.mxu0 %vm16198_vm0, %v20055_v6  ;;  %11048 = vmatprep.mubr.msk.f32.mxu1 %vm16198_vm0, %v20055_v6  ;;  %20346 = vst [vmem:[#allocation6_spill] sm:$0xff] %v16978_v9  ;;  %v7909_v6 = vld [vmem:[%s20048_s1 + $0x398] sm:$0xff] }
  0xc7   :  { %v17009_v17 = vpack.c.bf16 %v7909_v6, %v7908_v57  ;;  %v7912_v57 = vld [vmem:[%s20048_s1 + $0x3b0] sm:$0xff] }
  0xc8   :  { %13650 = vmatpush3.bf16.msra.mxu0 %v16902_v21  ;;  %14250 = vmatpush3.bf16.msra.mxu1 %v16902_v21 }
  0xc9   :  { %13651 = vmatprep.subr.bf16.mxu0 %v20117_v3  ;;  %14251 = vmatprep.subr.bf16.mxu1 %v20117_v3  ;;  %20348 = vst [vmem:[#allocation8_spill] sm:$0xff] %v17009_v17 }
  0xcc   :  { %13653 = vmatpush3.bf16.msra.mxu0 %v16918_v35  ;;  %14253 = vmatpush3.bf16.msra.mxu1 %v16918_v35 }
  0xcd   :  { %13654 = vmatprep.subr.bf16.mxu0 %v20117_v3  ;;  %14254 = vmatprep.subr.bf16.mxu1 %v20117_v3 }
  0xd0   :  { %13656 = vmatpush3.bf16.msra.mxu0 %v16930_v49  ;;  %14256 = vmatpush3.bf16.msra.mxu1 %v16930_v49 }
  0xd1   :  { %13657 = vmatprep.subr.bf16.mxu0 %v20117_v3  ;;  %14257 = vmatprep.subr.bf16.mxu1 %v20117_v3 }
  0xd4   :  { %13659 = vmatpush3.bf16.msra.mxu0 %v16942_v63  ;;  %14259 = vmatpush3.bf16.msra.mxu1 %v16942_v63 }
  0xd5   :  { %13660 = vmatprep.subr.bf16.mxu0 %v20117_v3  ;;  %14260 = vmatprep.subr.bf16.mxu1 %v20117_v3 }
  0xd8   :  { %13662 = vmatpush3.bf16.msra.mxu0 %v16954_v27  ;;  %14262 = vmatpush3.bf16.msra.mxu1 %v16954_v27 }
  0xd9   :  { %13663 = vmatprep.subr.bf16.mxu0 %v20117_v3  ;;  %14263 = vmatprep.subr.bf16.mxu1 %v20117_v3 }
  0xdc   :  { %13665 = vmatpush3.bf16.msra.mxu0 %v16966_v46  ;;  %14265 = vmatpush3.bf16.msra.mxu1 %v16966_v46 }
  0xdd   :  { %13666 = vmatprep.subr.bf16.mxu0 %v20117_v3  ;;  %14266 = vmatprep.subr.bf16.mxu1 %v20117_v3 }
  0xe0   :  { %13668 = vmatpush3.bf16.msra.mxu0 %v16978_v9  ;;  %14268 = vmatpush3.bf16.msra.mxu1 %v16978_v9  ;;  %v20349_v9 = vmov 0.0  }
  0xe1   :  { %13669 = vmatprep.subr.bf16.mxu0 %v20117_v3  ;;  %14269 = vmatprep.subr.bf16.mxu1 %v20117_v3 }
  0xe3   :  { %10174 = vmatmul.mubr.f32.vlgmr.msra.gmra.mrb[0].mxu0 %v16889_v8  ;;  %11049 = vmatmul.mubr.f32.vlgmr.msra.gmra.mrb[0].mxu1 %v16995_v54  ;;  %v7911_v8 = vld [vmem:[%s20048_s1 + $0x3a8] sm:$0xff] }
  0xe4   :  { %13671 = vmatpush3.bf16.msra.mxu0 %v16990_v40  ;;  %14271 = vmatpush3.bf16.msra.mxu1 %v16990_v40  ;;  %v17025_v6 = vpack.c.bf16 %v7911_v8, %v7910_v28  ;;  %v7913_v40 = vld [vmem:[%s20048_s1 + $0x3b8] sm:$0xff]  ;;  %v7914_v28 = vld [vmem:[%s20048_s1 + $0x3c0] sm:$0xff]  ;;  %v7915_v8 = vld [vmem:[%s20048_s1 + $0x3c8] sm:$0xff] }
  0xe5   :  { %13672 = vmatprep.subr.bf16.mxu0 %v20117_v3  ;;  %14272 = vmatprep.subr.bf16.mxu1 %v20117_v3  ;;  %v17037_v46 = vpack.c.bf16 %v7913_v40, %v7912_v57  ;;  %v7916_v40 = vld [vmem:[%s20048_s1 + $0x3d0] sm:$0xff]  ;;  %v7917_v57 = vld [vmem:[%s20048_s1 + $0x3d8] sm:$0xff] }
  0xe6   :  { %10208 = vmatprep.mubr.msk.f32.mxu0 %vm16198_vm0, %v20349_v9  ;;  %11083 = vmatprep.mubr.msk.f32.mxu1 %vm16198_vm0, %v20349_v9  ;;  %20350 = vst [vmem:[#allocation9_spill] sm:$0xff] %v17025_v6 }
  0xe7   :  { %20351 = vst [vmem:[#allocation10_spill] sm:$0xff] %v17037_v46 }
  0xe8   :  { %13674 = vmatpush3.bf16.msra.mxu0 %v17009_v17  ;;  %14274 = vmatpush3.bf16.msra.mxu1 %v17009_v17  ;;  %v17049_v17 = vpack.c.bf16 %v7915_v8, %v7914_v28  ;;  %v7918_v28 = vld [vmem:[%s20048_s1 + $0x3e0] sm:$0xff]  ;;  %v7919_v8 = vld [vmem:[%s20048_s1 + $0x3e8] sm:$0xff] }
  0xe9   :  { %13675 = vmatprep.subr.bf16.mxu0 %v20117_v3  ;;  %14275 = vmatprep.subr.bf16.mxu1 %v20117_v3 }
  0xea   :  { %20352 = vst [vmem:[#allocation11_spill] sm:$0xff] %v17049_v17 }
  0xec   :  { %13677 = vmatpush3.bf16.msra.mxu0 %v17025_v6  ;;  %14277 = vmatpush3.bf16.msra.mxu1 %v17025_v6  ;;  %v17061_v6 = vpack.c.bf16 %v7917_v57, %v7916_v40  ;;  %v7920_v40 = vld [vmem:[%s20048_s1 + $0x3f0] sm:$0xff]  ;;  %v7921_v57 = vld [vmem:[%s20048_s1 + $0x3f8] sm:$0xff] }
  0xed   :  { %13678 = vmatprep.subr.bf16.mxu0 %v20117_v3  ;;  %14278 = vmatprep.subr.bf16.mxu1 %v20117_v3 }
  0xee   :  { %20353 = vst [vmem:[#allocation12_spill] sm:$0xff] %v17061_v6 }
  0xf0   :  { %13680 = vmatpush3.bf16.msra.mxu0 %v17037_v46  ;;  %14280 = vmatpush3.bf16.msra.mxu1 %v17037_v46  ;;  %v17073_v46 = vpack.c.bf16 %v7919_v8, %v7918_v28  ;;  %v7922_v28 = vld [vmem:[%s20048_s1 + $0x400] sm:$0xff]  ;;  %v7923_v8 = vld [vmem:[%s20048_s1 + $0x408] sm:$0xff] }
  0xf1   :  { %13681 = vmatprep.subr.bf16.mxu0 %v20117_v3  ;;  %14281 = vmatprep.subr.bf16.mxu1 %v20117_v3 }
  0xf2   :  { %20354 = vst [vmem:[#allocation13_spill] sm:$0xff] %v17073_v46 }
  0xf4   :  { %13683 = vmatpush3.bf16.msra.mxu0 %v17049_v17  ;;  %14283 = vmatpush3.bf16.msra.mxu1 %v17049_v17  ;;  %v17085_v17 = vpack.c.bf16 %v7921_v57, %v7920_v40  ;;  %v17102_v40 = vld [vmem:[%s20047_s0 + $0x12] sm:$0x3] }
  0xf5   :  { %13684 = vmatprep.subr.bf16.mxu0 %v20117_v3  ;;  %14284 = vmatprep.subr.bf16.mxu1 %v20117_v3  ;;  %v7924_v57 = vld [vmem:[%s20048_s1 + $0x410] sm:$0xff] }
  0xf6   :  { %20355 = vst [vmem:[#allocation14_spill] sm:$0xff] %v17085_v17 }
  0xf8   :  { %13686 = vmatpush3.bf16.msra.mxu0 %v17061_v6  ;;  %14286 = vmatpush3.bf16.msra.mxu1 %v17061_v6  ;;  %v17097_v6 = vpack.c.bf16 %v7923_v8, %v7922_v28  ;;  %v7926_v8 = vld [vmem:[%s20048_s1 + $0x420] sm:$0xff] }
  0xf9   :  { %13687 = vmatprep.subr.bf16.mxu0 %v20117_v3  ;;  %14287 = vmatprep.subr.bf16.mxu1 %v20117_v3 }
  0xfa   :  { %20356 = vst [vmem:[#allocation15_spill] sm:$0xff] %v17097_v6 }
  0xfc   :  { %13689 = vmatpush3.bf16.msra.mxu0 %v17073_v46  ;;  %14289 = vmatpush3.bf16.msra.mxu1 %v17073_v46  ;;  %v7925_v46 = vld [vmem:[%s20048_s1 + $0x418] sm:$0xff] }
  0xfd   :  { %13690 = vmatprep.subr.bf16.mxu0 %v20117_v3  ;;  %14290 = vmatprep.subr.bf16.mxu1 %v20117_v3  ;;  %v17116_v28 = vpack.c.bf16 %v7925_v46, %v7924_v57  ;;  %v7928_v57 = vld [vmem:[%s20048_s1 + $0x430] sm:$0xff] }
  0xff   :  { %20357 = vst [vmem:[#allocation16_spill] sm:$0xff] %v17116_v28 }
 0x100   :  { %13692 = vmatpush3.bf16.msra.mxu0 %v17085_v17  ;;  %14292 = vmatpush3.bf16.msra.mxu1 %v17085_v17 }
 0x101   :  { %13693 = vmatprep.subr.bf16.mxu0 %v20117_v3  ;;  %14293 = vmatprep.subr.bf16.mxu1 %v20117_v3 }
 0x103   :  { %10209 = vmatmul.mubr.f32.vlgmr.msra.gmra.mrb[0].mxu0 %v16995_v54  ;;  %11084 = vmatmul.mubr.f32.vlgmr.msra.gmra.mrb[0].mxu1 %v17102_v40  ;;  %v7927_v54 = vld [vmem:[%s20048_s1 + $0x428] sm:$0xff] }
 0x104   :  { %13695 = vmatpush3.bf16.msra.mxu0 %v17097_v6  ;;  %14295 = vmatpush3.bf16.msra.mxu1 %v17097_v6  ;;  %v17132_v46 = vpack.c.bf16 %v7927_v54, %v7926_v8  ;;  %v7929_v6 = vld [vmem:[%s20048_s1 + $0x438] sm:$0xff]  ;;  %v7930_v8 = vld [vmem:[%s20048_s1 + $0x440] sm:$0xff]  ;;  %v7931_v54 = vld [vmem:[%s20048_s1 + $0x448] sm:$0xff] }
 0x105   :  { %13696 = vmatprep.subr.bf16.mxu0 %v20117_v3  ;;  %14296 = vmatprep.subr.bf16.mxu1 %v20117_v3  ;;  %v17144_v17 = vpack.c.bf16 %v7929_v6, %v7928_v57  ;;  %v7932_v6 = vld [vmem:[%s20048_s1 + $0x450] sm:$0xff]  ;;  %v7933_v57 = vld [vmem:[%s20048_s1 + $0x458] sm:$0xff] }
 0x106   :  { %10243 = vmatprep.mubr.msk.f32.mxu0 %vm16198_vm0, %v20349_v9  ;;  %11118 = vmatprep.mubr.msk.f32.mxu1 %vm16198_vm0, %v20349_v9  ;;  %20358 = vst [vmem:[#allocation17_spill] sm:$0xff] %v17132_v46 }
 0x107   :  { %20359 = vst [vmem:[#allocation18_spill] sm:$0xff] %v17144_v17 }
 0x108   :  { %13698 = vmatpush3.bf16.msra.mxu0 %v17116_v28  ;;  %14298 = vmatpush3.bf16.msra.mxu1 %v17116_v28  ;;  %v17156_v28 = vpack.c.bf16 %v7931_v54, %v7930_v8  ;;  %v7934_v8 = vld [vmem:[%s20048_s1 + $0x460] sm:$0xff]  ;;  %v7935_v54 = vld [vmem:[%s20048_s1 + $0x468] sm:$0xff] }
 0x109   :  { %13699 = vmatprep.subr.bf16.mxu0 %v20117_v3  ;;  %14299 = vmatprep.subr.bf16.mxu1 %v20117_v3 }
 0x10a   :  { %20360 = vst [vmem:[#allocation19_spill] sm:$0xff] %v17156_v28 }
 0x10c   :  { %13701 = vmatpush3.bf16.msra.mxu0 %v17132_v46  ;;  %14301 = vmatpush3.bf16.msra.mxu1 %v17132_v46  ;;  %v17168_v46 = vpack.c.bf16 %v7933_v57, %v7932_v6  ;;  %v7936_v6 = vld [vmem:[%s20048_s1 + $0x470] sm:$0xff]  ;;  %v7937_v57 = vld [vmem:[%s20048_s1 + $0x478] sm:$0xff] }
 0x10d   :  { %13702 = vmatprep.subr.bf16.mxu0 %v20117_v3  ;;  %14302 = vmatprep.subr.bf16.mxu1 %v20117_v3 }
 0x10e   :  { %20361 = vst [vmem:[#allocation20_spill] sm:$0xff] %v17168_v46 }
 0x110   :  { %13704 = vmatpush3.bf16.msra.mxu0 %v17144_v17  ;;  %14304 = vmatpush3.bf16.msra.mxu1 %v17144_v17  ;;  %v17180_v17 = vpack.c.bf16 %v7935_v54, %v7934_v8  ;;  %v7938_v8 = vld [vmem:[%s20048_s1 + $0x480] sm:$0xff]  ;;  %v7939_v54 = vld [vmem:[%s20048_s1 + $0x488] sm:$0xff] }
 0x111   :  { %13705 = vmatprep.subr.bf16.mxu0 %v20117_v3  ;;  %14305 = vmatprep.subr.bf16.mxu1 %v20117_v3 }
 0x112   :  { %20362 = vst [vmem:[#allocation21_spill] sm:$0xff] %v17180_v17 }
 0x114   :  { %13707 = vmatpush3.bf16.msra.mxu0 %v17156_v28  ;;  %14307 = vmatpush3.bf16.msra.mxu1 %v17156_v28  ;;  %v17192_v28 = vpack.c.bf16 %v7937_v57, %v7936_v6  ;;  %v17209_v6 = vld [vmem:[%s20047_s0 + $0x14] sm:$0x3] }
 0x115   :  { %13708 = vmatprep.subr.bf16.mxu0 %v20117_v3  ;;  %14308 = vmatprep.subr.bf16.mxu1 %v20117_v3  ;;  %v7940_v57 = vld [vmem:[%s20048_s1 + $0x490] sm:$0xff] }
 0x116   :  { %20363 = vst [vmem:[#allocation22_spill] sm:$0xff] %v17192_v28 }
 0x118   :  { %13710 = vmatpush3.bf16.msra.mxu0 %v17168_v46  ;;  %14310 = vmatpush3.bf16.msra.mxu1 %v17168_v46  ;;  %v17204_v46 = vpack.c.bf16 %v7939_v54, %v7938_v8  ;;  %v7942_v54 = vld [vmem:[%s20048_s1 + $0x4a0] sm:$0xff] }
 0x119   :  { %13711 = vmatprep.subr.bf16.mxu0 %v20117_v3  ;;  %14311 = vmatprep.subr.bf16.mxu1 %v20117_v3 }
 0x11a   :  { %20364 = vst [vmem:[#allocation23_spill] sm:$0xff] %v17204_v46 }
 0x11c   :  { %13713 = vmatpush3.bf16.msra.mxu0 %v17180_v17  ;;  %14313 = vmatpush3.bf16.msra.mxu1 %v17180_v17  ;;  %v7941_v17 = vld [vmem:[%s20048_s1 + $0x498] sm:$0xff] }
 0x11d   :  { %13714 = vmatprep.subr.bf16.mxu0 %v20117_v3  ;;  %14314 = vmatprep.subr.bf16.mxu1 %v20117_v3  ;;  %v17223_v8 = vpack.c.bf16 %v7941_v17, %v7940_v57  ;;  %v7944_v57 = vld [vmem:[%s20048_s1 + $0x4b0] sm:$0xff] }
 0x11f   :  { %20365 = vst [vmem:[#allocation24_spill] sm:$0xff] %v17223_v8 }
 0x120   :  { %13716 = vmatpush3.bf16.msra.mxu0 %v17192_v28  ;;  %14316 = vmatpush3.bf16.msra.mxu1 %v17192_v28 }
 0x121   :  { %13717 = vmatprep.subr.bf16.mxu0 %v20117_v3  ;;  %14317 = vmatprep.subr.bf16.mxu1 %v20117_v3 }
 0x123   :  { %10244 = vmatmul.mubr.f32.vlgmr.msra.gmra.mrb[0].mxu0 %v17102_v40  ;;  %11119 = vmatmul.mubr.f32.vlgmr.msra.gmra.mrb[0].mxu1 %v17209_v6  ;;  %v7943_v40 = vld [vmem:[%s20048_s1 + $0x4a8] sm:$0xff] }
 0x124   :  { %13719 = vmatpush3.bf16.msra.mxu0 %v17204_v46  ;;  %14319 = vmatpush3.bf16.msra.mxu1 %v17204_v46  ;;  %v17239_v17 = vpack.c.bf16 %v7943_v40, %v7942_v54  ;;  %v7945_v46 = vld [vmem:[%s20048_s1 + $0x4b8] sm:$0xff]  ;;  %v7946_v54 = vld [vmem:[%s20048_s1 + $0x4c0] sm:$0xff]  ;;  %v7947_v40 = vld [vmem:[%s20048_s1 + $0x4c8] sm:$0xff] }
 0x125   :  { %13720 = vmatprep.subr.bf16.mxu0 %v20117_v3  ;;  %14320 = vmatprep.subr.bf16.mxu1 %v20117_v3  ;;  %v17251_v28 = vpack.c.bf16 %v7945_v46, %v7944_v57  ;;  %v7948_v46 = vld [vmem:[%s20048_s1 + $0x4d0] sm:$0xff]  ;;  %v7949_v57 = vld [vmem:[%s20048_s1 + $0x4d8] sm:$0xff] }
 0x126   :  { %10278 = vmatprep.mubr.msk.f32.mxu0 %vm16198_vm0, %v20349_v9  ;;  %11153 = vmatprep.mubr.msk.f32.mxu1 %vm16198_vm0, %v20349_v9  ;;  %20366 = vst [vmem:[#allocation25_spill] sm:$0xff] %v17239_v17 }
 0x127   :  { %20367 = vst [vmem:[#allocation26_spill] sm:$0xff] %v17251_v28 }
 0x128   :  { %13722 = vmatpush3.bf16.msra.mxu0 %v17223_v8  ;;  %14322 = vmatpush3.bf16.msra.mxu1 %v17223_v8  ;;  %v17263_v8 = vpack.c.bf16 %v7947_v40, %v7946_v54  ;;  %v7950_v54 = vld [vmem:[%s20048_s1 + $0x4e0] sm:$0xff]  ;;  %v7951_v40 = vld [vmem:[%s20048_s1 + $0x4e8] sm:$0xff] }
 0x129   :  { %13723 = vmatprep.subr.bf16.mxu0 %v20117_v3  ;;  %14323 = vmatprep.subr.bf16.mxu1 %v20117_v3 }
 0x12a   :  { %20368 = vst [vmem:[#allocation27_spill] sm:$0xff] %v17263_v8 }
 0x12c   :  { %13725 = vmatpush3.bf16.msra.mxu0 %v17239_v17  ;;  %14325 = vmatpush3.bf16.msra.mxu1 %v17239_v17  ;;  %v17275_v17 = vpack.c.bf16 %v7949_v57, %v7948_v46  ;;  %v7952_v46 = vld [vmem:[%s20048_s1 + $0x4f0] sm:$0xff]  ;;  %v7953_v57 = vld [vmem:[%s20048_s1 + $0x4f8] sm:$0xff] }
 0x12d   :  { %13726 = vmatprep.subr.bf16.mxu0 %v20117_v3  ;;  %14326 = vmatprep.subr.bf16.mxu1 %v20117_v3 }
 0x12e   :  { %20369 = vst [vmem:[#allocation28_spill] sm:$0xff] %v17275_v17 }
 0x130   :  { %13728 = vmatpush3.bf16.msra.mxu0 %v17251_v28  ;;  %14328 = vmatpush3.bf16.msra.mxu1 %v17251_v28  ;;  %v17287_v28 = vpack.c.bf16 %v7951_v40, %v7950_v54  ;;  %v7954_v54 = vld [vmem:[%s20048_s1 + $0x500] sm:$0xff]  ;;  %v7955_v40 = vld [vmem:[%s20048_s1 + $0x508] sm:$0xff] }
 0x131   :  { %13729 = vmatprep.subr.bf16.mxu0 %v20117_v3  ;;  %14329 = vmatprep.subr.bf16.mxu1 %v20117_v3 }
 0x132   :  { %20370 = vst [vmem:[#allocation29_spill] sm:$0xff] %v17287_v28 }
 0x134   :  { %13731 = vmatpush3.bf16.msra.mxu0 %v17263_v8  ;;  %14331 = vmatpush3.bf16.msra.mxu1 %v17263_v8  ;;  %v17299_v8 = vpack.c.bf16 %v7953_v57, %v7952_v46  ;;  %v2888_v46 = vld [vmem:[%s20047_s0 + $0x16] sm:$0x3] }
 0x135   :  { %13732 = vmatprep.subr.bf16.mxu0 %v20117_v3  ;;  %14332 = vmatprep.subr.bf16.mxu1 %v20117_v3  ;;  %v7956_v57 = vld [vmem:[%s20048_s1 + $0x510] sm:$0xff] }
 0x136   :  { %20371 = vst [vmem:[#allocation30_spill] sm:$0xff] %v17299_v8 }
 0x138   :  { %13734 = vmatpush3.bf16.msra.mxu0 %v17275_v17  ;;  %14334 = vmatpush3.bf16.msra.mxu1 %v17275_v17  ;;  %v17311_v17 = vpack.c.bf16 %v7955_v40, %v7954_v54  ;;  %v7958_v40 = vld [vmem:[%s20048_s1 + $0x520] sm:$0xff] }
 0x139   :  { %13735 = vmatprep.subr.bf16.mxu0 %v20117_v3  ;;  %14335 = vmatprep.subr.bf16.mxu1 %v20117_v3 }
 0x13a   :  { %20372 = vst [vmem:[#allocation31_spill] sm:$0xff] %v17311_v17 }
 0x13c   :  { %13737 = vmatpush3.bf16.msra.mxu0 %v17287_v28  ;;  %14337 = vmatpush3.bf16.msra.mxu1 %v17287_v28  ;;  %v7957_v28 = vld [vmem:[%s20048_s1 + $0x518] sm:$0xff] }
 0x13d   :  { %13738 = vmatprep.subr.bf16.mxu0 %v20117_v3  ;;  %14338 = vmatprep.subr.bf16.mxu1 %v20117_v3  ;;  %v17327_v54 = vpack.c.bf16 %v7957_v28, %v7956_v57 }
 0x13f   :  { %20373 = vst [vmem:[#allocation32_spill] sm:$0xff] %v17327_v54 }
 0x140   :  { %13740 = vmatpush3.bf16.msra.mxu0 %v17299_v8  ;;  %14340 = vmatpush3.bf16.msra.mxu1 %v17299_v8  ;;  %v7959_v8 = vld [vmem:[%s20048_s1 + $0x528] sm:$0xff] }
 0x141   :  { %13741 = vmatprep.subr.bf16.mxu0 %v20117_v3  ;;  %14341 = vmatprep.subr.bf16.mxu1 %v20117_v3  ;;  %v17343_v28 = vpack.c.bf16 %v7959_v8, %v7958_v40  ;;  %v7962_v8 = vld [vmem:[%s20048_s1 + $0x540] sm:$0xff]  ;;  %v7963_v40 = vld [vmem:[%s20048_s1 + $0x548] sm:$0xff] }
 0x143   :  { %10279 = vmatmul.mubr.f32.vlgmr.msra.gmra.mrb[0].mxu0 %v17209_v6  ;;  %11154 = vmatmul.mubr.f32.vlgmr.msra.gmra.mrb[0].mxu1 %v2888_v46  ;;  %20374 = vst [vmem:[#allocation33_spill] sm:$0xff] %v17343_v28  ;;  %v7960_v6 = vld [vmem:[%s20048_s1 + $0x530] sm:$0xff]  ;;  %v7961_v46 = vld [vmem:[%s20048_s1 + $0x538] sm:$0xff] }
 0x144   :  { %13743 = vmatpush3.bf16.msra.mxu0 %v17311_v17  ;;  %14343 = vmatpush3.bf16.msra.mxu1 %v17311_v17  ;;  %v17355_v57 = vpack.c.bf16 %v7961_v46, %v7960_v6  ;;  %v7964_v6 = vld [vmem:[%s20048_s1 + $0x550] sm:$0xff]  ;;  %v7965_v46 = vld [vmem:[%s20048_s1 + $0x558] sm:$0xff] }
 0x145   :  { %13744 = vmatprep.subr.bf16.mxu0 %v20117_v3  ;;  %14344 = vmatprep.subr.bf16.mxu1 %v20117_v3 }
 0x146   :  { %10313 = vmatprep.mubr.msk.f32.mxu0 %vm16198_vm0, %v20349_v9  ;;  %11188 = vmatprep.mubr.msk.f32.mxu1 %vm16198_vm0, %v20349_v9  ;;  %20375 = vst [vmem:[#allocation34_spill] sm:$0xff] %v17355_v57 }
 0x148   :  { %13746 = vmatpush3.bf16.msra.mxu0 %v17327_v54  ;;  %14346 = vmatpush3.bf16.msra.mxu1 %v17327_v54  ;;  %v17367_v54 = vpack.c.bf16 %v7963_v40, %v7962_v8  ;;  %v7966_v8 = vld [vmem:[%s20048_s1 + $0x560] sm:$0xff]  ;;  %v7967_v40 = vld [vmem:[%s20048_s1 + $0x568] sm:$0xff] }
 0x149   :  { %13747 = vmatprep.subr.bf16.mxu0 %v20117_v3  ;;  %14347 = vmatprep.subr.bf16.mxu1 %v20117_v3 }
 0x14a   :  { %20376 = vst [vmem:[#allocation35_spill] sm:$0xff] %v17367_v54 }
 0x14c   :  { %13749 = vmatpush3.bf16.msra.mxu0 %v17343_v28  ;;  %14349 = vmatpush3.bf16.msra.mxu1 %v17343_v28  ;;  %v17379_v28 = vpack.c.bf16 %v7965_v46, %v7964_v6  ;;  %v7968_v6 = vld [vmem:[%s20048_s1 + $0x570] sm:$0xff]  ;;  %v7969_v46 = vld [vmem:[%s20048_s1 + $0x578] sm:$0xff] }
 0x14d   :  { %13750 = vmatprep.subr.bf16.mxu0 %v20117_v3  ;;  %14350 = vmatprep.subr.bf16.mxu1 %v20117_v3 }
 0x14e   :  { %20377 = vst [vmem:[#allocation36_spill] sm:$0xff] %v17379_v28 }
 0x150   :  { %13752 = vmatpush3.bf16.msra.mxu0 %v17355_v57  ;;  %14352 = vmatpush3.bf16.msra.mxu1 %v17355_v57  ;;  %v17391_v57 = vpack.c.bf16 %v7967_v40, %v7966_v8  ;;  %v7970_v8 = vld [vmem:[%s20048_s1 + $0x580] sm:$0xff]  ;;  %v7971_v40 = vld [vmem:[%s20048_s1 + $0x588] sm:$0xff] }
 0x151   :  { %13753 = vmatprep.subr.bf16.mxu0 %v20117_v3  ;;  %14353 = vmatprep.subr.bf16.mxu1 %v20117_v3 }
 0x152   :  { %20378 = vst [vmem:[#allocation37_spill] sm:$0xff] %v17391_v57 }
 0x154   :  { %13755 = vmatpush3.bf16.msra.mxu0 %v17367_v54  ;;  %14355 = vmatpush3.bf16.msra.mxu1 %v17367_v54  ;;  %v17403_v54 = vpack.c.bf16 %v7969_v46, %v7968_v6  ;;  %v915_v6 = vld [vmem:[%s20047_s0 + $0x18] sm:$0x3]  ;;  %v17418_v46 = vpack.c.bf16 %v7971_v40, %v7970_v8  ;;  %v7974_v40 = vld [vmem:[%s20048_s1 + $0x5a0] sm:$0xff] }
 0x155   :  { %13756 = vmatprep.subr.bf16.mxu0 %v20117_v3  ;;  %14356 = vmatprep.subr.bf16.mxu1 %v20117_v3 }
 0x156   :  { %20379 = vst [vmem:[#allocation38_spill] sm:$0xff] %v17403_v54  ;;  %20380 = vst [vmem:[#allocation39_spill] sm:$0xff] %v17418_v46 }
 0x158   :  { %13758 = vmatpush3.bf16.msra.mxu0 %v17379_v28  ;;  %14358 = vmatpush3.bf16.msra.mxu1 %v17379_v28  ;;  %v7972_v28 = vld [vmem:[%s20048_s1 + $0x590] sm:$0xff] }
 0x159   :  { %13759 = vmatprep.subr.bf16.mxu0 %v20117_v3  ;;  %14359 = vmatprep.subr.bf16.mxu1 %v20117_v3 }
 0x15c   :  { %13761 = vmatpush3.bf16.msra.mxu0 %v17391_v57  ;;  %14361 = vmatpush3.bf16.msra.mxu1 %v17391_v57  ;;  %v20381_v57 = vmov 0.0|0.0  }
 0x15d   :  { %13762 = vmatprep.subr.bf16.mxu0 %v20117_v3  ;;  %14362 = vmatprep.subr.bf16.mxu1 %v20117_v3  ;;  %v17423_v3 = vld [vmem:[%s20047_s0 + $0x1a] sm:$0x3] }
 0x160   :  { %13764 = vmatpush3.bf16.msra.mxu0 %v17403_v54  ;;  %14364 = vmatpush3.bf16.msra.mxu1 %v17403_v54  ;;  %v7973_v54 = vld [vmem:[%s20048_s1 + $0x598] sm:$0xff] }
 0x161   :  { %13765 = vmatprep.subr.bf16.mxu0 %v20381_v57  ;;  %14365 = vmatprep.subr.bf16.mxu1 %v20381_v57  ;;  %v17436_v8 = vpack.c.bf16 %v7973_v54, %v7972_v28  ;;  %v7976_v28 = vld [vmem:[%s20048_s1 + $0x5b0] sm:$0xff] }
 0x163   :  { %10314 = vmatmul.mubr.f32.vlgmr.msra.gmra.mrb[0].mxu0 %v915_v6  ;;  %11189 = vmatmul.mubr.f32.vlgmr.msra.gmra.mrb[0].mxu1 %v17423_v3  ;;  %20382 = vst [vmem:[#allocation40_spill] sm:$0xff] %v17436_v8  ;;  %v7975_v6 = vld [vmem:[%s20048_s1 + $0x5a8] sm:$0xff] }
 0x164   :  { %13767 = vmatpush3.bf16.msra.mxu0 %v17418_v46  ;;  %14367 = vmatpush3.bf16.msra.mxu1 %v17418_v46  ;;  %v17452_v54 = vpack.c.bf16 %v7975_v6, %v7974_v40  ;;  %v7977_v46 = vld [vmem:[%s20048_s1 + $0x5b8] sm:$0xff]  ;;  %v7978_v40 = vld [vmem:[%s20048_s1 + $0x5c0] sm:$0xff]  ;;  %v7979_v6 = vld [vmem:[%s20048_s1 + $0x5c8] sm:$0xff] }
 0x165   :  { %13768 = vmatprep.subr.bf16.mxu0 %v20381_v57  ;;  %14368 = vmatprep.subr.bf16.mxu1 %v20381_v57  ;;  %v17464_v17 = vpack.c.bf16 %v7977_v46, %v7976_v28  ;;  %v7980_v46 = vld [vmem:[%s20048_s1 + $0x5d0] sm:$0xff]  ;;  %v7981_v28 = vld [vmem:[%s20048_s1 + $0x5d8] sm:$0xff] }
 0x166   :  { %10348 = vmatprep.mubr.msk.f32.mxu0 %vm16198_vm0, %v20349_v9  ;;  %11223 = vmatprep.mubr.msk.f32.mxu1 %vm16198_vm0, %v20349_v9  ;;  %20383 = vst [vmem:[#allocation41_spill] sm:$0xff] %v17452_v54 }
 0x167   :  { %20384 = vst [vmem:[#allocation42_spill] sm:$0xff] %v17464_v17 }
 0x168   :  { %13770 = vmatpush3.bf16.msra.mxu0 %v17436_v8  ;;  %14370 = vmatpush3.bf16.msra.mxu1 %v17436_v8  ;;  %v17476_v8 = vpack.c.bf16 %v7979_v6, %v7978_v40  ;;  %v7982_v40 = vld [vmem:[%s20048_s1 + $0x5e0] sm:$0xff]  ;;  %v7983_v6 = vld [vmem:[%s20048_s1 + $0x5e8] sm:$0xff] }
 0x169   :  { %13771 = vmatprep.subr.bf16.mxu0 %v20381_v57  ;;  %14371 = vmatprep.subr.bf16.mxu1 %v20381_v57 }
 0x16a   :  { %20385 = vst [vmem:[#allocation43_spill] sm:$0xff] %v17476_v8 }
 0x16c   :  { %13773 = vmatpush3.bf16.msra.mxu0 %v17452_v54  ;;  %14373 = vmatpush3.bf16.msra.mxu1 %v17452_v54  ;;  %v17488_v54 = vpack.c.bf16 %v7981_v28, %v7980_v46  ;;  %v7984_v46 = vld [vmem:[%s20048_s1 + $0x5f0] sm:$0xff]  ;;  %v7985_v28 = vld [vmem:[%s20048_s1 + $0x5f8] sm:$0xff] }
 0x16d   :  { %13774 = vmatprep.subr.bf16.mxu0 %v20381_v57  ;;  %14374 = vmatprep.subr.bf16.mxu1 %v20381_v57 }
 0x16e   :  { %20386 = vst [vmem:[#allocation44_spill] sm:$0xff] %v17488_v54 }
 0x170   :  { %13776 = vmatpush3.bf16.msra.mxu0 %v17464_v17  ;;  %14376 = vmatpush3.bf16.msra.mxu1 %v17464_v17  ;;  %v17500_v17 = vpack.c.bf16 %v7983_v6, %v7982_v40  ;;  %v7986_v40 = vld [vmem:[%s20048_s1 + $0x600] sm:$0xff]  ;;  %v7987_v6 = vld [vmem:[%s20048_s1 + $0x608] sm:$0xff] }
 0x171   :  { %13777 = vmatprep.subr.bf16.mxu0 %v20381_v57  ;;  %14377 = vmatprep.subr.bf16.mxu1 %v20381_v57 }
 0x172   :  { %20387 = vst [vmem:[#allocation45_spill] sm:$0xff] %v17500_v17 }
 0x174   :  { %13779 = vmatpush3.bf16.msra.mxu0 %v17476_v8  ;;  %14379 = vmatpush3.bf16.msra.mxu1 %v17476_v8  ;;  %v17512_v8 = vpack.c.bf16 %v7985_v28, %v7984_v46  ;;  %v17529_v46 = vld [vmem:[%s20047_s0 + $0x1c] sm:$0x3]  ;;  %v7988_v28 = vld [vmem:[%s20048_s1 + $0x610] sm:$0xff] }
 0x175   :  { %13780 = vmatprep.subr.bf16.mxu0 %v20381_v57  ;;  %14380 = vmatprep.subr.bf16.mxu1 %v20381_v57 }
 0x176   :  { %20388 = vst [vmem:[#allocation46_spill] sm:$0xff] %v17512_v8 }
 0x178   :  { %13782 = vmatpush3.bf16.msra.mxu0 %v17488_v54  ;;  %14382 = vmatpush3.bf16.msra.mxu1 %v17488_v54  ;;  %v17524_v54 = vpack.c.bf16 %v7987_v6, %v7986_v40  ;;  %v7990_v6 = vld [vmem:[%s20048_s1 + $0x620] sm:$0xff] }
 0x179   :  { %13783 = vmatprep.subr.bf16.mxu0 %v20381_v57  ;;  %14383 = vmatprep.subr.bf16.mxu1 %v20381_v57 }
 0x17a   :  { %20389 = vst [vmem:[#allocation47_spill] sm:$0xff] %v17524_v54 }
 0x17c   :  { %13785 = vmatpush3.bf16.msra.mxu0 %v17500_v17  ;;  %14385 = vmatpush3.bf16.msra.mxu1 %v17500_v17  ;;  %v7989_v17 = vld [vmem:[%s20048_s1 + $0x618] sm:$0xff] }
 0x17d   :  { %13786 = vmatprep.subr.bf16.mxu0 %v20381_v57  ;;  %14386 = vmatprep.subr.bf16.mxu1 %v20381_v57  ;;  %v17543_v40 = vpack.c.bf16 %v7989_v17, %v7988_v28  ;;  %v7992_v28 = vld [vmem:[%s20048_s1 + $0x630] sm:$0xff] }
 0x17f   :  { %20390 = vst [vmem:[#allocation48_spill] sm:$0xff] %v17543_v40 }
 0x180   :  { %13788 = vmatpush3.bf16.msra.mxu0 %v17512_v8  ;;  %14388 = vmatpush3.bf16.msra.mxu1 %v17512_v8 }
 0x181   :  { %13789 = vmatprep.subr.bf16.mxu0 %v20381_v57  ;;  %14389 = vmatprep.subr.bf16.mxu1 %v20381_v57 }
 0x183   :  { %10349 = vmatmul.mubr.f32.vlgmr.msra.gmra.mrb[0].mxu0 %v17423_v3  ;;  %11224 = vmatmul.mubr.f32.vlgmr.msra.gmra.mrb[0].mxu1 %v17529_v46  ;;  %v7991_v3 = vld [vmem:[%s20048_s1 + $0x628] sm:$0xff] }
 0x184   :  { %13791 = vmatpush3.bf16.msra.mxu0 %v17524_v54  ;;  %14391 = vmatpush3.bf16.msra.mxu1 %v17524_v54  ;;  %v17559_v17 = vpack.c.bf16 %v7991_v3, %v7990_v6  ;;  %v7993_v54 = vld [vmem:[%s20048_s1 + $0x638] sm:$0xff]  ;;  %v7994_v6 = vld [vmem:[%s20048_s1 + $0x640] sm:$0xff]  ;;  %v7995_v3 = vld [vmem:[%s20048_s1 + $0x648] sm:$0xff] }
 0x185   :  { %13792 = vmatprep.subr.bf16.mxu0 %v20381_v57  ;;  %14392 = vmatprep.subr.bf16.mxu1 %v20381_v57  ;;  %v17571_v8 = vpack.c.bf16 %v7993_v54, %v7992_v28  ;;  %v7996_v54 = vld [vmem:[%s20048_s1 + $0x650] sm:$0xff]  ;;  %v7997_v28 = vld [vmem:[%s20048_s1 + $0x658] sm:$0xff] }
 0x186   :  { %10383 = vmatprep.mubr.msk.f32.mxu0 %vm16198_vm0, %v20349_v9  ;;  %11258 = vmatprep.mubr.msk.f32.mxu1 %vm16198_vm0, %v20349_v9  ;;  %20391 = vst [vmem:[#allocation49_spill] sm:$0xff] %v17559_v17 }
 0x187   :  { %20392 = vst [vmem:[#allocation50_spill] sm:$0xff] %v17571_v8 }
 0x188   :  { %13794 = vmatpush3.bf16.msra.mxu0 %v17543_v40  ;;  %14394 = vmatpush3.bf16.msra.mxu1 %v17543_v40  ;;  %v17583_v40 = vpack.c.bf16 %v7995_v3, %v7994_v6  ;;  %v7998_v6 = vld [vmem:[%s20048_s1 + $0x660] sm:$0xff]  ;;  %v7999_v3 = vld [vmem:[%s20048_s1 + $0x668] sm:$0xff] }
 0x189   :  { %13795 = vmatprep.subr.bf16.mxu0 %v20381_v57  ;;  %14395 = vmatprep.subr.bf16.mxu1 %v20381_v57 }
 0x18a   :  { %20393 = vst [vmem:[#allocation51_spill] sm:$0xff] %v17583_v40 }
 0x18c   :  { %13797 = vmatpush3.bf16.msra.mxu0 %v17559_v17  ;;  %14397 = vmatpush3.bf16.msra.mxu1 %v17559_v17  ;;  %v17595_v17 = vpack.c.bf16 %v7997_v28, %v7996_v54  ;;  %v8000_v54 = vld [vmem:[%s20048_s1 + $0x670] sm:$0xff]  ;;  %v8001_v28 = vld [vmem:[%s20048_s1 + $0x678] sm:$0xff] }
 0x18d   :  { %13798 = vmatprep.subr.bf16.mxu0 %v20381_v57  ;;  %14398 = vmatprep.subr.bf16.mxu1 %v20381_v57 }
 0x18e   :  { %20394 = vst [vmem:[#allocation52_spill] sm:$0xff] %v17595_v17 }
 0x190   :  { %13800 = vmatpush3.bf16.msra.mxu0 %v17571_v8  ;;  %14400 = vmatpush3.bf16.msra.mxu1 %v17571_v8  ;;  %v17607_v8 = vpack.c.bf16 %v7999_v3, %v7998_v6  ;;  %v8002_v6 = vld [vmem:[%s20048_s1 + $0x680] sm:$0xff]  ;;  %v8003_v3 = vld [vmem:[%s20048_s1 + $0x688] sm:$0xff] }
 0x191   :  { %13801 = vmatprep.subr.bf16.mxu0 %v20381_v57  ;;  %14401 = vmatprep.subr.bf16.mxu1 %v20381_v57 }
 0x192   :  { %20395 = vst [vmem:[#allocation53_spill] sm:$0xff] %v17607_v8 }
 0x194   :  { %13803 = vmatpush3.bf16.msra.mxu0 %v17583_v40  ;;  %14403 = vmatpush3.bf16.msra.mxu1 %v17583_v40  ;;  %v17619_v40 = vpack.c.bf16 %v8001_v28, %v8000_v54  ;;  %v17636_v54 = vld [vmem:[%s20047_s0 + $0x1e] sm:$0x3]  ;;  %v8004_v28 = vld [vmem:[%s20048_s1 + $0x690] sm:$0xff] }
 0x195   :  { %13804 = vmatprep.subr.bf16.mxu0 %v20381_v57  ;;  %14404 = vmatprep.subr.bf16.mxu1 %v20381_v57 }
 0x196   :  { %20396 = vst [vmem:[#allocation54_spill] sm:$0xff] %v17619_v40 }
 0x198   :  { %13806 = vmatpush3.bf16.msra.mxu0 %v17595_v17  ;;  %14406 = vmatpush3.bf16.msra.mxu1 %v17595_v17  ;;  %v17631_v17 = vpack.c.bf16 %v8003_v3, %v8002_v6  ;;  %v8006_v3 = vld [vmem:[%s20048_s1 + $0x6a0] sm:$0xff] }
 0x199   :  { %13807 = vmatprep.subr.bf16.mxu0 %v20381_v57  ;;  %14407 = vmatprep.subr.bf16.mxu1 %v20381_v57 }
 0x19a   :  { %20397 = vst [vmem:[#allocation55_spill] sm:$0xff] %v17631_v17 }
 0x19c   :  { %13809 = vmatpush3.bf16.msra.mxu0 %v17607_v8  ;;  %14409 = vmatpush3.bf16.msra.mxu1 %v17607_v8  ;;  %v8005_v8 = vld [vmem:[%s20048_s1 + $0x698] sm:$0xff] }
 0x19d   :  { %13810 = vmatprep.subr.bf16.mxu0 %v20381_v57  ;;  %14410 = vmatprep.subr.bf16.mxu1 %v20381_v57  ;;  %v17650_v6 = vpack.c.bf16 %v8005_v8, %v8004_v28  ;;  %v8008_v28 = vld [vmem:[%s20048_s1 + $0x6b0] sm:$0xff] }
 0x19f   :  { %20398 = vst [vmem:[#allocation56_spill] sm:$0xff] %v17650_v6 }
 0x1a0   :  { %13812 = vmatpush3.bf16.msra.mxu0 %v17619_v40  ;;  %14412 = vmatpush3.bf16.msra.mxu1 %v17619_v40 }
 0x1a1   :  { %13813 = vmatprep.subr.bf16.mxu0 %v20381_v57  ;;  %14413 = vmatprep.subr.bf16.mxu1 %v20381_v57 }
 0x1a3   :  { %10384 = vmatmul.mubr.f32.vlgmr.msra.gmra.mrb[0].mxu0 %v17529_v46  ;;  %11259 = vmatmul.mubr.f32.vlgmr.msra.gmra.mrb[0].mxu1 %v17636_v54  ;;  %v8007_v46 = vld [vmem:[%s20048_s1 + $0x6a8] sm:$0xff] }
 0x1a4   :  { %13815 = vmatpush3.bf16.msra.mxu0 %v17631_v17  ;;  %14415 = vmatpush3.bf16.msra.mxu1 %v17631_v17  ;;  %v17666_v8 = vpack.c.bf16 %v8007_v46, %v8006_v3  ;;  %v8009_v17 = vld [vmem:[%s20048_s1 + $0x6b8] sm:$0xff]  ;;  %v8010_v3 = vld [vmem:[%s20048_s1 + $0x6c0] sm:$0xff]  ;;  %v8011_v46 = vld [vmem:[%s20048_s1 + $0x6c8] sm:$0xff] }
 0x1a5   :  { %13816 = vmatprep.subr.bf16.mxu0 %v20381_v57  ;;  %14416 = vmatprep.subr.bf16.mxu1 %v20381_v57  ;;  %v17678_v40 = vpack.c.bf16 %v8009_v17, %v8008_v28  ;;  %v8012_v17 = vld [vmem:[%s20048_s1 + $0x6d0] sm:$0xff]  ;;  %v8013_v28 = vld [vmem:[%s20048_s1 + $0x6d8] sm:$0xff] }
 0x1a6   :  { %10418 = vmatprep.mubr.msk.f32.mxu0 %vm16198_vm0, %v20349_v9  ;;  %11293 = vmatprep.mubr.msk.f32.mxu1 %vm16198_vm0, %v20349_v9  ;;  %20399 = vst [vmem:[#allocation57_spill] sm:$0xff] %v17666_v8 }
 0x1a7   :  { %20400 = vst [vmem:[#allocation58_spill] sm:$0xff] %v17678_v40 }
 0x1a8   :  { %13818 = vmatpush3.bf16.msra.mxu0 %v17650_v6  ;;  %14418 = vmatpush3.bf16.msra.mxu1 %v17650_v6  ;;  %v17690_v6 = vpack.c.bf16 %v8011_v46, %v8010_v3  ;;  %v8014_v3 = vld [vmem:[%s20048_s1 + $0x6e0] sm:$0xff]  ;;  %v8015_v46 = vld [vmem:[%s20048_s1 + $0x6e8] sm:$0xff] }
 0x1a9   :  { %13819 = vmatprep.subr.bf16.mxu0 %v20381_v57  ;;  %14419 = vmatprep.subr.bf16.mxu1 %v20381_v57 }
 0x1aa   :  { %20401 = vst [vmem:[#allocation59_spill] sm:$0xff] %v17690_v6 }
 0x1ac   :  { %13821 = vmatpush3.bf16.msra.mxu0 %v17666_v8  ;;  %14421 = vmatpush3.bf16.msra.mxu1 %v17666_v8  ;;  %v17702_v8 = vpack.c.bf16 %v8013_v28, %v8012_v17  ;;  %v8016_v17 = vld [vmem:[%s20048_s1 + $0x6f0] sm:$0xff]  ;;  %v8017_v28 = vld [vmem:[%s20048_s1 + $0x6f8] sm:$0xff] }
 0x1ad   :  { %13822 = vmatprep.subr.bf16.mxu0 %v20381_v57  ;;  %14422 = vmatprep.subr.bf16.mxu1 %v20381_v57 }
 0x1ae   :  { %20402 = vst [vmem:[#allocation60_spill] sm:$0xff] %v17702_v8 }
 0x1b0   :  { %13824 = vmatpush3.bf16.msra.mxu0 %v17678_v40  ;;  %14424 = vmatpush3.bf16.msra.mxu1 %v17678_v40  ;;  %v17714_v40 = vpack.c.bf16 %v8015_v46, %v8014_v3  ;;  %v8018_v3 = vld [vmem:[%s20048_s1 + $0x700] sm:$0xff]  ;;  %v8019_v46 = vld [vmem:[%s20048_s1 + $0x708] sm:$0xff] }
 0x1b1   :  { %13825 = vmatprep.subr.bf16.mxu0 %v20381_v57  ;;  %14425 = vmatprep.subr.bf16.mxu1 %v20381_v57 }
 0x1b2   :  { %20403 = vst [vmem:[#allocation61_spill] sm:$0xff] %v17714_v40 }
 0x1b4   :  { %13827 = vmatpush3.bf16.msra.mxu0 %v17690_v6  ;;  %14427 = vmatpush3.bf16.msra.mxu1 %v17690_v6  ;;  %v17726_v6 = vpack.c.bf16 %v8017_v28, %v8016_v17  ;;  %v17743_v17 = vld [vmem:[%s20047_s0 + $0x20] sm:$0x3]  ;;  %v8020_v28 = vld [vmem:[%s20048_s1 + $0x710] sm:$0xff] }
 0x1b5   :  { %13828 = vmatprep.subr.bf16.mxu0 %v20381_v57  ;;  %14428 = vmatprep.subr.bf16.mxu1 %v20381_v57 }
 0x1b6   :  { %20404 = vst [vmem:[#allocation62_spill] sm:$0xff] %v17726_v6 }
 0x1b8   :  { %13830 = vmatpush3.bf16.msra.mxu0 %v17702_v8  ;;  %14430 = vmatpush3.bf16.msra.mxu1 %v17702_v8  ;;  %v17738_v8 = vpack.c.bf16 %v8019_v46, %v8018_v3  ;;  %v8022_v46 = vld [vmem:[%s20048_s1 + $0x720] sm:$0xff] }
 0x1b9   :  { %13831 = vmatprep.subr.bf16.mxu0 %v20381_v57  ;;  %14431 = vmatprep.subr.bf16.mxu1 %v20381_v57 }
 0x1ba   :  { %20405 = vst [vmem:[#allocation63_spill] sm:$0xff] %v17738_v8 }
 0x1bc   :  { %13833 = vmatpush3.bf16.msra.mxu0 %v17714_v40  ;;  %14433 = vmatpush3.bf16.msra.mxu1 %v17714_v40  ;;  %v8021_v40 = vld [vmem:[%s20048_s1 + $0x718] sm:$0xff] }
 0x1bd   :  { %13834 = vmatprep.subr.bf16.mxu0 %v20381_v57  ;;  %14434 = vmatprep.subr.bf16.mxu1 %v20381_v57  ;;  %v17757_v3 = vpack.c.bf16 %v8021_v40, %v8020_v28  ;;  %v8024_v28 = vld [vmem:[%s20048_s1 + $0x730] sm:$0xff] }
 0x1bf   :  { %20406 = vst [vmem:[#allocation64_spill] sm:$0xff] %v17757_v3 }
 0x1c0   :  { %13836 = vmatpush3.bf16.msra.mxu0 %v17726_v6  ;;  %14436 = vmatpush3.bf16.msra.mxu1 %v17726_v6 }
 0x1c1   :  { %13837 = vmatprep.subr.bf16.mxu0 %v20381_v57  ;;  %14437 = vmatprep.subr.bf16.mxu1 %v20381_v57 }
 0x1c3   :  { %10419 = vmatmul.mubr.f32.vlgmr.msra.gmra.mrb[0].mxu0 %v17636_v54  ;;  %11294 = vmatmul.mubr.f32.vlgmr.msra.gmra.mrb[0].mxu1 %v17743_v17  ;;  %v8023_v54 = vld [vmem:[%s20048_s1 + $0x728] sm:$0xff] }
 0x1c4   :  { %13839 = vmatpush3.bf16.msra.mxu0 %v17738_v8  ;;  %14439 = vmatpush3.bf16.msra.mxu1 %v17738_v8  ;;  %v17773_v40 = vpack.c.bf16 %v8023_v54, %v8022_v46  ;;  %v8025_v8 = vld [vmem:[%s20048_s1 + $0x738] sm:$0xff]  ;;  %v8026_v46 = vld [vmem:[%s20048_s1 + $0x740] sm:$0xff]  ;;  %v8027_v54 = vld [vmem:[%s20048_s1 + $0x748] sm:$0xff] }
 0x1c5   :  { %13840 = vmatprep.subr.bf16.mxu0 %v20381_v57  ;;  %14440 = vmatprep.subr.bf16.mxu1 %v20381_v57  ;;  %v17785_v6 = vpack.c.bf16 %v8025_v8, %v8024_v28  ;;  %v8028_v8 = vld [vmem:[%s20048_s1 + $0x750] sm:$0xff]  ;;  %v8029_v28 = vld [vmem:[%s20048_s1 + $0x758] sm:$0xff] }
 0x1c6   :  { %10453 = vmatprep.mubr.msk.f32.mxu0 %vm16198_vm0, %v20349_v9  ;;  %11328 = vmatprep.mubr.msk.f32.mxu1 %vm16198_vm0, %v20349_v9  ;;  %20407 = vst [vmem:[#allocation65_spill] sm:$0xff] %v17773_v40 }
 0x1c7   :  { %20408 = vst [vmem:[#allocation66_spill] sm:$0xff] %v17785_v6 }
 0x1c8   :  { %13842 = vmatpush3.bf16.msra.mxu0 %v17757_v3  ;;  %14442 = vmatpush3.bf16.msra.mxu1 %v17757_v3  ;;  %v17797_v3 = vpack.c.bf16 %v8027_v54, %v8026_v46  ;;  %v8030_v46 = vld [vmem:[%s20048_s1 + $0x760] sm:$0xff]  ;;  %v8031_v54 = vld [vmem:[%s20048_s1 + $0x768] sm:$0xff] }
 0x1c9   :  { %13843 = vmatprep.subr.bf16.mxu0 %v20381_v57  ;;  %14443 = vmatprep.subr.bf16.mxu1 %v20381_v57 }
 0x1ca   :  { %20409 = vst [vmem:[#allocation67_spill] sm:$0xff] %v17797_v3 }
 0x1cc   :  { %13845 = vmatpush3.bf16.msra.mxu0 %v17773_v40  ;;  %14445 = vmatpush3.bf16.msra.mxu1 %v17773_v40  ;;  %v17809_v40 = vpack.c.bf16 %v8029_v28, %v8028_v8  ;;  %v8032_v8 = vld [vmem:[%s20048_s1 + $0x770] sm:$0xff]  ;;  %v8033_v28 = vld [vmem:[%s20048_s1 + $0x778] sm:$0xff] }
 0x1cd   :  { %13846 = vmatprep.subr.bf16.mxu0 %v20381_v57  ;;  %14446 = vmatprep.subr.bf16.mxu1 %v20381_v57 }
 0x1ce   :  { %20410 = vst [vmem:[#allocation68_spill] sm:$0xff] %v17809_v40 }
 0x1d0   :  { %13848 = vmatpush3.bf16.msra.mxu0 %v17785_v6  ;;  %14448 = vmatpush3.bf16.msra.mxu1 %v17785_v6  ;;  %v17821_v6 = vpack.c.bf16 %v8031_v54, %v8030_v46  ;;  %v8034_v46 = vld [vmem:[%s20048_s1 + $0x780] sm:$0xff]  ;;  %v8035_v54 = vld [vmem:[%s20048_s1 + $0x788] sm:$0xff] }
 0x1d1   :  { %13849 = vmatprep.subr.bf16.mxu0 %v20381_v57  ;;  %14449 = vmatprep.subr.bf16.mxu1 %v20381_v57 }
 0x1d2   :  { %20411 = vst [vmem:[#allocation69_spill] sm:$0xff] %v17821_v6 }
 0x1d4   :  { %13851 = vmatpush3.bf16.msra.mxu0 %v17797_v3  ;;  %14451 = vmatpush3.bf16.msra.mxu1 %v17797_v3  ;;  %v17833_v3 = vpack.c.bf16 %v8033_v28, %v8032_v8  ;;  %v3244_v8 = vld [vmem:[%s20047_s0 + $0x22] sm:$0x3]  ;;  %v8036_v28 = vld [vmem:[%s20048_s1 + $0x790] sm:$0xff] }
 0x1d5   :  { %13852 = vmatprep.subr.bf16.mxu0 %v20381_v57  ;;  %14452 = vmatprep.subr.bf16.mxu1 %v20381_v57 }
 0x1d6   :  { %20412 = vst [vmem:[#allocation70_spill] sm:$0xff] %v17833_v3 }
 0x1d8   :  { %13854 = vmatpush3.bf16.msra.mxu0 %v17809_v40  ;;  %14454 = vmatpush3.bf16.msra.mxu1 %v17809_v40  ;;  %v17845_v40 = vpack.c.bf16 %v8035_v54, %v8034_v46  ;;  %v8038_v54 = vld [vmem:[%s20048_s1 + $0x7a0] sm:$0xff] }
 0x1d9   :  { %13855 = vmatprep.subr.bf16.mxu0 %v20381_v57  ;;  %14455 = vmatprep.subr.bf16.mxu1 %v20381_v57 }
 0x1da   :  { %20413 = vst [vmem:[#allocation71_spill] sm:$0xff] %v17845_v40 }
 0x1dc   :  { %13857 = vmatpush3.bf16.msra.mxu0 %v17821_v6  ;;  %14457 = vmatpush3.bf16.msra.mxu1 %v17821_v6  ;;  %v8037_v6 = vld [vmem:[%s20048_s1 + $0x798] sm:$0xff] }
 0x1dd   :  { %13858 = vmatprep.subr.bf16.mxu0 %v20381_v57  ;;  %14458 = vmatprep.subr.bf16.mxu1 %v20381_v57  ;;  %v17861_v46 = vpack.c.bf16 %v8037_v6, %v8036_v28 }
 0x1df   :  { %20414 = vst [vmem:[#allocation72_spill] sm:$0xff] %v17861_v46 }
 0x1e0   :  { %13860 = vmatpush3.bf16.msra.mxu0 %v17833_v3  ;;  %14460 = vmatpush3.bf16.msra.mxu1 %v17833_v3  ;;  %v8039_v3 = vld [vmem:[%s20048_s1 + $0x7a8] sm:$0xff] }
 0x1e1   :  { %13861 = vmatprep.subr.bf16.mxu0 %v20381_v57  ;;  %14461 = vmatprep.subr.bf16.mxu1 %v20381_v57  ;;  %v17877_v6 = vpack.c.bf16 %v8039_v3, %v8038_v54  ;;  %v8042_v3 = vld [vmem:[%s20048_s1 + $0x7c0] sm:$0xff]  ;;  %v8043_v54 = vld [vmem:[%s20048_s1 + $0x7c8] sm:$0xff] }
 0x1e3   :  { %10454 = vmatmul.mubr.f32.vlgmr.msra.gmra.mrb[0].mxu0 %v17743_v17  ;;  %11329 = vmatmul.mubr.f32.vlgmr.msra.gmra.mrb[0].mxu1 %v3244_v8  ;;  %20415 = vst [vmem:[#allocation73_spill] sm:$0xff] %v17877_v6  ;;  %v8040_v17 = vld [vmem:[%s20048_s1 + $0x7b0] sm:$0xff]  ;;  %v8041_v8 = vld [vmem:[%s20048_s1 + $0x7b8] sm:$0xff] }
 0x1e4   :  { %13863 = vmatpush3.bf16.msra.mxu0 %v17845_v40  ;;  %14463 = vmatpush3.bf16.msra.mxu1 %v17845_v40  ;;  %v17889_v28 = vpack.c.bf16 %v8041_v8, %v8040_v17  ;;  %v8044_v17 = vld [vmem:[%s20048_s1 + $0x7d0] sm:$0xff]  ;;  %v8045_v8 = vld [vmem:[%s20048_s1 + $0x7d8] sm:$0xff] }
 0x1e5   :  { %13864 = vmatprep.subr.bf16.mxu0 %v20381_v57  ;;  %14464 = vmatprep.subr.bf16.mxu1 %v20381_v57 }
 0x1e6   :  { %10488 = vmatprep.mubr.msk.f32.mxu0 %vm16198_vm0, %v20349_v9  ;;  %11363 = vmatprep.mubr.msk.f32.mxu1 %vm16198_vm0, %v20349_v9  ;;  %20416 = vst [vmem:[#allocation74_spill] sm:$0xff] %v17889_v28 }
 0x1e8   :  { %13866 = vmatpush3.bf16.msra.mxu0 %v17861_v46  ;;  %14466 = vmatpush3.bf16.msra.mxu1 %v17861_v46  ;;  %v17901_v46 = vpack.c.bf16 %v8043_v54, %v8042_v3  ;;  %v8046_v3 = vld [vmem:[%s20048_s1 + $0x7e0] sm:$0xff]  ;;  %v8047_v54 = vld [vmem:[%s20048_s1 + $0x7e8] sm:$0xff] }
 0x1e9   :  { %13867 = vmatprep.subr.bf16.mxu0 %v20381_v57  ;;  %14467 = vmatprep.subr.bf16.mxu1 %v20381_v57 }
 0x1ea   :  { %20417 = vst [vmem:[#allocation75_spill] sm:$0xff] %v17901_v46 }
 0x1ec   :  { %13869 = vmatpush3.bf16.msra.mxu0 %v17877_v6  ;;  %14469 = vmatpush3.bf16.msra.mxu1 %v17877_v6  ;;  %v17913_v6 = vpack.c.bf16 %v8045_v8, %v8044_v17  ;;  %v8048_v17 = vld [vmem:[%s20048_s1 + $0x7f0] sm:$0xff]  ;;  %v8049_v8 = vld [vmem:[%s20048_s1 + $0x7f8] sm:$0xff] }
 0x1ed   :  { %13870 = vmatprep.subr.bf16.mxu0 %v20381_v57  ;;  %14470 = vmatprep.subr.bf16.mxu1 %v20381_v57 }
 0x1ee   :  { %20418 = vst [vmem:[#allocation76_spill] sm:$0xff] %v17913_v6 }
 0x1f0   :  { %13872 = vmatpush3.bf16.msra.mxu0 %v17889_v28  ;;  %14472 = vmatpush3.bf16.msra.mxu1 %v17889_v28  ;;  %v17925_v28 = vpack.c.bf16 %v8047_v54, %v8046_v3  ;;  %v8050_v3 = vld [vmem:[%s20048_s1 + $0x800] sm:$0xff]  ;;  %v8051_v54 = vld [vmem:[%s20048_s1 + $0x808] sm:$0xff] }
 0x1f1   :  { %13873 = vmatprep.subr.bf16.mxu0 %v20381_v57  ;;  %14473 = vmatprep.subr.bf16.mxu1 %v20381_v57 }
 0x1f2   :  { %20419 = vst [vmem:[#allocation77_spill] sm:$0xff] %v17925_v28 }
 0x1f4   :  { %13875 = vmatpush3.bf16.msra.mxu0 %v17901_v46  ;;  %14475 = vmatpush3.bf16.msra.mxu1 %v17901_v46  ;;  %v17937_v46 = vpack.c.bf16 %v8049_v8, %v8048_v17  ;;  %v1360_v17 = vld [vmem:[%s20047_s0 + $0x24] sm:$0x3]  ;;  %v17952_v8 = vpack.c.bf16 %v8051_v54, %v8050_v3 }
 0x1f5   :  { %13876 = vmatprep.subr.bf16.mxu0 %v20381_v57  ;;  %14476 = vmatprep.subr.bf16.mxu1 %v20381_v57  ;;  %v8054_v54 = vld [vmem:[%s20048_s1 + $0x820] sm:$0xff] }
 0x1f6   :  { %20420 = vst [vmem:[#allocation78_spill] sm:$0xff] %v17937_v46  ;;  %20421 = vst [vmem:[#allocation79_spill] sm:$0xff] %v17952_v8 }
 0x1f8   :  { %13878 = vmatpush3.bf16.msra.mxu0 %v17913_v6  ;;  %14478 = vmatpush3.bf16.msra.mxu1 %v17913_v6  ;;  %v8052_v6 = vld [vmem:[%s20048_s1 + $0x810] sm:$0xff] }
 0x1f9   :  { %13879 = vmatprep.subr.bf16.mxu0 %v20381_v57  ;;  %14479 = vmatprep.subr.bf16.mxu1 %v20381_v57 }
 0x1fc   :  { %13881 = vmatpush3.bf16.msra.mxu0 %v17925_v28  ;;  %14481 = vmatpush3.bf16.msra.mxu1 %v17925_v28  ;;  %v17957_v28 = vld [vmem:[%s20047_s0 + $0x26] sm:$0x3] }
 0x1fd   :  { %13882 = vmatprep.subr.bf16.mxu0 %v20381_v57  ;;  %14482 = vmatprep.subr.bf16.mxu1 %v20381_v57 }
 0x200   :  { %13884 = vmatpush3.bf16.msra.mxu0 %v17937_v46  ;;  %14484 = vmatpush3.bf16.msra.mxu1 %v17937_v46  ;;  %v8053_v46 = vld [vmem:[%s20048_s1 + $0x818] sm:$0xff] }
 0x201   :  { %13885 = vmatprep.subr.bf16.mxu0 %v20381_v57  ;;  %14485 = vmatprep.subr.bf16.mxu1 %v20381_v57  ;;  %v17970_v3 = vpack.c.bf16 %v8053_v46, %v8052_v6  ;;  %v8056_v6 = vld [vmem:[%s20048_s1 + $0x830] sm:$0xff] }
 0x203   :  { %10489 = vmatmul.mubr.f32.vlgmr.msra.gmra.mrb[0].mxu0 %v1360_v17  ;;  %11364 = vmatmul.mubr.f32.vlgmr.msra.gmra.mrb[0].mxu1 %v17957_v28  ;;  %20422 = vst [vmem:[#allocation80_spill] sm:$0xff] %v17970_v3  ;;  %v8055_v17 = vld [vmem:[%s20048_s1 + $0x828] sm:$0xff] }
 0x204   :  { %13887 = vmatpush3.bf16.msra.mxu0 %v17952_v8  ;;  %14487 = vmatpush3.bf16.msra.mxu1 %v17952_v8  ;;  %v17986_v46 = vpack.c.bf16 %v8055_v17, %v8054_v54  ;;  %v8057_v8 = vld [vmem:[%s20048_s1 + $0x838] sm:$0xff]  ;;  %v8058_v54 = vld [vmem:[%s20048_s1 + $0x840] sm:$0xff]  ;;  %v8059_v17 = vld [vmem:[%s20048_s1 + $0x848] sm:$0xff] }
 0x205   :  { %13888 = vmatprep.subr.bf16.mxu0 %v20381_v57  ;;  %14488 = vmatprep.subr.bf16.mxu1 %v20381_v57  ;;  %v17998_v40 = vpack.c.bf16 %v8057_v8, %v8056_v6  ;;  %v8060_v8 = vld [vmem:[%s20048_s1 + $0x850] sm:$0xff]  ;;  %v8061_v6 = vld [vmem:[%s20048_s1 + $0x858] sm:$0xff] }
 0x206   :  { %10523 = vmatprep.mubr.msk.f32.mxu0 %vm16198_vm0, %v20349_v9  ;;  %11398 = vmatprep.mubr.msk.f32.mxu1 %vm16198_vm0, %v20349_v9  ;;  %20423 = vst [vmem:[#allocation81_spill] sm:$0xff] %v17986_v46 }
 0x207   :  { %20424 = vst [vmem:[#allocation82_spill] sm:$0xff] %v17998_v40 }
 0x208   :  { %13890 = vmatpush3.bf16.msra.mxu0 %v17970_v3  ;;  %14490 = vmatpush3.bf16.msra.mxu1 %v17970_v3  ;;  %v18010_v3 = vpack.c.bf16 %v8059_v17, %v8058_v54  ;;  %v8062_v54 = vld [vmem:[%s20048_s1 + $0x860] sm:$0xff]  ;;  %v8063_v17 = vld [vmem:[%s20048_s1 + $0x868] sm:$0xff] }
 0x209   :  { %13891 = vmatprep.subr.bf16.mxu0 %v20381_v57  ;;  %14491 = vmatprep.subr.bf16.mxu1 %v20381_v57 }
 0x20a   :  { %20425 = vst [vmem:[#allocation83_spill] sm:$0xff] %v18010_v3 }
 0x20c   :  { %13893 = vmatpush3.bf16.msra.mxu0 %v17986_v46  ;;  %14493 = vmatpush3.bf16.msra.mxu1 %v17986_v46  ;;  %v18022_v46 = vpack.c.bf16 %v8061_v6, %v8060_v8  ;;  %v8064_v8 = vld [vmem:[%s20048_s1 + $0x870] sm:$0xff]  ;;  %v8065_v6 = vld [vmem:[%s20048_s1 + $0x878] sm:$0xff] }
 0x20d   :  { %13894 = vmatprep.subr.bf16.mxu0 %v20381_v57  ;;  %14494 = vmatprep.subr.bf16.mxu1 %v20381_v57 }
 0x20e   :  { %20426 = vst [vmem:[#allocation84_spill] sm:$0xff] %v18022_v46 }
 0x210   :  { %13896 = vmatpush3.bf16.msra.mxu0 %v17998_v40  ;;  %14496 = vmatpush3.bf16.msra.mxu1 %v17998_v40  ;;  %v18034_v40 = vpack.c.bf16 %v8063_v17, %v8062_v54  ;;  %v8066_v54 = vld [vmem:[%s20048_s1 + $0x880] sm:$0xff]  ;;  %v8067_v17 = vld [vmem:[%s20048_s1 + $0x888] sm:$0xff] }
 0x211   :  { %13897 = vmatprep.subr.bf16.mxu0 %v20381_v57  ;;  %14497 = vmatprep.subr.bf16.mxu1 %v20381_v57 }
 0x212   :  { %20427 = vst [vmem:[#allocation85_spill] sm:$0xff] %v18034_v40 }
 0x214   :  { %13899 = vmatpush3.bf16.msra.mxu0 %v18010_v3  ;;  %14499 = vmatpush3.bf16.msra.mxu1 %v18010_v3  ;;  %v18046_v3 = vpack.c.bf16 %v8065_v6, %v8064_v8  ;;  %v18063_v8 = vld [vmem:[%s20047_s0 + $0x28] sm:$0x3]  ;;  %v8068_v6 = vld [vmem:[%s20048_s1 + $0x890] sm:$0xff] }
 0x215   :  { %13900 = vmatprep.subr.bf16.mxu0 %v20381_v57  ;;  %14500 = vmatprep.subr.bf16.mxu1 %v20381_v57 }
 0x216   :  { %20428 = vst [vmem:[#allocation86_spill] sm:$0xff] %v18046_v3 }
 0x218   :  { %13902 = vmatpush3.bf16.msra.mxu0 %v18022_v46  ;;  %14502 = vmatpush3.bf16.msra.mxu1 %v18022_v46  ;;  %v18058_v46 = vpack.c.bf16 %v8067_v17, %v8066_v54  ;;  %v8070_v17 = vld [vmem:[%s20048_s1 + $0x8a0] sm:$0xff] }
 0x219   :  { %13903 = vmatprep.subr.bf16.mxu0 %v20381_v57  ;;  %14503 = vmatprep.subr.bf16.mxu1 %v20381_v57 }
 0x21a   :  { %20429 = vst [vmem:[#allocation87_spill] sm:$0xff] %v18058_v46 }
 0x21c   :  { %13905 = vmatpush3.bf16.msra.mxu0 %v18034_v40  ;;  %14505 = vmatpush3.bf16.msra.mxu1 %v18034_v40  ;;  %v8069_v40 = vld [vmem:[%s20048_s1 + $0x898] sm:$0xff] }
 0x21d   :  { %13906 = vmatprep.subr.bf16.mxu0 %v20381_v57  ;;  %14506 = vmatprep.subr.bf16.mxu1 %v20381_v57  ;;  %v18077_v54 = vpack.c.bf16 %v8069_v40, %v8068_v6  ;;  %v8072_v6 = vld [vmem:[%s20048_s1 + $0x8b0] sm:$0xff] }
 0x21f   :  { %20430 = vst [vmem:[#allocation88_spill] sm:$0xff] %v18077_v54 }
 0x220   :  { %13908 = vmatpush3.bf16.msra.mxu0 %v18046_v3  ;;  %14508 = vmatpush3.bf16.msra.mxu1 %v18046_v3 }
 0x221   :  { %13909 = vmatprep.subr.bf16.mxu0 %v20381_v57  ;;  %14509 = vmatprep.subr.bf16.mxu1 %v20381_v57 }
 0x223   :  { %10524 = vmatmul.mubr.f32.vlgmr.msra.gmra.mrb[0].mxu0 %v17957_v28  ;;  %11399 = vmatmul.mubr.f32.vlgmr.msra.gmra.mrb[0].mxu1 %v18063_v8  ;;  %v8071_v28 = vld [vmem:[%s20048_s1 + $0x8a8] sm:$0xff] }
 0x224   :  { %13911 = vmatpush3.bf16.msra.mxu0 %v18058_v46  ;;  %14511 = vmatpush3.bf16.msra.mxu1 %v18058_v46  ;;  %v18093_v40 = vpack.c.bf16 %v8071_v28, %v8070_v17  ;;  %v8073_v46 = vld [vmem:[%s20048_s1 + $0x8b8] sm:$0xff]  ;;  %v8074_v17 = vld [vmem:[%s20048_s1 + $0x8c0] sm:$0xff]  ;;  %v8075_v28 = vld [vmem:[%s20048_s1 + $0x8c8] sm:$0xff] }
 0x225   :  { %13912 = vmatprep.subr.bf16.mxu0 %v20381_v57  ;;  %14512 = vmatprep.subr.bf16.mxu1 %v20381_v57  ;;  %v18105_v3 = vpack.c.bf16 %v8073_v46, %v8072_v6  ;;  %v8076_v46 = vld [vmem:[%s20048_s1 + $0x8d0] sm:$0xff]  ;;  %v8077_v6 = vld [vmem:[%s20048_s1 + $0x8d8] sm:$0xff] }
 0x226   :  { %10558 = vmatprep.mubr.msk.f32.mxu0 %vm16198_vm0, %v20349_v9  ;;  %11433 = vmatprep.mubr.msk.f32.mxu1 %vm16198_vm0, %v20349_v9  ;;  %20431 = vst [vmem:[#allocation89_spill] sm:$0xff] %v18093_v40 }
 0x227   :  { %20432 = vst [vmem:[#allocation90_spill] sm:$0xff] %v18105_v3 }
 0x228   :  { %13914 = vmatpush3.bf16.msra.mxu0 %v18077_v54  ;;  %14514 = vmatpush3.bf16.msra.mxu1 %v18077_v54  ;;  %v18117_v54 = vpack.c.bf16 %v8075_v28, %v8074_v17  ;;  %v8078_v17 = vld [vmem:[%s20048_s1 + $0x8e0] sm:$0xff]  ;;  %v8079_v28 = vld [vmem:[%s20048_s1 + $0x8e8] sm:$0xff] }
 0x229   :  { %13915 = vmatprep.subr.bf16.mxu0 %v20381_v57  ;;  %14515 = vmatprep.subr.bf16.mxu1 %v20381_v57 }
 0x22a   :  { %20433 = vst [vmem:[#allocation91_spill] sm:$0xff] %v18117_v54 }
 0x22c   :  { %13917 = vmatpush3.bf16.msra.mxu0 %v18093_v40  ;;  %14517 = vmatpush3.bf16.msra.mxu1 %v18093_v40  ;;  %v18129_v40 = vpack.c.bf16 %v8077_v6, %v8076_v46  ;;  %v8080_v46 = vld [vmem:[%s20048_s1 + $0x8f0] sm:$0xff]  ;;  %v8081_v6 = vld [vmem:[%s20048_s1 + $0x8f8] sm:$0xff] }
 0x22d   :  { %13918 = vmatprep.subr.bf16.mxu0 %v20381_v57  ;;  %14518 = vmatprep.subr.bf16.mxu1 %v20381_v57 }
 0x22e   :  { %20434 = vst [vmem:[#allocation92_spill] sm:$0xff] %v18129_v40 }
 0x230   :  { %13920 = vmatpush3.bf16.msra.mxu0 %v18105_v3  ;;  %14520 = vmatpush3.bf16.msra.mxu1 %v18105_v3  ;;  %v18141_v3 = vpack.c.bf16 %v8079_v28, %v8078_v17  ;;  %v8082_v17 = vld [vmem:[%s20048_s1 + $0x900] sm:$0xff]  ;;  %v8083_v28 = vld [vmem:[%s20048_s1 + $0x908] sm:$0xff] }
 0x231   :  { %13921 = vmatprep.subr.bf16.mxu0 %v20381_v57  ;;  %14521 = vmatprep.subr.bf16.mxu1 %v20381_v57 }
 0x232   :  { %20435 = vst [vmem:[#allocation93_spill] sm:$0xff] %v18141_v3 }
 0x234   :  { %13923 = vmatpush3.bf16.msra.mxu0 %v18117_v54  ;;  %14523 = vmatpush3.bf16.msra.mxu1 %v18117_v54  ;;  %v18153_v54 = vpack.c.bf16 %v8081_v6, %v8080_v46  ;;  %v18170_v46 = vld [vmem:[%s20047_s0 + $0x2a] sm:$0x3]  ;;  %v8084_v6 = vld [vmem:[%s20048_s1 + $0x910] sm:$0xff] }
 0x235   :  { %13924 = vmatprep.subr.bf16.mxu0 %v20381_v57  ;;  %14524 = vmatprep.subr.bf16.mxu1 %v20381_v57 }
 0x236   :  { %20436 = vst [vmem:[#allocation94_spill] sm:$0xff] %v18153_v54 }
 0x238   :  { %13926 = vmatpush3.bf16.msra.mxu0 %v18129_v40  ;;  %14526 = vmatpush3.bf16.msra.mxu1 %v18129_v40  ;;  %v18165_v40 = vpack.c.bf16 %v8083_v28, %v8082_v17  ;;  %v8086_v28 = vld [vmem:[%s20048_s1 + $0x920] sm:$0xff] }
 0x239   :  { %13927 = vmatprep.subr.bf16.mxu0 %v20381_v57  ;;  %14527 = vmatprep.subr.bf16.mxu1 %v20381_v57 }
 0x23a   :  { %20437 = vst [vmem:[#allocation95_spill] sm:$0xff] %v18165_v40 }
 0x23c   :  { %13929 = vmatpush3.bf16.msra.mxu0 %v18141_v3  ;;  %14529 = vmatpush3.bf16.msra.mxu1 %v18141_v3  ;;  %v8085_v3 = vld [vmem:[%s20048_s1 + $0x918] sm:$0xff] }
 0x23d   :  { %13930 = vmatprep.subr.bf16.mxu0 %v20381_v57  ;;  %14530 = vmatprep.subr.bf16.mxu1 %v20381_v57  ;;  %v18184_v17 = vpack.c.bf16 %v8085_v3, %v8084_v6  ;;  %v8088_v6 = vld [vmem:[%s20048_s1 + $0x930] sm:$0xff] }
 0x23f   :  { %20438 = vst [vmem:[#allocation96_spill] sm:$0xff] %v18184_v17 }
 0x240   :  { %13932 = vmatpush3.bf16.msra.mxu0 %v18153_v54  ;;  %14532 = vmatpush3.bf16.msra.mxu1 %v18153_v54 }
 0x241   :  { %13933 = vmatprep.subr.bf16.mxu0 %v20381_v57  ;;  %14533 = vmatprep.subr.bf16.mxu1 %v20381_v57 }
 0x243   :  { %10559 = vmatmul.mubr.f32.vlgmr.msra.gmra.mrb[0].mxu0 %v18063_v8  ;;  %11434 = vmatmul.mubr.f32.vlgmr.msra.gmra.mrb[0].mxu1 %v18170_v46  ;;  %v8087_v8 = vld [vmem:[%s20048_s1 + $0x928] sm:$0xff] }
 0x244   :  { %13935 = vmatpush3.bf16.msra.mxu0 %v18165_v40  ;;  %14535 = vmatpush3.bf16.msra.mxu1 %v18165_v40  ;;  %v18200_v3 = vpack.c.bf16 %v8087_v8, %v8086_v28  ;;  %v8089_v40 = vld [vmem:[%s20048_s1 + $0x938] sm:$0xff]  ;;  %v8090_v28 = vld [vmem:[%s20048_s1 + $0x940] sm:$0xff]  ;;  %v8091_v8 = vld [vmem:[%s20048_s1 + $0x948] sm:$0xff] }
 0x245   :  { %13936 = vmatprep.subr.bf16.mxu0 %v20381_v57  ;;  %14536 = vmatprep.subr.bf16.mxu1 %v20381_v57  ;;  %v18212_v54 = vpack.c.bf16 %v8089_v40, %v8088_v6  ;;  %v8092_v40 = vld [vmem:[%s20048_s1 + $0x950] sm:$0xff]  ;;  %v8093_v6 = vld [vmem:[%s20048_s1 + $0x958] sm:$0xff] }
 0x246   :  { %10593 = vmatprep.mubr.msk.f32.mxu0 %vm16198_vm0, %v20349_v9  ;;  %11468 = vmatprep.mubr.msk.f32.mxu1 %vm16198_vm0, %v20349_v9  ;;  %20439 = vst [vmem:[#allocation97_spill] sm:$0xff] %v18200_v3 }
 0x247   :  { %20440 = vst [vmem:[#allocation98_spill] sm:$0xff] %v18212_v54 }
 0x248   :  { %13938 = vmatpush3.bf16.msra.mxu0 %v18184_v17  ;;  %14538 = vmatpush3.bf16.msra.mxu1 %v18184_v17  ;;  %v18224_v17 = vpack.c.bf16 %v8091_v8, %v8090_v28  ;;  %v8094_v28 = vld [vmem:[%s20048_s1 + $0x960] sm:$0xff]  ;;  %v8095_v8 = vld [vmem:[%s20048_s1 + $0x968] sm:$0xff] }
 0x249   :  { %13939 = vmatprep.subr.bf16.mxu0 %v20381_v57  ;;  %14539 = vmatprep.subr.bf16.mxu1 %v20381_v57 }
 0x24a   :  { %20441 = vst [vmem:[#allocation99_spill] sm:$0xff] %v18224_v17 }
 0x24c   :  { %13941 = vmatpush3.bf16.msra.mxu0 %v18200_v3  ;;  %14541 = vmatpush3.bf16.msra.mxu1 %v18200_v3  ;;  %v18236_v3 = vpack.c.bf16 %v8093_v6, %v8092_v40  ;;  %v8096_v40 = vld [vmem:[%s20048_s1 + $0x970] sm:$0xff]  ;;  %v8097_v6 = vld [vmem:[%s20048_s1 + $0x978] sm:$0xff] }
 0x24d   :  { %13942 = vmatprep.subr.bf16.mxu0 %v20381_v57  ;;  %14542 = vmatprep.subr.bf16.mxu1 %v20381_v57 }
 0x24e   :  { %20442 = vst [vmem:[#allocation100_spill] sm:$0xff] %v18236_v3 }
 0x250   :  { %13944 = vmatpush3.bf16.msra.mxu0 %v18212_v54  ;;  %14544 = vmatpush3.bf16.msra.mxu1 %v18212_v54  ;;  %v18248_v54 = vpack.c.bf16 %v8095_v8, %v8094_v28  ;;  %v8098_v28 = vld [vmem:[%s20048_s1 + $0x980] sm:$0xff]  ;;  %v8099_v8 = vld [vmem:[%s20048_s1 + $0x988] sm:$0xff] }
 0x251   :  { %13945 = vmatprep.subr.bf16.mxu0 %v20381_v57  ;;  %14545 = vmatprep.subr.bf16.mxu1 %v20381_v57 }
 0x252   :  { %20443 = vst [vmem:[#allocation101_spill] sm:$0xff] %v18248_v54 }
 0x254   :  { %13947 = vmatpush3.bf16.msra.mxu0 %v18224_v17  ;;  %14547 = vmatpush3.bf16.msra.mxu1 %v18224_v17  ;;  %v18260_v17 = vpack.c.bf16 %v8097_v6, %v8096_v40  ;;  %v18277_v40 = vld [vmem:[%s20047_s0 + $0x2c] sm:$0x3]  ;;  %v8100_v6 = vld [vmem:[%s20048_s1 + $0x990] sm:$0xff] }
 0x255   :  { %13948 = vmatprep.subr.bf16.mxu0 %v20381_v57  ;;  %14548 = vmatprep.subr.bf16.mxu1 %v20381_v57 }
 0x256   :  { %20444 = vst [vmem:[#allocation102_spill] sm:$0xff] %v18260_v17 }
 0x258   :  { %13950 = vmatpush3.bf16.msra.mxu0 %v18236_v3  ;;  %14550 = vmatpush3.bf16.msra.mxu1 %v18236_v3  ;;  %v18272_v3 = vpack.c.bf16 %v8099_v8, %v8098_v28  ;;  %v8102_v8 = vld [vmem:[%s20048_s1 + $0x9a0] sm:$0xff] }
 0x259   :  { %13951 = vmatprep.subr.bf16.mxu0 %v20381_v57  ;;  %14551 = vmatprep.subr.bf16.mxu1 %v20381_v57 }
 0x25a   :  { %20445 = vst [vmem:[#allocation103_spill] sm:$0xff] %v18272_v3 }
 0x25c   :  { %13953 = vmatpush3.bf16.msra.mxu0 %v18248_v54  ;;  %14553 = vmatpush3.bf16.msra.mxu1 %v18248_v54  ;;  %v8101_v54 = vld [vmem:[%s20048_s1 + $0x998] sm:$0xff] }
 0x25d   :  { %13954 = vmatprep.subr.bf16.mxu0 %v20381_v57  ;;  %14554 = vmatprep.subr.bf16.mxu1 %v20381_v57  ;;  %v18291_v28 = vpack.c.bf16 %v8101_v54, %v8100_v6  ;;  %v8104_v6 = vld [vmem:[%s20048_s1 + $0x9b0] sm:$0xff] }
 0x25f   :  { %20446 = vst [vmem:[#allocation104_spill] sm:$0xff] %v18291_v28 }
 0x260   :  { %13956 = vmatpush3.bf16.msra.mxu0 %v18260_v17  ;;  %14556 = vmatpush3.bf16.msra.mxu1 %v18260_v17 }
 0x261   :  { %13957 = vmatprep.subr.bf16.mxu0 %v20381_v57  ;;  %14557 = vmatprep.subr.bf16.mxu1 %v20381_v57 }
 0x263   :  { %10594 = vmatmul.mubr.f32.vlgmr.msra.gmra.mrb[0].mxu0 %v18170_v46  ;;  %11469 = vmatmul.mubr.f32.vlgmr.msra.gmra.mrb[0].mxu1 %v18277_v40  ;;  %v8103_v46 = vld [vmem:[%s20048_s1 + $0x9a8] sm:$0xff] }
 0x264   :  { %13959 = vmatpush3.bf16.msra.mxu0 %v18272_v3  ;;  %14559 = vmatpush3.bf16.msra.mxu1 %v18272_v3  ;;  %v18307_v54 = vpack.c.bf16 %v8103_v46, %v8102_v8  ;;  %v8105_v3 = vld [vmem:[%s20048_s1 + $0x9b8] sm:$0xff]  ;;  %v8106_v8 = vld [vmem:[%s20048_s1 + $0x9c0] sm:$0xff]  ;;  %v8107_v46 = vld [vmem:[%s20048_s1 + $0x9c8] sm:$0xff] }
 0x265   :  { %13960 = vmatprep.subr.bf16.mxu0 %v20381_v57  ;;  %14560 = vmatprep.subr.bf16.mxu1 %v20381_v57  ;;  %v18319_v17 = vpack.c.bf16 %v8105_v3, %v8104_v6  ;;  %v8108_v3 = vld [vmem:[%s20048_s1 + $0x9d0] sm:$0xff]  ;;  %v8109_v6 = vld [vmem:[%s20048_s1 + $0x9d8] sm:$0xff] }
 0x266   :  { %10628 = vmatprep.mubr.msk.f32.mxu0 %vm16198_vm0, %v20349_v9  ;;  %11503 = vmatprep.mubr.msk.f32.mxu1 %vm16198_vm0, %v20349_v9  ;;  %20447 = vst [vmem:[#allocation105_spill] sm:$0xff] %v18307_v54 }
 0x267   :  { %20448 = vst [vmem:[#allocation106_spill] sm:$0xff] %v18319_v17 }
 0x268   :  { %13962 = vmatpush3.bf16.msra.mxu0 %v18291_v28  ;;  %14562 = vmatpush3.bf16.msra.mxu1 %v18291_v28  ;;  %v18331_v28 = vpack.c.bf16 %v8107_v46, %v8106_v8  ;;  %v8110_v8 = vld [vmem:[%s20048_s1 + $0x9e0] sm:$0xff]  ;;  %v8111_v46 = vld [vmem:[%s20048_s1 + $0x9e8] sm:$0xff] }
 0x269   :  { %13963 = vmatprep.subr.bf16.mxu0 %v20381_v57  ;;  %14563 = vmatprep.subr.bf16.mxu1 %v20381_v57 }
 0x26a   :  { %20449 = vst [vmem:[#allocation107_spill] sm:$0xff] %v18331_v28 }
 0x26c   :  { %13965 = vmatpush3.bf16.msra.mxu0 %v18307_v54  ;;  %14565 = vmatpush3.bf16.msra.mxu1 %v18307_v54  ;;  %v18343_v54 = vpack.c.bf16 %v8109_v6, %v8108_v3  ;;  %v8112_v3 = vld [vmem:[%s20048_s1 + $0x9f0] sm:$0xff]  ;;  %v8113_v6 = vld [vmem:[%s20048_s1 + $0x9f8] sm:$0xff] }
 0x26d   :  { %13966 = vmatprep.subr.bf16.mxu0 %v20381_v57  ;;  %14566 = vmatprep.subr.bf16.mxu1 %v20381_v57 }
 0x26e   :  { %20450 = vst [vmem:[#allocation108_spill] sm:$0xff] %v18343_v54 }
 0x270   :  { %13968 = vmatpush3.bf16.msra.mxu0 %v18319_v17  ;;  %14568 = vmatpush3.bf16.msra.mxu1 %v18319_v17  ;;  %v18355_v17 = vpack.c.bf16 %v8111_v46, %v8110_v8  ;;  %v8114_v8 = vld [vmem:[%s20048_s1 + $0xa00] sm:$0xff]  ;;  %v8115_v46 = vld [vmem:[%s20048_s1 + $0xa08] sm:$0xff] }
 0x271   :  { %13969 = vmatprep.subr.bf16.mxu0 %v20381_v57  ;;  %14569 = vmatprep.subr.bf16.mxu1 %v20381_v57 }
 0x272   :  { %20451 = vst [vmem:[#allocation109_spill] sm:$0xff] %v18355_v17 }
 0x274   :  { %13971 = vmatpush3.bf16.msra.mxu0 %v18331_v28  ;;  %14571 = vmatpush3.bf16.msra.mxu1 %v18331_v28  ;;  %v18367_v28 = vpack.c.bf16 %v8113_v6, %v8112_v3  ;;  %v3600_v3 = vld [vmem:[%s20047_s0 + $0x2e] sm:$0x3]  ;;  %v8116_v6 = vld [vmem:[%s20048_s1 + $0xa10] sm:$0xff] }
 0x275   :  { %13972 = vmatprep.subr.bf16.mxu0 %v20381_v57  ;;  %14572 = vmatprep.subr.bf16.mxu1 %v20381_v57 }
 0x276   :  { %20452 = vst [vmem:[#allocation110_spill] sm:$0xff] %v18367_v28 }
 0x278   :  { %13974 = vmatpush3.bf16.msra.mxu0 %v18343_v54  ;;  %14574 = vmatpush3.bf16.msra.mxu1 %v18343_v54  ;;  %v18379_v54 = vpack.c.bf16 %v8115_v46, %v8114_v8  ;;  %v8118_v46 = vld [vmem:[%s20048_s1 + $0xa20] sm:$0xff] }
 0x279   :  { %13975 = vmatprep.subr.bf16.mxu0 %v20381_v57  ;;  %14575 = vmatprep.subr.bf16.mxu1 %v20381_v57 }
 0x27a   :  { %20453 = vst [vmem:[#allocation111_spill] sm:$0xff] %v18379_v54 }
 0x27c   :  { %13977 = vmatpush3.bf16.msra.mxu0 %v18355_v17  ;;  %14577 = vmatpush3.bf16.msra.mxu1 %v18355_v17  ;;  %v8117_v17 = vld [vmem:[%s20048_s1 + $0xa18] sm:$0xff] }
 0x27d   :  { %13978 = vmatprep.subr.bf16.mxu0 %v20381_v57  ;;  %14578 = vmatprep.subr.bf16.mxu1 %v20381_v57  ;;  %v18395_v8 = vpack.c.bf16 %v8117_v17, %v8116_v6 }
 0x27f   :  { %20454 = vst [vmem:[#allocation112_spill] sm:$0xff] %v18395_v8 }
 0x280   :  { %13980 = vmatpush3.bf16.msra.mxu0 %v18367_v28  ;;  %14580 = vmatpush3.bf16.msra.mxu1 %v18367_v28  ;;  %v8119_v28 = vld [vmem:[%s20048_s1 + $0xa28] sm:$0xff] }
 0x281   :  { %13981 = vmatprep.subr.bf16.mxu0 %v20381_v57  ;;  %14581 = vmatprep.subr.bf16.mxu1 %v20381_v57  ;;  %v18411_v17 = vpack.c.bf16 %v8119_v28, %v8118_v46  ;;  %v8122_v28 = vld [vmem:[%s20048_s1 + $0xa40] sm:$0xff]  ;;  %v8123_v46 = vld [vmem:[%s20048_s1 + $0xa48] sm:$0xff] }
 0x283   :  { %10629 = vmatmul.mubr.f32.vlgmr.msra.gmra.mrb[0].mxu0 %v18277_v40  ;;  %11504 = vmatmul.mubr.f32.vlgmr.msra.gmra.mrb[0].mxu1 %v3600_v3  ;;  %20455 = vst [vmem:[#allocation113_spill] sm:$0xff] %v18411_v17  ;;  %v8120_v40 = vld [vmem:[%s20048_s1 + $0xa30] sm:$0xff]  ;;  %v8121_v3 = vld [vmem:[%s20048_s1 + $0xa38] sm:$0xff] }
 0x284   :  { %13983 = vmatpush3.bf16.msra.mxu0 %v18379_v54  ;;  %14583 = vmatpush3.bf16.msra.mxu1 %v18379_v54  ;;  %v18423_v6 = vpack.c.bf16 %v8121_v3, %v8120_v40  ;;  %v8124_v40 = vld [vmem:[%s20048_s1 + $0xa50] sm:$0xff]  ;;  %v8125_v3 = vld [vmem:[%s20048_s1 + $0xa58] sm:$0xff] }
 0x285   :  { %13984 = vmatprep.subr.bf16.mxu0 %v20381_v57  ;;  %14584 = vmatprep.subr.bf16.mxu1 %v20381_v57 }
 0x286   :  { %10663 = vmatprep.mubr.msk.f32.mxu0 %vm16198_vm0, %v20349_v9  ;;  %11538 = vmatprep.mubr.msk.f32.mxu1 %vm16198_vm0, %v20349_v9  ;;  %20456 = vst [vmem:[#allocation114_spill] sm:$0xff] %v18423_v6 }
 0x288   :  { %13986 = vmatpush3.bf16.msra.mxu0 %v18395_v8  ;;  %14586 = vmatpush3.bf16.msra.mxu1 %v18395_v8  ;;  %v18435_v8 = vpack.c.bf16 %v8123_v46, %v8122_v28  ;;  %v8126_v28 = vld [vmem:[%s20048_s1 + $0xa60] sm:$0xff]  ;;  %v8127_v46 = vld [vmem:[%s20048_s1 + $0xa68] sm:$0xff] }
 0x289   :  { %13987 = vmatprep.subr.bf16.mxu0 %v20381_v57  ;;  %14587 = vmatprep.subr.bf16.mxu1 %v20381_v57 }
 0x28a   :  { %20457 = vst [vmem:[#allocation115_spill] sm:$0xff] %v18435_v8 }
 0x28c   :  { %13989 = vmatpush3.bf16.msra.mxu0 %v18411_v17  ;;  %14589 = vmatpush3.bf16.msra.mxu1 %v18411_v17  ;;  %v18447_v17 = vpack.c.bf16 %v8125_v3, %v8124_v40  ;;  %v8128_v40 = vld [vmem:[%s20048_s1 + $0xa70] sm:$0xff]  ;;  %v8129_v3 = vld [vmem:[%s20048_s1 + $0xa78] sm:$0xff] }
 0x28d   :  { %13990 = vmatprep.subr.bf16.mxu0 %v20381_v57  ;;  %14590 = vmatprep.subr.bf16.mxu1 %v20381_v57 }
 0x28e   :  { %20458 = vst [vmem:[#allocation116_spill] sm:$0xff] %v18447_v17 }
 0x290   :  { %13992 = vmatpush3.bf16.msra.mxu0 %v18423_v6  ;;  %14592 = vmatpush3.bf16.msra.mxu1 %v18423_v6  ;;  %v18459_v6 = vpack.c.bf16 %v8127_v46, %v8126_v28  ;;  %v8130_v28 = vld [vmem:[%s20048_s1 + $0xa80] sm:$0xff]  ;;  %v8131_v46 = vld [vmem:[%s20048_s1 + $0xa88] sm:$0xff] }
 0x291   :  { %13993 = vmatprep.subr.bf16.mxu0 %v20381_v57  ;;  %14593 = vmatprep.subr.bf16.mxu1 %v20381_v57 }
 0x292   :  { %20459 = vst [vmem:[#allocation117_spill] sm:$0xff] %v18459_v6 }
 0x294   :  { %13995 = vmatpush3.bf16.msra.mxu0 %v18435_v8  ;;  %14595 = vmatpush3.bf16.msra.mxu1 %v18435_v8  ;;  %v18471_v8 = vpack.c.bf16 %v8129_v3, %v8128_v40  ;;  %v1805_v40 = vld [vmem:[%s20047_s0 + $0x30] sm:$0x3]  ;;  %v18486_v3 = vpack.c.bf16 %v8131_v46, %v8130_v28  ;;  %v8134_v46 = vld [vmem:[%s20048_s1 + $0xaa0] sm:$0xff] }
 0x295   :  { %13996 = vmatprep.subr.bf16.mxu0 %v20381_v57  ;;  %14596 = vmatprep.subr.bf16.mxu1 %v20381_v57 }
 0x296   :  { %20460 = vst [vmem:[#allocation118_spill] sm:$0xff] %v18471_v8  ;;  %20461 = vst [vmem:[#allocation119_spill] sm:$0xff] %v18486_v3 }
 0x298   :  { %13998 = vmatpush3.bf16.msra.mxu0 %v18447_v17  ;;  %14598 = vmatpush3.bf16.msra.mxu1 %v18447_v17  ;;  %v8132_v17 = vld [vmem:[%s20048_s1 + $0xa90] sm:$0xff] }
 0x299   :  { %13999 = vmatprep.subr.bf16.mxu0 %v20381_v57  ;;  %14599 = vmatprep.subr.bf16.mxu1 %v20381_v57 }
 0x29c   :  { %14001 = vmatpush3.bf16.msra.mxu0 %v18459_v6  ;;  %14601 = vmatpush3.bf16.msra.mxu1 %v18459_v6  ;;  %v18491_v6 = vld [vmem:[%s20047_s0 + $0x32] sm:$0x3] }
 0x29d   :  { %14002 = vmatprep.subr.bf16.mxu0 %v20381_v57  ;;  %14602 = vmatprep.subr.bf16.mxu1 %v20381_v57 }
 0x2a0   :  { %14004 = vmatpush3.bf16.msra.mxu0 %v18471_v8  ;;  %14604 = vmatpush3.bf16.msra.mxu1 %v18471_v8  ;;  %v8133_v8 = vld [vmem:[%s20048_s1 + $0xa98] sm:$0xff] }
 0x2a1   :  { %14005 = vmatprep.subr.bf16.mxu0 %v20381_v57  ;;  %14605 = vmatprep.subr.bf16.mxu1 %v20381_v57  ;;  %v18504_v28 = vpack.c.bf16 %v8133_v8, %v8132_v17  ;;  %v8136_v17 = vld [vmem:[%s20048_s1 + $0xab0] sm:$0xff] }
 0x2a3   :  { %10664 = vmatmul.mubr.f32.vlgmr.msra.gmra.mrb[0].mxu0 %v1805_v40  ;;  %11539 = vmatmul.mubr.f32.vlgmr.msra.gmra.mrb[0].mxu1 %v18491_v6  ;;  %20462 = vst [vmem:[#allocation120_spill] sm:$0xff] %v18504_v28  ;;  %v8135_v40 = vld [vmem:[%s20048_s1 + $0xaa8] sm:$0xff] }
 0x2a4   :  { %14007 = vmatpush3.bf16.msra.mxu0 %v18486_v3  ;;  %14607 = vmatpush3.bf16.msra.mxu1 %v18486_v3  ;;  %v18520_v8 = vpack.c.bf16 %v8135_v40, %v8134_v46  ;;  %v8137_v3 = vld [vmem:[%s20048_s1 + $0xab8] sm:$0xff]  ;;  %v8138_v46 = vld [vmem:[%s20048_s1 + $0xac0] sm:$0xff]  ;;  %v8139_v40 = vld [vmem:[%s20048_s1 + $0xac8] sm:$0xff] }
 0x2a5   :  { %14008 = vmatprep.subr.bf16.mxu0 %v20381_v57  ;;  %14608 = vmatprep.subr.bf16.mxu1 %v20381_v57  ;;  %v18532_v54 = vpack.c.bf16 %v8137_v3, %v8136_v17  ;;  %v8140_v3 = vld [vmem:[%s20048_s1 + $0xad0] sm:$0xff]  ;;  %v8141_v17 = vld [vmem:[%s20048_s1 + $0xad8] sm:$0xff] }
 0x2a6   :  { %10698 = vmatprep.mubr.msk.f32.mxu0 %vm16198_vm0, %v20349_v9  ;;  %11573 = vmatprep.mubr.msk.f32.mxu1 %vm16198_vm0, %v20349_v9  ;;  %20463 = vst [vmem:[#allocation121_spill] sm:$0xff] %v18520_v8 }
 0x2a7   :  { %20464 = vst [vmem:[#allocation122_spill] sm:$0xff] %v18532_v54 }
 0x2a8   :  { %14010 = vmatpush3.bf16.msra.mxu0 %v18504_v28  ;;  %14610 = vmatpush3.bf16.msra.mxu1 %v18504_v28  ;;  %v18544_v28 = vpack.c.bf16 %v8139_v40, %v8138_v46  ;;  %v8142_v46 = vld [vmem:[%s20048_s1 + $0xae0] sm:$0xff]  ;;  %v8143_v40 = vld [vmem:[%s20048_s1 + $0xae8] sm:$0xff] }
 0x2a9   :  { %14011 = vmatprep.subr.bf16.mxu0 %v20381_v57  ;;  %14611 = vmatprep.subr.bf16.mxu1 %v20381_v57 }
 0x2aa   :  { %20465 = vst [vmem:[#allocation123_spill] sm:$0xff] %v18544_v28 }
 0x2ac   :  { %14013 = vmatpush3.bf16.msra.mxu0 %v18520_v8  ;;  %14613 = vmatpush3.bf16.msra.mxu1 %v18520_v8  ;;  %v18556_v8 = vpack.c.bf16 %v8141_v17, %v8140_v3  ;;  %v8144_v3 = vld [vmem:[%s20048_s1 + $0xaf0] sm:$0xff]  ;;  %v8145_v17 = vld [vmem:[%s20048_s1 + $0xaf8] sm:$0xff] }
 0x2ad   :  { %14014 = vmatprep.subr.bf16.mxu0 %v20381_v57  ;;  %14614 = vmatprep.subr.bf16.mxu1 %v20381_v57 }
 0x2ae   :  { %20466 = vst [vmem:[#allocation124_spill] sm:$0xff] %v18556_v8 }
 0x2b0   :  { %14016 = vmatpush3.bf16.msra.mxu0 %v18532_v54  ;;  %14616 = vmatpush3.bf16.msra.mxu1 %v18532_v54  ;;  %v18568_v54 = vpack.c.bf16 %v8143_v40, %v8142_v46  ;;  %v8146_v46 = vld [vmem:[%s20048_s1 + $0xb00] sm:$0xff]  ;;  %v8147_v40 = vld [vmem:[%s20048_s1 + $0xb08] sm:$0xff] }
 0x2b1   :  { %14017 = vmatprep.subr.bf16.mxu0 %v20381_v57  ;;  %14617 = vmatprep.subr.bf16.mxu1 %v20381_v57 }
 0x2b2   :  { %20467 = vst [vmem:[#allocation125_spill] sm:$0xff] %v18568_v54 }
 0x2b4   :  { %14019 = vmatpush3.bf16.msra.mxu0 %v18544_v28  ;;  %14619 = vmatpush3.bf16.msra.mxu1 %v18544_v28  ;;  %v18580_v28 = vpack.c.bf16 %v8145_v17, %v8144_v3  ;;  %v18597_v3 = vld [vmem:[%s20047_s0 + $0x34] sm:$0x3] }
 0x2b5   :  { %14020 = vmatprep.subr.bf16.mxu0 %v20381_v57  ;;  %14620 = vmatprep.subr.bf16.mxu1 %v20381_v57  ;;  %v8148_v17 = vld [vmem:[%s20048_s1 + $0xb10] sm:$0xff] }
 0x2b6   :  { %20468 = vst [vmem:[#allocation126_spill] sm:$0xff] %v18580_v28 }
 0x2b8   :  { %14022 = vmatpush3.bf16.msra.mxu0 %v18556_v8  ;;  %14622 = vmatpush3.bf16.msra.mxu1 %v18556_v8  ;;  %v18592_v8 = vpack.c.bf16 %v8147_v40, %v8146_v46  ;;  %v8150_v40 = vld [vmem:[%s20048_s1 + $0xb20] sm:$0xff] }
 0x2b9   :  { %14023 = vmatprep.subr.bf16.mxu0 %v20381_v57  ;;  %14623 = vmatprep.subr.bf16.mxu1 %v20381_v57 }
 0x2ba   :  { %20469 = vst [vmem:[#allocation127_spill] sm:$0xff] %v18592_v8 }
 0x2bc   :  { %14025 = vmatpush3.bf16.msra.mxu0 %v18568_v54  ;;  %14625 = vmatpush3.bf16.msra.mxu1 %v18568_v54  ;;  %v8149_v54 = vld [vmem:[%s20048_s1 + $0xb18] sm:$0xff] }
 0x2bd   :  { %14026 = vmatprep.subr.bf16.mxu0 %v20381_v57  ;;  %14626 = vmatprep.subr.bf16.mxu1 %v20381_v57  ;;  %v18611_v46 = vpack.c.bf16 %v8149_v54, %v8148_v17  ;;  %v8152_v17 = vld [vmem:[%s20048_s1 + $0xb30] sm:$0xff] }
 0x2bf   :  { %20470 = vst [vmem:[#allocation128_spill] sm:$0xff] %v18611_v46 }
 0x2c0   :  { %14028 = vmatpush3.bf16.msra.mxu0 %v18580_v28  ;;  %14628 = vmatpush3.bf16.msra.mxu1 %v18580_v28 }
 0x2c1   :  { %14029 = vmatprep.subr.bf16.mxu0 %v20381_v57  ;;  %14629 = vmatprep.subr.bf16.mxu1 %v20381_v57 }
 0x2c3   :  { %10699 = vmatmul.mubr.f32.vlgmr.msra.gmra.mrb[0].mxu0 %v18491_v6  ;;  %11574 = vmatmul.mubr.f32.vlgmr.msra.gmra.mrb[0].mxu1 %v18597_v3  ;;  %v8151_v6 = vld [vmem:[%s20048_s1 + $0xb28] sm:$0xff] }
 0x2c4   :  { %14031 = vmatpush3.bf16.msra.mxu0 %v18592_v8  ;;  %14631 = vmatpush3.bf16.msra.mxu1 %v18592_v8  ;;  %v18627_v54 = vpack.c.bf16 %v8151_v6, %v8150_v40  ;;  %v8153_v8 = vld [vmem:[%s20048_s1 + $0xb38] sm:$0xff]  ;;  %v8154_v40 = vld [vmem:[%s20048_s1 + $0xb40] sm:$0xff]  ;;  %v8155_v6 = vld [vmem:[%s20048_s1 + $0xb48] sm:$0xff] }
 0x2c5   :  { %14032 = vmatprep.subr.bf16.mxu0 %v20381_v57  ;;  %14632 = vmatprep.subr.bf16.mxu1 %v20381_v57  ;;  %v18639_v28 = vpack.c.bf16 %v8153_v8, %v8152_v17  ;;  %v8156_v8 = vld [vmem:[%s20048_s1 + $0xb50] sm:$0xff]  ;;  %v8157_v17 = vld [vmem:[%s20048_s1 + $0xb58] sm:$0xff] }
 0x2c6   :  { %10733 = vmatprep.mubr.msk.f32.mxu0 %vm16198_vm0, %v20349_v9  ;;  %11608 = vmatprep.mubr.msk.f32.mxu1 %vm16198_vm0, %v20349_v9  ;;  %20471 = vst [vmem:[#allocation129_spill] sm:$0xff] %v18627_v54 }
 0x2c7   :  { %20472 = vst [vmem:[#allocation130_spill] sm:$0xff] %v18639_v28 }
 0x2c8   :  { %14034 = vmatpush3.bf16.msra.mxu0 %v18611_v46  ;;  %14634 = vmatpush3.bf16.msra.mxu1 %v18611_v46  ;;  %v18651_v46 = vpack.c.bf16 %v8155_v6, %v8154_v40  ;;  %v8158_v40 = vld [vmem:[%s20048_s1 + $0xb60] sm:$0xff]  ;;  %v8159_v6 = vld [vmem:[%s20048_s1 + $0xb68] sm:$0xff] }
 0x2c9   :  { %14035 = vmatprep.subr.bf16.mxu0 %v20381_v57  ;;  %14635 = vmatprep.subr.bf16.mxu1 %v20381_v57 }
 0x2ca   :  { %20473 = vst [vmem:[#allocation131_spill] sm:$0xff] %v18651_v46 }
 0x2cc   :  { %14037 = vmatpush3.bf16.msra.mxu0 %v18627_v54  ;;  %14637 = vmatpush3.bf16.msra.mxu1 %v18627_v54  ;;  %v18663_v54 = vpack.c.bf16 %v8157_v17, %v8156_v8  ;;  %v8160_v8 = vld [vmem:[%s20048_s1 + $0xb70] sm:$0xff]  ;;  %v8161_v17 = vld [vmem:[%s20048_s1 + $0xb78] sm:$0xff] }
 0x2cd   :  { %14038 = vmatprep.subr.bf16.mxu0 %v20381_v57  ;;  %14638 = vmatprep.subr.bf16.mxu1 %v20381_v57 }
 0x2ce   :  { %20474 = vst [vmem:[#allocation132_spill] sm:$0xff] %v18663_v54 }
 0x2d0   :  { %14040 = vmatpush3.bf16.msra.mxu0 %v18639_v28  ;;  %14640 = vmatpush3.bf16.msra.mxu1 %v18639_v28  ;;  %v18675_v28 = vpack.c.bf16 %v8159_v6, %v8158_v40  ;;  %v8162_v40 = vld [vmem:[%s20048_s1 + $0xb80] sm:$0xff]  ;;  %v8163_v6 = vld [vmem:[%s20048_s1 + $0xb88] sm:$0xff] }
 0x2d1   :  { %14041 = vmatprep.subr.bf16.mxu0 %v20381_v57  ;;  %14641 = vmatprep.subr.bf16.mxu1 %v20381_v57 }
 0x2d2   :  { %20475 = vst [vmem:[#allocation133_spill] sm:$0xff] %v18675_v28 }
 0x2d4   :  { %14043 = vmatpush3.bf16.msra.mxu0 %v18651_v46  ;;  %14643 = vmatpush3.bf16.msra.mxu1 %v18651_v46  ;;  %v18687_v46 = vpack.c.bf16 %v8161_v17, %v8160_v8  ;;  %v18704_v8 = vld [vmem:[%s20047_s0 + $0x36] sm:$0x3] }
 0x2d5   :  { %14044 = vmatprep.subr.bf16.mxu0 %v20381_v57  ;;  %14644 = vmatprep.subr.bf16.mxu1 %v20381_v57  ;;  %v8164_v17 = vld [vmem:[%s20048_s1 + $0xb90] sm:$0xff] }
 0x2d6   :  { %20476 = vst [vmem:[#allocation134_spill] sm:$0xff] %v18687_v46 }
 0x2d8   :  { %14046 = vmatpush3.bf16.msra.mxu0 %v18663_v54  ;;  %14646 = vmatpush3.bf16.msra.mxu1 %v18663_v54  ;;  %v18699_v54 = vpack.c.bf16 %v8163_v6, %v8162_v40  ;;  %v8166_v6 = vld [vmem:[%s20048_s1 + $0xba0] sm:$0xff] }
 0x2d9   :  { %14047 = vmatprep.subr.bf16.mxu0 %v20381_v57  ;;  %14647 = vmatprep.subr.bf16.mxu1 %v20381_v57 }
 0x2da   :  { %20477 = vst [vmem:[#allocation135_spill] sm:$0xff] %v18699_v54 }
 0x2dc   :  { %14049 = vmatpush3.bf16.msra.mxu0 %v18675_v28  ;;  %14649 = vmatpush3.bf16.msra.mxu1 %v18675_v28  ;;  %v8165_v28 = vld [vmem:[%s20048_s1 + $0xb98] sm:$0xff] }
 0x2dd   :  { %14050 = vmatprep.subr.bf16.mxu0 %v20381_v57  ;;  %14650 = vmatprep.subr.bf16.mxu1 %v20381_v57  ;;  %v18718_v40 = vpack.c.bf16 %v8165_v28, %v8164_v17  ;;  %v8168_v17 = vld [vmem:[%s20048_s1 + $0xbb0] sm:$0xff] }
 0x2df   :  { %20478 = vst [vmem:[#allocation136_spill] sm:$0xff] %v18718_v40 }
 0x2e0   :  { %14052 = vmatpush3.bf16.msra.mxu0 %v18687_v46  ;;  %14652 = vmatpush3.bf16.msra.mxu1 %v18687_v46 }
 0x2e1   :  { %14053 = vmatprep.subr.bf16.mxu0 %v20381_v57  ;;  %14653 = vmatprep.subr.bf16.mxu1 %v20381_v57 }
 0x2e3   :  { %10734 = vmatmul.mubr.f32.vlgmr.msra.gmra.mrb[0].mxu0 %v18597_v3  ;;  %11609 = vmatmul.mubr.f32.vlgmr.msra.gmra.mrb[0].mxu1 %v18704_v8  ;;  %v8167_v3 = vld [vmem:[%s20048_s1 + $0xba8] sm:$0xff] }
 0x2e4   :  { %14055 = vmatpush3.bf16.msra.mxu0 %v18699_v54  ;;  %14655 = vmatpush3.bf16.msra.mxu1 %v18699_v54  ;;  %v18734_v28 = vpack.c.bf16 %v8167_v3, %v8166_v6  ;;  %v8169_v54 = vld [vmem:[%s20048_s1 + $0xbb8] sm:$0xff]  ;;  %v8170_v6 = vld [vmem:[%s20048_s1 + $0xbc0] sm:$0xff]  ;;  %v8171_v3 = vld [vmem:[%s20048_s1 + $0xbc8] sm:$0xff] }
 0x2e5   :  { %14056 = vmatprep.subr.bf16.mxu0 %v20381_v57  ;;  %14656 = vmatprep.subr.bf16.mxu1 %v20381_v57  ;;  %v18746_v46 = vpack.c.bf16 %v8169_v54, %v8168_v17  ;;  %v8172_v54 = vld [vmem:[%s20048_s1 + $0xbd0] sm:$0xff]  ;;  %v8173_v17 = vld [vmem:[%s20048_s1 + $0xbd8] sm:$0xff] }
 0x2e6   :  { %10768 = vmatprep.mubr.msk.f32.mxu0 %vm16198_vm0, %v20349_v9  ;;  %11643 = vmatprep.mubr.msk.f32.mxu1 %vm16198_vm0, %v20349_v9  ;;  %20479 = vst [vmem:[#allocation137_spill] sm:$0xff] %v18734_v28 }
 0x2e7   :  { %20480 = vst [vmem:[#allocation138_spill] sm:$0xff] %v18746_v46 }
 0x2e8   :  { %14058 = vmatpush3.bf16.msra.mxu0 %v18718_v40  ;;  %14658 = vmatpush3.bf16.msra.mxu1 %v18718_v40  ;;  %v18758_v40 = vpack.c.bf16 %v8171_v3, %v8170_v6  ;;  %v8174_v6 = vld [vmem:[%s20048_s1 + $0xbe0] sm:$0xff]  ;;  %v8175_v3 = vld [vmem:[%s20048_s1 + $0xbe8] sm:$0xff] }
 0x2e9   :  { %14059 = vmatprep.subr.bf16.mxu0 %v20381_v57  ;;  %14659 = vmatprep.subr.bf16.mxu1 %v20381_v57 }
 0x2ea   :  { %20481 = vst [vmem:[#allocation139_spill] sm:$0xff] %v18758_v40 }
 0x2ec   :  { %14061 = vmatpush3.bf16.msra.mxu0 %v18734_v28  ;;  %14661 = vmatpush3.bf16.msra.mxu1 %v18734_v28  ;;  %v18770_v28 = vpack.c.bf16 %v8173_v17, %v8172_v54  ;;  %v8176_v54 = vld [vmem:[%s20048_s1 + $0xbf0] sm:$0xff]  ;;  %v8177_v17 = vld [vmem:[%s20048_s1 + $0xbf8] sm:$0xff] }
 0x2ed   :  { %14062 = vmatprep.subr.bf16.mxu0 %v20381_v57  ;;  %14662 = vmatprep.subr.bf16.mxu1 %v20381_v57 }
 0x2ee   :  { %20482 = vst [vmem:[#allocation140_spill] sm:$0xff] %v18770_v28 }
 0x2f0   :  { %14064 = vmatpush3.bf16.msra.mxu0 %v18746_v46  ;;  %14664 = vmatpush3.bf16.msra.mxu1 %v18746_v46  ;;  %v18782_v46 = vpack.c.bf16 %v8175_v3, %v8174_v6  ;;  %v8178_v6 = vld [vmem:[%s20048_s1 + $0xc00] sm:$0xff]  ;;  %v8179_v3 = vld [vmem:[%s20048_s1 + $0xc08] sm:$0xff] }
 0x2f1   :  { %14065 = vmatprep.subr.bf16.mxu0 %v20381_v57  ;;  %14665 = vmatprep.subr.bf16.mxu1 %v20381_v57 }
 0x2f2   :  { %20483 = vst [vmem:[#allocation141_spill] sm:$0xff] %v18782_v46 }
 0x2f4   :  { %14067 = vmatpush3.bf16.msra.mxu0 %v18758_v40  ;;  %14667 = vmatpush3.bf16.msra.mxu1 %v18758_v40  ;;  %v18794_v40 = vpack.c.bf16 %v8177_v17, %v8176_v54  ;;  %v2161_v54 = vld [vmem:[%s20047_s0 + $0x38] sm:$0x3]  ;;  %v8180_v17 = vld [vmem:[%s20048_s1 + $0xc10] sm:$0xff] }
 0x2f5   :  { %14068 = vmatprep.subr.bf16.mxu0 %v20381_v57  ;;  %14668 = vmatprep.subr.bf16.mxu1 %v20381_v57 }
 0x2f6   :  { %20484 = vst [vmem:[#allocation142_spill] sm:$0xff] %v18794_v40 }
 0x2f8   :  { %14070 = vmatpush3.bf16.msra.mxu0 %v18770_v28  ;;  %14670 = vmatpush3.bf16.msra.mxu1 %v18770_v28  ;;  %v18806_v28 = vpack.c.bf16 %v8179_v3, %v8178_v6  ;;  %v8182_v3 = vld [vmem:[%s20048_s1 + $0xc20] sm:$0xff] }
 0x2f9   :  { %14071 = vmatprep.subr.bf16.mxu0 %v20381_v57  ;;  %14671 = vmatprep.subr.bf16.mxu1 %v20381_v57 }
 0x2fa   :  { %20485 = vst [vmem:[#allocation143_spill] sm:$0xff] %v18806_v28 }
 0x2fc   :  { %14073 = vmatpush3.bf16.msra.mxu0 %v18782_v46  ;;  %14673 = vmatpush3.bf16.msra.mxu1 %v18782_v46  ;;  %v8181_v46 = vld [vmem:[%s20048_s1 + $0xc18] sm:$0xff] }
 0x2fd   :  { %14074 = vmatprep.subr.bf16.mxu0 %v20381_v57  ;;  %14674 = vmatprep.subr.bf16.mxu1 %v20381_v57  ;;  %v18822_v6 = vpack.c.bf16 %v8181_v46, %v8180_v17  ;;  %v8185_v17 = vld [vmem:[%s20048_s1 + $0xc38] sm:$0xff] }
 0x2ff   :  { %20486 = vst [vmem:[#allocation144_spill] sm:$0xff] %v18822_v6 }
 0x300   :  { %14076 = vmatpush3.bf16.msra.mxu0 %v18794_v40  ;;  %14676 = vmatpush3.bf16.msra.mxu1 %v18794_v40  ;;  %v8183_v40 = vld [vmem:[%s20048_s1 + $0xc28] sm:$0xff] }
 0x301   :  { %14077 = vmatprep.subr.bf16.mxu0 %v20381_v57  ;;  %14677 = vmatprep.subr.bf16.mxu1 %v20381_v57  ;;  %v18838_v46 = vpack.c.bf16 %v8183_v40, %v8182_v3  ;;  %v8186_v40 = vld [vmem:[%s20048_s1 + $0xc40] sm:$0xff]  ;;  %v8187_v3 = vld [vmem:[%s20048_s1 + $0xc48] sm:$0xff] }
 0x303   :  { %10769 = vmatmul.mubr.f32.vlgmr.msra.gmra.mrb[0].mxu0 %v18704_v8  ;;  %11644 = vmatmul.mubr.f32.vlgmr.msra.gmra.mrb[0].mxu1 %v2161_v54  ;;  %20487 = vst [vmem:[#allocation145_spill] sm:$0xff] %v18838_v46  ;;  %v8184_v8 = vld [vmem:[%s20048_s1 + $0xc30] sm:$0xff] }
 0x304   :  { %14079 = vmatpush3.bf16.msra.mxu0 %v18806_v28  ;;  %14679 = vmatpush3.bf16.msra.mxu1 %v18806_v28  ;;  %v18850_v28 = vpack.c.bf16 %v8185_v17, %v8184_v8  ;;  %v8188_v8 = vld [vmem:[%s20048_s1 + $0xc50] sm:$0xff]  ;;  %v8189_v17 = vld [vmem:[%s20048_s1 + $0xc58] sm:$0xff] }
 0x305   :  { %14080 = vmatprep.subr.bf16.mxu0 %v20381_v57  ;;  %14680 = vmatprep.subr.bf16.mxu1 %v20381_v57 }
 0x306   :  { %10803 = vmatprep.mubr.msk.f32.mxu0 %vm16198_vm0, %v20349_v9  ;;  %11678 = vmatprep.mubr.msk.f32.mxu1 %vm16198_vm0, %v20349_v9  ;;  %20488 = vst [vmem:[#allocation146_spill] sm:$0xff] %v18850_v28 }
 0x308   :  { %14082 = vmatpush3.bf16.msra.mxu0 %v18822_v6  ;;  %14682 = vmatpush3.bf16.msra.mxu1 %v18822_v6  ;;  %v18862_v6 = vpack.c.bf16 %v8187_v3, %v8186_v40  ;;  %v8190_v40 = vld [vmem:[%s20048_s1 + $0xc60] sm:$0xff]  ;;  %v8191_v3 = vld [vmem:[%s20048_s1 + $0xc68] sm:$0xff] }
 0x309   :  { %14083 = vmatprep.subr.bf16.mxu0 %v20381_v57  ;;  %14683 = vmatprep.subr.bf16.mxu1 %v20381_v57 }
 0x30a   :  { %20489 = vst [vmem:[#allocation147_spill] sm:$0xff] %v18862_v6 }
 0x30c   :  { %14085 = vmatpush3.bf16.msra.mxu0 %v18838_v46  ;;  %14685 = vmatpush3.bf16.msra.mxu1 %v18838_v46  ;;  %v18874_v46 = vpack.c.bf16 %v8189_v17, %v8188_v8  ;;  %v8192_v8 = vld [vmem:[%s20048_s1 + $0xc70] sm:$0xff]  ;;  %v8193_v17 = vld [vmem:[%s20048_s1 + $0xc78] sm:$0xff] }
 0x30d   :  { %14086 = vmatprep.subr.bf16.mxu0 %v20381_v57  ;;  %14686 = vmatprep.subr.bf16.mxu1 %v20381_v57 }
 0x310   :  { %14088 = vmatpush3.bf16.msra.mxu0 %v18850_v28  ;;  %14688 = vmatpush3.bf16.msra.mxu1 %v18850_v28  ;;  %v18886_v28 = vpack.c.bf16 %v8191_v3, %v8190_v40  ;;  %v3956_v40 = vld [vmem:[%s20047_s0 + $0x3a] sm:$0x3]  ;;  %v20526_v3 = vld [vmem:[#allocation41_spill] sm:$0xff] }
 0x311   :  { %14089 = vmatprep.subr.bf16.mxu0 %v20381_v57  ;;  %14689 = vmatprep.subr.bf16.mxu1 %v20381_v57 }
 0x314   :  { %14091 = vmatpush3.bf16.msra.mxu0 %v18862_v6  ;;  %14691 = vmatpush3.bf16.msra.mxu1 %v18862_v6  ;;  %v18898_v6 = vpack.c.bf16 %v8193_v17, %v8192_v8  ;;  %v20527_v8 = vld [vmem:[#allocation42_spill] sm:$0xff]  ;;  %v20528_v17 = vld [vmem:[#allocation43_spill] sm:$0xff] }
 0x315   :  { %14092 = vmatprep.subr.bf16.mxu0 %v20381_v57  ;;  %14692 = vmatprep.subr.bf16.mxu1 %v20381_v57 }
 0x318   :  { %14094 = vmatpush3.bf16.msra.mxu0 %v18874_v46  ;;  %14694 = vmatpush3.bf16.msra.mxu1 %v18874_v46 }
 0x319   :  { %14095 = vmatprep.subr.bf16.mxu0 %v20381_v57  ;;  %14695 = vmatprep.subr.bf16.mxu1 %v20381_v57 }
 0x31c   :  { %14097 = vmatpush3.bf16.msra.mxu0 %v18886_v28  ;;  %14697 = vmatpush3.bf16.msra.mxu1 %v18886_v28 }
 0x31d   :  { %14098 = vmatprep.subr.bf16.mxu0 %v20381_v57  ;;  %14698 = vmatprep.subr.bf16.mxu1 %v20381_v57 }
 0x320   :  { %14100 = vmatpush3.bf16.msra.mxu0 %v18898_v6  ;;  %14700 = vmatpush3.bf16.msra.mxu1 %v18898_v6 }
 0x321   :  { %14701 = vmatprep.subr.bf16.mxu0 %v20381_v57  ;;  %15301 = vmatprep.subr.bf16.mxu1 %v20381_v57 }
 0x323   :  { %10804 = vmatmul.mubr.f32.vlgmr.msra.gmra.mrb[0].mxu0 %v2161_v54  ;;  %11679 = vmatmul.mubr.f32.vlgmr.msra.gmra.mrb[0].mxu1 %v3956_v40  ;;  %v20525_v54 = vld [vmem:[#allocation40_spill] sm:$0xff] }
 0x324   :  { %14703 = vmatpush3.bf16.msra.mxu0 %v16252_v4  ;;  %15303 = vmatpush3.bf16.msra.mxu1 %v16252_v4  ;;  %v16149_v4 = vld [vmem:[%s20047_s0 + $0xe] sm:$0x3]  ;;  %v20529_v40 = vld [vmem:[#allocation44_spill] sm:$0xff] }
 0x325   :  { %14704 = vmatprep.subr.bf16.mxu0 %v20381_v57  ;;  %15304 = vmatprep.subr.bf16.mxu1 %v20381_v57 }
 0x326   :  { %11713 = vmatprep.mubr.msk.f32.mxu0 %vm16198_vm0, %v20349_v9  ;;  %12588 = vmatprep.mubr.msk.f32.mxu1 %vm16198_vm0, %v20349_v9 }
 0x328   :  { %14706 = vmatpush3.bf16.msra.mxu0 %v16263_v7  ;;  %15306 = vmatpush3.bf16.msra.mxu1 %v16263_v7  ;;  %v18951_v7 = vld [vmem:[%s20047_s0 + $0x10] sm:$0x3] }
 0x329   :  { %14707 = vmatprep.subr.bf16.mxu0 %v20381_v57  ;;  %15307 = vmatprep.subr.bf16.mxu1 %v20381_v57 }
 0x32c   :  { %14709 = vmatpush3.bf16.msra.mxu0 %v16275_v10  ;;  %15309 = vmatpush3.bf16.msra.mxu1 %v16275_v10  ;;  %v16151_v10 = vld [vmem:[%s20047_s0 + $0xc] sm:$0x3] }
 0x32d   :  { %14710 = vmatprep.subr.bf16.mxu0 %v20381_v57  ;;  %15310 = vmatprep.subr.bf16.mxu1 %v20381_v57 }
 0x330   :  { %14712 = vmatpush3.bf16.msra.mxu0 %v16287_v13  ;;  %15312 = vmatpush3.bf16.msra.mxu1 %v16287_v13  ;;  %v16152_v13 = vld [vmem:[%s20047_s0 + $0x12] sm:$0x3] }
 0x331   :  { %14713 = vmatprep.subr.bf16.mxu0 %v20381_v57  ;;  %15313 = vmatprep.subr.bf16.mxu1 %v20381_v57 }
 0x334   :  { %14715 = vmatpush3.bf16.msra.mxu0 %v16299_v16  ;;  %15315 = vmatpush3.bf16.msra.mxu1 %v16299_v16  ;;  %v16153_v16 = vld [vmem:[%s20047_s0 + $0x14] sm:$0x3] }
 0x335   :  { %14716 = vmatprep.subr.bf16.mxu0 %v20381_v57  ;;  %15316 = vmatprep.subr.bf16.mxu1 %v20381_v57 }
 0x338   :  { %14718 = vmatpush3.bf16.msra.mxu0 %v16311_v19  ;;  %15318 = vmatpush3.bf16.msra.mxu1 %v16311_v19  ;;  %v16154_v19 = vld [vmem:[%s20047_s0 + $0x16] sm:$0x3] }
 0x339   :  { %14719 = vmatprep.subr.bf16.mxu0 %v20381_v57  ;;  %15319 = vmatprep.subr.bf16.mxu1 %v20381_v57 }
 0x33c   :  { %14721 = vmatpush3.bf16.msra.mxu0 %v16323_v22  ;;  %15321 = vmatpush3.bf16.msra.mxu1 %v16323_v22  ;;  %v16155_v22 = vld [vmem:[%s20047_s0 + $0x18] sm:$0x3] }
 0x33d   :  { %14722 = vmatprep.subr.bf16.mxu0 %v20381_v57  ;;  %15322 = vmatprep.subr.bf16.mxu1 %v20381_v57 }
 0x340   :  { %14724 = vmatpush3.bf16.msra.mxu0 %v16335_v25  ;;  %15324 = vmatpush3.bf16.msra.mxu1 %v16335_v25  ;;  %v16156_v25 = vld [vmem:[%s20047_s0 + $0x1a] sm:$0x3] }
 0x341   :  { %14725 = vmatprep.subr.bf16.mxu0 %v20381_v57  ;;  %15325 = vmatprep.subr.bf16.mxu1 %v20381_v57 }
 0x343   :  { %11714 = vmatmul.mubr.f32.vlgmr.msra.gmra.mrb[2].mxu0 %v16149_v4  ;;  %12589 = vmatmul.mubr.f32.vlgmr.msra.gmra.mrb[2].mxu1 %v18951_v7 }
 0x344   :  { %14727 = vmatpush3.bf16.msra.mxu0 %v16352_v29  ;;  %15327 = vmatpush3.bf16.msra.mxu1 %v16352_v29 }
 0x345   :  { %14728 = vmatprep.subr.bf16.mxu0 %v20381_v57  ;;  %15328 = vmatprep.subr.bf16.mxu1 %v20381_v57 }
 0x346   :  { %11748 = vmatprep.mubr.msk.f32.mxu0 %vm16198_vm0, %v20349_v9  ;;  %12623 = vmatprep.mubr.msk.f32.mxu1 %vm16198_vm0, %v20349_v9 }
 0x348   :  { %14730 = vmatpush3.bf16.msra.mxu0 %v16371_v33  ;;  %15330 = vmatpush3.bf16.msra.mxu1 %v16371_v33 }
 0x349   :  { %14731 = vmatprep.subr.bf16.mxu0 %v20381_v57  ;;  %15331 = vmatprep.subr.bf16.mxu1 %v20381_v57 }
 0x34c   :  { %14733 = vmatpush3.bf16.msra.mxu0 %v16387_v36  ;;  %15333 = vmatpush3.bf16.msra.mxu1 %v16387_v36 }
 0x34d   :  { %14734 = vmatprep.subr.bf16.mxu0 %v20381_v57  ;;  %15334 = vmatprep.subr.bf16.mxu1 %v20381_v57 }
 0x350   :  { %14736 = vmatpush3.bf16.msra.mxu0 %v16399_v39  ;;  %15336 = vmatpush3.bf16.msra.mxu1 %v16399_v39 }
 0x351   :  { %14737 = vmatprep.subr.bf16.mxu0 %v20381_v57  ;;  %15337 = vmatprep.subr.bf16.mxu1 %v20381_v57 }
 0x354   :  { %14739 = vmatpush3.bf16.msra.mxu0 %v16411_v42  ;;  %15339 = vmatpush3.bf16.msra.mxu1 %v16411_v42 }
 0x355   :  { %14740 = vmatprep.subr.bf16.mxu0 %v20381_v57  ;;  %15340 = vmatprep.subr.bf16.mxu1 %v20381_v57 }
 0x358   :  { %14742 = vmatpush3.bf16.msra.mxu0 %v16423_v45  ;;  %15342 = vmatpush3.bf16.msra.mxu1 %v16423_v45  ;;  %v20490_v45 = vld [vmem:[#allocation5_spill] sm:$0xff] }
 0x359   :  { %14743 = vmatprep.subr.bf16.mxu0 %v20381_v57  ;;  %15343 = vmatprep.subr.bf16.mxu1 %v20381_v57 }
 0x35c   :  { %14745 = vmatpush3.bf16.msra.mxu0 %v16435_v48  ;;  %15345 = vmatpush3.bf16.msra.mxu1 %v16435_v48  ;;  %v20491_v48 = vld [vmem:[#allocation6_spill] sm:$0xff] }
 0x35d   :  { %14746 = vmatprep.subr.bf16.mxu0 %v20381_v57  ;;  %15346 = vmatprep.subr.bf16.mxu1 %v20381_v57 }
 0x360   :  { %14748 = vmatpush3.bf16.msra.mxu0 %v16447_v51  ;;  %15348 = vmatpush3.bf16.msra.mxu1 %v16447_v51  ;;  %v16157_v51 = vld [vmem:[%s20047_s0 + $0x1c] sm:$0x3] }
 0x361   :  { %14749 = vmatprep.subr.bf16.mxu0 %v20381_v57  ;;  %15349 = vmatprep.subr.bf16.mxu1 %v20381_v57 }
 0x363   :  { %11749 = vmatmul.mubr.f32.vlgmr.msra.gmra.mrb[2].mxu0 %v16151_v10  ;;  %12624 = vmatmul.mubr.f32.vlgmr.msra.gmra.mrb[2].mxu1 %v16149_v4  ;;  %v20530_v4 = vld [vmem:[#allocation45_spill] sm:$0xff] }
 0x364   :  { %14751 = vmatpush3.bf16.msra.mxu0 %v16462_v55  ;;  %15351 = vmatpush3.bf16.msra.mxu1 %v16462_v55  ;;  %v20492_v55 = vld [vmem:[#allocation7_spill] sm:$0xff]  ;;  %v16163_v10 = vld [vmem:[%s20047_s0 + $0x28] sm:$0x3] }
 0x365   :  { %14752 = vmatprep.subr.bf16.mxu0 %v20381_v57  ;;  %15352 = vmatprep.subr.bf16.mxu1 %v20381_v57 }
 0x366   :  { %11783 = vmatprep.mubr.msk.f32.mxu0 %vm16198_vm0, %v20349_v9  ;;  %12658 = vmatprep.mubr.msk.f32.mxu1 %vm16198_vm0, %v20349_v9 }
 0x368   :  { %14754 = vmatpush3.bf16.msra.mxu0 %v16475_v58  ;;  %15354 = vmatpush3.bf16.msra.mxu1 %v16475_v58  ;;  %v20493_v58 = vld [vmem:[#allocation8_spill] sm:$0xff] }
 0x369   :  { %14755 = vmatprep.subr.bf16.mxu0 %v20381_v57  ;;  %15355 = vmatprep.subr.bf16.mxu1 %v20381_v57 }
 0x36c   :  { %14757 = vmatpush3.bf16.msra.mxu0 %v16491_v61  ;;  %15357 = vmatpush3.bf16.msra.mxu1 %v16491_v61  ;;  %v20494_v61 = vld [vmem:[#allocation9_spill] sm:$0xff] }
 0x36d   :  { %14758 = vmatprep.subr.bf16.mxu0 %v20381_v57  ;;  %15358 = vmatprep.subr.bf16.mxu1 %v20381_v57 }
 0x370   :  { %14760 = vmatpush3.bf16.msra.mxu0 %v16503_v0  ;;  %15360 = vmatpush3.bf16.msra.mxu1 %v16503_v0  ;;  %v20495_v0 = vld [vmem:[#allocation10_spill] sm:$0xff] }
 0x371   :  { %14761 = vmatprep.subr.bf16.mxu0 %v20381_v57  ;;  %15361 = vmatprep.subr.bf16.mxu1 %v20381_v57 }
 0x374   :  { %14763 = vmatpush3.bf16.msra.mxu0 %v16515_v5  ;;  %15363 = vmatpush3.bf16.msra.mxu1 %v16515_v5  ;;  %v20496_v5 = vld [vmem:[#allocation11_spill] sm:$0xff] }
 0x375   :  { %14764 = vmatprep.subr.bf16.mxu0 %v20381_v57  ;;  %15364 = vmatprep.subr.bf16.mxu1 %v20381_v57 }
 0x378   :  { %14766 = vmatpush3.bf16.msra.mxu0 %v16527_v11  ;;  %15366 = vmatpush3.bf16.msra.mxu1 %v16527_v11  ;;  %v20497_v11 = vld [vmem:[#allocation12_spill] sm:$0xff] }
 0x379   :  { %14767 = vmatprep.subr.bf16.mxu0 %v20381_v57  ;;  %15367 = vmatprep.subr.bf16.mxu1 %v20381_v57 }
 0x37c   :  { %14769 = vmatpush3.bf16.msra.mxu0 %v16539_v15  ;;  %15369 = vmatpush3.bf16.msra.mxu1 %v16539_v15  ;;  %v20498_v15 = vld [vmem:[#allocation13_spill] sm:$0xff] }
 0x37d   :  { %14770 = vmatprep.subr.bf16.mxu0 %v20381_v57  ;;  %15370 = vmatprep.subr.bf16.mxu1 %v20381_v57 }
 0x380   :  { %14772 = vmatpush3.bf16.msra.mxu0 %v16551_v20  ;;  %15372 = vmatpush3.bf16.msra.mxu1 %v16551_v20  ;;  %v20499_v20 = vld [vmem:[#allocation14_spill] sm:$0xff] }
 0x381   :  { %14773 = vmatprep.subr.bf16.mxu0 %v20381_v57  ;;  %15373 = vmatprep.subr.bf16.mxu1 %v20381_v57 }
 0x383   :  { %11784 = vmatmul.mubr.f32.vlgmr.msra.gmra.mrb[2].mxu0 %v18951_v7  ;;  %12659 = vmatmul.mubr.f32.vlgmr.msra.gmra.mrb[2].mxu1 %v16152_v13  ;;  %v20531_v7 = vld [vmem:[#allocation46_spill] sm:$0xff] }
 0x384   :  { %14775 = vmatpush3.bf16.msra.mxu0 %v16563_v24  ;;  %15375 = vmatpush3.bf16.msra.mxu1 %v16563_v24  ;;  %v16158_v24 = vld [vmem:[%s20047_s0 + $0x1e] sm:$0x3] }
 0x385   :  { %14776 = vmatprep.subr.bf16.mxu0 %v20381_v57  ;;  %15376 = vmatprep.subr.bf16.mxu1 %v20381_v57 }
 0x386   :  { %11818 = vmatprep.mubr.msk.f32.mxu0 %vm16198_vm0, %v20349_v9  ;;  %12693 = vmatprep.mubr.msk.f32.mxu1 %vm16198_vm0, %v20349_v9 }
 0x388   :  { %14778 = vmatpush3.bf16.msra.mxu0 %v16582_v31  ;;  %15378 = vmatpush3.bf16.msra.mxu1 %v16582_v31  ;;  %v20500_v31 = vld [vmem:[#allocation15_spill] sm:$0xff] }
 0x389   :  { %14779 = vmatprep.subr.bf16.mxu0 %v20381_v57  ;;  %15379 = vmatprep.subr.bf16.mxu1 %v20381_v57 }
 0x38c   :  { %14781 = vmatpush3.bf16.msra.mxu0 %v16598_v34  ;;  %15381 = vmatpush3.bf16.msra.mxu1 %v16598_v34  ;;  %v20501_v34 = vld [vmem:[#allocation16_spill] sm:$0xff] }
 0x38d   :  { %14782 = vmatprep.subr.bf16.mxu0 %v20381_v57  ;;  %15382 = vmatprep.subr.bf16.mxu1 %v20381_v57 }
 0x390   :  { %14784 = vmatpush3.bf16.msra.mxu0 %v16610_v38  ;;  %15384 = vmatpush3.bf16.msra.mxu1 %v16610_v38  ;;  %v20502_v38 = vld [vmem:[#allocation17_spill] sm:$0xff] }
 0x391   :  { %14785 = vmatprep.subr.bf16.mxu0 %v20381_v57  ;;  %15385 = vmatprep.subr.bf16.mxu1 %v20381_v57 }
 0x394   :  { %14787 = vmatpush3.bf16.msra.mxu0 %v16622_v43  ;;  %15387 = vmatpush3.bf16.msra.mxu1 %v16622_v43  ;;  %v20503_v43 = vld [vmem:[#allocation18_spill] sm:$0xff] }
 0x395   :  { %14788 = vmatprep.subr.bf16.mxu0 %v20381_v57  ;;  %15388 = vmatprep.subr.bf16.mxu1 %v20381_v57 }
 0x398   :  { %14790 = vmatpush3.bf16.msra.mxu0 %v16634_v47  ;;  %15390 = vmatpush3.bf16.msra.mxu1 %v16634_v47  ;;  %v20504_v47 = vld [vmem:[#allocation19_spill] sm:$0xff] }
 0x399   :  { %14791 = vmatprep.subr.bf16.mxu0 %v20381_v57  ;;  %15391 = vmatprep.subr.bf16.mxu1 %v20381_v57 }
 0x39c   :  { %14793 = vmatpush3.bf16.msra.mxu0 %v16646_v52  ;;  %15393 = vmatpush3.bf16.msra.mxu1 %v16646_v52  ;;  %v20505_v52 = vld [vmem:[#allocation20_spill] sm:$0xff] }
 0x39d   :  { %14794 = vmatprep.subr.bf16.mxu0 %v20381_v57  ;;  %15394 = vmatprep.subr.bf16.mxu1 %v20381_v57 }
 0x3a0   :  { %14796 = vmatpush3.bf16.msra.mxu0 %v16658_v56  ;;  %15396 = vmatpush3.bf16.msra.mxu1 %v16658_v56  ;;  %v20506_v56 = vld [vmem:[#allocation21_spill] sm:$0xff] }
 0x3a1   :  { %14797 = vmatprep.subr.bf16.mxu0 %v20381_v57  ;;  %15397 = vmatprep.subr.bf16.mxu1 %v20381_v57 }
 0x3a3   :  { %11819 = vmatmul.mubr.f32.vlgmr.msra.gmra.mrb[2].mxu0 %v16152_v13  ;;  %12694 = vmatmul.mubr.f32.vlgmr.msra.gmra.mrb[2].mxu1 %v16153_v16  ;;  %v20532_v13 = vld [vmem:[#allocation47_spill] sm:$0xff] }
 0x3a4   :  { %14799 = vmatpush3.bf16.msra.mxu0 %v16670_v60  ;;  %15399 = vmatpush3.bf16.msra.mxu1 %v16670_v60  ;;  %v20507_v60 = vld [vmem:[#allocation22_spill] sm:$0xff] }
 0x3a5   :  { %14800 = vmatprep.subr.bf16.mxu0 %v20381_v57  ;;  %15400 = vmatprep.subr.bf16.mxu1 %v20381_v57 }
 0x3a6   :  { %11853 = vmatprep.mubr.msk.f32.mxu0 %vm16198_vm0, %v20349_v9  ;;  %12728 = vmatprep.mubr.msk.f32.mxu1 %vm16198_vm0, %v20349_v9 }
 0x3a8   :  { %14802 = vmatpush3.bf16.msra.mxu0 %v16689_v2  ;;  %15402 = vmatpush3.bf16.msra.mxu1 %v16689_v2  ;;  %v16159_v2 = vld [vmem:[%s20047_s0 + $0x20] sm:$0x3] }
 0x3a9   :  { %14803 = vmatprep.subr.bf16.mxu0 %v20381_v57  ;;  %15403 = vmatprep.subr.bf16.mxu1 %v20381_v57 }
 0x3ac   :  { %14805 = vmatpush3.bf16.msra.mxu0 %v16705_v12  ;;  %15405 = vmatpush3.bf16.msra.mxu1 %v16705_v12  ;;  %v20508_v12 = vld [vmem:[#allocation23_spill] sm:$0xff] }
 0x3ad   :  { %14806 = vmatprep.subr.bf16.mxu0 %v20381_v57  ;;  %15406 = vmatprep.subr.bf16.mxu1 %v20381_v57 }
 0x3b0   :  { %14808 = vmatpush3.bf16.msra.mxu0 %v16717_v18  ;;  %15408 = vmatpush3.bf16.msra.mxu1 %v16717_v18  ;;  %v20509_v18 = vld [vmem:[#allocation24_spill] sm:$0xff] }
 0x3b1   :  { %14809 = vmatprep.subr.bf16.mxu0 %v20381_v57  ;;  %15409 = vmatprep.subr.bf16.mxu1 %v20381_v57 }
 0x3b4   :  { %14811 = vmatpush3.bf16.msra.mxu0 %v16729_v26  ;;  %15411 = vmatpush3.bf16.msra.mxu1 %v16729_v26  ;;  %v20510_v26 = vld [vmem:[#allocation25_spill] sm:$0xff] }
 0x3b5   :  { %14812 = vmatprep.subr.bf16.mxu0 %v20381_v57  ;;  %15412 = vmatprep.subr.bf16.mxu1 %v20381_v57 }
 0x3b8   :  { %14814 = vmatpush3.bf16.msra.mxu0 %v16741_v32  ;;  %15414 = vmatpush3.bf16.msra.mxu1 %v16741_v32  ;;  %v20511_v32 = vld [vmem:[#allocation26_spill] sm:$0xff] }
 0x3b9   :  { %14815 = vmatprep.subr.bf16.mxu0 %v20381_v57  ;;  %15415 = vmatprep.subr.bf16.mxu1 %v20381_v57 }
 0x3bc   :  { %14817 = vmatpush3.bf16.msra.mxu0 %v16753_v37  ;;  %15417 = vmatpush3.bf16.msra.mxu1 %v16753_v37  ;;  %v20512_v37 = vld [vmem:[#allocation27_spill] sm:$0xff] }
 0x3bd   :  { %14818 = vmatprep.subr.bf16.mxu0 %v20381_v57  ;;  %15418 = vmatprep.subr.bf16.mxu1 %v20381_v57 }
 0x3c0   :  { %14820 = vmatpush3.bf16.msra.mxu0 %v16765_v44  ;;  %15420 = vmatpush3.bf16.msra.mxu1 %v16765_v44  ;;  %v20513_v44 = vld [vmem:[#allocation28_spill] sm:$0xff] }
 0x3c1   :  { %14821 = vmatprep.subr.bf16.mxu0 %v20381_v57  ;;  %15421 = vmatprep.subr.bf16.mxu1 %v20381_v57 }
 0x3c3   :  { %11854 = vmatmul.mubr.f32.vlgmr.msra.gmra.mrb[2].mxu0 %v16153_v16  ;;  %12729 = vmatmul.mubr.f32.vlgmr.msra.gmra.mrb[2].mxu1 %v16154_v19  ;;  %v20533_v16 = vld [vmem:[#allocation48_spill] sm:$0xff]  ;;  %v20534_v19 = vld [vmem:[#allocation49_spill] sm:$0xff] }
 0x3c4   :  { %14823 = vmatpush3.bf16.msra.mxu0 %v16777_v50  ;;  %15423 = vmatpush3.bf16.msra.mxu1 %v16777_v50  ;;  %v20514_v50 = vld [vmem:[#allocation29_spill] sm:$0xff] }
 0x3c5   :  { %14824 = vmatprep.subr.bf16.mxu0 %v20381_v57  ;;  %15424 = vmatprep.subr.bf16.mxu1 %v20381_v57 }
 0x3c6   :  { %11888 = vmatprep.mubr.msk.f32.mxu0 %vm16198_vm0, %v20349_v9  ;;  %12763 = vmatprep.mubr.msk.f32.mxu1 %vm16198_vm0, %v20349_v9 }
 0x3c8   :  { %14826 = vmatpush3.bf16.msra.mxu0 %v16793_v59  ;;  %15426 = vmatpush3.bf16.msra.mxu1 %v16793_v59  ;;  %v20515_v59 = vld [vmem:[#allocation30_spill] sm:$0xff] }
 0x3c9   :  { %14827 = vmatprep.subr.bf16.mxu0 %v20381_v57  ;;  %15427 = vmatprep.subr.bf16.mxu1 %v20381_v57 }
 0x3cc   :  { %14829 = vmatpush3.bf16.msra.mxu0 %v16809_v62  ;;  %15429 = vmatpush3.bf16.msra.mxu1 %v16809_v62  ;;  %v16160_v62 = vld [vmem:[%s20047_s0 + $0x22] sm:$0x3] }
 0x3cd   :  { %14830 = vmatprep.subr.bf16.mxu0 %v20381_v57  ;;  %15430 = vmatprep.subr.bf16.mxu1 %v20381_v57 }
 0x3d0   :  { %14832 = vmatpush3.bf16.msra.mxu0 %v16821_v14  ;;  %15432 = vmatpush3.bf16.msra.mxu1 %v16821_v14  ;;  %v20516_v14 = vld [vmem:[#allocation31_spill] sm:$0xff] }
 0x3d1   :  { %14833 = vmatprep.subr.bf16.mxu0 %v20381_v57  ;;  %15433 = vmatprep.subr.bf16.mxu1 %v20381_v57 }
 0x3d4   :  { %14835 = vmatpush3.bf16.msra.mxu0 %v16833_v23  ;;  %15435 = vmatpush3.bf16.msra.mxu1 %v16833_v23  ;;  %v20517_v23 = vld [vmem:[#allocation32_spill] sm:$0xff] }
 0x3d5   :  { %14836 = vmatprep.subr.bf16.mxu0 %v20381_v57  ;;  %15436 = vmatprep.subr.bf16.mxu1 %v20381_v57 }
 0x3d8   :  { %14838 = vmatpush3.bf16.msra.mxu0 %v16845_v30  ;;  %15438 = vmatpush3.bf16.msra.mxu1 %v16845_v30  ;;  %v20518_v30 = vld [vmem:[#allocation33_spill] sm:$0xff] }
 0x3d9   :  { %14839 = vmatprep.subr.bf16.mxu0 %v20381_v57  ;;  %15439 = vmatprep.subr.bf16.mxu1 %v20381_v57 }
 0x3dc   :  { %14841 = vmatpush3.bf16.msra.mxu0 %v16857_v41  ;;  %15441 = vmatpush3.bf16.msra.mxu1 %v16857_v41  ;;  %v20519_v41 = vld [vmem:[#allocation34_spill] sm:$0xff] }
 0x3dd   :  { %14842 = vmatprep.subr.bf16.mxu0 %v20381_v57  ;;  %15442 = vmatprep.subr.bf16.mxu1 %v20381_v57 }
 0x3e0   :  { %14844 = vmatpush3.bf16.msra.mxu0 %v16869_v53  ;;  %15444 = vmatpush3.bf16.msra.mxu1 %v16869_v53  ;;  %v20520_v53 = vld [vmem:[#allocation35_spill] sm:$0xff] }
 0x3e1   :  { %14845 = vmatprep.subr.bf16.mxu0 %v20381_v57  ;;  %15445 = vmatprep.subr.bf16.mxu1 %v20381_v57 }
 0x3e3   :  { %11889 = vmatmul.mubr.f32.vlgmr.msra.gmra.mrb[2].mxu0 %v16155_v22  ;;  %12764 = vmatmul.mubr.f32.vlgmr.msra.gmra.mrb[2].mxu1 %v16156_v25  ;;  %v20535_v22 = vld [vmem:[#allocation50_spill] sm:$0xff] }
 0x3e4   :  { %14847 = vmatpush3.bf16.msra.mxu0 %v16884_v1  ;;  %15447 = vmatpush3.bf16.msra.mxu1 %v16884_v1  ;;  %v20521_v1 = vld [vmem:[#allocation36_spill] sm:$0xff] }
 0x3e5   :  { %14848 = vmatprep.subr.bf16.mxu0 %v20381_v57  ;;  %15448 = vmatprep.subr.bf16.mxu1 %v20381_v57 }
 0x3e6   :  { %11923 = vmatprep.mubr.msk.f32.mxu0 %vm16198_vm0, %v20349_v9  ;;  %12798 = vmatprep.mubr.msk.f32.mxu1 %vm16198_vm0, %v20349_v9 }
 0x3e8   :  { %14850 = vmatpush3.bf16.msra.mxu0 %v16902_v21  ;;  %15450 = vmatpush3.bf16.msra.mxu1 %v16902_v21  ;;  %v20522_v21 = vld [vmem:[#allocation37_spill] sm:$0xff] }
 0x3e9   :  { %14851 = vmatprep.subr.bf16.mxu0 %v20381_v57  ;;  %15451 = vmatprep.subr.bf16.mxu1 %v20381_v57 }
 0x3ec   :  { %14853 = vmatpush3.bf16.msra.mxu0 %v16918_v35  ;;  %15453 = vmatpush3.bf16.msra.mxu1 %v16918_v35  ;;  %v20523_v35 = vld [vmem:[#allocation38_spill] sm:$0xff] }
 0x3ed   :  { %14854 = vmatprep.subr.bf16.mxu0 %v20381_v57  ;;  %15454 = vmatprep.subr.bf16.mxu1 %v20381_v57 }
 0x3f0   :  { %14856 = vmatpush3.bf16.msra.mxu0 %v16930_v49  ;;  %15456 = vmatpush3.bf16.msra.mxu1 %v16930_v49  ;;  %v16161_v49 = vld [vmem:[%s20047_s0 + $0x24] sm:$0x3] }
 0x3f1   :  { %14857 = vmatprep.subr.bf16.mxu0 %v20381_v57  ;;  %15457 = vmatprep.subr.bf16.mxu1 %v20381_v57 }
 0x3f4   :  { %14859 = vmatpush3.bf16.msra.mxu0 %v16942_v63  ;;  %15459 = vmatpush3.bf16.msra.mxu1 %v16942_v63  ;;  %v16162_v63 = vld [vmem:[%s20047_s0 + $0x26] sm:$0x3] }
 0x3f5   :  { %14860 = vmatprep.subr.bf16.mxu0 %v20381_v57  ;;  %15460 = vmatprep.subr.bf16.mxu1 %v20381_v57 }
 0x3f6   :  { %v19177_v29 = vpop.f32.mrb[0].mxu0  ;;  %v19179_v33 = vpop.f32.mrb[0].mxu1 }
 0x3f7   :  { %v4028_v36 = vmax.f32 %v19177_v29, %v19179_v33  ;;  %v10805_v39 = vpop.f32.mrb[1].mxu0  ;;  %v11680_v42 = vpop.f32.mrb[1].mxu1  ;;  %v8195_v29 = vld [vmem:[%s20051_s4] ss:$0 sm:$0xff]  ;;  %s16200_s4 = smov [#allocation2]  }
 0x3f8   :  { %14862 = vmatpush3.bf16.msra.mxu0 %v16954_v27  ;;  %15462 = vmatpush3.bf16.msra.mxu1 %v16954_v27  ;;  %v20524_v27 = vld [vmem:[#allocation39_spill] sm:$0xff]  ;;  %v20537_v39 = vld [vmem:[#allocation52_spill] sm:$0xff]  ;;  %v20538_v42 = vld [vmem:[#allocation53_spill] sm:$0xff] }
 0x3f9   :  { %14863 = vmatprep.subr.bf16.mxu0 %v20381_v57  ;;  %15463 = vmatprep.subr.bf16.mxu1 %v20381_v57 }
 0x3fc   :  { %14865 = vmatpush3.bf16.msra.mxu0 %v20490_v45  ;;  %15465 = vmatpush3.bf16.msra.mxu1 %v20490_v45  ;;  %v20539_v45 = vld [vmem:[#allocation54_spill] sm:$0xff] }
 0x3fd   :  { %14866 = vmatprep.subr.bf16.mxu0 %v20381_v57  ;;  %15466 = vmatprep.subr.bf16.mxu1 %v20381_v57 }
 0x400   :  { %14868 = vmatpush3.bf16.msra.mxu0 %v20491_v48  ;;  %15468 = vmatpush3.bf16.msra.mxu1 %v20491_v48  ;;  %v16164_v48 = vld [vmem:[%s20047_s0 + $0x2a] sm:$0x3] }
 0x401   :  { %14869 = vmatprep.subr.bf16.mxu0 %v20381_v57  ;;  %15469 = vmatprep.subr.bf16.mxu1 %v20381_v57 }
 0x403   :  { %11924 = vmatmul.mubr.f32.vlgmr.msra.gmra.mrb[2].mxu0 %v16156_v25  ;;  %12799 = vmatmul.mubr.f32.vlgmr.msra.gmra.mrb[2].mxu1 %v16157_v51  ;;  %v20536_v25 = vld [vmem:[#allocation51_spill] sm:$0xff] }
 0x404   :  { %14871 = vmatpush3.bf16.msra.mxu0 %v20492_v55  ;;  %15471 = vmatpush3.bf16.msra.mxu1 %v20492_v55  ;;  %v20541_v55 = vld [vmem:[#allocation56_spill] sm:$0xff] }
 0x405   :  { %14872 = vmatprep.subr.bf16.mxu0 %v20381_v57  ;;  %15472 = vmatprep.subr.bf16.mxu1 %v20381_v57 }
 0x406   :  { %11958 = vmatprep.mubr.msk.f32.mxu0 %vm16198_vm0, %v20349_v9  ;;  %12833 = vmatprep.mubr.msk.f32.mxu1 %vm16198_vm0, %v20349_v9 }
 0x408   :  { %14874 = vmatpush3.bf16.msra.mxu0 %v20493_v58  ;;  %15474 = vmatpush3.bf16.msra.mxu1 %v20493_v58  ;;  %v20542_v58 = vld [vmem:[#allocation57_spill] sm:$0xff] }
 0x409   :  { %14875 = vmatprep.subr.bf16.mxu0 %v20381_v57  ;;  %15475 = vmatprep.subr.bf16.mxu1 %v20381_v57 }
 0x40c   :  { %14877 = vmatpush3.bf16.msra.mxu0 %v20494_v61  ;;  %15477 = vmatpush3.bf16.msra.mxu1 %v20494_v61  ;;  %v20543_v61 = vld [vmem:[#allocation58_spill] sm:$0xff] }
 0x40d   :  { %14878 = vmatprep.subr.bf16.mxu0 %v20381_v57  ;;  %15478 = vmatprep.subr.bf16.mxu1 %v20381_v57 }
 0x410   :  { %14880 = vmatpush3.bf16.msra.mxu0 %v20495_v0  ;;  %15480 = vmatpush3.bf16.msra.mxu1 %v20495_v0  ;;  %v20544_v0 = vld [vmem:[#allocation59_spill] sm:$0xff] }
 0x411   :  { %14881 = vmatprep.subr.bf16.mxu0 %v20381_v57  ;;  %15481 = vmatprep.subr.bf16.mxu1 %v20381_v57 }
 0x414   :  { %14883 = vmatpush3.bf16.msra.mxu0 %v20496_v5  ;;  %15483 = vmatpush3.bf16.msra.mxu1 %v20496_v5  ;;  %v20545_v5 = vld [vmem:[#allocation60_spill] sm:$0xff] }
 0x415   :  { %14884 = vmatprep.subr.bf16.mxu0 %v20381_v57  ;;  %15484 = vmatprep.subr.bf16.mxu1 %v20381_v57 }
 0x418   :  { %14886 = vmatpush3.bf16.msra.mxu0 %v20497_v11  ;;  %15486 = vmatpush3.bf16.msra.mxu1 %v20497_v11  ;;  %v20546_v11 = vld [vmem:[#allocation61_spill] sm:$0xff] }
 0x419   :  { %14887 = vmatprep.subr.bf16.mxu0 %v20381_v57  ;;  %15487 = vmatprep.subr.bf16.mxu1 %v20381_v57 }
 0x41c   :  { %14889 = vmatpush3.bf16.msra.mxu0 %v20498_v15  ;;  %15489 = vmatpush3.bf16.msra.mxu1 %v20498_v15  ;;  %v20547_v15 = vld [vmem:[#allocation62_spill] sm:$0xff] }
 0x41d   :  { %14890 = vmatprep.subr.bf16.mxu0 %v20381_v57  ;;  %15490 = vmatprep.subr.bf16.mxu1 %v20381_v57 }
 0x420   :  { %14892 = vmatpush3.bf16.msra.mxu0 %v20499_v20  ;;  %15492 = vmatpush3.bf16.msra.mxu1 %v20499_v20  ;;  %v16165_v20 = vld [vmem:[%s20047_s0 + $0x2c] sm:$0x3] }
 0x421   :  { %14893 = vmatprep.subr.bf16.mxu0 %v20381_v57  ;;  %15493 = vmatprep.subr.bf16.mxu1 %v20381_v57 }
 0x423   :  { %11959 = vmatmul.mubr.f32.vlgmr.msra.gmra.mrb[2].mxu0 %v16157_v51  ;;  %12834 = vmatmul.mubr.f32.vlgmr.msra.gmra.mrb[2].mxu1 %v16158_v24  ;;  %v20540_v51 = vld [vmem:[#allocation55_spill] sm:$0xff] }
 0x424   :  { %14895 = vmatpush3.bf16.msra.mxu0 %v20500_v31  ;;  %15495 = vmatpush3.bf16.msra.mxu1 %v20500_v31  ;;  %v20549_v31 = vld [vmem:[#allocation64_spill] sm:$0xff] }
 0x425   :  { %14896 = vmatprep.subr.bf16.mxu0 %v20381_v57  ;;  %15496 = vmatprep.subr.bf16.mxu1 %v20381_v57 }
 0x426   :  { %11993 = vmatprep.mubr.msk.f32.mxu0 %vm16198_vm0, %v20349_v9  ;;  %12868 = vmatprep.mubr.msk.f32.mxu1 %vm16198_vm0, %v20349_v9 }
 0x428   :  { %14898 = vmatpush3.bf16.msra.mxu0 %v20501_v34  ;;  %15498 = vmatpush3.bf16.msra.mxu1 %v20501_v34  ;;  %v20550_v34 = vld [vmem:[#allocation65_spill] sm:$0xff] }
 0x429   :  { %14899 = vmatprep.subr.bf16.mxu0 %v20381_v57  ;;  %15499 = vmatprep.subr.bf16.mxu1 %v20381_v57 }
 0x42c   :  { %14901 = vmatpush3.bf16.msra.mxu0 %v20502_v38  ;;  %15501 = vmatpush3.bf16.msra.mxu1 %v20502_v38  ;;  %v20551_v38 = vld [vmem:[#allocation66_spill] sm:$0xff] }
 0x42d   :  { %14902 = vmatprep.subr.bf16.mxu0 %v20381_v57  ;;  %15502 = vmatprep.subr.bf16.mxu1 %v20381_v57 }
 0x430   :  { %14904 = vmatpush3.bf16.msra.mxu0 %v20503_v43  ;;  %15504 = vmatpush3.bf16.msra.mxu1 %v20503_v43  ;;  %v20552_v43 = vld [vmem:[#allocation67_spill] sm:$0xff] }
 0x431   :  { %14905 = vmatprep.subr.bf16.mxu0 %v20381_v57  ;;  %15505 = vmatprep.subr.bf16.mxu1 %v20381_v57 }
 0x434   :  { %14907 = vmatpush3.bf16.msra.mxu0 %v20504_v47  ;;  %15507 = vmatpush3.bf16.msra.mxu1 %v20504_v47  ;;  %v20553_v47 = vld [vmem:[#allocation68_spill] sm:$0xff] }
 0x435   :  { %14908 = vmatprep.subr.bf16.mxu0 %v20381_v57  ;;  %15508 = vmatprep.subr.bf16.mxu1 %v20381_v57 }
 0x438   :  { %14910 = vmatpush3.bf16.msra.mxu0 %v20505_v52  ;;  %15510 = vmatpush3.bf16.msra.mxu1 %v20505_v52  ;;  %v20554_v52 = vld [vmem:[#allocation69_spill] sm:$0xff] }
 0x439   :  { %14911 = vmatprep.subr.bf16.mxu0 %v20381_v57  ;;  %15511 = vmatprep.subr.bf16.mxu1 %v20381_v57 }
 0x43c   :  { %14913 = vmatpush3.bf16.msra.mxu0 %v20506_v56  ;;  %15513 = vmatpush3.bf16.msra.mxu1 %v20506_v56  ;;  %v20555_v56 = vld [vmem:[#allocation70_spill] sm:$0xff] }
 0x43d   :  { %14914 = vmatprep.subr.bf16.mxu0 %v20381_v57  ;;  %15514 = vmatprep.subr.bf16.mxu1 %v20381_v57 }
 0x440   :  { %14916 = vmatpush3.bf16.msra.mxu0 %v20507_v60  ;;  %15516 = vmatpush3.bf16.msra.mxu1 %v20507_v60  ;;  %v16166_v60 = vld [vmem:[%s20047_s0 + $0x2e] sm:$0x3] }
 0x441   :  { %14917 = vmatprep.subr.bf16.mxu0 %v20381_v57  ;;  %15517 = vmatprep.subr.bf16.mxu1 %v20381_v57 }
 0x443   :  { %11994 = vmatmul.mubr.f32.vlgmr.msra.gmra.mrb[2].mxu0 %v16158_v24  ;;  %12869 = vmatmul.mubr.f32.vlgmr.msra.gmra.mrb[2].mxu1 %v16159_v2  ;;  %v20548_v24 = vld [vmem:[#allocation63_spill] sm:$0xff] }
 0x444   :  { %14919 = vmatpush3.bf16.msra.mxu0 %v20508_v12  ;;  %15519 = vmatpush3.bf16.msra.mxu1 %v20508_v12  ;;  %v20557_v12 = vld [vmem:[#allocation72_spill] sm:$0xff] }
 0x445   :  { %14920 = vmatprep.subr.bf16.mxu0 %v20381_v57  ;;  %15520 = vmatprep.subr.bf16.mxu1 %v20381_v57 }
 0x446   :  { %12028 = vmatprep.mubr.msk.f32.mxu0 %vm16198_vm0, %v20349_v9  ;;  %12903 = vmatprep.mubr.msk.f32.mxu1 %vm16198_vm0, %v20349_v9 }
 0x448   :  { %14922 = vmatpush3.bf16.msra.mxu0 %v20509_v18  ;;  %15522 = vmatpush3.bf16.msra.mxu1 %v20509_v18  ;;  %v20558_v18 = vld [vmem:[#allocation73_spill] sm:$0xff] }
 0x449   :  { %14923 = vmatprep.subr.bf16.mxu0 %v20381_v57  ;;  %15523 = vmatprep.subr.bf16.mxu1 %v20381_v57 }
 0x44c   :  { %14925 = vmatpush3.bf16.msra.mxu0 %v20510_v26  ;;  %15525 = vmatpush3.bf16.msra.mxu1 %v20510_v26  ;;  %v20559_v26 = vld [vmem:[#allocation74_spill] sm:$0xff] }
 0x44d   :  { %14926 = vmatprep.subr.bf16.mxu0 %v20381_v57  ;;  %15526 = vmatprep.subr.bf16.mxu1 %v20381_v57 }
 0x450   :  { %14928 = vmatpush3.bf16.msra.mxu0 %v20511_v32  ;;  %15528 = vmatpush3.bf16.msra.mxu1 %v20511_v32  ;;  %v20560_v32 = vld [vmem:[#allocation75_spill] sm:$0xff] }
 0x451   :  { %14929 = vmatprep.subr.bf16.mxu0 %v20381_v57  ;;  %15529 = vmatprep.subr.bf16.mxu1 %v20381_v57 }
 0x454   :  { %14931 = vmatpush3.bf16.msra.mxu0 %v20512_v37  ;;  %15531 = vmatpush3.bf16.msra.mxu1 %v20512_v37  ;;  %v20561_v37 = vld [vmem:[#allocation76_spill] sm:$0xff] }
 0x455   :  { %14932 = vmatprep.subr.bf16.mxu0 %v20381_v57  ;;  %15532 = vmatprep.subr.bf16.mxu1 %v20381_v57 }
 0x458   :  { %14934 = vmatpush3.bf16.msra.mxu0 %v20513_v44  ;;  %15534 = vmatpush3.bf16.msra.mxu1 %v20513_v44  ;;  %v20562_v44 = vld [vmem:[#allocation77_spill] sm:$0xff] }
 0x459   :  { %14935 = vmatprep.subr.bf16.mxu0 %v20381_v57  ;;  %15535 = vmatprep.subr.bf16.mxu1 %v20381_v57 }
 0x45c   :  { %14937 = vmatpush3.bf16.msra.mxu0 %v20514_v50  ;;  %15537 = vmatpush3.bf16.msra.mxu1 %v20514_v50  ;;  %v20563_v50 = vld [vmem:[#allocation78_spill] sm:$0xff] }
 0x45d   :  { %14938 = vmatprep.subr.bf16.mxu0 %v20381_v57  ;;  %15538 = vmatprep.subr.bf16.mxu1 %v20381_v57 }
 0x460   :  { %14940 = vmatpush3.bf16.msra.mxu0 %v20515_v59  ;;  %15540 = vmatpush3.bf16.msra.mxu1 %v20515_v59  ;;  %v16167_v59 = vld [vmem:[%s20047_s0 + $0x30] sm:$0x3] }
 0x461   :  { %14941 = vmatprep.subr.bf16.mxu0 %v20381_v57  ;;  %15541 = vmatprep.subr.bf16.mxu1 %v20381_v57 }
 0x463   :  { %12029 = vmatmul.mubr.f32.vlgmr.msra.gmra.mrb[2].mxu0 %v16159_v2  ;;  %12904 = vmatmul.mubr.f32.vlgmr.msra.gmra.mrb[2].mxu1 %v16160_v62  ;;  %v20556_v2 = vld [vmem:[#allocation71_spill] sm:$0xff] }
 0x464   :  { %14943 = vmatpush3.bf16.msra.mxu0 %v20516_v14  ;;  %15543 = vmatpush3.bf16.msra.mxu1 %v20516_v14  ;;  %v16168_v62 = vld [vmem:[%s20047_s0 + $0x32] sm:$0x3] }
 0x465   :  { %14944 = vmatprep.subr.bf16.mxu0 %v20381_v57  ;;  %15544 = vmatprep.subr.bf16.mxu1 %v20381_v57  ;;  %v20564_v14 = vld [vmem:[#allocation79_spill] sm:$0xff] }
 0x466   :  { %12063 = vmatprep.mubr.msk.f32.mxu0 %vm16198_vm0, %v20349_v9  ;;  %12938 = vmatprep.mubr.msk.f32.mxu1 %vm16198_vm0, %v20349_v9 }
 0x468   :  { %14946 = vmatpush3.bf16.msra.mxu0 %v20517_v23  ;;  %15546 = vmatpush3.bf16.msra.mxu1 %v20517_v23  ;;  %v20565_v23 = vld [vmem:[#allocation80_spill] sm:$0xff] }
 0x469   :  { %14947 = vmatprep.subr.bf16.mxu0 %v20381_v57  ;;  %15547 = vmatprep.subr.bf16.mxu1 %v20381_v57 }
 0x46c   :  { %14949 = vmatpush3.bf16.msra.mxu0 %v20518_v30  ;;  %15549 = vmatpush3.bf16.msra.mxu1 %v20518_v30  ;;  %v20566_v30 = vld [vmem:[#allocation81_spill] sm:$0xff] }
 0x46d   :  { %14950 = vmatprep.subr.bf16.mxu0 %v20381_v57  ;;  %15550 = vmatprep.subr.bf16.mxu1 %v20381_v57 }
 0x470   :  { %14952 = vmatpush3.bf16.msra.mxu0 %v20519_v41  ;;  %15552 = vmatpush3.bf16.msra.mxu1 %v20519_v41  ;;  %v20567_v41 = vld [vmem:[#allocation82_spill] sm:$0xff] }
 0x471   :  { %14953 = vmatprep.subr.bf16.mxu0 %v20381_v57  ;;  %15553 = vmatprep.subr.bf16.mxu1 %v20381_v57 }
 0x474   :  { %14955 = vmatpush3.bf16.msra.mxu0 %v20520_v53  ;;  %15555 = vmatpush3.bf16.msra.mxu1 %v20520_v53  ;;  %v20568_v53 = vld [vmem:[#allocation83_spill] sm:$0xff] }
 0x475   :  { %14956 = vmatprep.subr.bf16.mxu0 %v20381_v57  ;;  %15556 = vmatprep.subr.bf16.mxu1 %v20381_v57 }
 0x478   :  { %14958 = vmatpush3.bf16.msra.mxu0 %v20521_v1  ;;  %15558 = vmatpush3.bf16.msra.mxu1 %v20521_v1  ;;  %v20569_v1 = vld [vmem:[#allocation84_spill] sm:$0xff] }
 0x479   :  { %14959 = vmatprep.subr.bf16.mxu0 %v20381_v57  ;;  %15559 = vmatprep.subr.bf16.mxu1 %v20381_v57 }
 0x47c   :  { %14961 = vmatpush3.bf16.msra.mxu0 %v20522_v21  ;;  %15561 = vmatpush3.bf16.msra.mxu1 %v20522_v21  ;;  %v20570_v21 = vld [vmem:[#allocation85_spill] sm:$0xff] }
 0x47d   :  { %14962 = vmatprep.subr.bf16.mxu0 %v20381_v57  ;;  %15562 = vmatprep.subr.bf16.mxu1 %v20381_v57 }
 0x480   :  { %14964 = vmatpush3.bf16.msra.mxu0 %v20523_v35  ;;  %15564 = vmatpush3.bf16.msra.mxu1 %v20523_v35  ;;  %v20571_v35 = vld [vmem:[#allocation86_spill] sm:$0xff] }
 0x481   :  { %14965 = vmatprep.subr.bf16.mxu0 %v20381_v57  ;;  %15565 = vmatprep.subr.bf16.mxu1 %v20381_v57 }
 0x483   :  { %12064 = vmatmul.mubr.f32.vlgmr.msra.gmra.mrb[2].mxu0 %v16161_v49  ;;  %12939 = vmatmul.mubr.f32.vlgmr.msra.gmra.mrb[2].mxu1 %v16162_v63  ;;  %v16169_v49 = vld [vmem:[%s20047_s0 + $0x34] sm:$0x3] }
 0x484   :  { %14967 = vmatpush3.bf16.msra.mxu0 %v20524_v27  ;;  %15567 = vmatpush3.bf16.msra.mxu1 %v20524_v27  ;;  %v20573_v27 = vld [vmem:[#allocation88_spill] sm:$0xff] }
 0x485   :  { %14968 = vmatprep.subr.bf16.mxu0 %v20381_v57  ;;  %15568 = vmatprep.subr.bf16.mxu1 %v20381_v57 }
 0x486   :  { %12098 = vmatprep.mubr.msk.f32.mxu0 %vm16198_vm0, %v20349_v9  ;;  %12973 = vmatprep.mubr.msk.f32.mxu1 %vm16198_vm0, %v20349_v9 }
 0x488   :  { %14970 = vmatpush3.bf16.msra.mxu0 %v20525_v54  ;;  %15570 = vmatpush3.bf16.msra.mxu1 %v20525_v54  ;;  %v20574_v54 = vld [vmem:[#allocation89_spill] sm:$0xff] }
 0x489   :  { %14971 = vmatprep.subr.bf16.mxu0 %v20381_v57  ;;  %15571 = vmatprep.subr.bf16.mxu1 %v20381_v57 }
 0x48c   :  { %14973 = vmatpush3.bf16.msra.mxu0 %v20526_v3  ;;  %15573 = vmatpush3.bf16.msra.mxu1 %v20526_v3  ;;  %v20575_v3 = vld [vmem:[#allocation90_spill] sm:$0xff] }
 0x48d   :  { %14974 = vmatprep.subr.bf16.mxu0 %v20381_v57  ;;  %15574 = vmatprep.subr.bf16.mxu1 %v20381_v57 }
 0x490   :  { %14976 = vmatpush3.bf16.msra.mxu0 %v20527_v8  ;;  %15576 = vmatpush3.bf16.msra.mxu1 %v20527_v8  ;;  %v20576_v8 = vld [vmem:[#allocation91_spill] sm:$0xff] }
 0x491   :  { %14977 = vmatprep.subr.bf16.mxu0 %v20381_v57  ;;  %15577 = vmatprep.subr.bf16.mxu1 %v20381_v57 }
 0x494   :  { %14979 = vmatpush3.bf16.msra.mxu0 %v20528_v17  ;;  %15579 = vmatpush3.bf16.msra.mxu1 %v20528_v17  ;;  %v20577_v17 = vld [vmem:[#allocation92_spill] sm:$0xff] }
 0x495   :  { %14980 = vmatprep.subr.bf16.mxu0 %v20381_v57  ;;  %15580 = vmatprep.subr.bf16.mxu1 %v20381_v57 }
 0x498   :  { %14982 = vmatpush3.bf16.msra.mxu0 %v20529_v40  ;;  %15582 = vmatpush3.bf16.msra.mxu1 %v20529_v40  ;;  %v20578_v40 = vld [vmem:[#allocation93_spill] sm:$0xff] }
 0x499   :  { %14983 = vmatprep.subr.bf16.mxu0 %v20381_v57  ;;  %15583 = vmatprep.subr.bf16.mxu1 %v20381_v57 }
 0x49c   :  { %14985 = vmatpush3.bf16.msra.mxu0 %v20530_v4  ;;  %15585 = vmatpush3.bf16.msra.mxu1 %v20530_v4  ;;  %v20579_v4 = vld [vmem:[#allocation94_spill] sm:$0xff] }
 0x49d   :  { %14986 = vmatprep.subr.bf16.mxu0 %v20381_v57  ;;  %15586 = vmatprep.subr.bf16.mxu1 %v20381_v57 }
 0x4a0   :  { %14988 = vmatpush3.bf16.msra.mxu0 %v20531_v7  ;;  %15588 = vmatpush3.bf16.msra.mxu1 %v20531_v7  ;;  %v16170_v7 = vld [vmem:[%s20047_s0 + $0x36] sm:$0x3] }
 0x4a1   :  { %14989 = vmatprep.subr.bf16.mxu0 %v20381_v57  ;;  %15589 = vmatprep.subr.bf16.mxu1 %v20381_v57 }
 0x4a3   :  { %12099 = vmatmul.mubr.f32.vlgmr.msra.gmra.mrb[2].mxu0 %v16162_v63  ;;  %12974 = vmatmul.mubr.f32.vlgmr.msra.gmra.mrb[2].mxu1 %v16163_v10  ;;  %v20572_v63 = vld [vmem:[#allocation87_spill] sm:$0xff] }
 0x4a4   :  { %14991 = vmatpush3.bf16.msra.mxu0 %v20532_v13  ;;  %15591 = vmatpush3.bf16.msra.mxu1 %v20532_v13  ;;  %v20581_v13 = vld [vmem:[#allocation96_spill] sm:$0xff] }
 0x4a5   :  { %14992 = vmatprep.subr.bf16.mxu0 %v20381_v57  ;;  %15592 = vmatprep.subr.bf16.mxu1 %v20381_v57 }
 0x4a6   :  { %12133 = vmatprep.mubr.msk.f32.mxu0 %vm16198_vm0, %v20349_v9  ;;  %13008 = vmatprep.mubr.msk.f32.mxu1 %vm16198_vm0, %v20349_v9 }
 0x4a8   :  { %14994 = vmatpush3.bf16.msra.mxu0 %v20533_v16  ;;  %15594 = vmatpush3.bf16.msra.mxu1 %v20533_v16  ;;  %v20582_v16 = vld [vmem:[#allocation97_spill] sm:$0xff] }
 0x4a9   :  { %14995 = vmatprep.subr.bf16.mxu0 %v20381_v57  ;;  %15595 = vmatprep.subr.bf16.mxu1 %v20381_v57 }
 0x4ac   :  { %14997 = vmatpush3.bf16.msra.mxu0 %v20534_v19  ;;  %15597 = vmatpush3.bf16.msra.mxu1 %v20534_v19  ;;  %v20583_v19 = vld [vmem:[#allocation98_spill] sm:$0xff] }
 0x4ad   :  { %14998 = vmatprep.subr.bf16.mxu0 %v20381_v57  ;;  %15598 = vmatprep.subr.bf16.mxu1 %v20381_v57 }
 0x4b0   :  { %15000 = vmatpush3.bf16.msra.mxu0 %v20535_v22  ;;  %15600 = vmatpush3.bf16.msra.mxu1 %v20535_v22  ;;  %v20584_v22 = vld [vmem:[#allocation99_spill] sm:$0xff] }
 0x4b1   :  { %15001 = vmatprep.subr.bf16.mxu0 %v20381_v57  ;;  %15601 = vmatprep.subr.bf16.mxu1 %v20381_v57 }
 0x4b4   :  { %15003 = vmatpush3.bf16.msra.mxu0 %v20536_v25  ;;  %15603 = vmatpush3.bf16.msra.mxu1 %v20536_v25  ;;  %v20585_v25 = vld [vmem:[#allocation100_spill] sm:$0xff] }
 0x4b5   :  { %15004 = vmatprep.subr.bf16.mxu0 %v20381_v57  ;;  %15604 = vmatprep.subr.bf16.mxu1 %v20381_v57 }
 0x4b8   :  { %15006 = vmatpush3.bf16.msra.mxu0 %v20537_v39  ;;  %15606 = vmatpush3.bf16.msra.mxu1 %v20537_v39  ;;  %v20586_v39 = vld [vmem:[#allocation101_spill] sm:$0xff] }
 0x4b9   :  { %15007 = vmatprep.subr.bf16.mxu0 %v20381_v57  ;;  %15607 = vmatprep.subr.bf16.mxu1 %v20381_v57 }
 0x4bc   :  { %15009 = vmatpush3.bf16.msra.mxu0 %v20538_v42  ;;  %15609 = vmatpush3.bf16.msra.mxu1 %v20538_v42  ;;  %v20587_v42 = vld [vmem:[#allocation102_spill] sm:$0xff] }
 0x4bd   :  { %15010 = vmatprep.subr.bf16.mxu0 %v20381_v57  ;;  %15610 = vmatprep.subr.bf16.mxu1 %v20381_v57 }
 0x4c0   :  { %15012 = vmatpush3.bf16.msra.mxu0 %v20539_v45  ;;  %15612 = vmatpush3.bf16.msra.mxu1 %v20539_v45  ;;  %v16171_v45 = vld [vmem:[%s20047_s0 + $0x38] sm:$0x3] }
 0x4c1   :  { %15013 = vmatprep.subr.bf16.mxu0 %v20381_v57  ;;  %15613 = vmatprep.subr.bf16.mxu1 %v20381_v57 }
 0x4c3   :  { %12134 = vmatmul.mubr.f32.vlgmr.msra.gmra.mrb[2].mxu0 %v16163_v10  ;;  %13009 = vmatmul.mubr.f32.vlgmr.msra.gmra.mrb[2].mxu1 %v16164_v48  ;;  %v20580_v10 = vld [vmem:[#allocation95_spill] sm:$0xff] }
 0x4c4   :  { %15015 = vmatpush3.bf16.msra.mxu0 %v20540_v51  ;;  %15615 = vmatpush3.bf16.msra.mxu1 %v20540_v51  ;;  %v20589_v51 = vld [vmem:[#allocation104_spill] sm:$0xff] }
 0x4c5   :  { %15016 = vmatprep.subr.bf16.mxu0 %v20381_v57  ;;  %15616 = vmatprep.subr.bf16.mxu1 %v20381_v57 }
 0x4c6   :  { %12168 = vmatprep.mubr.msk.f32.mxu0 %vm16198_vm0, %v20349_v9  ;;  %13043 = vmatprep.mubr.msk.f32.mxu1 %vm16198_vm0, %v20349_v9 }
 0x4c8   :  { %15018 = vmatpush3.bf16.msra.mxu0 %v20541_v55  ;;  %15618 = vmatpush3.bf16.msra.mxu1 %v20541_v55  ;;  %v20590_v55 = vld [vmem:[#allocation105_spill] sm:$0xff] }
 0x4c9   :  { %15019 = vmatprep.subr.bf16.mxu0 %v20381_v57  ;;  %15619 = vmatprep.subr.bf16.mxu1 %v20381_v57 }
 0x4cc   :  { %15021 = vmatpush3.bf16.msra.mxu0 %v20542_v58  ;;  %15621 = vmatpush3.bf16.msra.mxu1 %v20542_v58  ;;  %v20591_v58 = vld [vmem:[#allocation106_spill] sm:$0xff] }
 0x4cd   :  { %15022 = vmatprep.subr.bf16.mxu0 %v20381_v57  ;;  %15622 = vmatprep.subr.bf16.mxu1 %v20381_v57 }
 0x4d0   :  { %15024 = vmatpush3.bf16.msra.mxu0 %v20543_v61  ;;  %15624 = vmatpush3.bf16.msra.mxu1 %v20543_v61  ;;  %v20592_v61 = vld [vmem:[#allocation107_spill] sm:$0xff] }
 0x4d1   :  { %15025 = vmatprep.subr.bf16.mxu0 %v20381_v57  ;;  %15625 = vmatprep.subr.bf16.mxu1 %v20381_v57 }
 0x4d4   :  { %15027 = vmatpush3.bf16.msra.mxu0 %v20544_v0  ;;  %15627 = vmatpush3.bf16.msra.mxu1 %v20544_v0  ;;  %v20593_v0 = vld [vmem:[#allocation108_spill] sm:$0xff] }
 0x4d5   :  { %15028 = vmatprep.subr.bf16.mxu0 %v20381_v57  ;;  %15628 = vmatprep.subr.bf16.mxu1 %v20381_v57 }
 0x4d8   :  { %15030 = vmatpush3.bf16.msra.mxu0 %v20545_v5  ;;  %15630 = vmatpush3.bf16.msra.mxu1 %v20545_v5  ;;  %v20594_v5 = vld [vmem:[#allocation109_spill] sm:$0xff] }
 0x4d9   :  { %15031 = vmatprep.subr.bf16.mxu0 %v20381_v57  ;;  %15631 = vmatprep.subr.bf16.mxu1 %v20381_v57 }
 0x4dc   :  { %15033 = vmatpush3.bf16.msra.mxu0 %v20546_v11  ;;  %15633 = vmatpush3.bf16.msra.mxu1 %v20546_v11  ;;  %v20595_v11 = vld [vmem:[#allocation110_spill] sm:$0xff] }
 0x4dd   :  { %15034 = vmatprep.subr.bf16.mxu0 %v20381_v57  ;;  %15634 = vmatprep.subr.bf16.mxu1 %v20381_v57 }
 0x4e0   :  { %15036 = vmatpush3.bf16.msra.mxu0 %v20547_v15  ;;  %15636 = vmatpush3.bf16.msra.mxu1 %v20547_v15  ;;  %v16172_v15 = vld [vmem:[%s20047_s0 + $0x3a] sm:$0x3] }
 0x4e1   :  { %15037 = vmatprep.subr.bf16.mxu0 %v20381_v57  ;;  %15637 = vmatprep.subr.bf16.mxu1 %v20381_v57 }
 0x4e3   :  { %12169 = vmatmul.mubr.f32.vlgmr.msra.gmra.mrb[2].mxu0 %v16164_v48  ;;  %13044 = vmatmul.mubr.f32.vlgmr.msra.gmra.mrb[2].mxu1 %v16165_v20  ;;  %v20588_v48 = vld [vmem:[#allocation103_spill] sm:$0xff] }
 0x4e4   :  { %15039 = vmatpush3.bf16.msra.mxu0 %v20548_v24  ;;  %15639 = vmatpush3.bf16.msra.mxu1 %v20548_v24  ;;  %v20597_v24 = vld [vmem:[#allocation112_spill] sm:$0xff] }
 0x4e5   :  { %15040 = vmatprep.subr.bf16.mxu0 %v20381_v57  ;;  %15640 = vmatprep.subr.bf16.mxu1 %v20381_v57 }
 0x4e6   :  { %12203 = vmatprep.mubr.msk.f32.mxu0 %vm16198_vm0, %v20349_v9  ;;  %13078 = vmatprep.mubr.msk.f32.mxu1 %vm16198_vm0, %v20349_v9 }
 0x4e8   :  { %15042 = vmatpush3.bf16.msra.mxu0 %v20549_v31  ;;  %15642 = vmatpush3.bf16.msra.mxu1 %v20549_v31  ;;  %v20598_v31 = vld [vmem:[#allocation113_spill] sm:$0xff] }
 0x4e9   :  { %15043 = vmatprep.subr.bf16.mxu0 %v20381_v57  ;;  %15643 = vmatprep.subr.bf16.mxu1 %v20381_v57 }
 0x4ec   :  { %15045 = vmatpush3.bf16.msra.mxu0 %v20550_v34  ;;  %15645 = vmatpush3.bf16.msra.mxu1 %v20550_v34  ;;  %v20599_v34 = vld [vmem:[#allocation114_spill] sm:$0xff] }
 0x4ed   :  { %15046 = vmatprep.subr.bf16.mxu0 %v20381_v57  ;;  %15646 = vmatprep.subr.bf16.mxu1 %v20381_v57 }
 0x4f0   :  { %15048 = vmatpush3.bf16.msra.mxu0 %v20551_v38  ;;  %15648 = vmatpush3.bf16.msra.mxu1 %v20551_v38  ;;  %v20600_v38 = vld [vmem:[#allocation115_spill] sm:$0xff] }
 0x4f1   :  { %15049 = vmatprep.subr.bf16.mxu0 %v20381_v57  ;;  %15649 = vmatprep.subr.bf16.mxu1 %v20381_v57 }
 0x4f4   :  { %15051 = vmatpush3.bf16.msra.mxu0 %v20552_v43  ;;  %15651 = vmatpush3.bf16.msra.mxu1 %v20552_v43  ;;  %v20601_v43 = vld [vmem:[#allocation116_spill] sm:$0xff] }
 0x4f5   :  { %15052 = vmatprep.subr.bf16.mxu0 %v20381_v57  ;;  %15652 = vmatprep.subr.bf16.mxu1 %v20381_v57 }
 0x4f8   :  { %15054 = vmatpush3.bf16.msra.mxu0 %v20553_v47  ;;  %15654 = vmatpush3.bf16.msra.mxu1 %v20553_v47  ;;  %v20602_v47 = vld [vmem:[#allocation117_spill] sm:$0xff] }
 0x4f9   :  { %15055 = vmatprep.subr.bf16.mxu0 %v20381_v57  ;;  %15655 = vmatprep.subr.bf16.mxu1 %v20381_v57 }
 0x4fc   :  { %15057 = vmatpush3.bf16.msra.mxu0 %v20554_v52  ;;  %15657 = vmatpush3.bf16.msra.mxu1 %v20554_v52  ;;  %v20603_v52 = vld [vmem:[#allocation118_spill] sm:$0xff] }
 0x4fd   :  { %15058 = vmatprep.subr.bf16.mxu0 %v20381_v57  ;;  %15658 = vmatprep.subr.bf16.mxu1 %v20381_v57 }
 0x500   :  { %15060 = vmatpush3.bf16.msra.mxu0 %v20555_v56  ;;  %15660 = vmatpush3.bf16.msra.mxu1 %v20555_v56  ;;  %v5447_v56 = vld [vmem:[%s20047_s0 + $0x3c] sm:$0x3] }
 0x501   :  { %15061 = vmatprep.subr.bf16.mxu0 %v20381_v57  ;;  %15661 = vmatprep.subr.bf16.mxu1 %v20381_v57 }
 0x503   :  { %12204 = vmatmul.mubr.f32.vlgmr.msra.gmra.mrb[2].mxu0 %v16165_v20  ;;  %13079 = vmatmul.mubr.f32.vlgmr.msra.gmra.mrb[2].mxu1 %v16166_v60  ;;  %v20596_v20 = vld [vmem:[#allocation111_spill] sm:$0xff]  ;;  %v5519_v60 = vld [vmem:[%s20047_s0 + $0x3e] sm:$0x3] }
 0x504   :  { %15063 = vmatpush3.bf16.msra.mxu0 %v20556_v2  ;;  %15663 = vmatpush3.bf16.msra.mxu1 %v20556_v2  ;;  %v20604_v2 = vld [vmem:[#allocation119_spill] sm:$0xff] }
 0x505   :  { %15064 = vmatprep.subr.bf16.mxu0 %v20381_v57  ;;  %15664 = vmatprep.subr.bf16.mxu1 %v20381_v57 }
 0x506   :  { %12238 = vmatprep.mubr.msk.f32.mxu0 %vm16198_vm0, %v20349_v9  ;;  %13113 = vmatprep.mubr.msk.f32.mxu1 %vm16198_vm0, %v20349_v9 }
 0x508   :  { %15066 = vmatpush3.bf16.msra.mxu0 %v20557_v12  ;;  %15666 = vmatpush3.bf16.msra.mxu1 %v20557_v12  ;;  %v20605_v12 = vld [vmem:[#allocation120_spill] sm:$0xff] }
 0x509   :  { %15067 = vmatprep.subr.bf16.mxu0 %v20381_v57  ;;  %15667 = vmatprep.subr.bf16.mxu1 %v20381_v57 }
 0x50c   :  { %15069 = vmatpush3.bf16.msra.mxu0 %v20558_v18  ;;  %15669 = vmatpush3.bf16.msra.mxu1 %v20558_v18  ;;  %v20606_v18 = vld [vmem:[#allocation121_spill] sm:$0xff] }
 0x50d   :  { %15070 = vmatprep.subr.bf16.mxu0 %v20381_v57  ;;  %15670 = vmatprep.subr.bf16.mxu1 %v20381_v57 }
 0x510   :  { %15072 = vmatpush3.bf16.msra.mxu0 %v20559_v26  ;;  %15672 = vmatpush3.bf16.msra.mxu1 %v20559_v26  ;;  %v20607_v26 = vld [vmem:[#allocation122_spill] sm:$0xff] }
 0x511   :  { %15073 = vmatprep.subr.bf16.mxu0 %v20381_v57  ;;  %15673 = vmatprep.subr.bf16.mxu1 %v20381_v57 }
 0x514   :  { %15075 = vmatpush3.bf16.msra.mxu0 %v20560_v32  ;;  %15675 = vmatpush3.bf16.msra.mxu1 %v20560_v32  ;;  %v20608_v32 = vld [vmem:[#allocation123_spill] sm:$0xff] }
 0x515   :  { %15076 = vmatprep.subr.bf16.mxu0 %v20381_v57  ;;  %15676 = vmatprep.subr.bf16.mxu1 %v20381_v57 }
 0x518   :  { %15078 = vmatpush3.bf16.msra.mxu0 %v20561_v37  ;;  %15678 = vmatpush3.bf16.msra.mxu1 %v20561_v37  ;;  %v20609_v37 = vld [vmem:[#allocation124_spill] sm:$0xff] }
 0x519   :  { %15079 = vmatprep.subr.bf16.mxu0 %v20381_v57  ;;  %15679 = vmatprep.subr.bf16.mxu1 %v20381_v57 }
 0x51c   :  { %15081 = vmatpush3.bf16.msra.mxu0 %v20562_v44  ;;  %15681 = vmatpush3.bf16.msra.mxu1 %v20562_v44  ;;  %v20610_v44 = vld [vmem:[#allocation125_spill] sm:$0xff] }
 0x51d   :  { %15082 = vmatprep.subr.bf16.mxu0 %v20381_v57  ;;  %15682 = vmatprep.subr.bf16.mxu1 %v20381_v57 }
 0x520   :  { %15084 = vmatpush3.bf16.msra.mxu0 %v20563_v50  ;;  %15684 = vmatpush3.bf16.msra.mxu1 %v20563_v50  ;;  %v20611_v50 = vld [vmem:[#allocation126_spill] sm:$0xff] }
 0x521   :  { %15085 = vmatprep.subr.bf16.mxu0 %v20381_v57  ;;  %15685 = vmatprep.subr.bf16.mxu1 %v20381_v57 }
 0x523   :  { %12239 = vmatmul.mubr.f32.vlgmr.msra.gmra.mrb[2].mxu0 %v16167_v59  ;;  %13114 = vmatmul.mubr.f32.vlgmr.msra.gmra.mrb[2].mxu1 %v16168_v62  ;;  %v5591_v59 = vld [vmem:[%s20047_s0 + $0x40] sm:$0x3] }
 0x524   :  { %15087 = vmatpush3.bf16.msra.mxu0 %v20564_v14  ;;  %15687 = vmatpush3.bf16.msra.mxu1 %v20564_v14  ;;  %v20613_v14 = vld [vmem:[#allocation128_spill] sm:$0xff] }
 0x525   :  { %15088 = vmatprep.subr.bf16.mxu0 %v20381_v57  ;;  %15688 = vmatprep.subr.bf16.mxu1 %v20381_v57 }
 0x526   :  { %12273 = vmatprep.mubr.msk.f32.mxu0 %vm16198_vm0, %v20349_v9  ;;  %13148 = vmatprep.mubr.msk.f32.mxu1 %vm16198_vm0, %v20349_v9 }
 0x528   :  { %15090 = vmatpush3.bf16.msra.mxu0 %v20565_v23  ;;  %15690 = vmatpush3.bf16.msra.mxu1 %v20565_v23  ;;  %v20614_v23 = vld [vmem:[#allocation129_spill] sm:$0xff] }
 0x529   :  { %15091 = vmatprep.subr.bf16.mxu0 %v20381_v57  ;;  %15691 = vmatprep.subr.bf16.mxu1 %v20381_v57 }
 0x52c   :  { %15093 = vmatpush3.bf16.msra.mxu0 %v20566_v30  ;;  %15693 = vmatpush3.bf16.msra.mxu1 %v20566_v30  ;;  %v20615_v30 = vld [vmem:[#allocation130_spill] sm:$0xff] }
 0x52d   :  { %15094 = vmatprep.subr.bf16.mxu0 %v20381_v57  ;;  %15694 = vmatprep.subr.bf16.mxu1 %v20381_v57 }
 0x530   :  { %15096 = vmatpush3.bf16.msra.mxu0 %v20567_v41  ;;  %15696 = vmatpush3.bf16.msra.mxu1 %v20567_v41  ;;  %v20616_v41 = vld [vmem:[#allocation131_spill] sm:$0xff] }
 0x531   :  { %15097 = vmatprep.subr.bf16.mxu0 %v20381_v57  ;;  %15697 = vmatprep.subr.bf16.mxu1 %v20381_v57 }
 0x534   :  { %15099 = vmatpush3.bf16.msra.mxu0 %v20568_v53  ;;  %15699 = vmatpush3.bf16.msra.mxu1 %v20568_v53  ;;  %v20617_v53 = vld [vmem:[#allocation132_spill] sm:$0xff] }
 0x535   :  { %15100 = vmatprep.subr.bf16.mxu0 %v20381_v57  ;;  %15700 = vmatprep.subr.bf16.mxu1 %v20381_v57 }
 0x538   :  { %15102 = vmatpush3.bf16.msra.mxu0 %v20569_v1  ;;  %15702 = vmatpush3.bf16.msra.mxu1 %v20569_v1  ;;  %v20618_v1 = vld [vmem:[#allocation133_spill] sm:$0xff] }
 0x539   :  { %15103 = vmatprep.subr.bf16.mxu0 %v20381_v57  ;;  %15703 = vmatprep.subr.bf16.mxu1 %v20381_v57 }
 0x53c   :  { %15105 = vmatpush3.bf16.msra.mxu0 %v20570_v21  ;;  %15705 = vmatpush3.bf16.msra.mxu1 %v20570_v21  ;;  %v20619_v21 = vld [vmem:[#allocation134_spill] sm:$0xff] }
 0x53d   :  { %15106 = vmatprep.subr.bf16.mxu0 %v20381_v57  ;;  %15706 = vmatprep.subr.bf16.mxu1 %v20381_v57 }
 0x540   :  { %15108 = vmatpush3.bf16.msra.mxu0 %v20571_v35  ;;  %15708 = vmatpush3.bf16.msra.mxu1 %v20571_v35  ;;  %v5663_v35 = vld [vmem:[%s20047_s0 + $0x42] sm:$0x3] }
 0x541   :  { %15109 = vmatprep.subr.bf16.mxu0 %v20381_v57  ;;  %15709 = vmatprep.subr.bf16.mxu1 %v20381_v57 }
 0x543   :  { %12274 = vmatmul.mubr.f32.vlgmr.msra.gmra.mrb[2].mxu0 %v16168_v62  ;;  %13149 = vmatmul.mubr.f32.vlgmr.msra.gmra.mrb[2].mxu1 %v16169_v49  ;;  %v20612_v62 = vld [vmem:[#allocation127_spill] sm:$0xff] }
 0x544   :  { %15111 = vmatpush3.bf16.msra.mxu0 %v20572_v63  ;;  %15711 = vmatpush3.bf16.msra.mxu1 %v20572_v63  ;;  %v20621_v63 = vld [vmem:[#allocation136_spill] sm:$0xff] }
 0x545   :  { %15112 = vmatprep.subr.bf16.mxu0 %v20381_v57  ;;  %15712 = vmatprep.subr.bf16.mxu1 %v20381_v57 }
 0x546   :  { %12308 = vmatprep.mubr.msk.f32.mxu0 %vm16198_vm0, %v20349_v9  ;;  %13183 = vmatprep.mubr.msk.f32.mxu1 %vm16198_vm0, %v20349_v9 }
 0x548   :  { %15114 = vmatpush3.bf16.msra.mxu0 %v20573_v27  ;;  %15714 = vmatpush3.bf16.msra.mxu1 %v20573_v27  ;;  %v20622_v27 = vld [vmem:[#allocation137_spill] sm:$0xff] }
 0x549   :  { %15115 = vmatprep.subr.bf16.mxu0 %v20381_v57  ;;  %15715 = vmatprep.subr.bf16.mxu1 %v20381_v57 }
 0x54c   :  { %15117 = vmatpush3.bf16.msra.mxu0 %v20574_v54  ;;  %15717 = vmatpush3.bf16.msra.mxu1 %v20574_v54  ;;  %v20623_v54 = vld [vmem:[#allocation138_spill] sm:$0xff] }
 0x54d   :  { %15118 = vmatprep.subr.bf16.mxu0 %v20381_v57  ;;  %15718 = vmatprep.subr.bf16.mxu1 %v20381_v57 }
 0x550   :  { %15120 = vmatpush3.bf16.msra.mxu0 %v20575_v3  ;;  %15720 = vmatpush3.bf16.msra.mxu1 %v20575_v3  ;;  %v20624_v3 = vld [vmem:[#allocation139_spill] sm:$0xff] }
 0x551   :  { %15121 = vmatprep.subr.bf16.mxu0 %v20381_v57  ;;  %15721 = vmatprep.subr.bf16.mxu1 %v20381_v57 }
 0x554   :  { %15123 = vmatpush3.bf16.msra.mxu0 %v20576_v8  ;;  %15723 = vmatpush3.bf16.msra.mxu1 %v20576_v8  ;;  %v20625_v8 = vld [vmem:[#allocation140_spill] sm:$0xff] }
 0x555   :  { %15124 = vmatprep.subr.bf16.mxu0 %v20381_v57  ;;  %15724 = vmatprep.subr.bf16.mxu1 %v20381_v57 }
 0x558   :  { %15126 = vmatpush3.bf16.msra.mxu0 %v20577_v17  ;;  %15726 = vmatpush3.bf16.msra.mxu1 %v20577_v17  ;;  %v20626_v17 = vld [vmem:[#allocation141_spill] sm:$0xff] }
 0x559   :  { %15127 = vmatprep.subr.bf16.mxu0 %v20381_v57  ;;  %15727 = vmatprep.subr.bf16.mxu1 %v20381_v57 }
 0x55c   :  { %15129 = vmatpush3.bf16.msra.mxu0 %v20578_v40  ;;  %15729 = vmatpush3.bf16.msra.mxu1 %v20578_v40  ;;  %v20627_v40 = vld [vmem:[#allocation142_spill] sm:$0xff] }
 0x55d   :  { %15130 = vmatprep.subr.bf16.mxu0 %v20381_v57  ;;  %15730 = vmatprep.subr.bf16.mxu1 %v20381_v57 }
 0x560   :  { %15132 = vmatpush3.bf16.msra.mxu0 %v20579_v4  ;;  %15732 = vmatpush3.bf16.msra.mxu1 %v20579_v4  ;;  %v5735_v4 = vld [vmem:[%s20047_s0 + $0x44] sm:$0x3] }
 0x561   :  { %15133 = vmatprep.subr.bf16.mxu0 %v20381_v57  ;;  %15733 = vmatprep.subr.bf16.mxu1 %v20381_v57 }
 0x563   :  { %12309 = vmatmul.mubr.f32.vlgmr.msra.gmra.mrb[2].mxu0 %v16169_v49  ;;  %13184 = vmatmul.mubr.f32.vlgmr.msra.gmra.mrb[2].mxu1 %v16170_v7  ;;  %v20620_v49 = vld [vmem:[#allocation135_spill] sm:$0xff] }
 0x564   :  { %15135 = vmatpush3.bf16.msra.mxu0 %v20580_v10  ;;  %15735 = vmatpush3.bf16.msra.mxu1 %v20580_v10  ;;  %v20629_v10 = vld [vmem:[#allocation144_spill] sm:$0xff] }
 0x565   :  { %15136 = vmatprep.subr.bf16.mxu0 %v20381_v57  ;;  %15736 = vmatprep.subr.bf16.mxu1 %v20381_v57 }
 0x566   :  { %12343 = vmatprep.mubr.msk.f32.mxu0 %vm16198_vm0, %v20349_v9  ;;  %13218 = vmatprep.mubr.msk.f32.mxu1 %vm16198_vm0, %v20349_v9 }
 0x568   :  { %15138 = vmatpush3.bf16.msra.mxu0 %v20581_v13  ;;  %15738 = vmatpush3.bf16.msra.mxu1 %v20581_v13  ;;  %v20630_v13 = vld [vmem:[#allocation145_spill] sm:$0xff] }
 0x569   :  { %15139 = vmatprep.subr.bf16.mxu0 %v20381_v57  ;;  %15739 = vmatprep.subr.bf16.mxu1 %v20381_v57 }
 0x56c   :  { %15141 = vmatpush3.bf16.msra.mxu0 %v20582_v16  ;;  %15741 = vmatpush3.bf16.msra.mxu1 %v20582_v16  ;;  %v20631_v16 = vld [vmem:[#allocation146_spill] sm:$0xff] }
 0x56d   :  { %15142 = vmatprep.subr.bf16.mxu0 %v20381_v57  ;;  %15742 = vmatprep.subr.bf16.mxu1 %v20381_v57 }
 0x570   :  { %15144 = vmatpush3.bf16.msra.mxu0 %v20583_v19  ;;  %15744 = vmatpush3.bf16.msra.mxu1 %v20583_v19  ;;  %v20632_v19 = vld [vmem:[#allocation147_spill] sm:$0xff] }
 0x571   :  { %15145 = vmatprep.subr.bf16.mxu0 %v20381_v57  ;;  %15745 = vmatprep.subr.bf16.mxu1 %v20381_v57 }
 0x574   :  { %15147 = vmatpush3.bf16.msra.mxu0 %v20584_v22  ;;  %15747 = vmatpush3.bf16.msra.mxu1 %v20584_v22  ;;  %v7590_v22 = vld [vmem:[%s20050_s3] sm:$0xff] }
 0x575   :  { %15148 = vmatprep.subr.bf16.mxu0 %v20381_v57  ;;  %15748 = vmatprep.subr.bf16.mxu1 %v20381_v57 }
 0x578   :  { %15150 = vmatpush3.bf16.msra.mxu0 %v20585_v25  ;;  %15750 = vmatpush3.bf16.msra.mxu1 %v20585_v25 }
 0x579   :  { %15151 = vmatprep.subr.bf16.mxu0 %v20381_v57  ;;  %15751 = vmatprep.subr.bf16.mxu1 %v20381_v57 }
 0x57c   :  { %15153 = vmatpush3.bf16.msra.mxu0 %v20586_v39  ;;  %15753 = vmatpush3.bf16.msra.mxu1 %v20586_v39  ;;  %v7592_v39 = vld [vmem:[%s20050_s3 + $0x10] sm:$0xff] }
 0x57d   :  { %15154 = vmatprep.subr.bf16.mxu0 %v20381_v57  ;;  %15754 = vmatprep.subr.bf16.mxu1 %v20381_v57 }
 0x580   :  { %15156 = vmatpush3.bf16.msra.mxu0 %v20587_v42  ;;  %15756 = vmatpush3.bf16.msra.mxu1 %v20587_v42  ;;  %v7593_v42 = vld [vmem:[%s20050_s3 + $0x18] sm:$0xff] }
 0x581   :  { %15157 = vmatprep.subr.bf16.mxu0 %v20381_v57  ;;  %15757 = vmatprep.subr.bf16.mxu1 %v20381_v57 }
 0x583   :  { %12344 = vmatmul.mubr.f32.vlgmr.msra.gmra.mrb[2].mxu0 %v16170_v7  ;;  %13219 = vmatmul.mubr.f32.vlgmr.msra.gmra.mrb[2].mxu1 %v16171_v45  ;;  %v20628_v7 = vld [vmem:[#allocation143_spill] sm:$0xff] }
 0x584   :  { %15159 = vmatpush3.bf16.msra.mxu0 %v20588_v48  ;;  %15759 = vmatpush3.bf16.msra.mxu1 %v20588_v48  ;;  %v7595_v48 = vld [vmem:[%s20050_s3 + $0x28] sm:$0xff] }
 0x585   :  { %15160 = vmatprep.subr.bf16.mxu0 %v20381_v57  ;;  %15760 = vmatprep.subr.bf16.mxu1 %v20381_v57 }
 0x586   :  { %12378 = vmatprep.mubr.msk.f32.mxu0 %vm16198_vm0, %v20349_v9  ;;  %13253 = vmatprep.mubr.msk.f32.mxu1 %vm16198_vm0, %v20349_v9 }
 0x588   :  { %15162 = vmatpush3.bf16.msra.mxu0 %v20589_v51  ;;  %15762 = vmatpush3.bf16.msra.mxu1 %v20589_v51 }
 0x589   :  { %15163 = vmatprep.subr.bf16.mxu0 %v20381_v57  ;;  %15763 = vmatprep.subr.bf16.mxu1 %v20381_v57 }
 0x58c   :  { %15165 = vmatpush3.bf16.msra.mxu0 %v20590_v55  ;;  %15765 = vmatpush3.bf16.msra.mxu1 %v20590_v55  ;;  %v7596_v55 = vld [vmem:[%s20050_s3 + $0x30] sm:$0xff] }
 0x58d   :  { %15166 = vmatprep.subr.bf16.mxu0 %v20381_v57  ;;  %15766 = vmatprep.subr.bf16.mxu1 %v20381_v57 }
 0x590   :  { %15168 = vmatpush3.bf16.msra.mxu0 %v20591_v58  ;;  %15768 = vmatpush3.bf16.msra.mxu1 %v20591_v58  ;;  %v7597_v58 = vld [vmem:[%s20050_s3 + $0x38] sm:$0xff] }
 0x591   :  { %15169 = vmatprep.subr.bf16.mxu0 %v20381_v57  ;;  %15769 = vmatprep.subr.bf16.mxu1 %v20381_v57 }
 0x594   :  { %15171 = vmatpush3.bf16.msra.mxu0 %v20592_v61  ;;  %15771 = vmatpush3.bf16.msra.mxu1 %v20592_v61  ;;  %v15911_v61 = vpack.c.bf16 %v7597_v58, %v7596_v55 }
 0x595   :  { %15172 = vmatprep.subr.bf16.mxu0 %v20381_v57  ;;  %15772 = vmatprep.subr.bf16.mxu1 %v20381_v57 }
 0x598   :  { %15174 = vmatpush3.bf16.msra.mxu0 %v20593_v0  ;;  %15774 = vmatpush3.bf16.msra.mxu1 %v20593_v0  ;;  %v7599_v0 = vld [vmem:[%s20050_s3 + $0x48] sm:$0xff] }
 0x599   :  { %15175 = vmatprep.subr.bf16.mxu0 %v20381_v57  ;;  %15775 = vmatprep.subr.bf16.mxu1 %v20381_v57 }
 0x59c   :  { %15177 = vmatpush3.bf16.msra.mxu0 %v20594_v5  ;;  %15777 = vmatpush3.bf16.msra.mxu1 %v20594_v5 }
 0x59d   :  { %15178 = vmatprep.subr.bf16.mxu0 %v20381_v57  ;;  %15778 = vmatprep.subr.bf16.mxu1 %v20381_v57 }
 0x5a0   :  { %15180 = vmatpush3.bf16.msra.mxu0 %v20595_v11  ;;  %15780 = vmatpush3.bf16.msra.mxu1 %v20595_v11  ;;  %v7600_v11 = vld [vmem:[%s20050_s3 + $0x50] sm:$0xff] }
 0x5a1   :  { %15181 = vmatprep.subr.bf16.mxu0 %v20381_v57  ;;  %15781 = vmatprep.subr.bf16.mxu1 %v20381_v57 }
 0x5a3   :  { %12379 = vmatmul.mubr.f32.vlgmr.msra.gmra.mrb[2].mxu0 %v16171_v45  ;;  %13254 = vmatmul.mubr.f32.vlgmr.msra.gmra.mrb[2].mxu1 %v16172_v15  ;;  %v7594_v45 = vld [vmem:[%s20050_s3 + $0x20] sm:$0xff]  ;;  %v7601_v15 = vld [vmem:[%s20050_s3 + $0x58] sm:$0xff] }
 0x5a4   :  { %15183 = vmatpush3.bf16.msra.mxu0 %v20596_v20  ;;  %15783 = vmatpush3.bf16.msra.mxu1 %v20596_v20  ;;  %v15908_v51 = vpack.c.bf16 %v7595_v48, %v7594_v45  ;;  %v15917_v20 = vpack.c.bf16 %v7601_v15, %v7600_v11 }
 0x5a5   :  { %15184 = vmatprep.subr.bf16.mxu0 %v20381_v57  ;;  %15784 = vmatprep.subr.bf16.mxu1 %v20381_v57 }
 0x5a6   :  { %12413 = vmatprep.mubr.msk.f32.mxu0 %vm16198_vm0, %v20349_v9  ;;  %13288 = vmatprep.mubr.msk.f32.mxu1 %vm16198_vm0, %v20349_v9 }
 0x5a8   :  { %15186 = vmatpush3.bf16.msra.mxu0 %v20597_v24  ;;  %15786 = vmatpush3.bf16.msra.mxu1 %v20597_v24  ;;  %v7602_v24 = vld [vmem:[%s20050_s3 + $0x60] sm:$0xff] }
 0x5a9   :  { %15187 = vmatprep.subr.bf16.mxu0 %v20381_v57  ;;  %15787 = vmatprep.subr.bf16.mxu1 %v20381_v57 }
 0x5ac   :  { %15189 = vmatpush3.bf16.msra.mxu0 %v20598_v31  ;;  %15789 = vmatpush3.bf16.msra.mxu1 %v20598_v31  ;;  %v7603_v31 = vld [vmem:[%s20050_s3 + $0x68] sm:$0xff] }
 0x5ad   :  { %15190 = vmatprep.subr.bf16.mxu0 %v20381_v57  ;;  %15790 = vmatprep.subr.bf16.mxu1 %v20381_v57 }
 0x5b0   :  { %15192 = vmatpush3.bf16.msra.mxu0 %v20599_v34  ;;  %15792 = vmatpush3.bf16.msra.mxu1 %v20599_v34  ;;  %v15920_v34 = vpack.c.bf16 %v7603_v31, %v7602_v24 }
 0x5b1   :  { %15193 = vmatprep.subr.bf16.mxu0 %v20381_v57  ;;  %15793 = vmatprep.subr.bf16.mxu1 %v20381_v57 }
 0x5b4   :  { %15195 = vmatpush3.bf16.msra.mxu0 %v20600_v38  ;;  %15795 = vmatpush3.bf16.msra.mxu1 %v20600_v38  ;;  %v7604_v38 = vld [vmem:[%s20050_s3 + $0x70] sm:$0xff] }
 0x5b5   :  { %15196 = vmatprep.subr.bf16.mxu0 %v20381_v57  ;;  %15796 = vmatprep.subr.bf16.mxu1 %v20381_v57 }
 0x5b8   :  { %15198 = vmatpush3.bf16.msra.mxu0 %v20601_v43  ;;  %15798 = vmatpush3.bf16.msra.mxu1 %v20601_v43  ;;  %v7605_v43 = vld [vmem:[%s20050_s3 + $0x78] sm:$0xff] }
 0x5b9   :  { %15199 = vmatprep.subr.bf16.mxu0 %v20381_v57  ;;  %15799 = vmatprep.subr.bf16.mxu1 %v20381_v57 }
 0x5bc   :  { %15201 = vmatpush3.bf16.msra.mxu0 %v20602_v47  ;;  %15801 = vmatpush3.bf16.msra.mxu1 %v20602_v47  ;;  %v15923_v47 = vpack.c.bf16 %v7605_v43, %v7604_v38 }
 0x5bd   :  { %15202 = vmatprep.subr.bf16.mxu0 %v20381_v57  ;;  %15802 = vmatprep.subr.bf16.mxu1 %v20381_v57 }
 0x5c0   :  { %15204 = vmatpush3.bf16.msra.mxu0 %v20603_v52  ;;  %15804 = vmatpush3.bf16.msra.mxu1 %v20603_v52  ;;  %v7684_v52 = vld [vmem:[%s20052_s5] sm:$0xff] }
 0x5c1   :  { %15205 = vmatprep.subr.bf16.mxu0 %v20381_v57  ;;  %15805 = vmatprep.subr.bf16.mxu1 %v20381_v57 }
 0x5c3   :  { %12414 = vmatmul.mubr.f32.vlgmr.msra.gmra.mrb[2].mxu0 %v5447_v56  ;;  %13289 = vmatmul.mubr.f32.vlgmr.msra.gmra.mrb[2].mxu1 %v5519_v60  ;;  %v7685_v56 = vld [vmem:[%s20052_s5 + $0x8] sm:$0xff] }
 0x5c4   :  { %15207 = vmatpush3.bf16.msra.mxu0 %v20604_v2  ;;  %15807 = vmatpush3.bf16.msra.mxu1 %v20604_v2  ;;  %v15926_v2 = vpack.c.bf16 %v7685_v56, %v7684_v52 }
 0x5c5   :  { %15208 = vmatprep.subr.bf16.mxu0 %v20381_v57  ;;  %15808 = vmatprep.subr.bf16.mxu1 %v20381_v57 }
 0x5c6   :  { %12448 = vmatprep.mubr.msk.f32.mxu0 %vm16198_vm0, %v20349_v9  ;;  %13323 = vmatprep.mubr.msk.f32.mxu1 %vm16198_vm0, %v20349_v9 }
 0x5c8   :  { %15210 = vmatpush3.bf16.msra.mxu0 %v20605_v12  ;;  %15810 = vmatpush3.bf16.msra.mxu1 %v20605_v12  ;;  %v7687_v12 = vld [vmem:[%s20052_s5 + $0x18] sm:$0xff] }
 0x5c9   :  { %15211 = vmatprep.subr.bf16.mxu0 %v20381_v57  ;;  %15811 = vmatprep.subr.bf16.mxu1 %v20381_v57 }
 0x5cc   :  { %15213 = vmatpush3.bf16.msra.mxu0 %v20606_v18  ;;  %15813 = vmatpush3.bf16.msra.mxu1 %v20606_v18 }
 0x5cd   :  { %15214 = vmatprep.subr.bf16.mxu0 %v20381_v57  ;;  %15814 = vmatprep.subr.bf16.mxu1 %v20381_v57 }
 0x5d0   :  { %15216 = vmatpush3.bf16.msra.mxu0 %v20607_v26  ;;  %15816 = vmatpush3.bf16.msra.mxu1 %v20607_v26  ;;  %v7688_v26 = vld [vmem:[%s20052_s5 + $0x20] sm:$0xff] }
 0x5d1   :  { %15217 = vmatprep.subr.bf16.mxu0 %v20381_v57  ;;  %15817 = vmatprep.subr.bf16.mxu1 %v20381_v57 }
 0x5d4   :  { %15219 = vmatpush3.bf16.msra.mxu0 %v20608_v32  ;;  %15819 = vmatpush3.bf16.msra.mxu1 %v20608_v32  ;;  %v7689_v32 = vld [vmem:[%s20052_s5 + $0x28] sm:$0xff] }
 0x5d5   :  { %15220 = vmatprep.subr.bf16.mxu0 %v20381_v57  ;;  %15820 = vmatprep.subr.bf16.mxu1 %v20381_v57 }
 0x5d8   :  { %15222 = vmatpush3.bf16.msra.mxu0 %v20609_v37  ;;  %15822 = vmatpush3.bf16.msra.mxu1 %v20609_v37  ;;  %v15932_v37 = vpack.c.bf16 %v7689_v32, %v7688_v26 }
 0x5d9   :  { %15223 = vmatprep.subr.bf16.mxu0 %v20381_v57  ;;  %15823 = vmatprep.subr.bf16.mxu1 %v20381_v57 }
 0x5dc   :  { %15225 = vmatpush3.bf16.msra.mxu0 %v20610_v44  ;;  %15825 = vmatpush3.bf16.msra.mxu1 %v20610_v44  ;;  %v7690_v44 = vld [vmem:[%s20052_s5 + $0x30] sm:$0xff] }
 0x5dd   :  { %15226 = vmatprep.subr.bf16.mxu0 %v20381_v57  ;;  %15826 = vmatprep.subr.bf16.mxu1 %v20381_v57 }
 0x5e0   :  { %15228 = vmatpush3.bf16.msra.mxu0 %v20611_v50  ;;  %15828 = vmatpush3.bf16.msra.mxu1 %v20611_v50  ;;  %v7691_v50 = vld [vmem:[%s20052_s5 + $0x38] sm:$0xff] }
 0x5e1   :  { %15229 = vmatprep.subr.bf16.mxu0 %v20381_v57  ;;  %15829 = vmatprep.subr.bf16.mxu1 %v20381_v57 }
 0x5e3   :  { %12449 = vmatmul.mubr.f32.vlgmr.msra.gmra.mrb[2].mxu0 %v5519_v60  ;;  %13324 = vmatmul.mubr.f32.vlgmr.msra.gmra.mrb[2].mxu1 %v5591_v59  ;;  %v7686_v60 = vld [vmem:[%s20052_s5 + $0x10] sm:$0xff] }
 0x5e4   :  { %15231 = vmatpush3.bf16.msra.mxu0 %v20612_v62  ;;  %15831 = vmatpush3.bf16.msra.mxu1 %v20612_v62  ;;  %v15929_v18 = vpack.c.bf16 %v7687_v12, %v7686_v60  ;;  %v7692_v62 = vld [vmem:[%s20052_s5 + $0x40] sm:$0xff] }
 0x5e5   :  { %15232 = vmatprep.subr.bf16.mxu0 %v20381_v57  ;;  %15832 = vmatprep.subr.bf16.mxu1 %v20381_v57 }
 0x5e6   :  { %12483 = vmatprep.mubr.msk.f32.mxu0 %vm16198_vm0, %v20349_v9  ;;  %13358 = vmatprep.mubr.msk.f32.mxu1 %vm16198_vm0, %v20349_v9 }
 0x5e8   :  { %15234 = vmatpush3.bf16.msra.mxu0 %v20613_v14  ;;  %15834 = vmatpush3.bf16.msra.mxu1 %v20613_v14  ;;  %v7693_v14 = vld [vmem:[%s20052_s5 + $0x48] sm:$0xff] }
 0x5e9   :  { %15235 = vmatprep.subr.bf16.mxu0 %v20381_v57  ;;  %15835 = vmatprep.subr.bf16.mxu1 %v20381_v57 }
 0x5ec   :  { %15237 = vmatpush3.bf16.msra.mxu0 %v20614_v23  ;;  %15837 = vmatpush3.bf16.msra.mxu1 %v20614_v23  ;;  %v15938_v23 = vpack.c.bf16 %v7693_v14, %v7692_v62 }
 0x5ed   :  { %15238 = vmatprep.subr.bf16.mxu0 %v20381_v57  ;;  %15838 = vmatprep.subr.bf16.mxu1 %v20381_v57 }
 0x5f0   :  { %15240 = vmatpush3.bf16.msra.mxu0 %v20615_v30  ;;  %15840 = vmatpush3.bf16.msra.mxu1 %v20615_v30  ;;  %v7694_v30 = vld [vmem:[%s20052_s5 + $0x50] sm:$0xff] }
 0x5f1   :  { %15241 = vmatprep.subr.bf16.mxu0 %v20381_v57  ;;  %15841 = vmatprep.subr.bf16.mxu1 %v20381_v57 }
 0x5f4   :  { %15243 = vmatpush3.bf16.msra.mxu0 %v20616_v41  ;;  %15843 = vmatpush3.bf16.msra.mxu1 %v20616_v41  ;;  %v7695_v41 = vld [vmem:[%s20052_s5 + $0x58] sm:$0xff] }
 0x5f5   :  { %15244 = vmatprep.subr.bf16.mxu0 %v20381_v57  ;;  %15844 = vmatprep.subr.bf16.mxu1 %v20381_v57 }
 0x5f8   :  { %15246 = vmatpush3.bf16.msra.mxu0 %v20617_v53  ;;  %15846 = vmatpush3.bf16.msra.mxu1 %v20617_v53  ;;  %v15941_v53 = vpack.c.bf16 %v7695_v41, %v7694_v30 }
 0x5f9   :  { %15247 = vmatprep.subr.bf16.mxu0 %v20381_v57  ;;  %15847 = vmatprep.subr.bf16.mxu1 %v20381_v57 }
 0x5fc   :  { %15249 = vmatpush3.bf16.msra.mxu0 %v20618_v1  ;;  %15849 = vmatpush3.bf16.msra.mxu1 %v20618_v1  ;;  %v7696_v1 = vld [vmem:[%s20052_s5 + $0x60] sm:$0xff] }
 0x5fd   :  { %15250 = vmatprep.subr.bf16.mxu0 %v20381_v57  ;;  %15850 = vmatprep.subr.bf16.mxu1 %v20381_v57 }
 0x600   :  { %15252 = vmatpush3.bf16.msra.mxu0 %v20619_v21  ;;  %15852 = vmatpush3.bf16.msra.mxu1 %v20619_v21  ;;  %v7697_v21 = vld [vmem:[%s20052_s5 + $0x68] sm:$0xff] }
 0x601   :  { %15253 = vmatprep.subr.bf16.mxu0 %v20381_v57  ;;  %15853 = vmatprep.subr.bf16.mxu1 %v20381_v57 }
 0x603   :  { %12484 = vmatmul.mubr.f32.vlgmr.msra.gmra.mrb[2].mxu0 %v5591_v59  ;;  %13359 = vmatmul.mubr.f32.vlgmr.msra.gmra.mrb[2].mxu1 %v5663_v35  ;;  %v15935_v59 = vpack.c.bf16 %v7691_v50, %v7690_v44 }
 0x604   :  { %15255 = vmatpush3.bf16.msra.mxu0 %v20620_v49  ;;  %15855 = vmatpush3.bf16.msra.mxu1 %v20620_v49 }
 0x605   :  { %15256 = vmatprep.subr.bf16.mxu0 %v20381_v57  ;;  %15856 = vmatprep.subr.bf16.mxu1 %v20381_v57 }
 0x606   :  { %12518 = vmatprep.mubr.msk.f32.mxu0 %vm16198_vm0, %v20349_v9  ;;  %13393 = vmatprep.mubr.msk.f32.mxu1 %vm16198_vm0, %v20349_v9 }
 0x608   :  { %15258 = vmatpush3.bf16.msra.mxu0 %v20621_v63  ;;  %15858 = vmatpush3.bf16.msra.mxu1 %v20621_v63 }
 0x609   :  { %15259 = vmatprep.subr.bf16.mxu0 %v20381_v57  ;;  %15859 = vmatprep.subr.bf16.mxu1 %v20381_v57 }
 0x60c   :  { %15261 = vmatpush3.bf16.msra.mxu0 %v20622_v27  ;;  %15861 = vmatpush3.bf16.msra.mxu1 %v20622_v27 }
 0x60d   :  { %15262 = vmatprep.subr.bf16.mxu0 %v20381_v57  ;;  %15862 = vmatprep.subr.bf16.mxu1 %v20381_v57 }
 0x610   :  { %15264 = vmatpush3.bf16.msra.mxu0 %v20623_v54  ;;  %15864 = vmatpush3.bf16.msra.mxu1 %v20623_v54 }
 0x611   :  { %15265 = vmatprep.subr.bf16.mxu0 %v20381_v57  ;;  %15865 = vmatprep.subr.bf16.mxu1 %v20381_v57 }
 0x614   :  { %15267 = vmatpush3.bf16.msra.mxu0 %v20624_v3  ;;  %15867 = vmatpush3.bf16.msra.mxu1 %v20624_v3 }
 0x615   :  { %15268 = vmatprep.subr.bf16.mxu0 %v20381_v57  ;;  %15868 = vmatprep.subr.bf16.mxu1 %v20381_v57 }
 0x618   :  { %15270 = vmatpush3.bf16.msra.mxu0 %v20625_v8  ;;  %15870 = vmatpush3.bf16.msra.mxu1 %v20625_v8  ;;  %v8194_v8 = vld [vmem:[%s20049_s2] ss:$0 sm:$0xff] }
 0x619   :  { %15271 = vmatprep.subr.bf16.mxu0 %v20381_v57  ;;  %15871 = vmatprep.subr.bf16.mxu1 %v20381_v57 }
 0x61c   :  { %15273 = vmatpush3.bf16.msra.mxu0 %v20626_v17  ;;  %15873 = vmatpush3.bf16.msra.mxu1 %v20626_v17 }
 0x61d   :  { %15274 = vmatprep.subr.bf16.mxu0 %v20381_v57  ;;  %15874 = vmatprep.subr.bf16.mxu1 %v20381_v57 }
 0x620   :  { %15276 = vmatpush3.bf16.msra.mxu0 %v20627_v40  ;;  %15876 = vmatpush3.bf16.msra.mxu1 %v20627_v40 }
 0x621   :  { %15277 = vmatprep.subr.bf16.mxu0 %v20381_v57  ;;  %15877 = vmatprep.subr.bf16.mxu1 %v20381_v57 }
 0x623   :  { %12519 = vmatmul.mubr.f32.vlgmr.msra.gmra.mrb[2].mxu0 %v5663_v35  ;;  %13394 = vmatmul.mubr.f32.vlgmr.msra.gmra.mrb[2].mxu1 %v5735_v4  ;;  %v15944_v35 = vpack.c.bf16 %v7697_v21, %v7696_v1 }
 0x624   :  { %15279 = vmatpush3.bf16.msra.mxu0 %v20628_v7  ;;  %15879 = vmatpush3.bf16.msra.mxu1 %v20628_v7 }
 0x625   :  { %15280 = vmatprep.subr.bf16.mxu0 %v20381_v57  ;;  %15880 = vmatprep.subr.bf16.mxu1 %v20381_v57 }
 0x626   :  { %12553 = vmatprep.mubr.msk.f32.mxu0 %vm16198_vm0, %v20349_v9  ;;  %13428 = vmatprep.mubr.msk.f32.mxu1 %vm16198_vm0, %v20349_v9 }
 0x628   :  { %15282 = vmatpush3.bf16.msra.mxu0 %v20629_v10  ;;  %15882 = vmatpush3.bf16.msra.mxu1 %v20629_v10 }
 0x629   :  { %15283 = vmatprep.subr.bf16.mxu0 %v20381_v57  ;;  %15883 = vmatprep.subr.bf16.mxu1 %v20381_v57 }
 0x62c   :  { %15285 = vmatpush3.bf16.msra.mxu0 %v20630_v13  ;;  %15885 = vmatpush3.bf16.msra.mxu1 %v20630_v13 }
 0x62d   :  { %15286 = vmatprep.subr.bf16.mxu0 %v20381_v57  ;;  %15886 = vmatprep.subr.bf16.mxu1 %v20381_v57 }
 0x630   :  { %15288 = vmatpush3.bf16.msra.mxu0 %v20631_v16  ;;  %15888 = vmatpush3.bf16.msra.mxu1 %v20631_v16  ;;  %v7777_v16 = vlaneseq }
 0x631   :  { %15289 = vmatprep.subr.bf16.mxu0 %v20381_v57  ;;  %15889 = vmatprep.subr.bf16.mxu1 %v20381_v57 }
 0x634   :  { %15291 = vmatpush3.bf16.msra.mxu0 %v20632_v19  ;;  %15891 = vmatpush3.bf16.msra.mxu1 %v20632_v19  ;;  %v7778_v19 = vand.u32 127, %v7777_v16 }
 0x635   :  { %15292 = vmatprep.subr.bf16.mxu0 %v20381_v57  ;;  %15892 = vmatprep.subr.bf16.mxu1 %v20381_v57 }
 0x636   :  { %vm7779_vm1 = vcmp.lt.s32.totalorder %v7778_v19, 10 }
 0x638   :  { %15294 = vmatpush3.bf16.msra.mxu0 %v18874_v46  ;;  %15894 = vmatpush3.bf16.msra.mxu1 %v18874_v46  ;;  %v7591_v46 = vld [vmem:[%s20050_s3 + $0x8] sm:$0xff] }
 0x639   :  { %15295 = vmatprep.subr.bf16.mxu0 %v20381_v57  ;;  %15895 = vmatprep.subr.bf16.mxu1 %v20381_v57  ;;  %v15902_v25 = vpack.c.bf16 %v7591_v46, %v7590_v22  ;;  %v8196_v22 = vld [vmem:[%s20053_s6] ss:$0 sm:$0xff] }
 0x63c   :  { %15297 = vmatpush3.bf16.msra.mxu0 %v18886_v28  ;;  %15897 = vmatpush3.bf16.msra.mxu1 %v18886_v28  ;;  %v7510_v28 = vld [vmem:[%s20047_s0 + $0x46] sm:$0x3] }
 0x63d   :  { %15298 = vmatprep.subr.bf16.mxu0 %v20381_v57  ;;  %15898 = vmatprep.subr.bf16.mxu1 %v20381_v57 }
 0x640   :  { %15300 = vmatpush3.bf16.msra.mxu0 %v18898_v6  ;;  %15900 = vmatpush3.bf16.msra.mxu1 %v18898_v6  ;;  %v15905_v6 = vpack.c.bf16 %v7593_v42, %v7592_v39 }
 0x641   :  { %15901 = vmatprep.subr.bf16.mxu0 %v20381_v57  ;;  %15925 = vmatprep.subr.bf16.mxu1 %v20381_v57 }
 0x643   :  { %12554 = vmatmul.mubr.f32.vlgmr.msra.gmra.mrb[2].mxu0 %v5735_v4  ;;  %13429 = vmatmul.mubr.f32.vlgmr.msra.gmra.mrb[2].mxu1 %v7510_v28  ;;  %v7698_v4 = vld [vmem:[%s20052_s5 + $0x70] sm:$0xff] }
 0x644   :  { %15903 = vmatpush3.bf16.msra.mxu0 %v15902_v25  ;;  %13463 = vmatprep.mubr.msk.f32.mxu0 %vm16198_vm0, %v20349_v9 }
 0x645   :  { %15904 = vmatprep.subr.bf16.mxu0 %v20381_v57  ;;  %13498 = vmatprep.mubr.msk.f32.mxu1 %vm16198_vm0, %v20349_v9  ;;  %v7598_v9 = vld [vmem:[%s20050_s3 + $0x40] sm:$0xff] }
 0x646   :  { %v15914_v5 = vpack.c.bf16 %v7599_v0, %v7598_v9  ;;  %15927 = vmatpush3.bf16.msra.mxu1 %v15926_v2 }
 0x647   :  { %15928 = vmatprep.subr.bf16.mxu1 %v20381_v57 }
 0x648   :  { %15906 = vmatpush3.bf16.msra.mxu0 %v15905_v6 }
 0x649   :  { %15907 = vmatprep.subr.bf16.mxu0 %v20381_v57 }
 0x64a   :  { %15930 = vmatpush3.bf16.msra.mxu1 %v15929_v18 }
 0x64b   :  { %15931 = vmatprep.subr.bf16.mxu1 %v20381_v57 }
 0x64c   :  { %15909 = vmatpush3.bf16.msra.mxu0 %v15908_v51 }
 0x64d   :  { %15910 = vmatprep.subr.bf16.mxu0 %v20381_v57 }
 0x64e   :  { %15933 = vmatpush3.bf16.msra.mxu1 %v15932_v37 }
 0x64f   :  { %15934 = vmatprep.subr.bf16.mxu1 %v20381_v57 }
 0x650   :  { %15912 = vmatpush3.bf16.msra.mxu0 %v15911_v61 }
 0x651   :  { %15913 = vmatprep.subr.bf16.mxu0 %v20381_v57 }
 0x652   :  { %15936 = vmatpush3.bf16.msra.mxu1 %v15935_v59 }
 0x653   :  { %15937 = vmatprep.subr.bf16.mxu1 %v20381_v57 }
 0x654   :  { %15915 = vmatpush3.bf16.msra.mxu0 %v15914_v5 }
 0x655   :  { %15916 = vmatprep.subr.bf16.mxu0 %v20381_v57 }
 0x656   :  { %15939 = vmatpush3.bf16.msra.mxu1 %v15938_v23 }
 0x657   :  { %15940 = vmatprep.subr.bf16.mxu1 %v20381_v57 }
 0x658   :  { %15918 = vmatpush3.bf16.msra.mxu0 %v15917_v20 }
 0x659   :  { %15919 = vmatprep.subr.bf16.mxu0 %v20381_v57 }
 0x65a   :  { %15942 = vmatpush3.bf16.msra.mxu1 %v15941_v53 }
 0x65b   :  { %15943 = vmatprep.subr.bf16.mxu1 %v20381_v57 }
 0x65c   :  { %15921 = vmatpush3.bf16.msra.mxu0 %v15920_v34 }
 0x65d   :  { %15922 = vmatprep.subr.bf16.mxu0 %v20381_v57 }
 0x65e   :  { %15945 = vmatpush3.bf16.msra.mxu1 %v15944_v35 }
 0x65f   :  { %15946 = vmatprep.subr.bf16.mxu1 %v20381_v57  ;;  %v7699_v57 = vld [vmem:[%s20052_s5 + $0x78] sm:$0xff]  ;;  %s7802_s5 = sshll.u32 %s16200_s4, 4  ;;  %s7803_s5 = int_to_ptr.vmem [resolvable:$true] %s7802_s5 }
 0x660   :  { %15924 = vmatpush3.bf16.msra.mxu0 %v15923_v47  ;;  %v15947_v7 = vpack.c.bf16 %v7699_v57, %v7698_v4  ;;  %s16173_s6 = scalar_lea.vmem %s7803_s5, 32  ;;  %p16178_p1 = scmp.lt.s32.totalorder %s7803_s5, %s7803_s5 }
 0x661   :  { %p16174_p0 = scmp.ne.s32.totalorder %s7803_s5, %s16173_s6  ;;  %p16179_p2 = scmp.lt.s32.totalorder %s16173_s6, %s16173_s6 }
 0x662   :  { %15948 = vmatpush3.bf16.msra.mxu1 %v15947_v7 }
 0x663   :  { %p16180_p3 = por %p16179_p2, %p16178_p1 }
 0x665   :  { %p16181_p4 = pnand %p16180_p3, %p16174_p0 }
 0x716   :  { %v5802_v49 = vpop.f32.mrb[2].mxu0  ;;  %v7577_v63 = vpop.f32.mrb[2].mxu1 }
 0x717   :  { %v5807_v27 = vmax.f32 %v4028_v36, %v5802_v49  ;;  %v12555_v54 = vpop.f32.mrb[3].mxu0  ;;  %v13430_v3 = vpop.f32.mrb[3].mxu1 }
 0x719   :  { %v7582_v17 = vmax.f32 %v5807_v27, %v7577_v63 }
 0x71b   :  { %v7589_v40 = vadd.f32 %v8194_v8, %v7582_v17 }
 0x71d   :  { %13464 = vmatmul.mubr.f32.vlgmr.msra.gmra.mrb[4].mxu0 %v7589_v40 }
 0x7f0   :  { %v7679_v33 = vpop.f32.mrb[4].mxu0 }
 0x7f1   :  { %v7680_v36 = vadd.f32 %v8195_v29, %v7679_v33  ;;  %v13465_v10 = vpop.f32.mrb[5].mxu0 }
 0x7f3   :  { %v7683_v13 = vmax.f32 %v7680_v36, 0.0 }
 0x7f5   :  { %13499 = vmatmul.mubr.f32.vlgmr.msra.gmra.mrb[4].mxu1 %v7683_v13 }
 0x8c8   :  { %v7773_v46 = vpop.f32.mrb[4].mxu1 }
 0x8c9   :  { %v7774_v28 = vadd.f32 %v8196_v22, %v7773_v46  ;;  %v13500_v25 = vpop.f32.mrb[5].mxu1 }
 0x8cb   :  { %v7780_v39 = vsel %vm7779_vm1, %v7774_v28, -1e+30 }
 0x8cc   :  { %v7782_v42 = vsel %vm7781_vm2, %v7780_v39, -inf }
 0x8cd   :  { %7783 = vmax.xlane.f32.xlu0 %v7782_v42 }
 0x95a   :  { %v7784_v6 = vpop.xlane.xlu0 %7783 }
 0x95b   :  { %v7785_v45 = vsub.f32 %v7780_v39, %v7784_v6 }
 0x95d   :  { %v7786_v48 = vmul.f32 1.442695, %v7785_v45 }
 0x95f   :  { %16145 = vpow2.f32 %v7786_v48 }
 0x969   :  { %v16146_v51 = vpop.eup %16145 }
 0x96a   :  { %v7788_v55 = vsel %vm7781_vm2, %v16146_v51, 0.0 }
 0x96b   :  { %7789 = vadd.xlane.f32.xlu0 %v7788_v55 }
 0x9f8   :  { %v7790_v58 = vpop.xlane.xlu0 %7789 }
 0x9f9   :  { %16147 = vlog2.f32 %v7790_v58 }
 0xa03   :  { %v16148_v61 = vpop.eup %16147 }
 0xa04   :  { %v7792_v9 = vmul.f32 0.6931472, %v16148_v61 }
 0xa06   :  { %v7793_v0 = vadd.f32 %v7792_v9, %v7784_v6 }
 0xa08   :  { %v7794_v5 = vsub.f32 %v7780_v39, %v7793_v0 }
 0xa0a   :  { %7795 = vst [vmem:[#allocation2] sm:$0x3] %v7794_v5 }
 0xa0b   :  { %16184 = shalt.err (!%p16181_p4)
}
 0xa0c   :  { %s16185_s15 = scalar_lea.hbm %s20054_s7, 32 }
 0xa0d   :  { %p16186_p5 = scmp.ne.s32.totalorder %s20054_s7, %s16185_s15  ;;  %p16189_p6 = scmp.lt.u32.totalorder %s16185_s15, %s20054_s7 }
 0xa0f   :  { %p16191_p7 = pnand %p16189_p6, %p16186_p5 }
 0xa11   :  { %16194 = shalt.err (!%p16191_p7)
}
 0xa12   :  { %7805 = dma.vmem_to_hbm [thread:$0]  %s7803_s5, 32, %s20054_s7, [#allocation3]  }
 0xa13   :  { %16195 = dma.done.wait [#allocation3], 32  }
 0xa14   :  { %16196 = vsyncadd [#allocation3], 4294967264 }
 0xa15   :  { %7809 = vsyncpa [#allocation3], 1 }

</bundles_post_ra>
